<compile_context>
chip_gen: v7x
topology: tpu7x:2x2x1
jax: 0.10.0
libtpu: 0.0.40
codegen_flags: <defaults>
</compile_context>

<pallas_src>
import numpy as np
import jax
import jax.numpy as jnp
from jax.experimental import pallas as pl
from jax.experimental.pallas import tpu as pltpu


# ----------------------------------------------------------------------------
# helpers
# ----------------------------------------------------------------------------
def _round_up(n, m):
    return ((n + m - 1) // m) * m


def _pick_row_tile(n, max_tile=256):
    """Row tile (multiple of 8) giving >=2 grid steps when possible (megacore)."""
    if n >= 2 * max_tile:
        tile = max_tile
    else:
        tile = max(8, _round_up(max(1, n // 2), 8))
    return tile, _round_up(n, tile)


# ----------------------------------------------------------------------------
# Generic row-tiled linear kernel:  y = x @ w + b   (pipelined, "parallel")
# ----------------------------------------------------------------------------
def _linear_kernel(x_ref, w_ref, b_ref, o_ref):
    o_ref[...] = (
        jnp.dot(x_ref[...], w_ref[...], preferred_element_type=jnp.float32)
        + b_ref[...]
    )


def pallas_linear(x, w, b, *, max_row_tile=256):
    """x: (N, Din), w: (Din, Dout), b: (1, Dout) -> (N, Dout) float32."""
    N, Din = x.shape
    Dout = w.shape[1]
    tile, n_pad = _pick_row_tile(N, max_row_tile)
    if n_pad != N:
        x = jnp.pad(x, ((0, n_pad - N), (0, 0)))
    out = pl.pallas_call(
        _linear_kernel,
        out_shape=jax.ShapeDtypeStruct((n_pad, Dout), jnp.float32),
        grid_spec=pltpu.PrefetchScalarGridSpec(
            num_scalar_prefetch=0,
            grid=(n_pad // tile,),
            in_specs=[
                pl.BlockSpec((tile, Din), lambda i: (i, 0)),
                pl.BlockSpec((Din, Dout), lambda i: (0, 0)),
                pl.BlockSpec((1, Dout), lambda i: (0, 0)),
            ],
            out_specs=pl.BlockSpec((tile, Dout), lambda i: (i, 0)),
        ),
        compiler_params=pltpu.CompilerParams(dimension_semantics=("parallel",)),
    )(x, w, b)
    return out[:N] if n_pad != N else out


# ----------------------------------------------------------------------------
# Hoisted exit projection: logits = (h @ w_exit + b_exit) * mask, tiled (rows, V)
# ----------------------------------------------------------------------------
def _exit_kernel(h_ref, w_ref, b_ref, m_ref, o_ref):
    o_ref[...] = (
        jnp.dot(h_ref[...], w_ref[...], preferred_element_type=jnp.float32)
        + b_ref[...]
    ) * m_ref[...]


def pallas_exit_projection(h, w, b, mask, *, max_row_tile=256, v_tile=128):
    """h: (N, H), w: (H, V), b: (1, V), mask: (N, 1) -> (N, V) float32."""
    N, H = h.shape
    V = w.shape[1]
    if V % v_tile != 0:
        v_tile = V
    tile, n_pad = _pick_row_tile(N, max_row_tile)
    if n_pad != N:
        h = jnp.pad(h, ((0, n_pad - N), (0, 0)))
        mask = jnp.pad(mask, ((0, n_pad - N), (0, 0)))
    out = pl.pallas_call(
        _exit_kernel,
        out_shape=jax.ShapeDtypeStruct((n_pad, V), jnp.float32),
        grid_spec=pltpu.PrefetchScalarGridSpec(
            num_scalar_prefetch=0,
            grid=(n_pad // tile, V // v_tile),
            in_specs=[
                pl.BlockSpec((tile, H), lambda i, j: (i, 0)),
                pl.BlockSpec((H, v_tile), lambda i, j: (0, j)),
                pl.BlockSpec((1, v_tile), lambda i, j: (0, j)),
                pl.BlockSpec((tile, 1), lambda i, j: (i, 0)),
            ],
            out_specs=pl.BlockSpec((tile, v_tile), lambda i, j: (i, j)),
        ),
        compiler_params=pltpu.CompilerParams(
            dimension_semantics=("parallel", "parallel")),
    )(h, w, b, mask)
    return out[:N] if n_pad != N else out


# ----------------------------------------------------------------------------
# Fused decode loop: ONE invocation, lax.fori_loop over T inside the kernel
# ----------------------------------------------------------------------------
def _decoder_loop_kernel(
    nb_ref,            # SMEM (T,) int32 scalar-prefetch: active rows per step
    feat_ref,          # (B, L, C)  VMEM-resident feature
    fproj_ref,         # (B, L, A)  VMEM-resident (b_proj_feature + b_proj_hidden folded in)
    emb_ref,           # (T, B, E)  VMEM-resident embeddings, time-major
    whx_ref,           # (H, A+4H)  = [w_proj_hidden | w_hh]
    wat_ref,           # (1, A)     attn_hidden weight (scalar bias cancels in softmax)
    wih_ref,           # (C+E, 4H)  = [w_ih_ctx ; w_ih_emb]
    blstm_ref,         # (1, 4H)    b_ih + b_hh
    h_out_ref,         # (T, B, H)  per-step hidden state (exit projection hoisted out)
):
    B, L, C = feat_ref.shape
    A = fproj_ref.shape[2]
    T, _, H = h_out_ref.shape

    feat = feat_ref[...]
    fproj = fproj_ref[...]
    w_hx = whx_ref[...]
    w_at = wat_ref[...]
    w_ih = wih_ref[...]
    b_lstm = blstm_ref[...]

    row = jax.lax.broadcasted_iota(jnp.int32, (B, 1), 0)

    def step(t, carry):
        hx, cx = carry
        nb = nb_ref[t]
        emb = emb_ref[t]                                         # (B, E)

        # Issue the hx-dependent matmul first so the MXU pass overlaps the
        # attention elementwise/softmax chain (breaks the attention->LSTM dep).
        hx_all = jnp.dot(hx, w_hx, preferred_element_type=jnp.float32)  # (B, A+4H)
        hx_attn = hx_all[:, :A]                                  # (B, A)
        hx_gates = hx_all[:, A:]                                 # (B, 4H)

        # ---- attention ------------------------------------------------------
        e = jnp.maximum(fproj + hx_attn[:, None, :], 0.0)        # (B, L, A)
        scores = jnp.sum(e * w_at, axis=-1)                      # (B, L)
        scores = scores - jnp.max(scores, axis=-1, keepdims=True)
        es = jnp.exp(scores)
        alpha = es / jnp.sum(es, axis=-1, keepdims=True)         # exact softmax
        # Weighted context as a sublane (VPU) sum -- avoids B degenerate
        # M=1, K=L MXU matmuls.
        context = jnp.sum(feat * alpha[:, :, None], axis=1)      # (B, C)

        # ---- LSTM cell (torch gate order: i, f, g, o) -------------------------
        x = jnp.concatenate([context, emb], axis=-1)             # (B, C+E)
        gates = (
            jnp.dot(x, w_ih, preferred_element_type=jnp.float32)
            + hx_gates + b_lstm
        )                                                        # (B, 4H)
        i_g = jax.nn.sigmoid(gates[:, 0 * H:1 * H])
        f_g = jax.nn.sigmoid(gates[:, 1 * H:2 * H])
        g_g = jnp.tanh(gates[:, 2 * H:3 * H])
        o_g = jax.nn.sigmoid(gates[:, 3 * H:4 * H])
        c_new = f_g * cx + i_g * g_g
        h_new = o_g * jnp.tanh(c_new)

        # ---- shrinking-batch semantics via masking ----------------------------
        active = row < nb
        h_out_ref[t] = h_new          # inactive rows masked in the exit kernel
        return jnp.where(active, h_new, hx), jnp.where(active, c_new, cx)

    h0 = jnp.zeros((B, H), jnp.float32)
    c0 = jnp.zeros((B, H), jnp.float32)
    jax.lax.fori_loop(0, T, step, (h0, c0), unroll=True)


# ----------------------------------------------------------------------------
# Model wrapper (plain-JAX glue around the Pallas kernels)
# ----------------------------------------------------------------------------
def init_params(key, vocab, embed_dim, hidden_dim, attn_dim, feat_dim):
    ks = jax.random.split(key, 14)
    s = 0.1
    rnd = lambda k, shp: jax.random.normal(k, shp, jnp.float32) * s
    return dict(
        embedding=rnd(ks[0], (vocab, embed_dim)),
        w_proj_feature=rnd(ks[1], (feat_dim, attn_dim)),
        b_proj_feature=rnd(ks[2], (1, attn_dim)),
        w_proj_hidden=rnd(ks[3], (hidden_dim, attn_dim)),
        b_proj_hidden=rnd(ks[4], (1, attn_dim)),
        w_attn_hidden=rnd(ks[5], (1, attn_dim)),
        b_attn_hidden=rnd(ks[6], (1, 1)),
        w_ih_ctx=rnd(ks[7], (feat_dim, 4 * hidden_dim)),
        w_ih_emb=rnd(ks[8], (embed_dim, 4 * hidden_dim)),
        w_hh=rnd(ks[9], (hidden_dim, 4 * hidden_dim)),
        b_ih=rnd(ks[10], (1, 4 * hidden_dim)),
        b_hh=rnd(ks[11], (1, 4 * hidden_dim)),
        w_exit=rnd(ks[12], (hidden_dim, vocab)),
        b_exit=rnd(ks[13], (1, vocab)),
    )


@jax.jit
def _forward_jit(p, feature_nchw, caption, nb_arr):
    B, C, Hs, Ws = feature_nchw.shape
    L = Hs * Ws
    A = p["w_proj_feature"].shape[1]
    H = p["w_hh"].shape[0]
    E = p["embedding"].shape[1]
    V = p["w_exit"].shape[1]
    T = nb_arr.shape[0]

    # NCHW -> (B, L, C)  (== torch permute(0,2,3,1).view(-1, L, C))
    feat = jnp.transpose(feature_nchw, (0, 2, 3, 1)).reshape(B, L, C)

    # One-time feature projection; proj_hidden's bias is folded in here so the
    # decode loop does not need a separate (1, A) bias operand.
    fproj = pallas_linear(
        feat.reshape(B * L, C),
        p["w_proj_feature"],
        p["b_proj_feature"] + p["b_proj_hidden"],
    ).reshape(B, L, A)

    # Embedding gather is glue (table lookup), plain JAX, laid out time-major.
    emb_t = jnp.transpose(jnp.take(p["embedding"], caption, axis=0), (1, 0, 2))  # (T,B,E)

    # Fused weights: one hx matmul (attention proj + hh gates), one input matmul.
    w_hx = jnp.concatenate([p["w_proj_hidden"], p["w_hh"]], axis=1)   # (H, A+4H)
    w_ih = jnp.concatenate([p["w_ih_ctx"], p["w_ih_emb"]], axis=0)    # (C+E, 4H)
    b_lstm = p["b_ih"] + p["b_hh"]                                    # (1, 4H)

    grid_spec = pltpu.PrefetchScalarGridSpec(
        num_scalar_prefetch=1,                 # nb_arr lands in SMEM
        grid=(1,),                             # whole decode loop in ONE invocation
        in_specs=[
            pl.BlockSpec((B, L, C), lambda i, nb: (0, 0, 0)),         # feat
            pl.BlockSpec((B, L, A), lambda i, nb: (0, 0, 0)),         # fproj
            pl.BlockSpec((T, B, E), lambda i, nb: (0, 0, 0)),         # emb (all steps)
            pl.BlockSpec((H, A + 4 * H), lambda i, nb: (0, 0)),       # [w_proj_hidden|w_hh]
            pl.BlockSpec((1, A), lambda i, nb: (0, 0)),               # w_attn_hidden
            pl.BlockSpec((C + E, 4 * H), lambda i, nb: (0, 0)),       # [w_ih_ctx;w_ih_emb]
            pl.BlockSpec((1, 4 * H), lambda i, nb: (0, 0)),           # b_lstm
        ],
        out_specs=pl.BlockSpec((T, B, H), lambda i, nb: (0, 0, 0)),
    )

    h_tbh = pl.pallas_call(
        _decoder_loop_kernel,
        out_shape=jax.ShapeDtypeStruct((T, B, H), jnp.float32),
        grid_spec=grid_spec,
        compiler_params=pltpu.CompilerParams(
            dimension_semantics=("arbitrary",),
            vmem_limit_bytes=48 * 1024 * 1024,
        ),
    )(nb_arr, feat, fproj, emb_t, w_hx, p["w_attn_hidden"], w_ih, b_lstm)

    # Shrinking-batch mask: row b active at step t iff b < nb[t].
    row_ids = jax.lax.broadcasted_iota(jnp.int32, (T, B), 1)
    mask = (row_ids < nb_arr[:, None]).astype(jnp.float32).reshape(T * B, 1)

    # Hoisted exit projection: one big (T*B, H) @ (H, V) tiled, parallel matmul.
    logits = pallas_exit_projection(
        h_tbh.reshape(T * B, H), p["w_exit"], p["b_exit"], mask)       # (T*B, V)

    predicts = jnp.transpose(logits.reshape(T, B, V), (1, 0, 2))        # (B, T, V)
    return predicts.reshape(-1, V)


def attention_decoder_forward(p, feature_nchw, caption, lengths):
    """Mirrors AttentionDecoder.forward.  Returns (B * lengths[0], vocab)."""
    assert all(lengths[i] >= lengths[i + 1] for i in range(len(lengths) - 1)), \
        "lengths must be sorted descending (as assumed by the PyTorch module)"
    T = int(lengths[0])
    # PyTorch: batch_size = sum(i >= t for i in lengths)  (lengths sorted desc.)
    nb_arr = jnp.array([sum(1 for l in lengths if l >= t) for t in range(T)],
                       jnp.int32)
    return _forward_jit(p, feature_nchw, caption, nb_arr)


# ----------------------------------------------------------------------------
# Pure-numpy reference replicating the PyTorch loop (shrinking batch slices)
# ----------------------------------------------------------------------------
def reference_forward(p, feature_nchw, caption, lengths):
    pn = {k: np.asarray(v) for k, v in p.items()}
    feature_nchw = np.asarray(feature_nchw)
    caption = np.asarray(caption)
    B, C, Hs, Ws = feature_nchw.shape
    L = Hs * Ws
    H = pn["w_hh"].shape[0]
    V = pn["w_exit"].shape[1]
    sig = lambda x: 1.0 / (1.0 + np.exp(-x))

    feat = np.transpose(feature_nchw, (0, 2, 3, 1)).reshape(B, L, C)
    fproj = (feat.reshape(B * L, C) @ pn["w_proj_feature"] + pn["b_proj_feature"]).reshape(B, L, -1)
    hx = np.zeros((B, H), np.float32)
    cx = np.zeros((B, H), np.float32)
    T = int(lengths[0])
    predicts = np.zeros((B, T, V), np.float32)
    w_ih = np.concatenate([pn["w_ih_ctx"], pn["w_ih_emb"]], axis=0)

    for t in range(T):
        nb = int(sum(1 for l in lengths if l >= t))
        f_t, fp_t, h_t, c_t = feat[:nb], fproj[:nb], hx[:nb], cx[:nb]
        emb = pn["embedding"][caption[:nb, t]]
        hx_attn = h_t @ pn["w_proj_hidden"] + pn["b_proj_hidden"]
        e = np.maximum(fp_t + hx_attn[:, None, :], 0.0)
        scores = np.sum(e * pn["w_attn_hidden"][None, :, :], axis=-1) + pn["b_attn_hidden"]
        scores = scores - scores.max(axis=1, keepdims=True)
        es = np.exp(scores)
        alpha = es / es.sum(axis=1, keepdims=True)
        context = np.sum(f_t * alpha[:, :, None], axis=1)
        x = np.concatenate([context, emb], axis=1)
        gates = x @ w_ih + pn["b_ih"] + h_t @ pn["w_hh"] + pn["b_hh"]
        i_g, f_g = sig(gates[:, :H]), sig(gates[:, H:2 * H])
        g_g, o_g = np.tanh(gates[:, 2 * H:3 * H]), sig(gates[:, 3 * H:])
        c_new = f_g * c_t + i_g * g_g
        h_new = o_g * np.tanh(c_new)
        predicts[:nb, t, :] = h_new @ pn["w_exit"] + pn["b_exit"]
        hx, cx = hx.copy(), cx.copy()
        hx[:nb], cx[:nb] = h_new, c_new
    return predicts.reshape(-1, V)


# ----------------------------------------------------------------------------
if __name__ == "__main__":
    # Small but lane-friendly shapes (last dims multiples of 128, batch = 8
    # sublanes) so stores are unmasked and the MXU/VPU lanes are not wasted.
    B, FEAT_C, HS, WS = 8, 128, 4, 4          # feature: (8, 128, 4, 4), L = 16
    VOCAB, EMBED, HIDDEN, ATTN = 256, 128, 128, 128
    LENGTHS = [6, 6, 5, 5, 4, 3, 2, 2]        # sorted descending (module assumption)
    T = LENGTHS[0]

    root = jax.random.PRNGKey(0)
    k_par, k_feat, k_cap = jax.random.split(root, 3)
    params = init_params(k_par, VOCAB, EMBED, HIDDEN, ATTN, FEAT_C)
    feature = jax.random.normal(k_feat, (B, FEAT_C, HS, WS), jnp.float32)
    caption = jax.random.randint(k_cap, (B, T), 0, VOCAB, dtype=jnp.int32)

    out = attention_decoder_forward(params, feature, caption, LENGTHS)
    out = jax.block_until_ready(out)

    ref = reference_forward(params, feature, caption, LENGTHS)
    assert out.shape == (B * T, VOCAB), out.shape
    if not np.allclose(np.asarray(out), ref, atol=1e-2, rtol=1e-2):
        err = float(np.max(np.abs(np.asarray(out) - ref)))
        raise RuntimeError(f"Pallas kernel output mismatch vs reference (max abs err {err})")

    print("KERNEL_OK")
</pallas_src>

<mosaic_0001>
module attributes {stable_mosaic.version = 11 : i64} {
  func.func @_linear_kernel(%arg0: i32, %arg1: memref<64x128xf32, #tpu.memory_space<vmem>>, %arg2: memref<128x128xf32, #tpu.memory_space<vmem>>, %arg3: memref<1x128xf32, #tpu.memory_space<vmem>>, %arg4: memref<64x128xf32, #tpu.memory_space<vmem>>) attributes {dimension_semantics = [#tpu.dimension_semantics<parallel>], iteration_bounds = array<i64: 2>, scalar_prefetch = 0 : i64, scratch_operands = 0 : i64, tpu.core_type = #tpu.core_type<tc>, window_params = [{transform_indices = @transform_0, window_bounds = array<i64: 64, 128>}, {pipeline_mode = #tpu.pipeline_mode<synchronous>, transform_indices = @transform_1, window_bounds = array<i64: 128, 128>}, {pipeline_mode = #tpu.pipeline_mode<synchronous>, transform_indices = @transform_2, window_bounds = array<i64: 1, 128>}, {transform_indices = @transform_3, window_bounds = array<i64: 64, 128>}]} {
    %c0 = arith.constant 0 : index
    %c0_0 = arith.constant 0 : index
    %0 = vector.load %arg1[%c0, %c0_0] : memref<64x128xf32, #tpu.memory_space<vmem>>, vector<64x128xf32>
    %c0_1 = arith.constant 0 : index
    %c0_2 = arith.constant 0 : index
    %1 = vector.load %arg2[%c0_1, %c0_2] : memref<128x128xf32, #tpu.memory_space<vmem>>, vector<128x128xf32>
    %cst = arith.constant dense<0.000000e+00> : vector<64x128xf32>
    %2 = tpu.matmul %0, %1, %cst {dimension_numbers = #tpu.dot_dimension_numbers<[1], [0], [0], [1], [0, 0, 1, 1], [], []>} : vector<64x128xf32>, vector<128x128xf32>, vector<64x128xf32> -> vector<64x128xf32>
    %c0_3 = arith.constant 0 : index
    %c0_4 = arith.constant 0 : index
    %3 = vector.load %arg3[%c0_3, %c0_4] : memref<1x128xf32, #tpu.memory_space<vmem>>, vector<1x128xf32>
    %4 = vector.broadcast %3 : vector<1x128xf32> to vector<64x128xf32>
    %5 = arith.addf %2, %4 : vector<64x128xf32>
    %c0_5 = arith.constant 0 : index
    %c0_6 = arith.constant 0 : index
    %6 = vector.load %arg4[%c0_5, %c0_6] : memref<64x128xf32, #tpu.memory_space<vmem>>, vector<64x128xf32>
    tpu.vector_store %arg4[%c0_5, %c0_6], %5 {strides = array<i32>} : memref<64x128xf32, #tpu.memory_space<vmem>>, vector<64x128xf32>,
    return
  }
  func.func @transform_0(%arg0: i32) -> (i32, i32) {
    %c0_i32 = arith.constant 0 : i32
    %c0_i32_0 = arith.constant 0 : i32
    return %arg0, %c0_i32 : i32, i32
  }
  func.func @transform_1(%arg0: i32) -> (i32, i32) {
    %c0_i32 = arith.constant 0 : i32
    %c0_i32_0 = arith.constant 0 : i32
    %c0_i32_1 = arith.constant 0 : i32
    return %c0_i32, %c0_i32_0 : i32, i32
  }
  func.func @transform_2(%arg0: i32) -> (i32, i32) {
    %c0_i32 = arith.constant 0 : i32
    %c0_i32_0 = arith.constant 0 : i32
    %c0_i32_1 = arith.constant 0 : i32
    return %c0_i32, %c0_i32_0 : i32, i32
  }
  func.func @transform_3(%arg0: i32) -> (i32, i32) {
    %c0_i32 = arith.constant 0 : i32
    %c0_i32_0 = arith.constant 0 : i32
    return %arg0, %c0_i32 : i32, i32
  }
}

module attributes {stable_mosaic.version = 11 : i64} {
  func.func @_exit_kernel(%arg0: i32, %arg1: i32, %arg2: memref<24x128xf32, #tpu.memory_space<vmem>>, %arg3: memref<128x128xf32, #tpu.memory_space<vmem>>, %arg4: memref<1x128xf32, #tpu.memory_space<vmem>>, %arg5: memref<24x1xf32, #tpu.memory_space<vmem>>, %arg6: memref<24x128xf32, #tpu.memory_space<vmem>>) attributes {dimension_semantics = [#tpu.dimension_semantics<parallel>, #tpu.dimension_semantics<parallel>], iteration_bounds = array<i64: 2, 2>, scalar_prefetch = 0 : i64, scratch_operands = 0 : i64, tpu.core_type = #tpu.core_type<tc>, window_params = [{transform_indices = @transform_0, window_bounds = array<i64: 24, 128>}, {transform_indices = @transform_1, window_bounds = array<i64: 128, 128>}, {transform_indices = @transform_2, window_bounds = array<i64: 1, 128>}, {transform_indices = @transform_3, window_bounds = array<i64: 24, 1>}, {transform_indices = @transform_4, window_bounds = array<i64: 24, 128>}]} {
    %c0 = arith.constant 0 : index
    %c0_0 = arith.constant 0 : index
    %0 = vector.load %arg2[%c0, %c0_0] : memref<24x128xf32, #tpu.memory_space<vmem>>, vector<24x128xf32>
    %c0_1 = arith.constant 0 : index
    %c0_2 = arith.constant 0 : index
    %1 = vector.load %arg3[%c0_1, %c0_2] : memref<128x128xf32, #tpu.memory_space<vmem>>, vector<128x128xf32>
    %cst = arith.constant dense<0.000000e+00> : vector<24x128xf32>
    %2 = tpu.matmul %0, %1, %cst {dimension_numbers = #tpu.dot_dimension_numbers<[1], [0], [0], [1], [0, 0, 1, 1], [], []>} : vector<24x128xf32>, vector<128x128xf32>, vector<24x128xf32> -> vector<24x128xf32>
    %c0_3 = arith.constant 0 : index
    %c0_4 = arith.constant 0 : index
    %3 = vector.load %arg4[%c0_3, %c0_4] : memref<1x128xf32, #tpu.memory_space<vmem>>, vector<1x128xf32>
    %4 = vector.broadcast %3 : vector<1x128xf32> to vector<24x128xf32>
    %5 = arith.addf %2, %4 : vector<24x128xf32>
    %c0_5 = arith.constant 0 : index
    %c0_6 = arith.constant 0 : index
    %6 = vector.load %arg5[%c0_5, %c0_6] : memref<24x1xf32, #tpu.memory_space<vmem>>, vector<24x1xf32>
    %7 = vector.broadcast %6 : vector<24x1xf32> to vector<24x128xf32>
    %8 = arith.mulf %5, %7 : vector<24x128xf32>
    %c0_7 = arith.constant 0 : index
    %c0_8 = arith.constant 0 : index
    %9 = vector.load %arg6[%c0_7, %c0_8] : memref<24x128xf32, #tpu.memory_space<vmem>>, vector<24x128xf32>
    tpu.vector_store %arg6[%c0_7, %c0_8], %8 {strides = array<i32>} : memref<24x128xf32, #tpu.memory_space<vmem>>, vector<24x128xf32>,
    return
  }
  func.func @transform_0(%arg0: i32, %arg1: i32) -> (i32, i32) {
    %c0_i32 = arith.constant 0 : i32
    %c0_i32_0 = arith.constant 0 : i32
    return %arg0, %c0_i32 : i32, i32
  }
  func.func @transform_1(%arg0: i32, %arg1: i32) -> (i32, i32) {
    %c0_i32 = arith.constant 0 : i32
    %c0_i32_0 = arith.constant 0 : i32
    return %c0_i32, %arg1 : i32, i32
  }
  func.func @transform_2(%arg0: i32, %arg1: i32) -> (i32, i32) {
    %c0_i32 = arith.constant 0 : i32
    %c0_i32_0 = arith.constant 0 : i32
    return %c0_i32, %arg1 : i32, i32
  }
  func.func @transform_3(%arg0: i32, %arg1: i32) -> (i32, i32) {
    %c0_i32 = arith.constant 0 : i32
    %c0_i32_0 = arith.constant 0 : i32
    return %arg0, %c0_i32 : i32, i32
  }
  func.func @transform_4(%arg0: i32, %arg1: i32) -> (i32, i32) {
    %c0_i32 = arith.constant 0 : i32
    return %arg0, %arg1 : i32, i32
  }
}

module attributes {stable_mosaic.version = 11 : i64} {
  func.func @_decoder_loop_kernel(%arg0: i32, %arg1: memref<6xi32, #tpu.memory_space<smem>>, %arg2: memref<8x16x128xf32, #tpu.memory_space<vmem>>, %arg3: memref<8x16x128xf32, #tpu.memory_space<vmem>>, %arg4: memref<6x8x128xf32, #tpu.memory_space<vmem>>, %arg5: memref<128x640xf32, #tpu.memory_space<vmem>>, %arg6: memref<1x128xf32, #tpu.memory_space<vmem>>, %arg7: memref<256x512xf32, #tpu.memory_space<vmem>>, %arg8: memref<1x512xf32, #tpu.memory_space<vmem>>, %arg9: memref<6x8x128xf32, #tpu.memory_space<vmem>>) attributes {dimension_semantics = [#tpu.dimension_semantics<arbitrary>], iteration_bounds = array<i64: 1>, scalar_prefetch = 1 : i64, scratch_operands = 0 : i64, tpu.core_type = #tpu.core_type<tc>, window_params = [{pipeline_mode = #tpu.pipeline_mode<synchronous>, transform_indices = @transform_0, window_bounds = array<i64: 8, 16, 128>}, {pipeline_mode = #tpu.pipeline_mode<synchronous>, transform_indices = @transform_1, window_bounds = array<i64: 8, 16, 128>}, {pipeline_mode = #tpu.pipeline_mode<synchronous>, transform_indices = @transform_2, window_bounds = array<i64: 6, 8, 128>}, {pipeline_mode = #tpu.pipeline_mode<synchronous>, transform_indices = @transform_3, window_bounds = array<i64: 128, 640>}, {pipeline_mode = #tpu.pipeline_mode<synchronous>, transform_indices = @transform_4, window_bounds = array<i64: 1, 128>}, {pipeline_mode = #tpu.pipeline_mode<synchronous>, transform_indices = @transform_5, window_bounds = array<i64: 256, 512>}, {pipeline_mode = #tpu.pipeline_mode<synchronous>, transform_indices = @transform_6, window_bounds = array<i64: 1, 512>}, {pipeline_mode = #tpu.pipeline_mode<synchronous>, transform_indices = @transform_7, window_bounds = array<i64: 6, 8, 128>}]} {
    %c0 = arith.constant 0 : index
    %c0_0 = arith.constant 0 : index
    %c0_1 = arith.constant 0 : index
    %0 = vector.load %arg2[%c0, %c0_0, %c0_1] : memref<8x16x128xf32, #tpu.memory_space<vmem>>, vector<8x16x128xf32>
    %c0_2 = arith.constant 0 : index
    %c0_3 = arith.constant 0 : index
    %c0_4 = arith.constant 0 : index
    %1 = vector.load %arg3[%c0_2, %c0_3, %c0_4] : memref<8x16x128xf32, #tpu.memory_space<vmem>>, vector<8x16x128xf32>
    %c0_5 = arith.constant 0 : index
    %c0_6 = arith.constant 0 : index
    %2 = vector.load %arg5[%c0_5, %c0_6] : memref<128x640xf32, #tpu.memory_space<vmem>>, vector<128x640xf32>
    %c0_7 = arith.constant 0 : index
    %c0_8 = arith.constant 0 : index
    %3 = vector.load %arg6[%c0_7, %c0_8] : memref<1x128xf32, #tpu.memory_space<vmem>>, vector<1x128xf32>
    %c0_9 = arith.constant 0 : index
    %c0_10 = arith.constant 0 : index
    %4 = vector.load %arg7[%c0_9, %c0_10] : memref<256x512xf32, #tpu.memory_space<vmem>>, vector<256x512xf32>
    %c0_11 = arith.constant 0 : index
    %c0_12 = arith.constant 0 : index
    %5 = vector.load %arg8[%c0_11, %c0_12] : memref<1x512xf32, #tpu.memory_space<vmem>>, vector<1x512xf32>
    %6 = tpu.iota {dimensions = array<i32: 0>} : vector<8x1xi32>
    %cst = arith.constant 0.000000e+00 : f32
    %7 = vector.broadcast %cst : f32 to vector<8x128xf32>
    %cst_13 = arith.constant 0.000000e+00 : f32
    %8 = vector.broadcast %cst_13 : f32 to vector<8x128xf32>
    %c0_i32 = arith.constant 0 : i32
    %9 = arith.index_cast %c0_i32 : i32 to index
    %10 = memref.load %arg1[%9] : memref<6xi32, #tpu.memory_space<smem>>
    %11 = arith.index_cast %c0_i32 : i32 to index
    %c0_14 = arith.constant 0 : index
    %c0_15 = arith.constant 0 : index
    %12 = vector.load %arg4[%11, %c0_14, %c0_15] : memref<6x8x128xf32, #tpu.memory_space<vmem>>, vector<1x8x128xf32>
    %13 = vector.shape_cast %12 : vector<1x8x128xf32> to vector<8x128xf32>
    %cst_16 = arith.constant dense<0.000000e+00> : vector<8x640xf32>
    %14 = tpu.matmul %7, %2, %cst_16 {dimension_numbers = #tpu.dot_dimension_numbers<[1], [0], [0], [1], [0, 0, 1, 1], [], []>} : vector<8x128xf32>, vector<128x640xf32>, vector<8x640xf32> -> vector<8x640xf32>
    %15 = vector.extract_strided_slice %14 {offsets = [0, 0], sizes = [8, 128], strides = [1, 1]} : vector<8x640xf32> to vector<8x128xf32>
    %16 = vector.extract_strided_slice %14 {offsets = [0, 128], sizes = [8, 512], strides = [1, 1]} : vector<8x640xf32> to vector<8x512xf32>
    %17 = vector.shape_cast %15 : vector<8x128xf32> to vector<8x1x128xf32>
    %18 = vector.broadcast %17 : vector<8x1x128xf32> to vector<8x16x128xf32>
    %19 = arith.addf %1, %18 : vector<8x16x128xf32>
    %cst_17 = arith.constant 0.000000e+00 : f32
    %20 = vector.broadcast %cst_17 : f32 to vector<8x16x128xf32>
    %21 = arith.maximumf %19, %20 : vector<8x16x128xf32>
    %22 = vector.shape_cast %3 : vector<1x128xf32> to vector<1x1x128xf32>
    %23 = vector.broadcast %22 : vector<1x1x128xf32> to vector<8x16x128xf32>
    %24 = arith.mulf %21, %23 : vector<8x16x128xf32>
    %cst_18 = arith.constant dense<0.000000e+00> : vector<8x16xf32>
    %25 = vector.multi_reduction <add>, %24, %cst_18 [2] : vector<8x16x128xf32> to vector<8x16xf32>
    %cst_19 = arith.constant dense<0xFF800000> : vector<8xf32>
    %26 = vector.multi_reduction <maximumf>, %25, %cst_19 [1] : vector<8x16xf32> to vector<8xf32>
    %27 = vector.shape_cast %26 : vector<8xf32> to vector<8x1xf32>
    %28 = vector.broadcast %27 : vector<8x1xf32> to vector<8x16xf32>
    %29 = arith.subf %25, %28 : vector<8x16xf32>
    %30 = math.exp %29 : vector<8x16xf32>
    %cst_20 = arith.constant dense<0.000000e+00> : vector<8xf32>
    %31 = vector.multi_reduction <add>, %30, %cst_20 [1] : vector<8x16xf32> to vector<8xf32>
    %32 = vector.shape_cast %31 : vector<8xf32> to vector<8x1xf32>
    %33 = vector.broadcast %32 : vector<8x1xf32> to vector<8x16xf32>
    %34 = arith.divf %30, %33 : vector<8x16xf32>
    %35 = vector.shape_cast %34 : vector<8x16xf32> to vector<8x16x1xf32>
    %36 = vector.broadcast %35 : vector<8x16x1xf32> to vector<8x16x128xf32>
    %37 = arith.mulf %0, %36 : vector<8x16x128xf32>
    %cst_21 = arith.constant dense<0.000000e+00> : vector<8x128xf32>
    %38 = vector.multi_reduction <add>, %37, %cst_21 [1] : vector<8x16x128xf32> to vector<8x128xf32>
    %39 = tpu.concatenate %38, %13 in 1 : vector<8x128xf32>, vector<8x128xf32> -> vector<8x256xf32>
    %cst_22 = arith.constant dense<0.000000e+00> : vector<8x512xf32>
    %40 = tpu.matmul %39, %4, %cst_22 {dimension_numbers = #tpu.dot_dimension_numbers<[1], [0], [0], [1], [0, 0, 1, 1], [], []>} : vector<8x256xf32>, vector<256x512xf32>, vector<8x512xf32> -> vector<8x512xf32>
    %41 = arith.addf %40, %16 : vector<8x512xf32>
    %42 = vector.broadcast %5 : vector<1x512xf32> to vector<8x512xf32>
    %43 = arith.addf %41, %42 : vector<8x512xf32>
    %44 = vector.extract_strided_slice %43 {offsets = [0, 0], sizes = [8, 128], strides = [1, 1]} : vector<8x512xf32> to vector<8x128xf32>
    %45 = arith.negf %44 : vector<8x128xf32>
    %46 = math.exp %45 : vector<8x128xf32>
    %cst_23 = arith.constant 1.000000e+00 : f32
    %47 = vector.broadcast %cst_23 : f32 to vector<8x128xf32>
    %48 = arith.addf %47, %46 : vector<8x128xf32>
    %49 = arith.divf %47, %48 : vector<8x128xf32>
    %50 = vector.extract_strided_slice %43 {offsets = [0, 128], sizes = [8, 128], strides = [1, 1]} : vector<8x512xf32> to vector<8x128xf32>
    %51 = arith.negf %50 : vector<8x128xf32>
    %52 = math.exp %51 : vector<8x128xf32>
    %cst_24 = arith.constant 1.000000e+00 : f32
    %53 = vector.broadcast %cst_24 : f32 to vector<8x128xf32>
    %54 = arith.addf %53, %52 : vector<8x128xf32>
    %55 = arith.divf %53, %54 : vector<8x128xf32>
    %56 = vector.extract_strided_slice %43 {offsets = [0, 256], sizes = [8, 128], strides = [1, 1]} : vector<8x512xf32> to vector<8x128xf32>
    %57 = math.tanh %56 : vector<8x128xf32>
    %58 = vector.extract_strided_slice %43 {offsets = [0, 384], sizes = [8, 128], strides = [1, 1]} : vector<8x512xf32> to vector<8x128xf32>
    %59 = arith.negf %58 : vector<8x128xf32>
    %60 = math.exp %59 : vector<8x128xf32>
    %cst_25 = arith.constant 1.000000e+00 : f32
    %61 = vector.broadcast %cst_25 : f32 to vector<8x128xf32>
    %62 = arith.addf %61, %60 : vector<8x128xf32>
    %63 = arith.divf %61, %62 : vector<8x128xf32>
    %64 = arith.mulf %55, %8 : vector<8x128xf32>
    %65 = arith.mulf %49, %57 : vector<8x128xf32>
    %66 = arith.addf %64, %65 : vector<8x128xf32>
    %67 = math.tanh %66 : vector<8x128xf32>
    %68 = arith.mulf %63, %67 : vector<8x128xf32>
    %69 = vector.broadcast %10 : i32 to vector<8x1xi32>
    %70 = arith.cmpi slt, %6, %69 : vector<8x1xi32>
    %71 = arith.index_cast %c0_i32 : i32 to index
    %c0_26 = arith.constant 0 : index
    %c0_27 = arith.constant 0 : index
    %72 = vector.load %arg9[%71, %c0_26, %c0_27] : memref<6x8x128xf32, #tpu.memory_space<vmem>>, vector<1x8x128xf32>
    %73 = vector.shape_cast %72 : vector<1x8x128xf32> to vector<8x128xf32>
    %74 = vector.shape_cast %68 : vector<8x128xf32> to vector<1x8x128xf32>
    tpu.vector_store %arg9[%71, %c0_26, %c0_27], %74 {strides = array<i32>} : memref<6x8x128xf32, #tpu.memory_space<vmem>>, vector<1x8x128xf32>,
    %75 = vector.shape_cast %70 : vector<8x1xi1> to vector<8x1xi1>
    %76 = vector.broadcast %75 : vector<8x1xi1> to vector<8x128xi1>
    %77 = arith.select %76, %68, %7 : vector<8x128xi1>, vector<8x128xf32>
    %78 = vector.shape_cast %70 : vector<8x1xi1> to vector<8x1xi1>
    %79 = vector.broadcast %78 : vector<8x1xi1> to vector<8x128xi1>
    %80 = arith.select %79, %66, %8 : vector<8x128xi1>, vector<8x128xf32>
    %c1_i32 = arith.constant 1 : i32
    %81 = arith.index_cast %c1_i32 : i32 to index
    %82 = memref.load %arg1[%81] : memref<6xi32, #tpu.memory_space<smem>>
    %83 = arith.index_cast %c1_i32 : i32 to index
    %c0_28 = arith.constant 0 : index
    %c0_29 = arith.constant 0 : index
    %84 = vector.load %arg4[%83, %c0_28, %c0_29] : memref<6x8x128xf32, #tpu.memory_space<vmem>>, vector<1x8x128xf32>
    %85 = vector.shape_cast %84 : vector<1x8x128xf32> to vector<8x128xf32>
    %cst_30 = arith.constant dense<0.000000e+00> : vector<8x640xf32>
    %86 = tpu.matmul %77, %2, %cst_30 {dimension_numbers = #tpu.dot_dimension_numbers<[1], [0], [0], [1], [0, 0, 1, 1], [], []>} : vector<8x128xf32>, vector<128x640xf32>, vector<8x640xf32> -> vector<8x640xf32>
    %87 = vector.extract_strided_slice %86 {offsets = [0, 0], sizes = [8, 128], strides = [1, 1]} : vector<8x640xf32> to vector<8x128xf32>
    %88 = vector.extract_strided_slice %86 {offsets = [0, 128], sizes = [8, 512], strides = [1, 1]} : vector<8x640xf32> to vector<8x512xf32>
    %89 = vector.shape_cast %87 : vector<8x128xf32> to vector<8x1x128xf32>
    %90 = vector.broadcast %89 : vector<8x1x128xf32> to vector<8x16x128xf32>
    %91 = arith.addf %1, %90 : vector<8x16x128xf32>
    %cst_31 = arith.constant 0.000000e+00 : f32
    %92 = vector.broadcast %cst_31 : f32 to vector<8x16x128xf32>
    %93 = arith.maximumf %91, %92 : vector<8x16x128xf32>
    %94 = vector.shape_cast %3 : vector<1x128xf32> to vector<1x1x128xf32>
    %95 = vector.broadcast %94 : vector<1x1x128xf32> to vector<8x16x128xf32>
    %96 = arith.mulf %93, %95 : vector<8x16x128xf32>
    %cst_32 = arith.constant dense<0.000000e+00> : vector<8x16xf32>
    %97 = vector.multi_reduction <add>, %96, %cst_32 [2] : vector<8x16x128xf32> to vector<8x16xf32>
    %cst_33 = arith.constant dense<0xFF800000> : vector<8xf32>
    %98 = vector.multi_reduction <maximumf>, %97, %cst_33 [1] : vector<8x16xf32> to vector<8xf32>
    %99 = vector.shape_cast %98 : vector<8xf32> to vector<8x1xf32>
    %100 = vector.broadcast %99 : vector<8x1xf32> to vector<8x16xf32>
    %101 = arith.subf %97, %100 : vector<8x16xf32>
    %102 = math.exp %101 : vector<8x16xf32>
    %cst_34 = arith.constant dense<0.000000e+00> : vector<8xf32>
    %103 = vector.multi_reduction <add>, %102, %cst_34 [1] : vector<8x16xf32> to vector<8xf32>
    %104 = vector.shape_cast %103 : vector<8xf32> to vector<8x1xf32>
    %105 = vector.broadcast %104 : vector<8x1xf32> to vector<8x16xf32>
    %106 = arith.divf %102, %105 : vector<8x16xf32>
    %107 = vector.shape_cast %106 : vector<8x16xf32> to vector<8x16x1xf32>
    %108 = vector.broadcast %107 : vector<8x16x1xf32> to vector<8x16x128xf32>
    %109 = arith.mulf %0, %108 : vector<8x16x128xf32>
    %cst_35 = arith.constant dense<0.000000e+00> : vector<8x128xf32>
    %110 = vector.multi_reduction <add>, %109, %cst_35 [1] : vector<8x16x128xf32> to vector<8x128xf32>
    %111 = tpu.concatenate %110, %85 in 1 : vector<8x128xf32>, vector<8x128xf32> -> vector<8x256xf32>
    %cst_36 = arith.constant dense<0.000000e+00> : vector<8x512xf32>
    %112 = tpu.matmul %111, %4, %cst_36 {dimension_numbers = #tpu.dot_dimension_numbers<[1], [0], [0], [1], [0, 0, 1, 1], [], []>} : vector<8x256xf32>, vector<256x512xf32>, vector<8x512xf32> -> vector<8x512xf32>
    %113 = arith.addf %112, %88 : vector<8x512xf32>
    %114 = vector.broadcast %5 : vector<1x512xf32> to vector<8x512xf32>
    %115 = arith.addf %113, %114 : vector<8x512xf32>
    %116 = vector.extract_strided_slice %115 {offsets = [0, 0], sizes = [8, 128], strides = [1, 1]} : vector<8x512xf32> to vector<8x128xf32>
    %117 = arith.negf %116 : vector<8x128xf32>
    %118 = math.exp %117 : vector<8x128xf32>
    %cst_37 = arith.constant 1.000000e+00 : f32
    %119 = vector.broadcast %cst_37 : f32 to vector<8x128xf32>
    %120 = arith.addf %119, %118 : vector<8x128xf32>
    %121 = arith.divf %119, %120 : vector<8x128xf32>
    %122 = vector.extract_strided_slice %115 {offsets = [0, 128], sizes = [8, 128], strides = [1, 1]} : vector<8x512xf32> to vector<8x128xf32>
    %123 = arith.negf %122 : vector<8x128xf32>
    %124 = math.exp %123 : vector<8x128xf32>
    %cst_38 = arith.constant 1.000000e+00 : f32
    %125 = vector.broadcast %cst_38 : f32 to vector<8x128xf32>
    %126 = arith.addf %125, %124 : vector<8x128xf32>
    %127 = arith.divf %125, %126 : vector<8x128xf32>
    %128 = vector.extract_strided_slice %115 {offsets = [0, 256], sizes = [8, 128], strides = [1, 1]} : vector<8x512xf32> to vector<8x128xf32>
    %129 = math.tanh %128 : vector<8x128xf32>
    %130 = vector.extract_strided_slice %115 {offsets = [0, 384], sizes = [8, 128], strides = [1, 1]} : vector<8x512xf32> to vector<8x128xf32>
    %131 = arith.negf %130 : vector<8x128xf32>
    %132 = math.exp %131 : vector<8x128xf32>
    %cst_39 = arith.constant 1.000000e+00 : f32
    %133 = vector.broadcast %cst_39 : f32 to vector<8x128xf32>
    %134 = arith.addf %133, %132 : vector<8x128xf32>
    %135 = arith.divf %133, %134 : vector<8x128xf32>
    %136 = arith.mulf %127, %80 : vector<8x128xf32>
    %137 = arith.mulf %121, %129 : vector<8x128xf32>
    %138 = arith.addf %136, %137 : vector<8x128xf32>
    %139 = math.tanh %138 : vector<8x128xf32>
    %140 = arith.mulf %135, %139 : vector<8x128xf32>
    %141 = vector.broadcast %82 : i32 to vector<8x1xi32>
    %142 = arith.cmpi slt, %6, %141 : vector<8x1xi32>
    %143 = arith.index_cast %c1_i32 : i32 to index
    %c0_40 = arith.constant 0 : index
    %c0_41 = arith.constant 0 : index
    %144 = vector.load %arg9[%143, %c0_40, %c0_41] : memref<6x8x128xf32, #tpu.memory_space<vmem>>, vector<1x8x128xf32>
    %145 = vector.shape_cast %144 : vector<1x8x128xf32> to vector<8x128xf32>
    %146 = vector.shape_cast %140 : vector<8x128xf32> to vector<1x8x128xf32>
    tpu.vector_store %arg9[%143, %c0_40, %c0_41], %146 {strides = array<i32>} : memref<6x8x128xf32, #tpu.memory_space<vmem>>, vector<1x8x128xf32>,
    %147 = vector.shape_cast %142 : vector<8x1xi1> to vector<8x1xi1>
    %148 = vector.broadcast %147 : vector<8x1xi1> to vector<8x128xi1>
    %149 = arith.select %148, %140, %77 : vector<8x128xi1>, vector<8x128xf32>
    %150 = vector.shape_cast %142 : vector<8x1xi1> to vector<8x1xi1>
    %151 = vector.broadcast %150 : vector<8x1xi1> to vector<8x128xi1>
    %152 = arith.select %151, %138, %80 : vector<8x128xi1>, vector<8x128xf32>
    %c2_i32 = arith.constant 2 : i32
    %153 = arith.index_cast %c2_i32 : i32 to index
    %154 = memref.load %arg1[%153] : memref<6xi32, #tpu.memory_space<smem>>
    %155 = arith.index_cast %c2_i32 : i32 to index
    %c0_42 = arith.constant 0 : index
    %c0_43 = arith.constant 0 : index
    %156 = vector.load %arg4[%155, %c0_42, %c0_43] : memref<6x8x128xf32, #tpu.memory_space<vmem>>, vector<1x8x128xf32>
    %157 = vector.shape_cast %156 : vector<1x8x128xf32> to vector<8x128xf32>
    %cst_44 = arith.constant dense<0.000000e+00> : vector<8x640xf32>
    %158 = tpu.matmul %149, %2, %cst_44 {dimension_numbers = #tpu.dot_dimension_numbers<[1], [0], [0], [1], [0, 0, 1, 1], [], []>} : vector<8x128xf32>, vector<128x640xf32>, vector<8x640xf32> -> vector<8x640xf32>
    %159 = vector.extract_strided_slice %158 {offsets = [0, 0], sizes = [8, 128], strides = [1, 1]} : vector<8x640xf32> to vector<8x128xf32>
    %160 = vector.extract_strided_slice %158 {offsets = [0, 128], sizes = [8, 512], strides = [1, 1]} : vector<8x640xf32> to vector<8x512xf32>
    %161 = vector.shape_cast %159 : vector<8x128xf32> to vector<8x1x128xf32>
    %162 = vector.broadcast %161 : vector<8x1x128xf32> to vector<8x16x128xf32>
    %163 = arith.addf %1, %162 : vector<8x16x128xf32>
    %cst_45 = arith.constant 0.000000e+00 : f32
    %164 = vector.broadcast %cst_45 : f32 to vector<8x16x128xf32>
    %165 = arith.maximumf %163, %164 : vector<8x16x128xf32>
    %166 = vector.shape_cast %3 : vector<1x128xf32> to vector<1x1x128xf32>
    %167 = vector.broadcast %166 : vector<1x1x128xf32> to vector<8x16x128xf32>
    %168 = arith.mulf %165, %167 : vector<8x16x128xf32>
    %cst_46 = arith.constant dense<0.000000e+00> : vector<8x16xf32>
    %169 = vector.multi_reduction <add>, %168, %cst_46 [2] : vector<8x16x128xf32> to vector<8x16xf32>
    %cst_47 = arith.constant dense<0xFF800000> : vector<8xf32>
    %170 = vector.multi_reduction <maximumf>, %169, %cst_47 [1] : vector<8x16xf32> to vector<8xf32>
    %171 = vector.shape_cast %170 : vector<8xf32> to vector<8x1xf32>
    %172 = vector.broadcast %171 : vector<8x1xf32> to vector<8x16xf32>
    %173 = arith.subf %169, %172 : vector<8x16xf32>
    %174 = math.exp %173 : vector<8x16xf32>
    %cst_48 = arith.constant dense<0.000000e+00> : vector<8xf32>
    %175 = vector.multi_reduction <add>, %174, %cst_48 [1] : vector<8x16xf32> to vector<8xf32>
    %176 = vector.shape_cast %175 : vector<8xf32> to vector<8x1xf32>
    %177 = vector.broadcast %176 : vector<8x1xf32> to vector<8x16xf32>
    %178 = arith.divf %174, %177 : vector<8x16xf32>
    %179 = vector.shape_cast %178 : vector<8x16xf32> to vector<8x16x1xf32>
    %180 = vector.broadcast %179 : vector<8x16x1xf32> to vector<8x16x128xf32>
    %181 = arith.mulf %0, %180 : vector<8x16x128xf32>
    %cst_49 = arith.constant dense<0.000000e+00> : vector<8x128xf32>
    %182 = vector.multi_reduction <add>, %181, %cst_49 [1] : vector<8x16x128xf32> to vector<8x128xf32>
    %183 = tpu.concatenate %182, %157 in 1 : vector<8x128xf32>, vector<8x128xf32> -> vector<8x256xf32>
    %cst_50 = arith.constant dense<0.000000e+00> : vector<8x512xf32>
    %184 = tpu.matmul %183, %4, %cst_50 {dimension_numbers = #tpu.dot_dimension_numbers<[1], [0], [0], [1], [0, 0, 1, 1], [], []>} : vector<8x256xf32>, vector<256x512xf32>, vector<8x512xf32> -> vector<8x512xf32>
    %185 = arith.addf %184, %160 : vector<8x512xf32>
    %186 = vector.broadcast %5 : vector<1x512xf32> to vector<8x512xf32>
    %187 = arith.addf %185, %186 : vector<8x512xf32>
    %188 = vector.extract_strided_slice %187 {offsets = [0, 0], sizes = [8, 128], strides = [1, 1]} : vector<8x512xf32> to vector<8x128xf32>
    %189 = arith.negf %188 : vector<8x128xf32>
    %190 = math.exp %189 : vector<8x128xf32>
    %cst_51 = arith.constant 1.000000e+00 : f32
    %191 = vector.broadcast %cst_51 : f32 to vector<8x128xf32>
    %192 = arith.addf %191, %190 : vector<8x128xf32>
    %193 = arith.divf %191, %192 : vector<8x128xf32>
    %194 = vector.extract_strided_slice %187 {offsets = [0, 128], sizes = [8, 128], strides = [1, 1]} : vector<8x512xf32> to vector<8x128xf32>
    %195 = arith.negf %194 : vector<8x128xf32>
    %196 = math.exp %195 : vector<8x128xf32>
    %cst_52 = arith.constant 1.000000e+00 : f32
    %197 = vector.broadcast %cst_52 : f32 to vector<8x128xf32>
    %198 = arith.addf %197, %196 : vector<8x128xf32>
    %199 = arith.divf %197, %198 : vector<8x128xf32>
    %200 = vector.extract_strided_slice %187 {offsets = [0, 256], sizes = [8, 128], strides = [1, 1]} : vector<8x512xf32> to vector<8x128xf32>
    %201 = math.tanh %200 : vector<8x128xf32>
    %202 = vector.extract_strided_slice %187 {offsets = [0, 384], sizes = [8, 128], strides = [1, 1]} : vector<8x512xf32> to vector<8x128xf32>
    %203 = arith.negf %202 : vector<8x128xf32>
    %204 = math.exp %203 : vector<8x128xf32>
    %cst_53 = arith.constant 1.000000e+00 : f32
    %205 = vector.broadcast %cst_53 : f32 to vector<8x128xf32>
    %206 = arith.addf %205, %204 : vector<8x128xf32>
    %207 = arith.divf %205, %206 : vector<8x128xf32>
    %208 = arith.mulf %199, %152 : vector<8x128xf32>
    %209 = arith.mulf %193, %201 : vector<8x128xf32>
    %210 = arith.addf %208, %209 : vector<8x128xf32>
    %211 = math.tanh %210 : vector<8x128xf32>
    %212 = arith.mulf %207, %211 : vector<8x128xf32>
    %213 = vector.broadcast %154 : i32 to vector<8x1xi32>
    %214 = arith.cmpi slt, %6, %213 : vector<8x1xi32>
    %215 = arith.index_cast %c2_i32 : i32 to index
    %c0_54 = arith.constant 0 : index
    %c0_55 = arith.constant 0 : index
    %216 = vector.load %arg9[%215, %c0_54, %c0_55] : memref<6x8x128xf32, #tpu.memory_space<vmem>>, vector<1x8x128xf32>
    %217 = vector.shape_cast %216 : vector<1x8x128xf32> to vector<8x128xf32>
    %218 = vector.shape_cast %212 : vector<8x128xf32> to vector<1x8x128xf32>
    tpu.vector_store %arg9[%215, %c0_54, %c0_55], %218 {strides = array<i32>} : memref<6x8x128xf32, #tpu.memory_space<vmem>>, vector<1x8x128xf32>,
    %219 = vector.shape_cast %214 : vector<8x1xi1> to vector<8x1xi1>
    %220 = vector.broadcast %219 : vector<8x1xi1> to vector<8x128xi1>
    %221 = arith.select %220, %212, %149 : vector<8x128xi1>, vector<8x128xf32>
    %222 = vector.shape_cast %214 : vector<8x1xi1> to vector<8x1xi1>
    %223 = vector.broadcast %222 : vector<8x1xi1> to vector<8x128xi1>
    %224 = arith.select %223, %210, %152 : vector<8x128xi1>, vector<8x128xf32>
    %c3_i32 = arith.constant 3 : i32
    %225 = arith.index_cast %c3_i32 : i32 to index
    %226 = memref.load %arg1[%225] : memref<6xi32, #tpu.memory_space<smem>>
    %227 = arith.index_cast %c3_i32 : i32 to index
    %c0_56 = arith.constant 0 : index
    %c0_57 = arith.constant 0 : index
    %228 = vector.load %arg4[%227, %c0_56, %c0_57] : memref<6x8x128xf32, #tpu.memory_space<vmem>>, vector<1x8x128xf32>
    %229 = vector.shape_cast %228 : vector<1x8x128xf32> to vector<8x128xf32>
    %cst_58 = arith.constant dense<0.000000e+00> : vector<8x640xf32>
    %230 = tpu.matmul %221, %2, %cst_58 {dimension_numbers = #tpu.dot_dimension_numbers<[1], [0], [0], [1], [0, 0, 1, 1], [], []>} : vector<8x128xf32>, vector<128x640xf32>, vector<8x640xf32> -> vector<8x640xf32>
    %231 = vector.extract_strided_slice %230 {offsets = [0, 0], sizes = [8, 128], strides = [1, 1]} : vector<8x640xf32> to vector<8x128xf32>
    %232 = vector.extract_strided_slice %230 {offsets = [0, 128], sizes = [8, 512], strides = [1, 1]} : vector<8x640xf32> to vector<8x512xf32>
    %233 = vector.shape_cast %231 : vector<8x128xf32> to vector<8x1x128xf32>
    %234 = vector.broadcast %233 : vector<8x1x128xf32> to vector<8x16x128xf32>
    %235 = arith.addf %1, %234 : vector<8x16x128xf32>
    %cst_59 = arith.constant 0.000000e+00 : f32
    %236 = vector.broadcast %cst_59 : f32 to vector<8x16x128xf32>
    %237 = arith.maximumf %235, %236 : vector<8x16x128xf32>
    %238 = vector.shape_cast %3 : vector<1x128xf32> to vector<1x1x128xf32>
    %239 = vector.broadcast %238 : vector<1x1x128xf32> to vector<8x16x128xf32>
    %240 = arith.mulf %237, %239 : vector<8x16x128xf32>
    %cst_60 = arith.constant dense<0.000000e+00> : vector<8x16xf32>
    %241 = vector.multi_reduction <add>, %240, %cst_60 [2] : vector<8x16x128xf32> to vector<8x16xf32>
    %cst_61 = arith.constant dense<0xFF800000> : vector<8xf32>
    %242 = vector.multi_reduction <maximumf>, %241, %cst_61 [1] : vector<8x16xf32> to vector<8xf32>
    %243 = vector.shape_cast %242 : vector<8xf32> to vector<8x1xf32>
    %244 = vector.broadcast %243 : vector<8x1xf32> to vector<8x16xf32>
    %245 = arith.subf %241, %244 : vector<8x16xf32>
    %246 = math.exp %245 : vector<8x16xf32>
    %cst_62 = arith.constant dense<0.000000e+00> : vector<8xf32>
    %247 = vector.multi_reduction <add>, %246, %cst_62 [1] : vector<8x16xf32> to vector<8xf32>
    %248 = vector.shape_cast %247 : vector<8xf32> to vector<8x1xf32>
    %249 = vector.broadcast %248 : vector<8x1xf32> to vector<8x16xf32>
    %250 = arith.divf %246, %249 : vector<8x16xf32>
    %251 = vector.shape_cast %250 : vector<8x16xf32> to vector<8x16x1xf32>
    %252 = vector.broadcast %251 : vector<8x16x1xf32> to vector<8x16x128xf32>
    %253 = arith.mulf %0, %252 : vector<8x16x128xf32>
    %cst_63 = arith.constant dense<0.000000e+00> : vector<8x128xf32>
    %254 = vector.multi_reduction <add>, %253, %cst_63 [1] : vector<8x16x128xf32> to vector<8x128xf32>
    %255 = tpu.concatenate %254, %229 in 1 : vector<8x128xf32>, vector<8x128xf32> -> vector<8x256xf32>
    %cst_64 = arith.constant dense<0.000000e+00> : vector<8x512xf32>
    %256 = tpu.matmul %255, %4, %cst_64 {dimension_numbers = #tpu.dot_dimension_numbers<[1], [0], [0], [1], [0, 0, 1, 1], [], []>} : vector<8x256xf32>, vector<256x512xf32>, vector<8x512xf32> -> vector<8x512xf32>
    %257 = arith.addf %256, %232 : vector<8x512xf32>
    %258 = vector.broadcast %5 : vector<1x512xf32> to vector<8x512xf32>
    %259 = arith.addf %257, %258 : vector<8x512xf32>
    %260 = vector.extract_strided_slice %259 {offsets = [0, 0], sizes = [8, 128], strides = [1, 1]} : vector<8x512xf32> to vector<8x128xf32>
    %261 = arith.negf %260 : vector<8x128xf32>
    %262 = math.exp %261 : vector<8x128xf32>
    %cst_65 = arith.constant 1.000000e+00 : f32
    %263 = vector.broadcast %cst_65 : f32 to vector<8x128xf32>
    %264 = arith.addf %263, %262 : vector<8x128xf32>
    %265 = arith.divf %263, %264 : vector<8x128xf32>
    %266 = vector.extract_strided_slice %259 {offsets = [0, 128], sizes = [8, 128], strides = [1, 1]} : vector<8x512xf32> to vector<8x128xf32>
    %267 = arith.negf %266 : vector<8x128xf32>
    %268 = math.exp %267 : vector<8x128xf32>
    %cst_66 = arith.constant 1.000000e+00 : f32
    %269 = vector.broadcast %cst_66 : f32 to vector<8x128xf32>
    %270 = arith.addf %269, %268 : vector<8x128xf32>
    %271 = arith.divf %269, %270 : vector<8x128xf32>
    %272 = vector.extract_strided_slice %259 {offsets = [0, 256], sizes = [8, 128], strides = [1, 1]} : vector<8x512xf32> to vector<8x128xf32>
    %273 = math.tanh %272 : vector<8x128xf32>
    %274 = vector.extract_strided_slice %259 {offsets = [0, 384], sizes = [8, 128], strides = [1, 1]} : vector<8x512xf32> to vector<8x128xf32>
    %275 = arith.negf %274 : vector<8x128xf32>
    %276 = math.exp %275 : vector<8x128xf32>
    %cst_67 = arith.constant 1.000000e+00 : f32
    %277 = vector.broadcast %cst_67 : f32 to vector<8x128xf32>
    %278 = arith.addf %277, %276 : vector<8x128xf32>
    %279 = arith.divf %277, %278 : vector<8x128xf32>
    %280 = arith.mulf %271, %224 : vector<8x128xf32>
    %281 = arith.mulf %265, %273 : vector<8x128xf32>
    %282 = arith.addf %280, %281 : vector<8x128xf32>
    %283 = math.tanh %282 : vector<8x128xf32>
    %284 = arith.mulf %279, %283 : vector<8x128xf32>
    %285 = vector.broadcast %226 : i32 to vector<8x1xi32>
    %286 = arith.cmpi slt, %6, %285 : vector<8x1xi32>
    %287 = arith.index_cast %c3_i32 : i32 to index
    %c0_68 = arith.constant 0 : index
    %c0_69 = arith.constant 0 : index
    %288 = vector.load %arg9[%287, %c0_68, %c0_69] : memref<6x8x128xf32, #tpu.memory_space<vmem>>, vector<1x8x128xf32>
    %289 = vector.shape_cast %288 : vector<1x8x128xf32> to vector<8x128xf32>
    %290 = vector.shape_cast %284 : vector<8x128xf32> to vector<1x8x128xf32>
    tpu.vector_store %arg9[%287, %c0_68, %c0_69], %290 {strides = array<i32>} : memref<6x8x128xf32, #tpu.memory_space<vmem>>, vector<1x8x128xf32>,
    %291 = vector.shape_cast %286 : vector<8x1xi1> to vector<8x1xi1>
    %292 = vector.broadcast %291 : vector<8x1xi1> to vector<8x128xi1>
    %293 = arith.select %292, %284, %221 : vector<8x128xi1>, vector<8x128xf32>
    %294 = vector.shape_cast %286 : vector<8x1xi1> to vector<8x1xi1>
    %295 = vector.broadcast %294 : vector<8x1xi1> to vector<8x128xi1>
    %296 = arith.select %295, %282, %224 : vector<8x128xi1>, vector<8x128xf32>
    %c4_i32 = arith.constant 4 : i32
    %297 = arith.index_cast %c4_i32 : i32 to index
    %298 = memref.load %arg1[%297] : memref<6xi32, #tpu.memory_space<smem>>
    %299 = arith.index_cast %c4_i32 : i32 to index
    %c0_70 = arith.constant 0 : index
    %c0_71 = arith.constant 0 : index
    %300 = vector.load %arg4[%299, %c0_70, %c0_71] : memref<6x8x128xf32, #tpu.memory_space<vmem>>, vector<1x8x128xf32>
    %301 = vector.shape_cast %300 : vector<1x8x128xf32> to vector<8x128xf32>
    %cst_72 = arith.constant dense<0.000000e+00> : vector<8x640xf32>
    %302 = tpu.matmul %293, %2, %cst_72 {dimension_numbers = #tpu.dot_dimension_numbers<[1], [0], [0], [1], [0, 0, 1, 1], [], []>} : vector<8x128xf32>, vector<128x640xf32>, vector<8x640xf32> -> vector<8x640xf32>
    %303 = vector.extract_strided_slice %302 {offsets = [0, 0], sizes = [8, 128], strides = [1, 1]} : vector<8x640xf32> to vector<8x128xf32>
    %304 = vector.extract_strided_slice %302 {offsets = [0, 128], sizes = [8, 512], strides = [1, 1]} : vector<8x640xf32> to vector<8x512xf32>
    %305 = vector.shape_cast %303 : vector<8x128xf32> to vector<8x1x128xf32>
    %306 = vector.broadcast %305 : vector<8x1x128xf32> to vector<8x16x128xf32>
    %307 = arith.addf %1, %306 : vector<8x16x128xf32>
    %cst_73 = arith.constant 0.000000e+00 : f32
    %308 = vector.broadcast %cst_73 : f32 to vector<8x16x128xf32>
    %309 = arith.maximumf %307, %308 : vector<8x16x128xf32>
    %310 = vector.shape_cast %3 : vector<1x128xf32> to vector<1x1x128xf32>
    %311 = vector.broadcast %310 : vector<1x1x128xf32> to vector<8x16x128xf32>
    %312 = arith.mulf %309, %311 : vector<8x16x128xf32>
    %cst_74 = arith.constant dense<0.000000e+00> : vector<8x16xf32>
    %313 = vector.multi_reduction <add>, %312, %cst_74 [2] : vector<8x16x128xf32> to vector<8x16xf32>
    %cst_75 = arith.constant dense<0xFF800000> : vector<8xf32>
    %314 = vector.multi_reduction <maximumf>, %313, %cst_75 [1] : vector<8x16xf32> to vector<8xf32>
    %315 = vector.shape_cast %314 : vector<8xf32> to vector<8x1xf32>
    %316 = vector.broadcast %315 : vector<8x1xf32> to vector<8x16xf32>
    %317 = arith.subf %313, %316 : vector<8x16xf32>
    %318 = math.exp %317 : vector<8x16xf32>
    %cst_76 = arith.constant dense<0.000000e+00> : vector<8xf32>
    %319 = vector.multi_reduction <add>, %318, %cst_76 [1] : vector<8x16xf32> to vector<8xf32>
    %320 = vector.shape_cast %319 : vector<8xf32> to vector<8x1xf32>
    %321 = vector.broadcast %320 : vector<8x1xf32> to vector<8x16xf32>
    %322 = arith.divf %318, %321 : vector<8x16xf32>
    %323 = vector.shape_cast %322 : vector<8x16xf32> to vector<8x16x1xf32>
    %324 = vector.broadcast %323 : vector<8x16x1xf32> to vector<8x16x128xf32>
    %325 = arith.mulf %0, %324 : vector<8x16x128xf32>
    %cst_77 = arith.constant dense<0.000000e+00> : vector<8x128xf32>
    %326 = vector.multi_reduction <add>, %325, %cst_77 [1] : vector<8x16x128xf32> to vector<8x128xf32>
    %327 = tpu.concatenate %326, %301 in 1 : vector<8x128xf32>, vector<8x128xf32> -> vector<8x256xf32>
    %cst_78 = arith.constant dense<0.000000e+00> : vector<8x512xf32>
    %328 = tpu.matmul %327, %4, %cst_78 {dimension_numbers = #tpu.dot_dimension_numbers<[1], [0], [0], [1], [0, 0, 1, 1], [], []>} : vector<8x256xf32>, vector<256x512xf32>, vector<8x512xf32> -> vector<8x512xf32>
    %329 = arith.addf %328, %304 : vector<8x512xf32>
    %330 = vector.broadcast %5 : vector<1x512xf32> to vector<8x512xf32>
    %331 = arith.addf %329, %330 : vector<8x512xf32>
    %332 = vector.extract_strided_slice %331 {offsets = [0, 0], sizes = [8, 128], strides = [1, 1]} : vector<8x512xf32> to vector<8x128xf32>
    %333 = arith.negf %332 : vector<8x128xf32>
    %334 = math.exp %333 : vector<8x128xf32>
    %cst_79 = arith.constant 1.000000e+00 : f32
    %335 = vector.broadcast %cst_79 : f32 to vector<8x128xf32>
    %336 = arith.addf %335, %334 : vector<8x128xf32>
    %337 = arith.divf %335, %336 : vector<8x128xf32>
    %338 = vector.extract_strided_slice %331 {offsets = [0, 128], sizes = [8, 128], strides = [1, 1]} : vector<8x512xf32> to vector<8x128xf32>
    %339 = arith.negf %338 : vector<8x128xf32>
    %340 = math.exp %339 : vector<8x128xf32>
    %cst_80 = arith.constant 1.000000e+00 : f32
    %341 = vector.broadcast %cst_80 : f32 to vector<8x128xf32>
    %342 = arith.addf %341, %340 : vector<8x128xf32>
    %343 = arith.divf %341, %342 : vector<8x128xf32>
    %344 = vector.extract_strided_slice %331 {offsets = [0, 256], sizes = [8, 128], strides = [1, 1]} : vector<8x512xf32> to vector<8x128xf32>
    %345 = math.tanh %344 : vector<8x128xf32>
    %346 = vector.extract_strided_slice %331 {offsets = [0, 384], sizes = [8, 128], strides = [1, 1]} : vector<8x512xf32> to vector<8x128xf32>
    %347 = arith.negf %346 : vector<8x128xf32>
    %348 = math.exp %347 : vector<8x128xf32>
    %cst_81 = arith.constant 1.000000e+00 : f32
    %349 = vector.broadcast %cst_81 : f32 to vector<8x128xf32>
    %350 = arith.addf %349, %348 : vector<8x128xf32>
    %351 = arith.divf %349, %350 : vector<8x128xf32>
    %352 = arith.mulf %343, %296 : vector<8x128xf32>
    %353 = arith.mulf %337, %345 : vector<8x128xf32>
    %354 = arith.addf %352, %353 : vector<8x128xf32>
    %355 = math.tanh %354 : vector<8x128xf32>
    %356 = arith.mulf %351, %355 : vector<8x128xf32>
    %357 = vector.broadcast %298 : i32 to vector<8x1xi32>
    %358 = arith.cmpi slt, %6, %357 : vector<8x1xi32>
    %359 = arith.index_cast %c4_i32 : i32 to index
    %c0_82 = arith.constant 0 : index
    %c0_83 = arith.constant 0 : index
    %360 = vector.load %arg9[%359, %c0_82, %c0_83] : memref<6x8x128xf32, #tpu.memory_space<vmem>>, vector<1x8x128xf32>
    %361 = vector.shape_cast %360 : vector<1x8x128xf32> to vector<8x128xf32>
    %362 = vector.shape_cast %356 : vector<8x128xf32> to vector<1x8x128xf32>
    tpu.vector_store %arg9[%359, %c0_82, %c0_83], %362 {strides = array<i32>} : memref<6x8x128xf32, #tpu.memory_space<vmem>>, vector<1x8x128xf32>,
    %363 = vector.shape_cast %358 : vector<8x1xi1> to vector<8x1xi1>
    %364 = vector.broadcast %363 : vector<8x1xi1> to vector<8x128xi1>
    %365 = arith.select %364, %356, %293 : vector<8x128xi1>, vector<8x128xf32>
    %366 = vector.shape_cast %358 : vector<8x1xi1> to vector<8x1xi1>
    %367 = vector.broadcast %366 : vector<8x1xi1> to vector<8x128xi1>
    %368 = arith.select %367, %354, %296 : vector<8x128xi1>, vector<8x128xf32>
    %c5_i32 = arith.constant 5 : i32
    %369 = arith.index_cast %c5_i32 : i32 to index
    %370 = memref.load %arg1[%369] : memref<6xi32, #tpu.memory_space<smem>>
    %371 = arith.index_cast %c5_i32 : i32 to index
    %c0_84 = arith.constant 0 : index
    %c0_85 = arith.constant 0 : index
    %372 = vector.load %arg4[%371, %c0_84, %c0_85] : memref<6x8x128xf32, #tpu.memory_space<vmem>>, vector<1x8x128xf32>
    %373 = vector.shape_cast %372 : vector<1x8x128xf32> to vector<8x128xf32>
    %cst_86 = arith.constant dense<0.000000e+00> : vector<8x640xf32>
    %374 = tpu.matmul %365, %2, %cst_86 {dimension_numbers = #tpu.dot_dimension_numbers<[1], [0], [0], [1], [0, 0, 1, 1], [], []>} : vector<8x128xf32>, vector<128x640xf32>, vector<8x640xf32> -> vector<8x640xf32>
    %375 = vector.extract_strided_slice %374 {offsets = [0, 0], sizes = [8, 128], strides = [1, 1]} : vector<8x640xf32> to vector<8x128xf32>
    %376 = vector.extract_strided_slice %374 {offsets = [0, 128], sizes = [8, 512], strides = [1, 1]} : vector<8x640xf32> to vector<8x512xf32>
    %377 = vector.shape_cast %375 : vector<8x128xf32> to vector<8x1x128xf32>
    %378 = vector.broadcast %377 : vector<8x1x128xf32> to vector<8x16x128xf32>
    %379 = arith.addf %1, %378 : vector<8x16x128xf32>
    %cst_87 = arith.constant 0.000000e+00 : f32
    %380 = vector.broadcast %cst_87 : f32 to vector<8x16x128xf32>
    %381 = arith.maximumf %379, %380 : vector<8x16x128xf32>
    %382 = vector.shape_cast %3 : vector<1x128xf32> to vector<1x1x128xf32>
    %383 = vector.broadcast %382 : vector<1x1x128xf32> to vector<8x16x128xf32>
    %384 = arith.mulf %381, %383 : vector<8x16x128xf32>
    %cst_88 = arith.constant dense<0.000000e+00> : vector<8x16xf32>
    %385 = vector.multi_reduction <add>, %384, %cst_88 [2] : vector<8x16x128xf32> to vector<8x16xf32>
    %cst_89 = arith.constant dense<0xFF800000> : vector<8xf32>
    %386 = vector.multi_reduction <maximumf>, %385, %cst_89 [1] : vector<8x16xf32> to vector<8xf32>
    %387 = vector.shape_cast %386 : vector<8xf32> to vector<8x1xf32>
    %388 = vector.broadcast %387 : vector<8x1xf32> to vector<8x16xf32>
    %389 = arith.subf %385, %388 : vector<8x16xf32>
    %390 = math.exp %389 : vector<8x16xf32>
    %cst_90 = arith.constant dense<0.000000e+00> : vector<8xf32>
    %391 = vector.multi_reduction <add>, %390, %cst_90 [1] : vector<8x16xf32> to vector<8xf32>
    %392 = vector.shape_cast %391 : vector<8xf32> to vector<8x1xf32>
    %393 = vector.broadcast %392 : vector<8x1xf32> to vector<8x16xf32>
    %394 = arith.divf %390, %393 : vector<8x16xf32>
    %395 = vector.shape_cast %394 : vector<8x16xf32> to vector<8x16x1xf32>
    %396 = vector.broadcast %395 : vector<8x16x1xf32> to vector<8x16x128xf32>
    %397 = arith.mulf %0, %396 : vector<8x16x128xf32>
    %cst_91 = arith.constant dense<0.000000e+00> : vector<8x128xf32>
    %398 = vector.multi_reduction <add>, %397, %cst_91 [1] : vector<8x16x128xf32> to vector<8x128xf32>
    %399 = tpu.concatenate %398, %373 in 1 : vector<8x128xf32>, vector<8x128xf32> -> vector<8x256xf32>
    %cst_92 = arith.constant dense<0.000000e+00> : vector<8x512xf32>
    %400 = tpu.matmul %399, %4, %cst_92 {dimension_numbers = #tpu.dot_dimension_numbers<[1], [0], [0], [1], [0, 0, 1, 1], [], []>} : vector<8x256xf32>, vector<256x512xf32>, vector<8x512xf32> -> vector<8x512xf32>
    %401 = arith.addf %400, %376 : vector<8x512xf32>
    %402 = vector.broadcast %5 : vector<1x512xf32> to vector<8x512xf32>
    %403 = arith.addf %401, %402 : vector<8x512xf32>
    %404 = vector.extract_strided_slice %403 {offsets = [0, 0], sizes = [8, 128], strides = [1, 1]} : vector<8x512xf32> to vector<8x128xf32>
    %405 = arith.negf %404 : vector<8x128xf32>
    %406 = math.exp %405 : vector<8x128xf32>
    %cst_93 = arith.constant 1.000000e+00 : f32
    %407 = vector.broadcast %cst_93 : f32 to vector<8x128xf32>
    %408 = arith.addf %407, %406 : vector<8x128xf32>
    %409 = arith.divf %407, %408 : vector<8x128xf32>
    %410 = vector.extract_strided_slice %403 {offsets = [0, 128], sizes = [8, 128], strides = [1, 1]} : vector<8x512xf32> to vector<8x128xf32>
    %411 = arith.negf %410 : vector<8x128xf32>
    %412 = math.exp %411 : vector<8x128xf32>
    %cst_94 = arith.constant 1.000000e+00 : f32
    %413 = vector.broadcast %cst_94 : f32 to vector<8x128xf32>
    %414 = arith.addf %413, %412 : vector<8x128xf32>
    %415 = arith.divf %413, %414 : vector<8x128xf32>
    %416 = vector.extract_strided_slice %403 {offsets = [0, 256], sizes = [8, 128], strides = [1, 1]} : vector<8x512xf32> to vector<8x128xf32>
    %417 = math.tanh %416 : vector<8x128xf32>
    %418 = vector.extract_strided_slice %403 {offsets = [0, 384], sizes = [8, 128], strides = [1, 1]} : vector<8x512xf32> to vector<8x128xf32>
    %419 = arith.negf %418 : vector<8x128xf32>
    %420 = math.exp %419 : vector<8x128xf32>
    %cst_95 = arith.constant 1.000000e+00 : f32
    %421 = vector.broadcast %cst_95 : f32 to vector<8x128xf32>
    %422 = arith.addf %421, %420 : vector<8x128xf32>
    %423 = arith.divf %421, %422 : vector<8x128xf32>
    %424 = arith.mulf %415, %368 : vector<8x128xf32>
    %425 = arith.mulf %409, %417 : vector<8x128xf32>
    %426 = arith.addf %424, %425 : vector<8x128xf32>
    %427 = math.tanh %426 : vector<8x128xf32>
    %428 = arith.mulf %423, %427 : vector<8x128xf32>
    %429 = vector.broadcast %370 : i32 to vector<8x1xi32>
    %430 = arith.cmpi slt, %6, %429 : vector<8x1xi32>
    %431 = arith.index_cast %c5_i32 : i32 to index
    %c0_96 = arith.constant 0 : index
    %c0_97 = arith.constant 0 : index
    %432 = vector.load %arg9[%431, %c0_96, %c0_97] : memref<6x8x128xf32, #tpu.memory_space<vmem>>, vector<1x8x128xf32>
    %433 = vector.shape_cast %432 : vector<1x8x128xf32> to vector<8x128xf32>
    %434 = vector.shape_cast %428 : vector<8x128xf32> to vector<1x8x128xf32>
    tpu.vector_store %arg9[%431, %c0_96, %c0_97], %434 {strides = array<i32>} : memref<6x8x128xf32, #tpu.memory_space<vmem>>, vector<1x8x128xf32>,
    %435 = vector.shape_cast %430 : vector<8x1xi1> to vector<8x1xi1>
    %436 = vector.broadcast %435 : vector<8x1xi1> to vector<8x128xi1>
    %437 = arith.select %436, %428, %365 : vector<8x128xi1>, vector<8x128xf32>
    %438 = vector.shape_cast %430 : vector<8x1xi1> to vector<8x1xi1>
    %439 = vector.broadcast %438 : vector<8x1xi1> to vector<8x128xi1>
    %440 = arith.select %439, %426, %368 : vector<8x128xi1>, vector<8x128xf32>
    %c6_i32 = arith.constant 6 : i32
    return
  }
  func.func @transform_0(%arg0: i32, %arg1: memref<6xi32, #tpu.memory_space<smem>>) -> (i32, i32, i32) {
    %c0_i32 = arith.constant 0 : i32
    %c0_i32_0 = arith.constant 0 : i32
    %c0_i32_1 = arith.constant 0 : i32
    %c0_i32_2 = arith.constant 0 : i32
    return %c0_i32, %c0_i32_0, %c0_i32_1 : i32, i32, i32
  }
  func.func @transform_1(%arg0: i32, %arg1: memref<6xi32, #tpu.memory_space<smem>>) -> (i32, i32, i32) {
    %c0_i32 = arith.constant 0 : i32
    %c0_i32_0 = arith.constant 0 : i32
    %c0_i32_1 = arith.constant 0 : i32
    %c0_i32_2 = arith.constant 0 : i32
    return %c0_i32, %c0_i32_0, %c0_i32_1 : i32, i32, i32
  }
  func.func @transform_2(%arg0: i32, %arg1: memref<6xi32, #tpu.memory_space<smem>>) -> (i32, i32, i32) {
    %c0_i32 = arith.constant 0 : i32
    %c0_i32_0 = arith.constant 0 : i32
    %c0_i32_1 = arith.constant 0 : i32
    %c0_i32_2 = arith.constant 0 : i32
    return %c0_i32, %c0_i32_0, %c0_i32_1 : i32, i32, i32
  }
  func.func @transform_3(%arg0: i32, %arg1: memref<6xi32, #tpu.memory_space<smem>>) -> (i32, i32) {
    %c0_i32 = arith.constant 0 : i32
    %c0_i32_0 = arith.constant 0 : i32
    %c0_i32_1 = arith.constant 0 : i32
    return %c0_i32, %c0_i32_0 : i32, i32
  }
  func.func @transform_4(%arg0: i32, %arg1: memref<6xi32, #tpu.memory_space<smem>>) -> (i32, i32) {
    %c0_i32 = arith.constant 0 : i32
    %c0_i32_0 = arith.constant 0 : i32
    %c0_i32_1 = arith.constant 0 : i32
    return %c0_i32, %c0_i32_0 : i32, i32
  }
  func.func @transform_5(%arg0: i32, %arg1: memref<6xi32, #tpu.memory_space<smem>>) -> (i32, i32) {
    %c0_i32 = arith.constant 0 : i32
    %c0_i32_0 = arith.constant 0 : i32
    %c0_i32_1 = arith.constant 0 : i32
    return %c0_i32, %c0_i32_0 : i32, i32
  }
  func.func @transform_6(%arg0: i32, %arg1: memref<6xi32, #tpu.memory_space<smem>>) -> (i32, i32) {
    %c0_i32 = arith.constant 0 : i32
    %c0_i32_0 = arith.constant 0 : i32
    %c0_i32_1 = arith.constant 0 : i32
    return %c0_i32, %c0_i32_0 : i32, i32
  }
  func.func @transform_7(%arg0: i32, %arg1: memref<6xi32, #tpu.memory_space<smem>>) -> (i32, i32, i32) {
    %c0_i32 = arith.constant 0 : i32
    %c0_i32_0 = arith.constant 0 : i32
    %c0_i32_1 = arith.constant 0 : i32
    %c0_i32_2 = arith.constant 0 : i32
    return %c0_i32, %c0_i32_0, %c0_i32_1 : i32, i32, i32
  }
}

</mosaic_0001>

<bundles_post_ra>
// kernel: _forward_jit.3
= control target key start
LH: loop header
LB: loop body
LE: loop exit
PB: predicated region body
PF: predicated region fallthrough
CT: control target
= control target key end

     0   :  { %s538_s12 = smov 0   ;;  %s623_s0 = inlined_call_operand.vmem [shape: f32[128,128], index: 0, kind: input, shape index: {}]   ;;  %s624_s1 = inlined_call_operand.vmem [shape: f32[128,128], index: 1, kind: input, shape index: {}]   ;;  %s625_s2 = inlined_call_operand.vmem [shape: f32[1,128], index: 2, kind: input, shape index: {}]   ;;  %s626_s3 = inlined_call_operand.vmem [shape: f32[128,128], index: 3, kind: output, shape index: {}]  }
   0x1 LB: > { %s374_s13 = sadd.s32 4294967295, %s516_s12   ;;  %p378_p0 = scmp.ge.s32.totalorder %s516_s12, 1  ;;  %s516_s12 = sphi %s538_s12, %s13_s12  }
   0x2   : > { %p138_p1 = scmp.lt.s32.totalorder %s516_s12, 3 }
   0x4   : > { %p139_p2 = pnand %p378_p0, %p138_p1 }
   0x5   : > { %v182_v0 = vld [vmem:[%s624_s1] sm:$0xff] (!%p139_p2)  ;;  %v183_v1 = vld [vmem:[%s624_s1 + $0x8] sm:$0xff] (!%p139_p2)  ;;  %v184_v2 = vld [vmem:[%s624_s1 + $0x10] sm:$0xff] (!%p139_p2)  ;;  %s379_s20 = sshll.u32 (!%p139_p2), %s374_s13, 3 }
   0x6   : > { %142 = sbr.rel (%p139_p2) target bundleno = 261 (0x105), region = 32  ;;  %v454_v3 = vpack.c.bf16 (!%p139_p2), %v183_v1, %v182_v0  ;;  %v185_v4 = vld [vmem:[%s624_s1 + $0x18] sm:$0xff] (!%p139_p2)  ;;  %p163_p3 = scmp.lt.s32.totalorder (!%p139_p2), %s379_s20, 15  ;;  %v186_v6 = vld [vmem:[%s624_s1 + $0x20] sm:$0xff] (!%p139_p2)  ;;  %v187_v7 = vld [vmem:[%s624_s1 + $0x28] sm:$0xff] (!%p139_p2) }
   0x7   : > { %v458_v5 = vpack.c.bf16 (!%p139_p2), %v185_v4, %v184_v2  ;;  %v462_v8 = vpack.c.bf16 (!%p139_p2), %v187_v7, %v186_v6  ;;  %v188_v9 = vld [vmem:[%s624_s1 + $0x30] sm:$0xff] (!%p139_p2)  ;;  %v189_v10 = vld [vmem:[%s624_s1 + $0x38] sm:$0xff] (!%p139_p2)  ;;  %v190_v14 = vld [vmem:[%s624_s1 + $0x40] sm:$0xff] (!%p139_p2) }
   0x8   : > { %455 = vmatprep.subr.bf16.mxu0 (!%p139_p2), %v454_v3  ;;  %486 = vmatprep.subr.bf16.mxu1 (!%p139_p2), %v454_v3  ;;  %v466_v13 = vpack.c.bf16 (!%p139_p2), %v189_v10, %v188_v9  ;;  %v191_v15 = vld [vmem:[%s624_s1 + $0x48] sm:$0xff] (!%p139_p2)  ;;  %v192_v17 = vld [vmem:[%s624_s1 + $0x50] sm:$0xff] (!%p139_p2)  ;;  %v193_v18 = vld [vmem:[%s624_s1 + $0x58] sm:$0xff] (!%p139_p2) }
   0x9   : > { %457 = vmatpush3.bf16.msra.mxu0 (!%p139_p2), %v454_v3  ;;  %494 = vmatpush3.bf16.msra.mxu1 (!%p139_p2), %v454_v3  ;;  %v470_v16 = vpack.c.bf16 (!%p139_p2), %v191_v15, %v190_v14  ;;  %v474_v19 = vpack.c.bf16 (!%p139_p2), %v193_v18, %v192_v17  ;;  %v194_v20 = vld [vmem:[%s624_s1 + $0x60] sm:$0xff] (!%p139_p2)  ;;  %v195_v21 = vld [vmem:[%s624_s1 + $0x68] sm:$0xff] (!%p139_p2)  ;;  %v196_v23 = vld [vmem:[%s624_s1 + $0x70] sm:$0xff] (!%p139_p2) }
   0xa   : > { %459 = vmatprep.subr.bf16.mxu0 (!%p139_p2), %v458_v5  ;;  %487 = vmatprep.subr.bf16.mxu1 (!%p139_p2), %v458_v5  ;;  %v478_v22 = vpack.c.bf16 (!%p139_p2), %v195_v21, %v194_v20  ;;  %v197_v24 = vld [vmem:[%s624_s1 + $0x78] sm:$0xff] (!%p139_p2)  ;;  %v383_v32 = vld [vmem:[%s625_s2] ss:$0 sm:$0xff] (!%p139_p2) }
   0xb   : > { %v482_v25 = vpack.c.bf16 (!%p139_p2), %v197_v24, %v196_v23 }
   0xd   : > { %s628_s20 = smov (!%p163_p3, %s379_s20), 15  ;;  %461 = vmatpush3.bf16.msra.mxu0 %v458_v5  ;;  %495 = vmatpush3.bf16.msra.mxu1 %v458_v5 }
   0xe   : > { %s380_s27 = sshll.u32 %s628_s20, 3  ;;  %463 = vmatprep.subr.bf16.mxu0 %v462_v8  ;;  %488 = vmatprep.subr.bf16.mxu1 %v462_v8 }
   0xf   : > { %s578_s7 = scalar_lea.vmem %s623_s0, %s380_s27  ;;  %s172_s4 = scalar_lea.vmem %s626_s3, %s380_s27 }
  0x10   : > { %v174_v11 = vld [vmem:[%s578_s7] sm:$0xff]  ;;  %v175_v26 = vld [vmem:[%s578_s7 + $0x8] sm:$0xff]  ;;  %v176_v28 = vld [vmem:[%s578_s7 + $0x10] sm:$0xff] }
  0x11   : > { %v178_v12 = vld [vmem:[%s578_s7 + $0x20] sm:$0xff]  ;;  %442 = vmatprep.mubr.f32.mxu0 %v174_v11  ;;  %465 = vmatpush3.bf16.msra.mxu0 %v462_v8  ;;  %v179_v27 = vld [vmem:[%s578_s7 + $0x28] sm:$0xff]  ;;  %v180_v29 = vld [vmem:[%s578_s7 + $0x30] sm:$0xff] }
  0x12   : > { %448 = vmatprep.mubr.f32.mxu1 %v178_v12  ;;  %496 = vmatpush3.bf16.msra.mxu1 %v462_v8  ;;  %v177_v30 = vld [vmem:[%s578_s7 + $0x18] sm:$0xff] }
  0x13   : > { %467 = vmatprep.subr.bf16.mxu0 %v466_v13  ;;  %489 = vmatprep.subr.bf16.mxu1 %v466_v13  ;;  %v181_v31 = vld [vmem:[%s578_s7 + $0x38] sm:$0xff] }
  0x15   : > { %469 = vmatpush3.bf16.msra.mxu0 %v466_v13 }
  0x16   : > { %497 = vmatpush3.bf16.msra.mxu1 %v466_v13  ;;  %471 = vmatprep.subr.bf16.mxu0 %v470_v16 }
  0x17   : > { %490 = vmatprep.subr.bf16.mxu1 %v470_v16 }
  0x19   : > { %473 = vmatpush3.bf16.msra.mxu0 %v470_v16 }
  0x1a   : > { %498 = vmatpush3.bf16.msra.mxu1 %v470_v16  ;;  %475 = vmatprep.subr.bf16.mxu0 %v474_v19 }
  0x1b   : > { %491 = vmatprep.subr.bf16.mxu1 %v474_v19 }
  0x1d   : > { %477 = vmatpush3.bf16.msra.mxu0 %v474_v19 }
  0x1e   : > { %499 = vmatpush3.bf16.msra.mxu1 %v474_v19  ;;  %479 = vmatprep.subr.bf16.mxu0 %v478_v22 }
  0x1f   : > { %492 = vmatprep.subr.bf16.mxu1 %v478_v22 }
  0x21   : > { %481 = vmatpush3.bf16.msra.mxu0 %v478_v22 }
  0x22   : > { %500 = vmatpush3.bf16.msra.mxu1 %v478_v22  ;;  %483 = vmatprep.subr.bf16.mxu0 %v482_v25 }
  0x23   : > { %493 = vmatprep.subr.bf16.mxu1 %v482_v25 }
  0x25   : > { %485 = vmatpush3.bf16.msra.mxu0 %v482_v25 }
  0x26   : > { %501 = vmatpush3.bf16.msra.mxu1 %v482_v25 }
  0x28   : > { %443 = vmatmul.mubr.f32.vlgmr.msra.gmra.mrb[0].mxu0 %v175_v26 }
  0x29   : > { %449 = vmatmul.mubr.f32.vlgmr.msra.gmra.mrb[0].mxu1 %v179_v27  ;;  %445 = vmatprep.mubr.f32.mxu0 %v176_v28 }
  0x2a   : > { %451 = vmatprep.mubr.f32.mxu1 %v180_v29 }
  0x2c   : > { %446 = vmatmul.mubr.f32.gmra.mrb[2].mxu0 %v177_v30 }
  0x2d   : > { %452 = vmatmul.mubr.f32.gmra.mrb[2].mxu1 %v181_v31 }
  0xfb   : > { %v444_v33 = vpop.f32.mrb[0].mxu0 }
  0xfc   : > { %v450_v34 = vpop.f32.mrb[0].mxu1  ;;  %v277_v35 = vadd.f32 %v444_v33, %v383_v32  ;;  %v271_v37 = vpop.f32.mrb[1].mxu0 }
  0xfd   : > { %v297_v36 = vadd.f32 %v450_v34, %v383_v32  ;;  %v291_v38 = vpop.f32.mrb[1].mxu1  ;;  %v272_v39 = vadd.f32 %v383_v32, %v271_v37 }
  0xfe   : > { %v292_v40 = vadd.f32 %v383_v32, %v291_v38  ;;  %311 = vst [vmem:[%s172_s4 + $0x8] sm:$0xff] %v277_v35 }
  0xff   : > { %315 = vst [vmem:[%s172_s4 + $0x28] sm:$0xff] %v297_v36  ;;  %310 = vst [vmem:[%s172_s4] sm:$0xff] %v272_v39  ;;  %v447_v41 = vpop.f32.mrb[2].mxu0 }
 0x100   : > { %314 = vst [vmem:[%s172_s4 + $0x20] sm:$0xff] %v292_v40  ;;  %v453_v42 = vpop.f32.mrb[2].mxu1  ;;  %v287_v43 = vadd.f32 %v447_v41, %v383_v32  ;;  %v281_v45 = vpop.f32.mrb[3].mxu0 }
 0x101   : > { %v307_v44 = vadd.f32 %v453_v42, %v383_v32  ;;  %v301_v46 = vpop.f32.mrb[3].mxu1  ;;  %v282_v47 = vadd.f32 %v383_v32, %v281_v45 }
 0x102   : > { %v302_v48 = vadd.f32 %v383_v32, %v301_v46  ;;  %313 = vst [vmem:[%s172_s4 + $0x18] sm:$0xff] %v287_v43 }
 0x103   : > { %317 = vst [vmem:[%s172_s4 + $0x38] sm:$0xff] %v307_v44  ;;  %312 = vst [vmem:[%s172_s4 + $0x10] sm:$0xff] %v282_v47 }
 0x104   : > { %316 = vst [vmem:[%s172_s4 + $0x30] sm:$0xff] %v302_v48 }
 0x105 PF: > { %s13_s12 = sadd.s32 1, %s516_s12  }
 0x106   : > { %p10_p4 = scmp.ge.s32.totalorder %s13_s12, 4  }
 0x108   :  { %12 = sbr.rel (!%p10_p4) target bundleno = 1 (0x1), region = 62 }

// kernel: _forward_jit.5
= control target key start
LH: loop header
LB: loop body
LE: loop exit
PB: predicated region body
PF: predicated region fallthrough
CT: control target
= control target key end

     0   :  { %s940_s15 = smov 0   ;;  %s942_s16 = smov 0   ;;  %s1135_s0 = inlined_call_operand.vmem [shape: f32[48,128], index: 0, kind: input, shape index: {}]   ;;  %s1136_s1 = inlined_call_operand.vmem [shape: f32[128,256], index: 1, kind: input, shape index: {}]   ;;  %s1137_s2 = inlined_call_operand.vmem [shape: f32[1,256], index: 2, kind: input, shape index: {}]   ;;  %s1138_s3 = inlined_call_operand.vmem [shape: f32[48,1], index: 3, kind: input, shape index: {}]   ;;  %s1139_s4 = inlined_call_operand.vmem [shape: f32[48,256], index: 4, kind: output, shape index: {}]  }
   0x1   :  { %s944_s17 = smov 0   ;;  %s946_s18 = smov 0  }
   0x2   :  { %s948_s19 = smov 0   ;;  %s950_s20 = smov 0  }
   0x3   :  { %s952_s21 = smov 0   ;;  %s954_s22 = smov 0  }
   0x4   :  { %s956_s23 = smov 0  }
   0x5 LB: > { %s644_s24 = sadd.s32 4294967295, %s909_s23   ;;  %s23_s25 = sadd.s32 1, %s901_s21  ;;  %s909_s23 = sphi %s956_s23, %s14_s23   ;;  %s905_s22 = sphi %s954_s22, %s1148_s22   ;;  %s901_s21 = sphi %s952_s21, %s1147_s21   ;;  %s897_s20 = sphi %s950_s20, %s1146_s20   ;;  %s893_s19 = sphi %s948_s19, %s1145_s19   ;;  %s889_s18 = sphi %s946_s18, %s1144_s18   ;;  %s885_s17 = sphi %s944_s17, %s1143_s17   ;;  %s881_s16 = sphi %s942_s16, %s1142_s16   ;;  %s877_s15 = sphi %s940_s15, %s1141_s15  }
   0x6   : > { %p24_p0 = scmp.ge.s32.totalorder %s23_s25, 2  ;;  %s26_s26 = sadd.s32 1, %s905_s22 }
   0x7   : > { %s59_s27 = sadd.s32 1, %s889_s18  ;;  %p66_p1 = scmp.ne.s32.totalorder %s889_s18, %s885_s17 }
   0x8   : > { %s1150_s25 = smov (%p24_p0, %s23_s25), 0  ;;  %s1152_s26 = smov (!%p24_p0, %s26_s26), %s905_s22 }
   0x9   : > { %s56_s28 = ssub.s32 %s901_s21, %s1150_s25  ;;  %p67_p2 = scmp.eq.s32.totalorder %s909_s23, 0 }
   0xa   : > { %p28_p3 = scmp.ge.s32.totalorder %s1152_s26, 2  ;;  %p57_p4 = scmp.eq.s32.totalorder %s56_s28, 0 }
   0xb   : > { %p68_p5 = por %p67_p2, %p66_p1  ;;  %s139_s29 = sadd.s32 1, %s881_s16 }
   0xc   : > { %s1154_s26 = smov (%p28_p3, %s1152_s26), 0  ;;  %p149_p6 = scmp.ne.s32.totalorder %s881_s16, %s877_s15 }
   0xd   : > { %s1001_s30 = scalar_select %p57_p4, %s889_s18, %s59_s27  }
   0xe   : > { %s134_s5 = ssub.s32 %s905_s22, %s1154_s26  ;;  %p150_p7 = scmp.eq.s32.totalorder %s644_s24, 3 }
   0xf   : > { %s136_s6 = sor.u32 %s134_s5, %s56_s28  ;;  %p647_p10 = scmp.ge.s32.totalorder %s909_s23, 4 }
  0x10   : > { %p137_p8 = scmp.eq.s32.totalorder %s136_s6, 0  ;;  %p1007_p9 = por %p150_p7, %p149_p6 }
  0x11   : > { %172 = sbr.rel (%p647_p10) target bundleno = 36 (0x24), region = 16 }
  0x12   : > { %s1012_s8 = scalar_select %p137_p8, %s881_s16, %s139_s29  }
  0x18   : > { %184 = sbr.rel (!%p68_p5) target bundleno = 36 (0x24), region = 24  ;;  %s186_s9 = sand.u32 (%p68_p5), 1, %s889_s18  }
  0x19   : > { %s649_s10 = sshll.u32 (%p68_p5), %s901_s21, 3  ;;  %s648_s11 = sshll.u32 (%p68_p5), %s186_s9, 7 }
  0x1a   : > { %s1020_s14 = scalar_lea.vmem (%p68_p5), %s1136_s1, %s649_s10  ;;  %s188_s24 = scalar_lea.vmem (%p68_p5), [#allocation2], %s648_s11 }
  0x1b   : > { %v248_v0 = vld [vmem:[%s1020_s14] sm:$0xff] (%p68_p5)  ;;  %v250_v1 = vld [vmem:[%s1020_s14 + $0x10] sm:$0xff] (%p68_p5) }
  0x1c   : > { %v252_v2 = vld [vmem:[%s1020_s14 + $0x20] sm:$0xff] (%p68_p5)  ;;  %249 = vst [vmem:[%s188_s24] sm:$0xff] (%p68_p5), %v248_v0  ;;  %251 = vst [vmem:[%s188_s24 + $0x8] sm:$0xff] (%p68_p5), %v250_v1  ;;  %v254_v3 = vld [vmem:[%s1020_s14 + $0x30] sm:$0xff] (%p68_p5) }
  0x1d   : > { %253 = vst [vmem:[%s188_s24 + $0x10] sm:$0xff] (%p68_p5), %v252_v2  ;;  %v256_v4 = vld [vmem:[%s1020_s14 + $0x40] sm:$0xff] (%p68_p5)  ;;  %v258_v5 = vld [vmem:[%s1020_s14 + $0x50] sm:$0xff] (%p68_p5)  ;;  %255 = vst [vmem:[%s188_s24 + $0x18] sm:$0xff] (%p68_p5), %v254_v3 }
  0x1e   : > { %257 = vst [vmem:[%s188_s24 + $0x20] sm:$0xff] (%p68_p5), %v256_v4  ;;  %259 = vst [vmem:[%s188_s24 + $0x28] sm:$0xff] (%p68_p5), %v258_v5  ;;  %v260_v6 = vld [vmem:[%s1020_s14 + $0x60] sm:$0xff] (%p68_p5)  ;;  %v262_v7 = vld [vmem:[%s1020_s14 + $0x70] sm:$0xff] (%p68_p5) }
  0x1f   : > { %v264_v8 = vld [vmem:[%s1020_s14 + $0x80] sm:$0xff]  ;;  %261 = vst [vmem:[%s188_s24 + $0x30] sm:$0xff] %v260_v6  ;;  %263 = vst [vmem:[%s188_s24 + $0x38] sm:$0xff] %v262_v7  ;;  %v266_v9 = vld [vmem:[%s1020_s14 + $0x90] sm:$0xff] }
  0x20   : > { %265 = vst [vmem:[%s188_s24 + $0x40] sm:$0xff] %v264_v8  ;;  %v268_v10 = vld [vmem:[%s1020_s14 + $0xa0] sm:$0xff]  ;;  %v270_v11 = vld [vmem:[%s1020_s14 + $0xb0] sm:$0xff]  ;;  %267 = vst [vmem:[%s188_s24 + $0x48] sm:$0xff] %v266_v9 }
  0x21   : > { %269 = vst [vmem:[%s188_s24 + $0x50] sm:$0xff] %v268_v10  ;;  %271 = vst [vmem:[%s188_s24 + $0x58] sm:$0xff] %v270_v11  ;;  %v272_v12 = vld [vmem:[%s1020_s14 + $0xc0] sm:$0xff]  ;;  %v274_v13 = vld [vmem:[%s1020_s14 + $0xd0] sm:$0xff] }
  0x22   : > { %v276_v14 = vld [vmem:[%s1020_s14 + $0xe0] sm:$0xff]  ;;  %273 = vst [vmem:[%s188_s24 + $0x60] sm:$0xff] %v272_v12  ;;  %275 = vst [vmem:[%s188_s24 + $0x68] sm:$0xff] %v274_v13  ;;  %v278_v15 = vld [vmem:[%s1020_s14 + $0xf0] sm:$0xff] }
  0x23   : > { %277 = vst [vmem:[%s188_s24 + $0x70] sm:$0xff] %v276_v14  ;;  %279 = vst [vmem:[%s188_s24 + $0x78] sm:$0xff] %v278_v15 }
  0x24 PF: > { %p650_p11 = scmp.ge.s32.totalorder %s909_s23, 1  ;;  %p299_p12 = scmp.lt.s32.totalorder %s909_s23, 5 }
  0x26   : > { %p300_p13 = pnand %p650_p11, %p299_p12 }
  0x27   : > { %s306_s27 = sand.u32 (!%p300_p13), 1, %s885_s17   ;;  %s343_s28 = smul.u32 (!%p300_p13), 3, %s897_s20  ;;  %v911_v16 = vmov (!%p300_p13), 0.0|0.0   ;;  %vm912_vm0 = vmmov (!%p300_p13), 0   ;;  %v913_v17 = vmov (!%p300_p13), 0.0   ;;  %v914_v21 = vmov (!%p300_p13), 0  }
  0x28   : > { %303 = sbr.rel (%p300_p13) target bundleno = 305 (0x131), region = 70  ;;  %720 = vmatprep.subr.bf16.mxu0 (!%p300_p13), %v911_v16  ;;  %744 = vmatprep.subr.bf16.mxu1 (!%p300_p13), %v911_v16  ;;  %s651_s29 = sshll.u32 (!%p300_p13), %s306_s27, 7 }
  0x29   : > { %711 = vmatprep.mubr.msk.f32.mxu0 (!%p300_p13), %vm912_vm0, %v913_v17  ;;  %714 = vmatprep.mubr.msk.f32.mxu1 (!%p300_p13), %vm912_vm0, %v913_v17  ;;  %p344_p0 = scmp.lt.s32.totalorder (!%p300_p13), %s343_s28, 5  ;;  %s1048_s5 = scalar_lea.vmem (!%p300_p13), [#allocation2], %s651_s29 }
  0x2a   : > { %v362_v18 = vld [vmem:[%s1048_s5] sm:$0xff] (!%p300_p13)  ;;  %v363_v19 = vld [vmem:[%s1048_s5 + $0x8] sm:$0xff] (!%p300_p13)  ;;  %v364_v20 = vld [vmem:[%s1048_s5 + $0x10] sm:$0xff] (!%p300_p13)  ;;  %837 = vset.pattern.permute.xlu0 (!%p300_p13), %v914_v21  ;;  %838 = vset.pattern.permute.xlu1 (!%p300_p13), %v914_v21  ;;  %p349_p1 = scmp.lt.s32.totalorder (!%p300_p13), %s893_s19, 1  ;;  %s340_s24 = sand.u32 (!%p300_p13), 1, %s877_s15  }
  0x2b   : > { %v721_v22 = vpack.c.bf16 (!%p300_p13), %v363_v19, %v362_v18  ;;  %v365_v23 = vld [vmem:[%s1048_s5 + $0x18] sm:$0xff] (!%p300_p13)  ;;  %v366_v25 = vld [vmem:[%s1048_s5 + $0x20] sm:$0xff] (!%p300_p13)  ;;  %v367_v26 = vld [vmem:[%s1048_s5 + $0x28] sm:$0xff] (!%p300_p13) }
  0x2c   : > { %v724_v24 = vpack.c.bf16 (!%p300_p13), %v365_v23, %v364_v20  ;;  %v727_v28 = vpack.c.bf16 (!%p300_p13), %v367_v26, %v366_v25  ;;  %v368_v30 = vld [vmem:[%s1048_s5 + $0x30] sm:$0xff] (!%p300_p13)  ;;  %v369_v31 = vld [vmem:[%s1048_s5 + $0x38] sm:$0xff] (!%p300_p13)  ;;  %v370_v34 = vld [vmem:[%s1048_s5 + $0x40] sm:$0xff] (!%p300_p13) }
  0x2d   : > { %722 = vmatpush3.bf16.msra.mxu0 (!%p300_p13), %v721_v22  ;;  %752 = vmatpush3.bf16.msra.mxu1 (!%p300_p13), %v721_v22  ;;  %v730_v33 = vpack.c.bf16 (!%p300_p13), %v369_v31, %v368_v30  ;;  %v371_v35 = vld [vmem:[%s1048_s5 + $0x48] sm:$0xff] (!%p300_p13)  ;;  %v372_v37 = vld [vmem:[%s1048_s5 + $0x50] sm:$0xff] (!%p300_p13)  ;;  %v373_v38 = vld [vmem:[%s1048_s5 + $0x58] sm:$0xff] (!%p300_p13) }
  0x2e   : > { %723 = vmatprep.subr.bf16.mxu0 (!%p300_p13), %v911_v16  ;;  %745 = vmatprep.subr.bf16.mxu1 (!%p300_p13), %v911_v16  ;;  %v733_v36 = vpack.c.bf16 (!%p300_p13), %v371_v35, %v370_v34  ;;  %v736_v39 = vpack.c.bf16 (!%p300_p13), %v373_v38, %v372_v37  ;;  %v374_v40 = vld [vmem:[%s1048_s5 + $0x60] sm:$0xff] (!%p300_p13)  ;;  %v375_v41 = vld [vmem:[%s1048_s5 + $0x68] sm:$0xff] (!%p300_p13)  ;;  %v376_v43 = vld [vmem:[%s1048_s5 + $0x70] sm:$0xff] (!%p300_p13) }
  0x2f   : > { %s1156_s28 = smov (!%p344_p0, %s343_s28), 5  ;;  %v739_v42 = vpack.c.bf16 %v375_v41, %v374_v40  ;;  %v377_v44 = vld [vmem:[%s1048_s5 + $0x78] sm:$0xff]  ;;  %s760_s5 = smul.u32 24, %s340_s24 }
  0x30   : > { %s652_s17 = sshll.u32 %s1156_s28, 3  ;;  %v742_v45 = vpack.c.bf16 %v377_v44, %v376_v43  ;;  %s659_s15 = smul.u32 (%p1007_p9), 6, %s897_s20 }
  0x31   : > { %s356_s10 = scalar_lea.vmem %s1138_s3, %s652_s17  ;;  %725 = vmatpush3.bf16.msra.mxu0 %v724_v24  ;;  %753 = vmatpush3.bf16.msra.mxu1 %v724_v24  ;;  %s347_s13 = scalar_lea.vmem %s1135_s0, %s652_s17 }
  0x32   : > { %v465_v27 = vld [vmem:[%s356_s10] sm:$0xff]  ;;  %v467_v29 = vld [vmem:[%s356_s10 + $0x10] sm:$0xff]  ;;  %726 = vmatprep.subr.bf16.mxu0 %v911_v16  ;;  %746 = vmatprep.subr.bf16.mxu1 %v911_v16  ;;  %v466_v32 = vld [vmem:[%s356_s10 + $0x8] sm:$0xff]  ;;  %s350_s14 = scalar_select %p349_p1, %s893_s19, 1 }
  0x33   : > { %470 = vperm.xlu0 %837, %v465_v27   ;;  %480 = vperm.xlu1 %838, %v467_v29   ;;  %v359_v46 = vld [vmem:[%s347_s13] sm:$0xff]  ;;  %v360_v47 = vld [vmem:[%s347_s13 + $0x8] sm:$0xff]  ;;  %v361_v48 = vld [vmem:[%s347_s13 + $0x10] sm:$0xff]  ;;  %s342_s17 = scalar_lea.vmem [#allocation3], %s760_s5  ;;  %s498_s6 = sadd.s32 (%p1007_p9), %s893_s19, %s659_s15 }
  0x34   : > { %s351_s29 = scalar_lea.vmem %s1137_s2, %s350_s14  ;;  %s656_s9 = sshll.u32 (%p1007_p9), %s498_s6, 3 }
  0x35   : > { %728 = vmatpush3.bf16.msra.mxu0 %v727_v28  ;;  %754 = vmatpush3.bf16.msra.mxu1 %v727_v28  ;;  %v654_v50 = vld [vmem:[%s351_s29] ss:$0 sm:$0xff]  ;;  %s500_s12 = scalar_lea.vmem (%p1007_p9), %s1139_s4, %s656_s9 }
  0x36   : > { %729 = vmatprep.subr.bf16.mxu0 %v911_v16  ;;  %747 = vmatprep.subr.bf16.mxu1 %v911_v16 }
  0x37   : > { %475 = vperm.xlu0 %837, %v466_v32  }
  0x39   : > { %731 = vmatpush3.bf16.msra.mxu0 %v730_v33  ;;  %755 = vmatpush3.bf16.msra.mxu1 %v730_v33 }
  0x3a   : > { %732 = vmatprep.subr.bf16.mxu0 %v911_v16  ;;  %748 = vmatprep.subr.bf16.mxu1 %v911_v16 }
  0x3d   : > { %734 = vmatpush3.bf16.msra.mxu0 %v733_v36  ;;  %756 = vmatpush3.bf16.msra.mxu1 %v733_v36 }
  0x3e   : > { %735 = vmatprep.subr.bf16.mxu0 %v911_v16  ;;  %749 = vmatprep.subr.bf16.mxu1 %v911_v16 }
  0x41   : > { %737 = vmatpush3.bf16.msra.mxu0 %v736_v39  ;;  %757 = vmatpush3.bf16.msra.mxu1 %v736_v39 }
  0x42   : > { %738 = vmatprep.subr.bf16.mxu0 %v911_v16  ;;  %750 = vmatprep.subr.bf16.mxu1 %v911_v16 }
  0x45   : > { %740 = vmatpush3.bf16.msra.mxu0 %v739_v42  ;;  %758 = vmatpush3.bf16.msra.mxu1 %v739_v42 }
  0x46   : > { %741 = vmatprep.subr.bf16.mxu0 %v911_v16  ;;  %751 = vmatprep.subr.bf16.mxu1 %v911_v16 }
  0x49   : > { %743 = vmatpush3.bf16.msra.mxu0 %v742_v45  ;;  %759 = vmatpush3.bf16.msra.mxu1 %v742_v45 }
  0x4c   : > { %712 = vmatmul.mubr.f32.vlgmr.msra.gmra.mrb[0].mxu0 %v359_v46  ;;  %715 = vmatmul.mubr.f32.vlgmr.msra.gmra.mrb[0].mxu1 %v360_v47 }
  0x4d   : > { %717 = vmatprep.mubr.msk.f32.mxu1 %vm912_vm0, %v913_v17 }
  0x50   : > { %718 = vmatmul.mubr.f32.gmra.mrb[2].mxu1 %v361_v48 }
  0xb2   : > { %v471_v49 = vpop.permute.xlu0 %470  ;;  %v481_v61 = vpop.permute.xlu1 %480 }
  0xb6   : > { %v476_v51 = vpop.permute.xlu0 %475 }
 0x11f   : > { %v451_v52 = vpop.f32.mrb[0].mxu0  ;;  %v456_v53 = vpop.f32.mrb[0].mxu1 }
 0x120   : > { %v452_v54 = vadd.f32 %v654_v50, %v451_v52  ;;  %v457_v55 = vadd.f32 %v654_v50, %v456_v53  ;;  %v716_v56 = vpop.f32.mrb[1].mxu1  ;;  %v713_v57 = vpop.f32.mrb[1].mxu0 }
 0x122   : > { %v483_v58 = vmul.f32 %v471_v49, %v452_v54  ;;  %v484_v59 = vmul.f32 %v476_v51, %v457_v55  ;;  %495 = sbr.rel (!%p1007_p9) target bundleno = 305 (0x131), region = 78 }
 0x123   : > { %v461_v60 = vpop.f32.mrb[2].mxu1 }
 0x124   : > { %486 = vst [vmem:[%s342_s17] sm:$0xff] %v483_v58  ;;  %487 = vst [vmem:[%s342_s17 + $0x8] sm:$0xff] %v484_v59  ;;  %v462_v62 = vadd.f32 %v654_v50, %v461_v60  ;;  %v719_v63 = vpop.f32.mrb[3].mxu1 }
 0x126   : > { %v485_v0 = vmul.f32 %v481_v61, %v462_v62 }
 0x128   : > { %488 = vst [vmem:[%s342_s17 + $0x10] sm:$0xff] %v485_v0 }
 0x12b   : > { %v532_v1 = vld [vmem:[%s342_s17] sm:$0xff]  ;;  %v534_v2 = vld [vmem:[%s342_s17 + $0x8] sm:$0xff] }
 0x12c   : > { %533 = vst [vmem:[%s500_s12] sm:$0xff] %v532_v1  ;;  %535 = vst [vmem:[%s500_s12 + $0x10] sm:$0xff] %v534_v2 }
 0x12f   : > { %v536_v3 = vld [vmem:[%s342_s17 + $0x10] sm:$0xff] }
 0x130   : > { %537 = vst [vmem:[%s500_s12 + $0x20] sm:$0xff] %v536_v3 }
 0x131 PF: > { %s14_s23 = sadd.s32 1, %s909_s23   ;;  %s1141_s15 = smov %s881_s16 }
 0x132   : > { %p11_p2 = scmp.ge.s32.totalorder %s14_s23, 6   ;;  %s1142_s16 = smov %s1012_s8 }
 0x133   : > { %s1143_s17 = smov %s889_s18  ;;  %s1144_s18 = smov %s1001_s30 }
 0x134   : > { %s1145_s19 = smov %s901_s21  ;;  %s1146_s20 = smov %s905_s22 }
 0x135   : > { %s1147_s21 = smov %s1150_s25  ;;  %s1148_s22 = smov %s1154_s26 }
 0x136   :  { %13 = sbr.rel (!%p11_p2) target bundleno = 5 (0x5), region = 156 }

// kernel: _forward_jit.4
= control target key start
LH: loop header
LB: loop body
LE: loop exit
PB: predicated region body
PF: predicated region fallthrough
CT: control target
= control target key end

     0   :  { %s13171_s0 = inlined_call_operand.vmem [shape: s32[6], index: 0, kind: input, shape index: {}]   ;;  %s13172_s1 = inlined_call_operand.vmem [shape: f32[8,16,128], index: 1, kind: input, shape index: {}]   ;;  %s13173_s2 = inlined_call_operand.vmem [shape: f32[8,16,128], index: 2, kind: input, shape index: {}]   ;;  %s13174_s3 = inlined_call_operand.vmem [shape: f32[6,8,128], index: 3, kind: input, shape index: {}]   ;;  %s13175_s4 = inlined_call_operand.vmem [shape: f32[128,640], index: 4, kind: input, shape index: {}]   ;;  %s13176_s5 = inlined_call_operand.vmem [shape: f32[1,128], index: 5, kind: input, shape index: {}]   ;;  %s13177_s6 = inlined_call_operand.vmem [shape: f32[256,512], index: 6, kind: input, shape index: {}]   ;;  %s13178_s7 = inlined_call_operand.vmem [shape: f32[1,512], index: 7, kind: input, shape index: {}]   ;;  %s13179_s8 = inlined_call_operand.vmem [shape: f32[6,8,128], index: 8, kind: output, shape index: {}]  }
   0x1   :  { %s13_s29 = sshll.u32 %s13171_s0, 4  ;;  %s14_s29 = int_to_ptr.vmem [resolvable:$true] %s13_s29 }
   0x2   :  { %s9298_s30 = scalar_lea.vmem %s14_s29, 16  ;;  %p9303_p1 = scmp.lt.s32.totalorder %s14_s29, %s14_s29 }
   0x3   :  { %p9299_p0 = scmp.ne.s32.totalorder %s14_s29, %s9298_s30  ;;  %p9304_p2 = scmp.lt.s32.totalorder %s9298_s30, %s9298_s30 }
   0x5   :  { %p9305_p3 = por %p9304_p2, %p9303_p1 }
   0x7   :  { %p9306_p4 = pnand %p9305_p3, %p9299_p0 }
   0x9   :  { %9309 = shalt.err (!%p9306_p4)  }
   0xa   :  { %s9312_s9 = smov [#allocation3]  }
   0xb   :  { %16 = dma.vmem_to_smem %s14_s29, 16, %s9312_s9, [#allocation2] }
   0xc   :  { %9310 = dma.done.wait [#allocation2], 16 }
   0xd   :  { %9311 = vsyncadd [#allocation2], 4294967280 }
   0xe   :  { %18 = sfence }
   0xf   :  { %v66_v0 = vld [vmem:[%s13175_s4 + $0x8] sm:$0xff]  ;;  %v71_v1 = vld [vmem:[%s13175_s4 + $0x30] sm:$0xff]  ;;  %v65_v2 = vld [vmem:[%s13175_s4] sm:$0xff]  ;;  %v13180_v7 = vmov 0.0   ;;  %v275_v49 = vlaneseq  ;;  %v9314_v50 = vmov 1966171168  }
  0x10   :  { %v9375_v3 = vpack.c.bf16 %v71_v1, %v66_v0  ;;  %v70_v4 = vld [vmem:[%s13175_s4 + $0x28] sm:$0xff]  ;;  %v76_v5 = vld [vmem:[%s13175_s4 + $0x58] sm:$0xff]  ;;  %v81_v6 = vld [vmem:[%s13175_s4 + $0x80] sm:$0xff]  ;;  %343 = vmatprep.mubr.f32.mxu0 %v13180_v7  ;;  %414 = vmatprep.mubr.f32.mxu1 %v13180_v7  ;;  %v494_v51 = vunpack.c.l.s4 %v9314_v50  ;;  %vm694_vm0 = vcmask 130112   ;;  %vm759_vm1 = vcmask 1041409   ;;  %s7101_s14 = sld [smem:[#allocation3 + $0x1]] }
  0x11   :  { %v9388_v8 = vpack.c.bf16 %v70_v4, %v65_v2  ;;  %v9390_v9 = vpack.c.bf16 %v81_v6, %v76_v5  ;;  %v75_v10 = vld [vmem:[%s13175_s4 + $0x50] sm:$0xff]  ;;  %v80_v11 = vld [vmem:[%s13175_s4 + $0x78] sm:$0xff]  ;;  %v86_v12 = vld [vmem:[%s13175_s4 + $0xa8] sm:$0xff]  ;;  %v9514_v52 = vshrl.u32 %v275_v49, 7  ;;  %vm761_vm2 = vcmask 1042434   ;;  %s7110_s9 = sld [smem:[#allocation3 + $0x2]] }
  0x12   :  { %13417 = vst [vmem:[#allocation5_spill] sm:$0xff] %v9375_v3  ;;  %7446 = vmatprep.subr.bf16.mxu0 %v9375_v3  ;;  %v91_v13 = vld [vmem:[%s13175_s4 + $0xd0] sm:$0xff]  ;;  %v9406_v14 = vpack.c.bf16 %v80_v11, %v75_v10  ;;  %v85_v16 = vld [vmem:[%s13175_s4 + $0xa0] sm:$0xff]  ;;  %v90_v17 = vld [vmem:[%s13175_s4 + $0xc8] sm:$0xff]  ;;  %v495_v53 = vunpack.c.0.s8 %v494_v51  ;;  %vm763_vm3 = vcmask 1043459   ;;  %vm765_vm4 = vcmask 1044484  }
  0x13   :  { %7448 = vmatpush1.bf16.msra.mxu0 %v9388_v8  ;;  %v9409_v15 = vpack.c.bf16 %v91_v13, %v86_v12  ;;  %v96_v18 = vld [vmem:[%s13175_s4 + $0xf8] sm:$0xff]  ;;  %v101_v19 = vld [vmem:[%s13175_s4 + $0x120] sm:$0xff]  ;;  %v9424_v20 = vpack.c.bf16 %v90_v17, %v85_v16  ;;  %v95_v22 = vld [vmem:[%s13175_s4 + $0xf0] sm:$0xff]  ;;  %13426 = vst [vmem:[#allocation14_spill] sm:$0xff] %v9514_v52  ;;  %v9523_v59 = vsub.s32 0, %v9514_v52  ;;  %vm767_vm5 = vcmask 1045509  }
  0x14   :  { %7450 = vmatprep.subr.bf16.mxu0 %v9390_v9  ;;  %v9427_v21 = vpack.c.bf16 %v101_v19, %v96_v18  ;;  %v100_v23 = vld [vmem:[%s13175_s4 + $0x118] sm:$0xff]  ;;  %v106_v24 = vld [vmem:[%s13175_s4 + $0x148] sm:$0xff]  ;;  %v111_v25 = vld [vmem:[%s13175_s4 + $0x170] sm:$0xff]  ;;  %v9517_v54 = vsub.s32 %v495_v53, %v9514_v52  ;;  %vm769_vm6 = vcmask 1046534   ;;  %vm771_vm7 = vcmask 1047559   ;;  %s7116_s24 = sld [smem:[#allocation3 + $0x3]] }
  0x15   :  { %v9442_v26 = vpack.c.bf16 %v100_v23, %v95_v22  ;;  %v9445_v27 = vpack.c.bf16 %v111_v25, %v106_v24  ;;  %v105_v28 = vld [vmem:[%s13175_s4 + $0x140] sm:$0xff]  ;;  %v110_v29 = vld [vmem:[%s13175_s4 + $0x168] sm:$0xff]  ;;  %v116_v30 = vld [vmem:[%s13175_s4 + $0x198] sm:$0xff]  ;;  %13429 = vst [vmem:[#allocation17_spill] sm:$0xff] %v9523_v59  ;;  %vm774_vm8 = vcmask 130048   ;;  %vm9317_vm9 = vmmov 0  }
  0x16   :  { %v121_v31 = vld [vmem:[%s13175_s4 + $0x1c0] sm:$0xff]  ;;  %v9460_v32 = vpack.c.bf16 %v110_v29, %v105_v28  ;;  %v115_v34 = vld [vmem:[%s13175_s4 + $0x190] sm:$0xff]  ;;  %v120_v35 = vld [vmem:[%s13175_s4 + $0x1b8] sm:$0xff]  ;;  %13427 = vst [vmem:[#allocation15_spill] sm:$0xff] %v9517_v54 }
  0x17   :  { %7452 = vmatpush1.bf16.msra.mxu0 %v9406_v14  ;;  %13418 = vst [vmem:[#allocation6_spill] sm:$0xff] %v9445_v27  ;;  %v9463_v33 = vpack.c.bf16 %v121_v31, %v116_v30  ;;  %v126_v36 = vld [vmem:[%s13175_s4 + $0x1e8] sm:$0xff]  ;;  %v131_v37 = vld [vmem:[%s13175_s4 + $0x210] sm:$0xff]  ;;  %v9478_v38 = vpack.c.bf16 %v120_v35, %v115_v34  ;;  %v125_v40 = vld [vmem:[%s13175_s4 + $0x1e0] sm:$0xff] }
  0x18   :  { %7454 = vmatprep.subr.bf16.mxu0 %v9409_v15  ;;  %13419 = vst [vmem:[#allocation7_spill] sm:$0xff] %v9460_v32  ;;  %v9481_v39 = vpack.c.bf16 %v131_v37, %v126_v36  ;;  %v130_v41 = vld [vmem:[%s13175_s4 + $0x208] sm:$0xff]  ;;  %v136_v42 = vld [vmem:[%s13175_s4 + $0x238] sm:$0xff]  ;;  %v141_v43 = vld [vmem:[%s13175_s4 + $0x260] sm:$0xff] }
  0x19   :  { %13420 = vst [vmem:[#allocation8_spill] sm:$0xff] %v9463_v33  ;;  %13421 = vst [vmem:[#allocation9_spill] sm:$0xff] %v9478_v38  ;;  %v9496_v44 = vpack.c.bf16 %v130_v41, %v125_v40  ;;  %v9499_v45 = vpack.c.bf16 %v141_v43, %v136_v42  ;;  %v135_v46 = vld [vmem:[%s13175_s4 + $0x230] sm:$0xff]  ;;  %v140_v47 = vld [vmem:[%s13175_s4 + $0x258] sm:$0xff] }
  0x1a   :  { %13422 = vst [vmem:[#allocation10_spill] sm:$0xff] %v9481_v39  ;;  %v9508_v48 = vpack.c.bf16 %v140_v47, %v135_v46  ;;  %v49_v1 = vld [vmem:[%s13173_s2] sm:$0xff]  ;;  %v50_v2 = vld [vmem:[%s13173_s2 + $0x8] sm:$0xff]  ;;  %v51_v5 = vld [vmem:[%s13173_s2 + $0x10] sm:$0xff] }
  0x1b   :  { %7456 = vmatpush1.bf16.msra.mxu0 %v9424_v20  ;;  %13423 = vst [vmem:[#allocation11_spill] sm:$0xff] %v9496_v44  ;;  %13424 = vst [vmem:[#allocation12_spill] sm:$0xff] %v9499_v45  ;;  %v52_v6 = vld [vmem:[%s13173_s2 + $0x18] sm:$0xff]  ;;  %v9547_v17 = vld [vmem:[%s13176_s5] ss:$0 sm:$0xff] }
  0x1c   :  { %7458 = vmatprep.subr.bf16.mxu0 %v9427_v21  ;;  %13425 = vst [vmem:[#allocation13_spill] sm:$0xff] %v9508_v48  ;;  %v53_v22 = vld [vmem:[%s13173_s2 + $0x20] sm:$0xff]  ;;  %v54_v24 = vld [vmem:[%s13173_s2 + $0x28] sm:$0xff] }
  0x1d   :  { %v57_v36 = vld [vmem:[%s13173_s2 + $0x40] sm:$0xff]  ;;  %v58_v42 = vld [vmem:[%s13173_s2 + $0x48] sm:$0xff] }
  0x1f   :  { %7460 = vmatpush1.bf16.msra.mxu0 %v9442_v26 }
  0x20   :  { %7462 = vmatprep.subr.bf16.mxu0 %v9445_v27 }
  0x23   :  { %7464 = vmatpush1.bf16.msra.mxu0 %v9460_v32 }
  0x24   :  { %7466 = vmatprep.subr.bf16.mxu0 %v9463_v33 }
  0x27   :  { %7468 = vmatpush1.bf16.msra.mxu0 %v9478_v38 }
  0x28   :  { %7470 = vmatprep.subr.bf16.mxu0 %v9481_v39 }
  0x2b   :  { %7472 = vmatpush1.bf16.msra.mxu0 %v9496_v44 }
  0x2c   :  { %7474 = vmatprep.subr.bf16.mxu0 %v9499_v45 }
  0x2f   :  { %7476 = vmatpush1.bf16.msra.mxu0 %v9508_v48 }
  0x32   :  { %344 = vmatmul.mubr.f32.vlgmr.msra.gmra.mrb[0].mxu0 %v13180_v7 }
 0x105   :  { %v345_v55 = vpop.f32.mrb[0].mxu0 }
 0x106   :  { %v492_v56 = vcombine.high %v345_v55, %v345_v55  ;;  %v499_v57 = vrot.slane %v345_v55, %v9517_v54  ;;  %v9520_v58 = vpop.f32.mrb[1].mxu0 }
 0x107   :  { %13428 = vst [vmem:[#allocation16_spill] sm:$0xff] %v9520_v58 }
 0x108   :  { %v506_v60 = vrot.slane %v492_v56, %v9517_v54  ;;  %v507_v61 = vcombine.high %v499_v57, %v499_v57  ;;  %v515_v62 = vrot.slane %v499_v57, %v9517_v54  ;;  %v55_v57 = vld [vmem:[%s13173_s2 + $0x30] sm:$0xff] }
 0x10a   :  { %v529_v63 = vrot.slane %v507_v61, %v9517_v54  ;;  %v537_v0 = vcombine.high %v515_v62, %v515_v62  ;;  %v544_v4 = vrot.slane %v515_v62, %v9523_v59  ;;  %v522_v10 = vrot.slane %v506_v60, %v9517_v54 }
 0x10b   :  { %v508_v25 = vcombine.high %v506_v60, %v506_v60  ;;  %v56_v60 = vld [vmem:[%s13173_s2 + $0x38] sm:$0xff] }
 0x10c   :  { %v548_v11 = vrot.slane %v529_v63, %v9523_v59  ;;  %v581_v12 = vadd.f32 %v544_v4, %v49_v1  ;;  %v582_v13 = vadd.f32 %v544_v4, %v50_v2  ;;  %v552_v16 = vrot.slane %v537_v0, %v9523_v59 }
 0x10d   :  { %v560_v29 = vrot.slane %v522_v10, %v9523_v59  ;;  %v539_v30 = vcombine.high %v529_v63, %v529_v63  ;;  %v536_v46 = vrot.slane %v508_v25, %v9517_v54  ;;  %v538_v62 = vcombine.high %v522_v10, %v522_v10  ;;  %v62_v25 = vld [vmem:[%s13173_s2 + $0x68] sm:$0xff] }
 0x10e   :  { %v583_v18 = vadd.f32 %v548_v11, %v51_v5  ;;  %v584_v19 = vadd.f32 %v548_v11, %v52_v6  ;;  %v597_v23 = vmax.f32 %v581_v12, 0.0  ;;  %v598_v34 = vmax.f32 %v582_v13, 0.0  ;;  %v59_v6 = vld [vmem:[%s13173_s2 + $0x50] sm:$0xff]  ;;  %v60_v11 = vld [vmem:[%s13173_s2 + $0x58] sm:$0xff] }
 0x10f   :  { %v585_v35 = vadd.f32 %v552_v16, %v53_v22  ;;  %v586_v41 = vadd.f32 %v552_v16, %v54_v24  ;;  %v589_v43 = vadd.f32 %v560_v29, %v57_v36  ;;  %v556_v51 = vrot.slane %v539_v30, %v9523_v59  ;;  %v61_v24 = vld [vmem:[%s13173_s2 + $0x60] sm:$0xff] }
 0x110   :  { %v599_v28 = vmax.f32 %v583_v18, 0.0  ;;  %v619_v31 = vmul.f32 %v9547_v17, %v597_v23  ;;  %v600_v40 = vmax.f32 %v584_v19, 0.0  ;;  %v620_v47 = vmul.f32 %v9547_v17, %v598_v34 }
 0x111   :  { %v601_v50 = vmax.f32 %v585_v35, 0.0  ;;  %v602_v55 = vmax.f32 %v586_v41, 0.0  ;;  %v590_v56 = vadd.f32 %v560_v29, %v58_v42  ;;  %v605_v61 = vmax.f32 %v589_v43, 0.0 }
 0x112   :  { %v621_v37 = vmul.f32 %v9547_v17, %v599_v28  ;;  %635 = vadd.xlane.f32.xlu0 %v619_v31  ;;  %v622_v53 = vmul.f32 %v9547_v17, %v600_v40  ;;  %v587_v0 = vadd.f32 %v556_v51, %v55_v57  ;;  %v564_v1 = vrot.slane %v536_v46, %v9523_v59  ;;  %v64_v40 = vld [vmem:[%s13173_s2 + $0x78] sm:$0xff] }
 0x113   :  { %v623_v63 = vmul.f32 %v9547_v17, %v601_v50  ;;  %v624_v2 = vmul.f32 %v9547_v17, %v602_v55  ;;  %v606_v4 = vmax.f32 %v590_v56, 0.0  ;;  %v588_v5 = vadd.f32 %v556_v51, %v56_v60 }
 0x114   :  { %639 = vadd.xlane.f32.xlu1 %v621_v37  ;;  %v627_v10 = vmul.f32 %v9547_v17, %v605_v61  ;;  %v603_v12 = vmax.f32 %v587_v0, 0.0  ;;  %v591_v13 = vadd.f32 %v564_v1, %v59_v6  ;;  %v568_v16 = vrot.slane %v538_v62, %v9523_v59  ;;  %v63_v37 = vld [vmem:[%s13173_s2 + $0x70] sm:$0xff] }
 0x115   :  { %v540_v18 = vcombine.high %v536_v46, %v536_v46  ;;  %v628_v19 = vmul.f32 %v9547_v17, %v606_v4  ;;  %v604_v22 = vmax.f32 %v588_v5, 0.0  ;;  %v592_v23 = vadd.f32 %v564_v1, %v60_v11 }
 0x116   :  { %637 = vadd.xlane.f32.xlu0 %v620_v47  ;;  %v625_v28 = vmul.f32 %v9547_v17, %v603_v12  ;;  %v607_v29 = vmax.f32 %v591_v13, 0.0  ;;  %v593_v30 = vadd.f32 %v568_v16, %v61_v24  ;;  %v594_v36 = vadd.f32 %v568_v16, %v62_v25 }
 0x117   :  { %v572_v31 = vrot.slane %v540_v18, %v9523_v59  ;;  %v626_v34 = vmul.f32 %v9547_v17, %v604_v22  ;;  %v608_v35 = vmax.f32 %v592_v23, 0.0  ;;  %v684_v4 = vand.u32 127, %v275_v49 }
 0x118   :  { %641 = vadd.xlane.f32.xlu1 %v622_v53  ;;  %v629_v41 = vmul.f32 %v9547_v17, %v607_v29  ;;  %v609_v42 = vmax.f32 %v593_v30, 0.0  ;;  %v610_v47 = vmax.f32 %v594_v36, 0.0 }
 0x119   :  { %v595_v43 = vadd.f32 %v572_v31, %v63_v37  ;;  %v630_v46 = vmul.f32 %v9547_v17, %v608_v35  ;;  %v596_v50 = vadd.f32 %v572_v31, %v64_v40  ;;  %v689_v5 = vadd.s32 4294967288, %v684_v4 }
 0x11a   :  { %643 = vadd.xlane.f32.xlu0 %v623_v63  ;;  %v631_v51 = vmul.f32 %v9547_v17, %v609_v42  ;;  %v632_v55 = vmul.f32 %v9547_v17, %v610_v47  ;;  %v9632_v13 = vsub.s32 %v684_v4, %v9514_v52 }
 0x11b   :  { %v611_v53 = vmax.f32 %v595_v43, 0.0  ;;  %v612_v56 = vmax.f32 %v596_v50, 0.0  ;;  %v9625_v11 = vsub.s32 %v689_v5, %v9514_v52 }
 0x11c   :  { %645 = vadd.xlane.f32.xlu1 %v624_v2  ;;  %13431 = vst [vmem:[#allocation19_spill] sm:$0xff] %v9632_v13 }
 0x11d   :  { %v633_v57 = vmul.f32 %v9547_v17, %v611_v53  ;;  %v634_v60 = vmul.f32 %v9547_v17, %v612_v56  ;;  %13430 = vst [vmem:[#allocation18_spill] sm:$0xff] %v9625_v11 }
 0x11e   :  { %651 = vadd.xlane.f32.xlu0 %v627_v10 }
 0x120   :  { %653 = vadd.xlane.f32.xlu1 %v628_v19 }
 0x122   :  { %647 = vadd.xlane.f32.xlu0 %v625_v28 }
 0x124   :  { %649 = vadd.xlane.f32.xlu1 %v626_v34 }
 0x126   :  { %655 = vadd.xlane.f32.xlu0 %v629_v41 }
 0x128   :  { %657 = vadd.xlane.f32.xlu1 %v630_v46 }
 0x12a   :  { %659 = vadd.xlane.f32.xlu0 %v631_v51 }
 0x12c   :  { %661 = vadd.xlane.f32.xlu1 %v632_v55 }
 0x12e   :  { %663 = vadd.xlane.f32.xlu0 %v633_v57 }
 0x130   :  { %665 = vadd.xlane.f32.xlu1 %v634_v60 }
 0x19f   :  { %v9607_v61 = vpop.xlane.xlu0 %635 }
 0x1a0   :  { %v688_v28 = vrot.slane %v9607_v61, %v9632_v13 }
 0x1a1   :  { %v9609_v62 = vpop.xlane.xlu1 %639 }
 0x1a2   :  { %v699_v18 = vrot.slane %v9609_v62, %v9632_v13 }
 0x1a3   :  { %v9611_v63 = vpop.xlane.xlu0 %637 }
 0x1a4   :  { %v693_v19 = vrot.slane %v9611_v63, %v9625_v11 }
 0x1a5   :  { %v9613_v0 = vpop.xlane.xlu1 %641 }
 0x1a6   :  { %v703_v16 = vrot.slane %v9613_v0, %v9625_v11  ;;  %v695_v34 = vsel %vm694_vm0, %v693_v19, %v688_v28 }
 0x1a7   :  { %v9615_v1 = vpop.xlane.xlu0 %643 }
 0x1a8   :  { %v708_v24 = vrot.slane %v9615_v1, %v9632_v13  ;;  %v704_v29 = vsel %vm694_vm0, %v703_v16, %v699_v18 }
 0x1a9   :  { %v9617_v2 = vpop.xlane.xlu1 %645  ;;  %v760_v40 = vsel %vm759_vm1, %v704_v29, %v695_v34  ;;  %v9315_v29 = vmov 0   ;;  %v9695_v34 = vsub.s32 6, %v9514_v52 }
 0x1aa   :  { %v712_v49 = vrot.slane %v9617_v2, %v9625_v11  ;;  %8748 = vset.pattern.permute.xlu0 %v9315_v29  ;;  %8747 = vset.pattern.permute.xlu1 %v9315_v29 }
 0x1ab   :  { %v9620_v6 = vpop.xlane.xlu0 %651  ;;  %13434 = vst [vmem:[#allocation22_spill] sm:$0xff] %v9695_v34 }
 0x1ac   :  { %v713_v31 = vsel %vm694_vm0, %v712_v49, %v708_v24  ;;  %v726_v50 = vrot.slane %v9620_v6, %v9632_v13 }
 0x1ad   :  { %v9622_v17 = vpop.xlane.xlu1 %653  ;;  %v762_v43 = vsel %vm761_vm2, %v713_v31, %v760_v40  ;;  %v9692_v31 = vsub.s32 5, %v9514_v52 }
 0x1ae   :  { %v730_v41 = vrot.slane %v9622_v17, %v9625_v11 }
 0x1af   :  { %v9627_v10 = vpop.xlane.xlu0 %647  ;;  %13433 = vst [vmem:[#allocation21_spill] sm:$0xff] %v9692_v31 }
 0x1b0   :  { %v717_v30 = vrot.slane %v9627_v10, %v9632_v13  ;;  %v731_v57 = vsel %vm694_vm0, %v730_v41, %v726_v50 }
 0x1b1   :  { %v9629_v12 = vpop.xlane.xlu1 %649 }
 0x1b2   :  { %v721_v22 = vrot.slane %v9629_v12, %v9625_v11 }
 0x1b3   :  { %v9644_v23 = vpop.xlane.xlu0 %655 }
 0x1b4   :  { %v722_v35 = vsel %vm694_vm0, %v721_v22, %v717_v30  ;;  %v735_v46 = vrot.slane %v9644_v23, %v9632_v13  ;;  %v9689_v30 = vsub.s32 1, %v9514_v52 }
 0x1b5   :  { %v9648_v25 = vpop.xlane.xlu1 %657  ;;  %v764_v51 = vsel %vm763_vm3, %v722_v35, %v762_v43  ;;  %v9703_v43 = vsub.s32 7, %v9514_v52 }
 0x1b6   :  { %v739_v36 = vrot.slane %v9648_v25, %v9625_v11  ;;  %v766_v49 = vsel %vm765_vm4, %v731_v57, %v764_v51  ;;  %13432 = vst [vmem:[#allocation20_spill] sm:$0xff] %v9689_v30  ;;  %v9711_v51 = vsub.s32 2, %v9514_v52 }
 0x1b7   :  { %v660_v37 = vpop.xlane.xlu0 %659  ;;  %13435 = vst [vmem:[#allocation23_spill] sm:$0xff] %v9703_v43 }
 0x1b8   :  { %v744_v53 = vrot.slane %v660_v37, %v9632_v13  ;;  %v740_v55 = vsel %vm694_vm0, %v739_v36, %v735_v46  ;;  %13436 = vst [vmem:[#allocation24_spill] sm:$0xff] %v9711_v51 }
 0x1b9   :  { %v9663_v42 = vpop.xlane.xlu1 %661  ;;  %v768_v18 = vsel %vm767_vm5, %v740_v55, %v766_v49 }
 0x1ba   :  { %v748_v47 = vrot.slane %v9663_v42, %v9625_v11 }
 0x1bb   :  { %v664_v56 = vpop.xlane.xlu0 %663 }
 0x1bc   :  { %v749_v4 = vsel %vm694_vm0, %v748_v47, %v744_v53  ;;  %v753_v5 = vrot.slane %v664_v56, %v9632_v13 }
 0x1bd   :  { %v9676_v60 = vpop.xlane.xlu1 %665  ;;  %v770_v22 = vsel %vm769_vm6, %v749_v4, %v768_v18 }
 0x1be   :  { %v757_v16 = vrot.slane %v9676_v60, %v9625_v11 }
 0x1c0   :  { %v758_v19 = vsel %vm694_vm0, %v757_v16, %v753_v5 }
 0x1c1   :  { %v772_v24 = vsel %vm771_vm7, %v758_v19, %v770_v22 }
 0x1c2   :  { %v775_v28 = vsel %vm774_vm8, %v772_v24, -inf }
 0x1c3   :  { %776 = vmax.xlane.f32.xlu0 %v775_v28 }
 0x250   :  { %v777_v35 = vpop.xlane.xlu0 %776 }
 0x251   :  { %v782_v36 = vrot.slane %v777_v35, %v9523_v59  ;;  %v786_v40 = vrot.slane %v777_v35, %v9689_v30  ;;  %v9700_v41 = vrot.slane %v777_v35, %v9692_v31  ;;  %v9706_v46 = vrot.slane %v777_v35, %v9695_v34 }
 0x252   :  { %v9717_v5 = vrot.slane %v777_v35, %v9703_v43 }
 0x253   :  { %v820_v47 = vsub.f32 %v9611_v63, %v782_v36  ;;  %v819_v50 = vsub.f32 %v9607_v61, %v782_v36  ;;  %v829_v53 = vsub.f32 %v9644_v23, %v9700_v41  ;;  %v821_v55 = vsub.f32 %v9609_v62, %v786_v40 }
 0x254   :  { %v831_v49 = vsub.f32 %v660_v37, %v9706_v46  ;;  %v790_v63 = vrot.slane %v777_v35, %v9711_v51  ;;  %v822_v18 = vsub.f32 %v9613_v0, %v786_v40  ;;  %v833_v23 = vsub.f32 %v664_v56, %v9717_v5 }
 0x255   :  { %v837_v57 = vmul.f32 1.442695, %v820_v47  ;;  %v835_v4 = vmul.f32 1.442695, %v819_v50  ;;  %v855_v16 = vmul.f32 1.442695, %v829_v53 }
 0x256   :  { %v839_v61 = vmul.f32 1.442695, %v821_v55  ;;  %v859_v19 = vmul.f32 1.442695, %v831_v49  ;;  %v9724_v62 = vsub.s32 3, %v9514_v52  ;;  %v823_v24 = vsub.f32 %v9615_v1, %v790_v63 }
 0x257   :  { %8749 = vpow2.f32 %v837_v57  ;;  %v841_v22 = vmul.f32 1.442695, %v822_v18  ;;  %v863_v28 = vmul.f32 1.442695, %v833_v23  ;;  %v824_v36 = vsub.f32 %v9617_v2, %v790_v63 }
 0x258   :  { %8751 = vpow2.f32 %v835_v4  ;;  %13437 = vst [vmem:[#allocation25_spill] sm:$0xff] %v9724_v62  ;;  %v794_v37 = vrot.slane %v777_v35, %v9724_v62  ;;  %v843_v29 = vmul.f32 1.442695, %v823_v24  ;;  %v9736_v56 = vsub.s32 4, %v9514_v52 }
 0x259   :  { %8753 = vpow2.f32 %v855_v16  ;;  %v845_v1 = vmul.f32 1.442695, %v824_v36  ;;  %v832_v24 = vsub.f32 %v9663_v42, %v9706_v46 }
 0x25a   :  { %8755 = vpow2.f32 %v839_v61  ;;  %13438 = vst [vmem:[#allocation26_spill] sm:$0xff] %v9736_v56  ;;  %v825_v47 = vsub.f32 %v9627_v10, %v794_v37  ;;  %v798_v2 = vrot.slane %v777_v35, %v9736_v56  ;;  %v826_v57 = vsub.f32 %v9629_v12, %v794_v37 }
 0x25b   :  { %8757 = vpow2.f32 %v859_v19  ;;  %v834_v37 = vsub.f32 %v9676_v60, %v9717_v5 }
 0x25c   :  { %8759 = vpow2.f32 %v841_v22  ;;  %v847_v55 = vmul.f32 1.442695, %v825_v47  ;;  %v849_v10 = vmul.f32 1.442695, %v826_v57  ;;  %v827_v49 = vsub.f32 %v9620_v6, %v798_v2 }
 0x25d   :  { %8761 = vpow2.f32 %v863_v28  ;;  %v828_v35 = vsub.f32 %v9622_v17, %v798_v2  ;;  %v830_v6 = vsub.f32 %v9648_v25, %v9700_v41  ;;  %v861_v17 = vmul.f32 1.442695, %v832_v24 }
 0x25e   :  { %8763 = vpow2.f32 %v843_v29  ;;  %v851_v12 = vmul.f32 1.442695, %v827_v49  ;;  %v865_v25 = vmul.f32 1.442695, %v834_v37 }
 0x25f   :  { %8765 = vpow2.f32 %v845_v1  ;;  %v853_v19 = vmul.f32 1.442695, %v828_v35  ;;  %v857_v22 = vmul.f32 1.442695, %v830_v6 }
 0x260   :  { %8767 = vpow2.f32 %v847_v55 }
 0x261   :  { %v9729_v0 = vpop.eup %8749  ;;  %8769 = vpow2.f32 %v849_v10 }
 0x262   :  { %v9731_v40 = vpop.eup %8751  ;;  %887 = vperm.xlu0 %8748, %v9729_v0   ;;  %8771 = vpow2.f32 %v851_v12 }
 0x263   :  { %884 = vperm.xlu1 %8747, %v9731_v40   ;;  %v9739_v50 = vpop.eup %8753  ;;  %8773 = vpow2.f32 %v853_v19 }
 0x264   :  { %v9741_v53 = vpop.eup %8755  ;;  %8775 = vpow2.f32 %v857_v22 }
 0x265   :  { %v9747_v4 = vpop.eup %8757  ;;  %8777 = vpow2.f32 %v861_v17 }
 0x266   :  { %914 = vperm.xlu0 %8748, %v9739_v50   ;;  %v9749_v16 = vpop.eup %8759  ;;  %8779 = vpow2.f32 %v865_v25 }
 0x267   :  { %890 = vperm.xlu1 %8747, %v9741_v53   ;;  %v9754_v63 = vpop.eup %8761 }
 0x268   :  { %v9756_v61 = vpop.eup %8763 }
 0x269   :  { %v9761_v18 = vpop.eup %8765 }
 0x26a   :  { %920 = vperm.xlu0 %8748, %v9747_v4   ;;  %v9766_v23 = vpop.eup %8767 }
 0x26b   :  { %893 = vperm.xlu1 %8747, %v9749_v16   ;;  %v9771_v28 = vpop.eup %8769 }
 0x26c   :  { %v9776_v29 = vpop.eup %8771 }
 0x26d   :  { %v9779_v41 = vpop.eup %8773 }
 0x26e   :  { %926 = vperm.xlu0 %8748, %v9754_v63   ;;  %v9782_v42 = vpop.eup %8775 }
 0x26f   :  { %896 = vperm.xlu1 %8747, %v9756_v61   ;;  %v9785_v46 = vpop.eup %8777 }
 0x270   :  { %v9788_v60 = vpop.eup %8779 }
 0x273   :  { %899 = vperm.xlu1 %8747, %v9761_v18  }
 0x277   :  { %902 = vperm.xlu1 %8747, %v9766_v23  }
 0x27b   :  { %905 = vperm.xlu1 %8747, %v9771_v28  }
 0x27f   :  { %908 = vperm.xlu1 %8747, %v9776_v29  }
 0x283   :  { %911 = vperm.xlu1 %8747, %v9779_v41  }
 0x287   :  { %917 = vperm.xlu1 %8747, %v9782_v42  }
 0x28b   :  { %923 = vperm.xlu1 %8747, %v9785_v46  }
 0x28f   :  { %929 = vperm.xlu1 %8747, %v9788_v60  }
 0x2e1   :  { %v888_v57 = vpop.permute.xlu0 %887 }
 0x2e2   :  { %v885_v5 = vpop.permute.xlu1 %884  ;;  %v938_v17 = vrot.slane %v888_v57, %v9625_v11 }
 0x2e3   :  { %v934_v37 = vrot.slane %v885_v5, %v9632_v13 }
 0x2e5   :  { %v915_v12 = vpop.permute.xlu0 %914  ;;  %v939_v5 = vsel %vm694_vm0, %v938_v17, %v934_v37 }
 0x2e6   :  { %v891_v36 = vpop.permute.xlu1 %890 }
 0x2e7   :  { %v943_v25 = vrot.slane %v891_v36, %v9632_v13  ;;  %v979_v36 = vrot.slane %v915_v12, %v9632_v13 }
 0x2e9   :  { %v921_v6 = vpop.permute.xlu0 %920 }
 0x2ea   :  { %v894_v1 = vpop.permute.xlu1 %893 }
 0x2eb   :  { %v947_v19 = vrot.slane %v894_v1, %v9625_v11 }
 0x2ed   :  { %v948_v58 = vsel %vm694_vm0, %v947_v19, %v943_v25 }
 0x2ee   :  { %v897_v47 = vpop.permute.xlu1 %896  ;;  %v1003_v19 = vsel %vm759_vm1, %v948_v58, %v939_v5 }
 0x2ef   :  { %v952_v54 = vrot.slane %v897_v47, %v9632_v13 }
 0x2f2   :  { %v900_v2 = vpop.permute.xlu1 %899 }
 0x2f3   :  { %v956_v22 = vrot.slane %v900_v2, %v9625_v11 }
 0x2f5   :  { %v957_v2 = vsel %vm694_vm0, %v956_v22, %v952_v54 }
 0x2f6   :  { %v903_v55 = vpop.permute.xlu1 %902  ;;  %v1004_v54 = vsel %vm761_vm2, %v957_v2, %v1003_v19  ;;  %v73_v2 = vld [vmem:[%s13175_s4 + $0x40] sm:$0xff] }
 0x2f7   :  { %v961_v1 = vrot.slane %v903_v55, %v9632_v13  ;;  %v927_v55 = vpop.permute.xlu0 %926 }
 0x2fa   :  { %v906_v10 = vpop.permute.xlu1 %905 }
 0x2fb   :  { %v965_v7 = vrot.slane %v906_v10, %v9625_v11 }
 0x2fd   :  { %v966_v10 = vsel %vm694_vm0, %v965_v7, %v961_v1  ;;  %v997_v7 = vrot.slane %v927_v55, %v9632_v13  ;;  %v68_v1 = vld [vmem:[%s13175_s4 + $0x18] sm:$0xff] }
 0x2fe   :  { %v909_v49 = vpop.permute.xlu1 %908  ;;  %v1005_v22 = vsel %vm763_vm3, %v966_v10, %v1004_v54  ;;  %v9832_v5 = vpack.c.bf16 %v73_v2, %v68_v1  ;;  %v72_v10 = vld [vmem:[%s13175_s4 + $0x38] sm:$0xff]  ;;  %v83_v54 = vld [vmem:[%s13175_s4 + $0x90] sm:$0xff]  ;;  %v89_v1 = vld [vmem:[%s13175_s4 + $0xc0] sm:$0xff] }
 0x2ff   :  { %v970_v57 = vrot.slane %v909_v49, %v9632_v13  ;;  %v94_v2 = vld [vmem:[%s13175_s4 + $0xe8] sm:$0xff] }
 0x300   :  { %13439 = vst [vmem:[#allocation27_spill] sm:$0xff] %v9832_v5  ;;  %7478 = vmatprep.subr.bf16.mxu1 %v9832_v5 }
 0x302   :  { %v912_v35 = vpop.permute.xlu1 %911 }
 0x303   :  { %v974_v52 = vrot.slane %v912_v35, %v9625_v11  ;;  %v988_v35 = vrot.slane %v921_v6, %v9632_v13  ;;  %v122_v13 = vld [vmem:[%s13175_s4 + $0x1c8] sm:$0xff] }
 0x306   :  { %v918_v24 = vpop.permute.xlu1 %917 }
 0x307   :  { %v983_v48 = vrot.slane %v918_v24, %v9625_v11  ;;  %v975_v24 = vsel %vm694_vm0, %v974_v52, %v970_v57  ;;  %v67_v57 = vld [vmem:[%s13175_s4 + $0x10] sm:$0xff] }
 0x308   :  { %v1006_v6 = vsel %vm765_vm4, %v975_v24, %v1005_v22  ;;  %v9844_v19 = vpack.c.bf16 %v72_v10, %v67_v57  ;;  %v78_v24 = vld [vmem:[%s13175_s4 + $0x68] sm:$0xff]  ;;  %v103_v10 = vld [vmem:[%s13175_s4 + $0x130] sm:$0xff] }
 0x309   :  { %v984_v49 = vsel %vm694_vm0, %v983_v48, %v979_v36  ;;  %v13192_v36 = vmov 0.0|0.0   ;;  %v9858_v22 = vpack.c.bf16 %v83_v54, %v78_v24  ;;  %v98_v57 = vld [vmem:[%s13175_s4 + $0x108] sm:$0xff]  ;;  %v97_v24 = vld [vmem:[%s13175_s4 + $0x100] sm:$0xff] }
 0x30a   :  { %v924_v45 = vpop.permute.xlu1 %923  ;;  %v1007_v58 = vsel %vm767_vm5, %v984_v49, %v1006_v6  ;;  %7509 = vmatprep.subr.bf16.mxu0 %v13192_v36  ;;  %v77_v49 = vld [vmem:[%s13175_s4 + $0x60] sm:$0xff]  ;;  %7480 = vmatpush1.bf16.msra.mxu1 %v9844_v19  ;;  %v9914_v54 = vpack.c.bf16 %v103_v10, %v98_v57  ;;  %v114_v10 = vld [vmem:[%s13175_s4 + $0x188] sm:$0xff] }
 0x30b   :  { %v992_v47 = vrot.slane %v924_v45, %v9625_v11  ;;  %7482 = vmatprep.subr.bf16.mxu1 %v9858_v22  ;;  %v109_v57 = vld [vmem:[%s13175_s4 + $0x160] sm:$0xff] }
 0x30d   :  { %v993_v12 = vsel %vm694_vm0, %v992_v47, %v988_v35  ;;  %v69_v47 = vld [vmem:[%s13175_s4 + $0x20] sm:$0xff]  ;;  %v74_v35 = vld [vmem:[%s13175_s4 + $0x48] sm:$0xff] }
 0x30e   :  { %v930_v17 = vpop.permute.xlu1 %929  ;;  %v1008_v52 = vsel %vm769_vm6, %v993_v12, %v1007_v58  ;;  %v9846_v55 = vpack.c.bf16 %v74_v35, %v69_v47  ;;  %v79_v12 = vld [vmem:[%s13175_s4 + $0x70] sm:$0xff]  ;;  %v88_v58 = vld [vmem:[%s13175_s4 + $0xb8] sm:$0xff]  ;;  %v9907_v35 = vpack.c.bf16 %v94_v2, %v89_v1 }
 0x30f   :  { %v1001_v45 = vrot.slane %v930_v17, %v9625_v11  ;;  %v82_v17 = vld [vmem:[%s13175_s4 + $0x88] sm:$0xff]  ;;  %v112_v2 = vld [vmem:[%s13175_s4 + $0x178] sm:$0xff]  ;;  %v13451_v11 = vmov 0.0|0.0  }
 0x310   :  { %13440 = vst [vmem:[#allocation28_spill] sm:$0xff] %v9846_v55  ;;  %7511 = vmatpush3.bf16.msra.mxu0 %v9846_v55  ;;  %13442 = vst [vmem:[#allocation30_spill] sm:$0xff] %v9907_v35 }
 0x311   :  { %v1002_v37 = vsel %vm694_vm0, %v1001_v45, %v997_v7  ;;  %v84_v7 = vld [vmem:[%s13175_s4 + $0x98] sm:$0xff]  ;;  %v9871_v45 = vpack.c.bf16 %v82_v17, %v77_v49  ;;  %7512 = vmatprep.subr.bf16.mxu0 %v13192_v36  ;;  %v102_v49 = vld [vmem:[%s13175_s4 + $0x128] sm:$0xff]  ;;  %v99_v17 = vld [vmem:[%s13175_s4 + $0x110] sm:$0xff] }
 0x312   :  { %v1009_v25 = vsel %vm771_vm7, %v1002_v37, %v1008_v52  ;;  %v9873_v6 = vpack.c.bf16 %v84_v7, %v79_v12  ;;  %v93_v37 = vld [vmem:[%s13175_s4 + $0xe0] sm:$0xff]  ;;  %v87_v52 = vld [vmem:[%s13175_s4 + $0xb0] sm:$0xff]  ;;  %v104_v12 = vld [vmem:[%s13175_s4 + $0x138] sm:$0xff] }
 0x313   :  { %v1011_v48 = vsel %vm774_vm8, %v1009_v25, 0.0  ;;  %v9886_v25 = vpack.c.bf16 %v93_v37, %v88_v58  ;;  %7484 = vmatpush1.bf16.msra.mxu1 %v9871_v45  ;;  %v108_v7 = vld [vmem:[%s13175_s4 + $0x158] sm:$0xff]  ;;  %v113_v58 = vld [vmem:[%s13175_s4 + $0x180] sm:$0xff]  ;;  %v9933_v37 = vpack.c.bf16 %v102_v49, %v97_v24  ;;  %v118_v24 = vld [vmem:[%s13175_s4 + $0x1a8] sm:$0xff] }
 0x314   :  { %1012 = vadd.xlane.f32.xlu0 %v1011_v48  ;;  %13441 = vst [vmem:[#allocation29_spill] sm:$0xff] %v9873_v6  ;;  %v92_v48 = vld [vmem:[%s13175_s4 + $0xd8] sm:$0xff]  ;;  %7514 = vmatpush3.bf16.msra.mxu0 %v9873_v6  ;;  %v9942_v1 = vpack.c.bf16 %v113_v58, %v108_v7  ;;  %v123_v49 = vld [vmem:[%s13175_s4 + $0x1d0] sm:$0xff]  ;;  %v117_v7 = vld [vmem:[%s13175_s4 + $0x1a0] sm:$0xff] }
 0x315   :  { %v9905_v47 = vpack.c.bf16 %v92_v48, %v87_v52  ;;  %7486 = vmatprep.subr.bf16.mxu1 %v9886_v25  ;;  %7515 = vmatprep.subr.bf16.mxu0 %v13192_v36  ;;  %13443 = vst [vmem:[#allocation31_spill] sm:$0xff] %v9933_v37  ;;  %v9935_v52 = vpack.c.bf16 %v104_v12, %v99_v17  ;;  %v107_v48 = vld [vmem:[%s13175_s4 + $0x150] sm:$0xff] }
 0x316   :  { %13445 = vst [vmem:[#allocation33_spill] sm:$0xff] %v9942_v1  ;;  %v9961_v17 = vpack.c.bf16 %v112_v2, %v107_v48  ;;  %v9963_v12 = vpack.c.bf16 %v114_v10, %v109_v57  ;;  %v9970_v58 = vpack.c.bf16 %v123_v49, %v118_v24  ;;  %v119_v48 = vld [vmem:[%s13175_s4 + $0x1b0] sm:$0xff]  ;;  %v124_v2 = vld [vmem:[%s13175_s4 + $0x1d8] sm:$0xff]  ;;  %v133_v10 = vld [vmem:[%s13175_s4 + $0x220] sm:$0xff]  ;;  %v9989_v24 = vpack.c.bf16 %v122_v13, %v117_v7 }
 0x317   :  { %7488 = vmatpush1.bf16.msra.mxu1 %v9905_v47  ;;  %13444 = vst [vmem:[#allocation32_spill] sm:$0xff] %v9935_v52  ;;  %v128_v57 = vld [vmem:[%s13175_s4 + $0x1f8] sm:$0xff]  ;;  %v9991_v49 = vpack.c.bf16 %v124_v2, %v119_v48  ;;  %v129_v13 = vld [vmem:[%s13175_s4 + $0x200] sm:$0xff]  ;;  %v134_v7 = vld [vmem:[%s13175_s4 + $0x228] sm:$0xff] }
 0x318   :  { %7517 = vmatpush3.bf16.msra.mxu0 %v9907_v35  ;;  %7490 = vmatprep.subr.bf16.mxu1 %v9914_v54  ;;  %13446 = vst [vmem:[#allocation34_spill] sm:$0xff] %v9961_v17  ;;  %13447 = vst [vmem:[#allocation35_spill] sm:$0xff] %v9963_v12  ;;  %v132_v35 = vld [vmem:[%s13175_s4 + $0x218] sm:$0xff]  ;;  %v10013_v2 = vpack.c.bf16 %v134_v7, %v129_v13 }
 0x319   :  { %7518 = vmatprep.subr.bf16.mxu0 %v13192_v36  ;;  %13448 = vst [vmem:[#allocation36_spill] sm:$0xff] %v9970_v58  ;;  %13449 = vst [vmem:[#allocation37_spill] sm:$0xff] %v9989_v24 }
 0x31a   :  { %13450 = vst [vmem:[#allocation38_spill] sm:$0xff] %v9991_v49  ;;  %13454 = vst [vmem:[#allocation41_spill] sm:$0xff] %v10013_v2 }
 0x31b   :  { %7492 = vmatpush1.bf16.msra.mxu1 %v9933_v37 }
 0x31c   :  { %7520 = vmatpush3.bf16.msra.mxu0 %v9935_v52  ;;  %7494 = vmatprep.subr.bf16.mxu1 %v9942_v1  ;;  %v9998_v52 = vpack.c.bf16 %v133_v10, %v128_v57 }
 0x31d   :  { %7521 = vmatprep.subr.bf16.mxu0 %v13192_v36  ;;  %v127_v36 = vld [vmem:[%s13175_s4 + $0x1f0] sm:$0xff] }
 0x31e   :  { %13452 = vst [vmem:[#allocation39_spill] sm:$0xff] %v9998_v52  ;;  %v10011_v48 = vpack.c.bf16 %v132_v35, %v127_v36 }
 0x31f   :  { %7496 = vmatpush1.bf16.msra.mxu1 %v9961_v17 }
 0x320   :  { %7523 = vmatpush3.bf16.msra.mxu0 %v9963_v12  ;;  %7498 = vmatprep.subr.bf16.mxu1 %v9970_v58  ;;  %13453 = vst [vmem:[#allocation40_spill] sm:$0xff] %v10011_v48 }
 0x321   :  { %7524 = vmatprep.subr.bf16.mxu0 %v13451_v11 }
 0x323   :  { %7500 = vmatpush1.bf16.msra.mxu1 %v9989_v24 }
 0x324   :  { %7526 = vmatpush3.bf16.msra.mxu0 %v9991_v49  ;;  %7502 = vmatprep.subr.bf16.mxu1 %v9998_v52 }
 0x325   :  { %7527 = vmatprep.subr.bf16.mxu0 %v13451_v11 }
 0x327   :  { %7504 = vmatpush1.bf16.msra.mxu1 %v10011_v48 }
 0x328   :  { %7529 = vmatpush3.bf16.msra.mxu0 %v10013_v2 }
 0x329   :  { %7530 = vmatprep.subr.bf16.mxu0 %v13451_v11 }
 0x3a1   :  { %v10020_v57 = vpop.xlane.xlu0 %1012 }
 0x3a2   :  { %v1034_v10 = vrot.slane %v10020_v57, %v9736_v56  ;;  %v1018_v36 = vrot.slane %v10020_v57, %v9523_v59  ;;  %v1046_v35 = vrot.slane %v10020_v57, %v9703_v43  ;;  %v1022_v13 = vrot.slane %v10020_v57, %v9689_v30  ;;  %v43_v59 = vld [vmem:[%s13172_s1 + $0x50] sm:$0xff] }
 0x3a3   :  { %v1026_v56 = vrot.slane %v10020_v57, %v9711_v51  ;;  %v13458_v51 = vmov 0.0  }
 0x3a4   :  { %8781 = vrcp.f32 %v1034_v10  ;;  %v138_v10 = vld [vmem:[%s13175_s4 + $0x248] sm:$0xff]  ;;  %7267 = vmatprep.mubr.msk.f32.mxu0 %vm9317_vm9, %v13458_v51 }
 0x3a5   :  { %8783 = vrcp.f32 %v1018_v36  ;;  %v143_v36 = vld [vmem:[%s13175_s4 + $0x270] sm:$0xff] }
 0x3a6   :  { %8785 = vrcp.f32 %v1046_v35 }
 0x3a7   :  { %8787 = vrcp.f32 %v1022_v13  ;;  %v10050_v13 = vpack.c.bf16 %v143_v36, %v138_v10  ;;  %v1030_v10 = vrot.slane %v10020_v57, %v9724_v62 }
 0x3a8   :  { %8789 = vrcp.f32 %v1026_v56 }
 0x3a9   :  { %13455 = vst [vmem:[#allocation42_spill] sm:$0xff] %v10050_v13  ;;  %7506 = vmatprep.subr.bf16.mxu1 %v10050_v13  ;;  %8791 = vrcp.f32 %v1030_v10 }
 0x3ae   :  { %v10030_v7 = vpop.eup %8781 }
 0x3af   :  { %v8784_v2 = vpop.eup %8783  ;;  %v1068_v49 = vmul.f32 %v10030_v7, %v9776_v29  ;;  %v137_v29 = vld [vmem:[%s13175_s4 + $0x240] sm:$0xff] }
 0x3b0   :  { %v10036_v12 = vpop.eup %8785  ;;  %v1056_v43 = vmul.f32 %v8784_v2, %v9731_v40  ;;  %v139_v40 = vld [vmem:[%s13175_s4 + $0x250] sm:$0xff]  ;;  %v1057_v6 = vmul.f32 %v8784_v2, %v9729_v0 }
 0x3b1   :  { %1121 = vperm.xlu0 %8748, %v1068_v49   ;;  %v1077_v35 = vmul.f32 %v10036_v12, %v9754_v63  ;;  %v144_v49 = vld [vmem:[%s13175_s4 + $0x278] sm:$0xff]  ;;  %v8788_v56 = vpop.eup %8787 }
 0x3b2   :  { %1081 = vperm.xlu1 %8747, %v1056_v43   ;;  %v142_v43 = vld [vmem:[%s13175_s4 + $0x268] sm:$0xff]  ;;  %v10064_v63 = vpack.c.bf16 %v144_v49, %v139_v40  ;;  %v1059_v36 = vmul.f32 %v8788_v56, %v9741_v53  ;;  %v1060_v0 = vmul.f32 %v8788_v56, %v9749_v16  ;;  %v8790_v2 = vpop.eup %8789  ;;  %v149_v53 = vld [vmem:[%s13177_s6 + $0x18] sm:$0xff]  ;;  %v150_v40 = vld [vmem:[%s13177_s6 + $0x20] sm:$0xff]  ;;  %v1038_v49 = vrot.slane %v10020_v57, %v9692_v31  ;;  %s7122_s4 = sld [smem:[#allocation3 + $0x4]] }
 0x3b3   :  { %v10062_v55 = vpack.c.bf16 %v142_v43, %v137_v29  ;;  %v1062_v29 = vmul.f32 %v8790_v2, %v9756_v61  ;;  %v153_v16 = vld [vmem:[%s13177_s6 + $0x38] sm:$0xff]  ;;  %v146_v61 = vld [vmem:[%s13177_s6] sm:$0xff]  ;;  %v163_v31 = vld [vmem:[%s13177_s6 + $0x88] sm:$0xff] }
 0x3b4   :  { %13457 = vst [vmem:[#allocation44_spill] sm:$0xff] %v10064_v63  ;;  %7532 = vmatpush3.bf16.msra.mxu0 %v10064_v63  ;;  %v10097_v56 = vpack.c.bf16 %v153_v16, %v149_v53  ;;  %v10099_v10 = vpack.c.bf16 %v150_v40, %v146_v61  ;;  %v159_v53 = vld [vmem:[%s13177_s6 + $0x68] sm:$0xff]  ;;  %v8792_v16 = vpop.eup %8791  ;;  %v161_v61 = vld [vmem:[%s13177_s6 + $0x78] sm:$0xff]  ;;  %v154_v40 = vld [vmem:[%s13177_s6 + $0x40] sm:$0xff]  ;;  %8793 = vrcp.f32 %v1038_v49 }
 0x3b5   :  { %13456 = vst [vmem:[#allocation43_spill] sm:$0xff] %v10062_v55  ;;  %1151 = vperm.xlu0 %8748, %v1077_v35   ;;  %7508 = vmatpush1.bf16.msra.mxu1 %v10062_v55  ;;  %v151_v35 = vld [vmem:[%s13177_s6 + $0x28] sm:$0xff] }
 0x3b6   :  { %1086 = vperm.xlu1 %8747, %v1057_v6   ;;  %v147_v6 = vld [vmem:[%s13177_s6 + $0x8] sm:$0xff]  ;;  %13460 = vst [vmem:[#allocation46_spill] sm:$0xff] %v10097_v56  ;;  %13461 = vst [vmem:[#allocation47_spill] sm:$0xff] %v10099_v10  ;;  %7598 = vmatprep.subr.bf16.mxu0 %v10097_v56  ;;  %v1066_v56 = vmul.f32 %v8792_v16, %v9771_v28 }
 0x3b7   :  { %v10084_v43 = vpack.c.bf16 %v151_v35, %v147_v6  ;;  %v155_v35 = vld [vmem:[%s13177_s6 + $0x48] sm:$0xff]  ;;  %7268 = vmatmul.mubr.f32.vlgmr.msra.gmra.mrb[2].mxu0 %v13458_v51 }
 0x3b8   :  { %415 = vmatmul.mubr.f32.vlgmr.msra.gmra.mrb[0].mxu1 %v13458_v51  ;;  %v167_v49 = vld [vmem:[%s13177_s6 + $0xa8] sm:$0xff] }
 0x3b9   :  { %13459 = vst [vmem:[#allocation45_spill] sm:$0xff] %v10084_v43  ;;  %7534 = vmatprep.subr.bf16.mxu1 %v10084_v43 }
 0x3ba   :  { %1091 = vperm.xlu1 %8747, %v1059_v36   ;;  %v148_v36 = vld [vmem:[%s13177_s6 + $0x10] sm:$0xff]  ;;  %7536 = vmatpush1.bf16.msra.mxu1 %v10099_v10 }
 0x3be   :  { %1096 = vperm.xlu1 %8747, %v1060_v0   ;;  %v152_v0 = vld [vmem:[%s13177_s6 + $0x30] sm:$0xff] }
 0x3bf   :  { %v10111_v6 = vpack.c.bf16 %v152_v0, %v148_v36  ;;  %v158_v0 = vld [vmem:[%s13177_s6 + $0x60] sm:$0xff] }
 0x3c1   :  { %13462 = vst [vmem:[#allocation48_spill] sm:$0xff] %v10111_v6  ;;  %7600 = vmatpush1.bf16.msra.mxu0 %v10111_v6  ;;  %v165_v6 = vld [vmem:[%s13177_s6 + $0x98] sm:$0xff] }
 0x3c2   :  { %1101 = vperm.xlu1 %8747, %v1062_v29   ;;  %v1063_v29 = vmul.f32 %v8790_v2, %v9761_v18  ;;  %v10121_v18 = vpack.c.bf16 %v159_v53, %v155_v35  ;;  %v157_v2 = vld [vmem:[%s13177_s6 + $0x58] sm:$0xff]  ;;  %v156_v35 = vld [vmem:[%s13177_s6 + $0x50] sm:$0xff] }
 0x3c3   :  { %v10133_v36 = vpack.c.bf16 %v161_v61, %v157_v2  ;;  %v160_v53 = vld [vmem:[%s13177_s6 + $0x70] sm:$0xff]  ;;  %v1065_v61 = vmul.f32 %v8792_v16, %v9766_v23  ;;  %v169_v23 = vld [vmem:[%s13177_s6 + $0xb8] sm:$0xff] }
 0x3c4   :  { %13463 = vst [vmem:[#allocation49_spill] sm:$0xff] %v10121_v18  ;;  %7538 = vmatprep.subr.bf16.mxu1 %v10121_v18  ;;  %v10148_v2 = vpack.c.bf16 %v160_v53, %v156_v35  ;;  %v166_v35 = vld [vmem:[%s13177_s6 + $0xa0] sm:$0xff]  ;;  %v1042_v53 = vrot.slane %v10020_v57, %v9695_v34  ;;  %v171_v57 = vld [vmem:[%s13177_s6 + $0xc8] sm:$0xff]  ;;  %v177_v16 = vld [vmem:[%s13177_s6 + $0xf8] sm:$0xff] }
 0x3c5   :  { %13464 = vst [vmem:[#allocation50_spill] sm:$0xff] %v10133_v36  ;;  %7602 = vmatprep.subr.bf16.mxu0 %v10133_v36  ;;  %v168_v36 = vld [vmem:[%s13177_s6 + $0xb0] sm:$0xff]  ;;  %v183_v34 = vld [vmem:[%s13177_s6 + $0x128] sm:$0xff] }
 0x3c6   :  { %1106 = vperm.xlu1 %8747, %v1063_v29   ;;  %v10146_v29 = vpack.c.bf16 %v158_v0, %v154_v40  ;;  %13466 = vst [vmem:[#allocation52_spill] sm:$0xff] %v10148_v2  ;;  %v10162_v40 = vpack.c.bf16 %v167_v49, %v163_v31  ;;  %v162_v0 = vld [vmem:[%s13177_s6 + $0x80] sm:$0xff]  ;;  %7604 = vmatpush1.bf16.msra.mxu0 %v10148_v2  ;;  %v164_v49 = vld [vmem:[%s13177_s6 + $0x90] sm:$0xff]  ;;  %8795 = vrcp.f32 %v1042_v53 }
 0x3c7   :  { %v10178_v31 = vpack.c.bf16 %v166_v35, %v162_v0  ;;  %v10188_v63 = vpack.c.bf16 %v168_v36, %v164_v49  ;;  %v170_v36 = vld [vmem:[%s13177_s6 + $0xc0] sm:$0xff]  ;;  %v172_v35 = vld [vmem:[%s13177_s6 + $0xd0] sm:$0xff] }
 0x3c8   :  { %13465 = vst [vmem:[#allocation51_spill] sm:$0xff] %v10146_v29  ;;  %7540 = vmatpush1.bf16.msra.mxu1 %v10146_v29  ;;  %13467 = vst [vmem:[#allocation53_spill] sm:$0xff] %v10162_v40  ;;  %v176_v49 = vld [vmem:[%s13177_s6 + $0xf0] sm:$0xff] }
 0x3c9   :  { %13469 = vst [vmem:[#allocation55_spill] sm:$0xff] %v10178_v31  ;;  %7542 = vmatprep.subr.bf16.mxu1 %v10162_v40  ;;  %13470 = vst [vmem:[#allocation56_spill] sm:$0xff] %v10188_v63 }
 0x3ca   :  { %1111 = vperm.xlu1 %8747, %v1065_v61   ;;  %v10176_v61 = vpack.c.bf16 %v169_v23, %v165_v6  ;;  %v175_v6 = vld [vmem:[%s13177_s6 + $0xe8] sm:$0xff]  ;;  %v173_v23 = vld [vmem:[%s13177_s6 + $0xd8] sm:$0xff] }
 0x3cb   :  { %v10201_v28 = vpack.c.bf16 %v175_v6, %v171_v57  ;;  %v10210_v0 = vpack.c.bf16 %v177_v16, %v173_v23  ;;  %v1069_v57 = vmul.f32 %v10030_v7, %v9779_v41  ;;  %v10226_v6 = vpack.c.bf16 %v176_v49, %v172_v35  ;;  %v8794_v23 = vpop.eup %8793  ;;  %v179_v16 = vld [vmem:[%s13177_s6 + $0x108] sm:$0xff]  ;;  %v181_v41 = vld [vmem:[%s13177_s6 + $0x118] sm:$0xff]  ;;  %v182_v35 = vld [vmem:[%s13177_s6 + $0x120] sm:$0xff] }
 0x3cc   :  { %13468 = vst [vmem:[#allocation54_spill] sm:$0xff] %v10176_v61  ;;  %7606 = vmatprep.subr.bf16.mxu0 %v10176_v61  ;;  %7544 = vmatpush1.bf16.msra.mxu1 %v10178_v31  ;;  %v10239_v7 = vpack.c.bf16 %v183_v34, %v179_v16  ;;  %v180_v34 = vld [vmem:[%s13177_s6 + $0x110] sm:$0xff]  ;;  %v199_v61 = vld [vmem:[%s13177_s6 + $0x1a8] sm:$0xff] }
 0x3cd   :  { %13471 = vst [vmem:[#allocation57_spill] sm:$0xff] %v10201_v28  ;;  %7608 = vmatpush1.bf16.msra.mxu0 %v10188_v63  ;;  %13472 = vst [vmem:[#allocation58_spill] sm:$0xff] %v10210_v0  ;;  %7546 = vmatprep.subr.bf16.mxu1 %v10201_v28  ;;  %v184_v16 = vld [vmem:[%s13177_s6 + $0x130] sm:$0xff] }
 0x3ce   :  { %1116 = vperm.xlu1 %8747, %v1066_v56   ;;  %v174_v56 = vld [vmem:[%s13177_s6 + $0xe0] sm:$0xff]  ;;  %13474 = vst [vmem:[#allocation60_spill] sm:$0xff] %v10226_v6  ;;  %7610 = vmatprep.subr.bf16.mxu0 %v10210_v0  ;;  %13475 = vst [vmem:[#allocation61_spill] sm:$0xff] %v10239_v7  ;;  %v1071_v0 = vmul.f32 %v8794_v23, %v9739_v50  ;;  %v10263_v63 = vpack.c.bf16 %v184_v16, %v180_v34 }
 0x3cf   :  { %v10224_v53 = vpack.c.bf16 %v174_v56, %v170_v36  ;;  %v185_v36 = vld [vmem:[%s13177_s6 + $0x138] sm:$0xff]  ;;  %v178_v56 = vld [vmem:[%s13177_s6 + $0x100] sm:$0xff] }
 0x3d0   :  { %v10251_v49 = vpack.c.bf16 %v185_v36, %v181_v41  ;;  %13478 = vst [vmem:[#allocation64_spill] sm:$0xff] %v10263_v63  ;;  %v187_v41 = vld [vmem:[%s13177_s6 + $0x148] sm:$0xff]  ;;  %v186_v34 = vld [vmem:[%s13177_s6 + $0x140] sm:$0xff] }
 0x3d1   :  { %13473 = vst [vmem:[#allocation59_spill] sm:$0xff] %v10224_v53  ;;  %7548 = vmatpush1.bf16.msra.mxu1 %v10224_v53  ;;  %7612 = vmatpush1.bf16.msra.mxu0 %v10226_v6  ;;  %v191_v36 = vld [vmem:[%s13177_s6 + $0x168] sm:$0xff] }
 0x3d2   :  { %1126 = vperm.xlu1 %8747, %v1069_v57   ;;  %13476 = vst [vmem:[#allocation62_spill] sm:$0xff] %v10251_v49  ;;  %v10253_v57 = vpack.c.bf16 %v182_v35, %v178_v56  ;;  %7550 = vmatprep.subr.bf16.mxu1 %v10239_v7  ;;  %v189_v56 = vld [vmem:[%s13177_s6 + $0x158] sm:$0xff]  ;;  %v10276_v50 = vpack.c.bf16 %v191_v36, %v187_v41  ;;  %v188_v41 = vld [vmem:[%s13177_s6 + $0x150] sm:$0xff] }
 0x3d3   :  { %7614 = vmatprep.subr.bf16.mxu0 %v10251_v49  ;;  %v193_v35 = vld [vmem:[%s13177_s6 + $0x178] sm:$0xff]  ;;  %v192_v36 = vld [vmem:[%s13177_s6 + $0x170] sm:$0xff]  ;;  %v1072_v49 = vmul.f32 %v8794_v23, %v9782_v42 }
 0x3d4   :  { %13477 = vst [vmem:[#allocation63_spill] sm:$0xff] %v10253_v57  ;;  %13479 = vst [vmem:[#allocation65_spill] sm:$0xff] %v10276_v50  ;;  %v10285_v16 = vpack.c.bf16 %v193_v35, %v189_v56  ;;  %v10300_v56 = vpack.c.bf16 %v192_v36, %v188_v41  ;;  %v8796_v35 = vpop.eup %8795  ;;  %v197_v42 = vld [vmem:[%s13177_s6 + $0x198] sm:$0xff]  ;;  %v198_v41 = vld [vmem:[%s13177_s6 + $0x1a0] sm:$0xff] }
 0x3d5   :  { %7552 = vmatpush1.bf16.msra.mxu1 %v10253_v57  ;;  %7616 = vmatpush1.bf16.msra.mxu0 %v10263_v63  ;;  %v195_v63 = vld [vmem:[%s13177_s6 + $0x188] sm:$0xff] }
 0x3d6   :  { %1131 = vperm.xlu1 %8747, %v1071_v0   ;;  %13480 = vst [vmem:[#allocation66_spill] sm:$0xff] %v10285_v16  ;;  %v190_v0 = vld [vmem:[%s13177_s6 + $0x160] sm:$0xff]  ;;  %7554 = vmatprep.subr.bf16.mxu1 %v10276_v50  ;;  %13482 = vst [vmem:[#allocation68_spill] sm:$0xff] %v10300_v56  ;;  %v10313_v23 = vpack.c.bf16 %v199_v61, %v195_v63  ;;  %v196_v63 = vld [vmem:[%s13177_s6 + $0x190] sm:$0xff] }
 0x3d7   :  { %v10298_v6 = vpack.c.bf16 %v190_v0, %v186_v34  ;;  %7618 = vmatprep.subr.bf16.mxu0 %v10285_v16  ;;  %v201_v34 = vld [vmem:[%s13177_s6 + $0x1b8] sm:$0xff]  ;;  %v194_v0 = vld [vmem:[%s13177_s6 + $0x180] sm:$0xff]  ;;  %v200_v61 = vld [vmem:[%s13177_s6 + $0x1b0] sm:$0xff]  ;;  %v1074_v16 = vmul.f32 %v8796_v35, %v9747_v4 }
 0x3d8   :  { %13483 = vst [vmem:[#allocation69_spill] sm:$0xff] %v10313_v23  ;;  %v10325_v36 = vpack.c.bf16 %v201_v34, %v197_v42  ;;  %v10337_v2 = vpack.c.bf16 %v200_v61, %v196_v63  ;;  %v203_v42 = vld [vmem:[%s13177_s6 + $0x1c8] sm:$0xff]  ;;  %v202_v63 = vld [vmem:[%s13177_s6 + $0x1c0] sm:$0xff] }
 0x3d9   :  { %13481 = vst [vmem:[#allocation67_spill] sm:$0xff] %v10298_v6  ;;  %7556 = vmatpush1.bf16.msra.mxu1 %v10298_v6  ;;  %7620 = vmatpush1.bf16.msra.mxu0 %v10300_v56  ;;  %v207_v34 = vld [vmem:[%s13177_s6 + $0x1e8] sm:$0xff]  ;;  %v206_v61 = vld [vmem:[%s13177_s6 + $0x1e0] sm:$0xff]  ;;  %v1075_v56 = vmul.f32 %v8796_v35, %v9785_v46  ;;  %v213_v46 = vld [vmem:[%s13177_s6 + $0x218] sm:$0xff] }
 0x3da   :  { %1136 = vperm.xlu1 %8747, %v1072_v49   ;;  %13484 = vst [vmem:[#allocation70_spill] sm:$0xff] %v10325_v36  ;;  %v10327_v49 = vpack.c.bf16 %v198_v41, %v194_v0  ;;  %7558 = vmatprep.subr.bf16.mxu1 %v10313_v23  ;;  %13486 = vst [vmem:[#allocation72_spill] sm:$0xff] %v10337_v2  ;;  %v205_v0 = vld [vmem:[%s13177_s6 + $0x1d8] sm:$0xff]  ;;  %v10350_v4 = vpack.c.bf16 %v207_v34, %v203_v42  ;;  %v204_v42 = vld [vmem:[%s13177_s6 + $0x1d0] sm:$0xff] }
 0x3db   :  { %7622 = vmatprep.subr.bf16.mxu0 %v10325_v36  ;;  %v209_v41 = vld [vmem:[%s13177_s6 + $0x1f8] sm:$0xff]  ;;  %v208_v34 = vld [vmem:[%s13177_s6 + $0x1f0] sm:$0xff] }
 0x3dc   :  { %13485 = vst [vmem:[#allocation71_spill] sm:$0xff] %v10327_v49  ;;  %13487 = vst [vmem:[#allocation73_spill] sm:$0xff] %v10350_v4  ;;  %v10362_v36 = vpack.c.bf16 %v209_v41, %v205_v0  ;;  %v211_v0 = vld [vmem:[%s13177_s6 + $0x208] sm:$0xff]  ;;  %v217_v35 = vld [vmem:[%s13177_s6 + $0x238] sm:$0xff] }
 0x3dd   :  { %7560 = vmatpush1.bf16.msra.mxu1 %v10327_v49  ;;  %7624 = vmatpush1.bf16.msra.mxu0 %v10337_v2  ;;  %v10374_v49 = vpack.c.bf16 %v208_v34, %v204_v42  ;;  %v215_v41 = vld [vmem:[%s13177_s6 + $0x228] sm:$0xff]  ;;  %v10395_v42 = vpack.c.bf16 %v217_v35, %v213_v46  ;;  %v214_v34 = vld [vmem:[%s13177_s6 + $0x220] sm:$0xff]  ;;  %v1078_v35 = vmul.f32 %v10036_v12, %v9788_v60  ;;  %v225_v60 = vld [vmem:[%s13177_s6 + $0x278] sm:$0xff] }
 0x3de   :  { %1141 = vperm.xlu1 %8747, %v1074_v16   ;;  %13488 = vst [vmem:[#allocation74_spill] sm:$0xff] %v10362_v36  ;;  %v10364_v16 = vpack.c.bf16 %v206_v61, %v202_v63  ;;  %7562 = vmatprep.subr.bf16.mxu1 %v10350_v4  ;;  %v10383_v63 = vpack.c.bf16 %v215_v41, %v211_v0  ;;  %v210_v61 = vld [vmem:[%s13177_s6 + $0x200] sm:$0xff]  ;;  %v212_v0 = vld [vmem:[%s13177_s6 + $0x210] sm:$0xff]  ;;  %v223_v2 = vld [vmem:[%s13177_s6 + $0x268] sm:$0xff] }
 0x3df   :  { %13490 = vst [vmem:[#allocation76_spill] sm:$0xff] %v10374_v49  ;;  %7626 = vmatprep.subr.bf16.mxu0 %v10362_v36  ;;  %13492 = vst [vmem:[#allocation78_spill] sm:$0xff] %v10395_v42  ;;  %v216_v41 = vld [vmem:[%s13177_s6 + $0x230] sm:$0xff]  ;;  %v219_v36 = vld [vmem:[%s13177_s6 + $0x248] sm:$0xff] }
 0x3e0   :  { %13489 = vst [vmem:[#allocation75_spill] sm:$0xff] %v10364_v16  ;;  %13491 = vst [vmem:[#allocation77_spill] sm:$0xff] %v10383_v63  ;;  %v10410_v46 = vpack.c.bf16 %v216_v41, %v212_v0  ;;  %v218_v12 = vld [vmem:[%s13177_s6 + $0x240] sm:$0xff]  ;;  %v39_v23 = vld [vmem:[%s13172_s1 + $0x30] sm:$0xff] }
 0x3e1   :  { %7564 = vmatpush1.bf16.msra.mxu1 %v10364_v16  ;;  %7628 = vmatpush1.bf16.msra.mxu0 %v10374_v49  ;;  %v222_v0 = vld [vmem:[%s13177_s6 + $0x260] sm:$0xff] }
 0x3e2   :  { %1146 = vperm.xlu1 %8747, %v1075_v56   ;;  %7566 = vmatprep.subr.bf16.mxu1 %v10383_v63  ;;  %v10408_v56 = vpack.c.bf16 %v214_v34, %v210_v61  ;;  %13494 = vst [vmem:[#allocation80_spill] sm:$0xff] %v10410_v46  ;;  %v221_v61 = vld [vmem:[%s13177_s6 + $0x258] sm:$0xff]  ;;  %v10425_v34 = vpack.c.bf16 %v223_v2, %v219_v36  ;;  %v220_v2 = vld [vmem:[%s13177_s6 + $0x250] sm:$0xff]  ;;  %v266_v4 = vld [vmem:[%s13177_s6 + $0x3c0] sm:$0xff] }
 0x3e3   :  { %7630 = vmatprep.subr.bf16.mxu0 %v10395_v42  ;;  %v10437_v41 = vpack.c.bf16 %v225_v60, %v221_v61  ;;  %v224_v36 = vld [vmem:[%s13177_s6 + $0x270] sm:$0xff]  ;;  %v231_v61 = vld [vmem:[%s13177_s6 + $0x2a8] sm:$0xff] }
 0x3e4   :  { %13493 = vst [vmem:[#allocation79_spill] sm:$0xff] %v10408_v56  ;;  %13495 = vst [vmem:[#allocation81_spill] sm:$0xff] %v10425_v34  ;;  %v10448_v42 = vpack.c.bf16 %v224_v36, %v220_v2  ;;  %v226_v2 = vld [vmem:[%s13177_s6 + $0x280] sm:$0xff] }
 0x3e5   :  { %7568 = vmatpush1.bf16.msra.mxu1 %v10408_v56  ;;  %7632 = vmatpush1.bf16.msra.mxu0 %v10410_v46  ;;  %13496 = vst [vmem:[#allocation82_spill] sm:$0xff] %v10437_v41  ;;  %v227_v46 = vld [vmem:[%s13177_s6 + $0x288] sm:$0xff] }
 0x3e6   :  { %1156 = vperm.xlu1 %8747, %v1078_v35   ;;  %v10439_v35 = vpack.c.bf16 %v222_v0, %v218_v12  ;;  %7570 = vmatprep.subr.bf16.mxu1 %v10425_v34  ;;  %13498 = vst [vmem:[#allocation84_spill] sm:$0xff] %v10448_v42  ;;  %v10457_v60 = vpack.c.bf16 %v231_v61, %v227_v46  ;;  %v229_v12 = vld [vmem:[%s13177_s6 + $0x298] sm:$0xff]  ;;  %v230_v46 = vld [vmem:[%s13177_s6 + $0x2a0] sm:$0xff]  ;;  %v228_v61 = vld [vmem:[%s13177_s6 + $0x290] sm:$0xff] }
 0x3e7   :  { %7634 = vmatprep.subr.bf16.mxu0 %v10437_v41  ;;  %v233_v0 = vld [vmem:[%s13177_s6 + $0x2b8] sm:$0xff]  ;;  %v232_v41 = vld [vmem:[%s13177_s6 + $0x2b0] sm:$0xff]  ;;  %v10482_v49 = vpack.c.bf16 %v230_v46, %v226_v2  ;;  %v234_v46 = vld [vmem:[%s13177_s6 + $0x2c0] sm:$0xff] }
 0x3e8   :  { %13497 = vst [vmem:[#allocation83_spill] sm:$0xff] %v10439_v35  ;;  %13499 = vst [vmem:[#allocation85_spill] sm:$0xff] %v10457_v60  ;;  %v10469_v36 = vpack.c.bf16 %v233_v0, %v229_v12  ;;  %v10484_v12 = vpack.c.bf16 %v232_v41, %v228_v61  ;;  %v235_v0 = vld [vmem:[%s13177_s6 + $0x2c8] sm:$0xff]  ;;  %v241_v41 = vld [vmem:[%s13177_s6 + $0x2f8] sm:$0xff] }
 0x3e9   :  { %7572 = vmatpush1.bf16.msra.mxu1 %v10439_v35  ;;  %7636 = vmatpush1.bf16.msra.mxu0 %v10448_v42  ;;  %13501 = vst [vmem:[#allocation87_spill] sm:$0xff] %v10482_v49  ;;  %v239_v35 = vld [vmem:[%s13177_s6 + $0x2e8] sm:$0xff]  ;;  %v237_v42 = vld [vmem:[%s13177_s6 + $0x2d8] sm:$0xff]  ;;  %v238_v61 = vld [vmem:[%s13177_s6 + $0x2e0] sm:$0xff] }
 0x3ea   :  { %13500 = vst [vmem:[#allocation86_spill] sm:$0xff] %v10469_v36  ;;  %7574 = vmatprep.subr.bf16.mxu1 %v10457_v60  ;;  %13502 = vst [vmem:[#allocation88_spill] sm:$0xff] %v10484_v12  ;;  %7638 = vmatprep.subr.bf16.mxu0 %v10469_v36  ;;  %v10497_v2 = vpack.c.bf16 %v239_v35, %v235_v0  ;;  %v10509_v36 = vpack.c.bf16 %v241_v41, %v237_v42  ;;  %v236_v35 = vld [vmem:[%s13177_s6 + $0x2d0] sm:$0xff]  ;;  %v243_v42 = vld [vmem:[%s13177_s6 + $0x308] sm:$0xff] }
 0x3eb   :  { %v10511_v60 = vpack.c.bf16 %v238_v61, %v234_v46  ;;  %v240_v0 = vld [vmem:[%s13177_s6 + $0x2f0] sm:$0xff]  ;;  %v247_v41 = vld [vmem:[%s13177_s6 + $0x328] sm:$0xff]  ;;  %v245_v46 = vld [vmem:[%s13177_s6 + $0x318] sm:$0xff] }
 0x3ec   :  { %13503 = vst [vmem:[#allocation89_spill] sm:$0xff] %v10497_v2  ;;  %13504 = vst [vmem:[#allocation90_spill] sm:$0xff] %v10509_v36  ;;  %v10533_v61 = vpack.c.bf16 %v247_v41, %v243_v42  ;;  %v244_v42 = vld [vmem:[%s13177_s6 + $0x310] sm:$0xff] }
 0x3ed   :  { %7576 = vmatpush1.bf16.msra.mxu1 %v10482_v49  ;;  %7640 = vmatpush1.bf16.msra.mxu0 %v10484_v12  ;;  %13505 = vst [vmem:[#allocation91_spill] sm:$0xff] %v10511_v60  ;;  %v10520_v49 = vpack.c.bf16 %v240_v0, %v236_v35  ;;  %v249_v35 = vld [vmem:[%s13177_s6 + $0x338] sm:$0xff]  ;;  %v242_v0 = vld [vmem:[%s13177_s6 + $0x300] sm:$0xff]  ;;  %v248_v41 = vld [vmem:[%s13177_s6 + $0x330] sm:$0xff] }
 0x3ee   :  { %7578 = vmatprep.subr.bf16.mxu1 %v10497_v2  ;;  %7642 = vmatprep.subr.bf16.mxu0 %v10509_v36  ;;  %13507 = vst [vmem:[#allocation93_spill] sm:$0xff] %v10533_v61  ;;  %v246_v36 = vld [vmem:[%s13177_s6 + $0x320] sm:$0xff]  ;;  %v10545_v12 = vpack.c.bf16 %v249_v35, %v245_v46  ;;  %v10559_v34 = vpack.c.bf16 %v248_v41, %v244_v42  ;;  %v253_v46 = vld [vmem:[%s13177_s6 + $0x358] sm:$0xff] }
 0x3ef   :  { %13506 = vst [vmem:[#allocation92_spill] sm:$0xff] %v10520_v49  ;;  %v10547_v2 = vpack.c.bf16 %v246_v36, %v242_v0  ;;  %v255_v36 = vld [vmem:[%s13177_s6 + $0x368] sm:$0xff]  ;;  %v257_v35 = vld [vmem:[%s13177_s6 + $0x378] sm:$0xff]  ;;  %v250_v42 = vld [vmem:[%s13177_s6 + $0x340] sm:$0xff] }
 0x3f0   :  { %13508 = vst [vmem:[#allocation94_spill] sm:$0xff] %v10545_v12  ;;  %13510 = vst [vmem:[#allocation96_spill] sm:$0xff] %v10559_v34  ;;  %v254_v41 = vld [vmem:[%s13177_s6 + $0x360] sm:$0xff] }
 0x3f1   :  { %7580 = vmatpush1.bf16.msra.mxu1 %v10511_v60  ;;  %7644 = vmatpush1.bf16.msra.mxu0 %v10520_v49  ;;  %13509 = vst [vmem:[#allocation95_spill] sm:$0xff] %v10547_v2  ;;  %v251_v60 = vld [vmem:[%s13177_s6 + $0x348] sm:$0xff]  ;;  %v10573_v49 = vpack.c.bf16 %v257_v35, %v253_v46  ;;  %v10585_v56 = vpack.c.bf16 %v254_v41, %v250_v42  ;;  %v261_v41 = vld [vmem:[%s13177_s6 + $0x398] sm:$0xff] }
 0x3f2   :  { %7582 = vmatprep.subr.bf16.mxu1 %v10533_v61  ;;  %7646 = vmatprep.subr.bf16.mxu0 %v10545_v12  ;;  %v10571_v0 = vpack.c.bf16 %v255_v36, %v251_v60  ;;  %v252_v61 = vld [vmem:[%s13177_s6 + $0x350] sm:$0xff]  ;;  %v259_v36 = vld [vmem:[%s13177_s6 + $0x388] sm:$0xff]  ;;  %v265_v12 = vld [vmem:[%s13177_s6 + $0x3b8] sm:$0xff] }
 0x3f3   :  { %13512 = vst [vmem:[#allocation98_spill] sm:$0xff] %v10573_v49  ;;  %13513 = vst [vmem:[#allocation99_spill] sm:$0xff] %v10585_v56  ;;  %v256_v60 = vld [vmem:[%s13177_s6 + $0x370] sm:$0xff]  ;;  %v263_v46 = vld [vmem:[%s13177_s6 + $0x3a8] sm:$0xff] }
 0x3f4   :  { %13511 = vst [vmem:[#allocation97_spill] sm:$0xff] %v10571_v0  ;;  %v10598_v35 = vpack.c.bf16 %v256_v60, %v252_v61  ;;  %v10600_v42 = vpack.c.bf16 %v263_v46, %v259_v36  ;;  %v262_v61 = vld [vmem:[%s13177_s6 + $0x3a0] sm:$0xff]  ;;  %v260_v60 = vld [vmem:[%s13177_s6 + $0x390] sm:$0xff]  ;;  %v267_v46 = vld [vmem:[%s13177_s6 + $0x3c8] sm:$0xff] }
 0x3f5   :  { %7584 = vmatpush1.bf16.msra.mxu1 %v10547_v2  ;;  %7648 = vmatpush1.bf16.msra.mxu0 %v10559_v34  ;;  %v258_v2 = vld [vmem:[%s13177_s6 + $0x380] sm:$0xff]  ;;  %v10612_v34 = vpack.c.bf16 %v265_v12, %v261_v41  ;;  %v264_v36 = vld [vmem:[%s13177_s6 + $0x3b0] sm:$0xff]  ;;  %v271_v12 = vld [vmem:[%s13177_s6 + $0x3e8] sm:$0xff] }
 0x3f6   :  { %7586 = vmatprep.subr.bf16.mxu1 %v10571_v0  ;;  %13514 = vst [vmem:[#allocation100_spill] sm:$0xff] %v10598_v35  ;;  %13515 = vst [vmem:[#allocation101_spill] sm:$0xff] %v10600_v42  ;;  %7650 = vmatprep.subr.bf16.mxu0 %v10573_v49  ;;  %v269_v41 = vld [vmem:[%s13177_s6 + $0x3d8] sm:$0xff]  ;;  %v10633_v49 = vpack.c.bf16 %v262_v61, %v258_v2  ;;  %v10640_v63 = vpack.c.bf16 %v264_v36, %v260_v60  ;;  %v270_v2 = vld [vmem:[%s13177_s6 + $0x3e0] sm:$0xff] }
 0x3f7   :  { %13516 = vst [vmem:[#allocation102_spill] sm:$0xff] %v10612_v34  ;;  %v273_v0 = vld [vmem:[%s13177_s6 + $0x3f8] sm:$0xff]  ;;  %v10642_v16 = vpack.c.bf16 %v271_v12, %v267_v46  ;;  %v278_v61 = vld [vmem:[%s13174_s3] sm:$0xff]  ;;  %v268_v60 = vld [vmem:[%s13177_s6 + $0x3d0] sm:$0xff]  ;;  %v10663_v46 = vpack.c.bf16 %v270_v2, %v266_v4 }
 0x3f8   :  { %13517 = vst [vmem:[#allocation103_spill] sm:$0xff] %v10633_v49  ;;  %13518 = vst [vmem:[#allocation104_spill] sm:$0xff] %v10640_v63  ;;  %v272_v36 = vld [vmem:[%s13177_s6 + $0x3f0] sm:$0xff]  ;;  %1311 = vmatprep.mubr.f32.mxu1 %v278_v61  ;;  %1382 = vmatprep.mubr.f32.mxu0 %v278_v61 }
 0x3f9   :  { %7588 = vmatpush1.bf16.msra.mxu1 %v10585_v56  ;;  %7652 = vmatpush1.bf16.msra.mxu0 %v10598_v35  ;;  %13519 = vst [vmem:[#allocation105_spill] sm:$0xff] %v10642_v16  ;;  %v10654_v35 = vpack.c.bf16 %v273_v0, %v269_v41  ;;  %13521 = vst [vmem:[#allocation107_spill] sm:$0xff] %v10663_v46  ;;  %v10667_v0 = vpack.c.bf16 %v272_v36, %v268_v60  ;;  %v36_v60 = vld [vmem:[%s13172_s1 + $0x18] sm:$0xff] }
 0x3fa   :  { %7590 = vmatprep.subr.bf16.mxu1 %v10600_v42  ;;  %7654 = vmatprep.subr.bf16.mxu0 %v10612_v34  ;;  %v33_v42 = vld [vmem:[%s13172_s1] sm:$0xff] }
 0x3fb   :  { %13520 = vst [vmem:[#allocation106_spill] sm:$0xff] %v10654_v35  ;;  %13522 = vst [vmem:[#allocation108_spill] sm:$0xff] %v10667_v0 }
 0x3fd   :  { %7592 = vmatpush1.bf16.msra.mxu1 %v10633_v49  ;;  %7656 = vmatpush1.bf16.msra.mxu0 %v10640_v63  ;;  %v42_v49 = vld [vmem:[%s13172_s1 + $0x48] sm:$0xff] }
 0x3fe   :  { %7594 = vmatprep.subr.bf16.mxu1 %v10642_v16  ;;  %7658 = vmatprep.subr.bf16.mxu0 %v10654_v35  ;;  %v35_v35 = vld [vmem:[%s13172_s1 + $0x10] sm:$0xff]  ;;  %v37_v16 = vld [vmem:[%s13172_s1 + $0x20] sm:$0xff] }
 0x401   :  { %7596 = vmatpush1.bf16.msra.mxu1 %v10663_v46  ;;  %7660 = vmatpush1.bf16.msra.mxu0 %v10667_v0  ;;  %v38_v0 = vld [vmem:[%s13172_s1 + $0x28] sm:$0xff] }
 0x402   :  { %7662 = vmatprep.subr.bf16.mxu1 %v9375_v3  ;;  %7694 = vmatprep.subr.bf16.mxu0 %v9832_v5  ;;  %v34_v5 = vld [vmem:[%s13172_s1 + $0x8] sm:$0xff]  ;;  %v40_v3 = vld [vmem:[%s13172_s1 + $0x38] sm:$0xff] }
 0x430   :  { %v1122_v50 = vpop.permute.xlu0 %1121 }
 0x431   :  { %v1082_v12 = vpop.permute.xlu1 %1081 }
 0x432   :  { %v1159_v31 = vmul.f32 %v1082_v12, %v33_v42  ;;  %v45_v42 = vld [vmem:[%s13172_s1 + $0x60] sm:$0xff] }
 0x435   :  { %v1087_v41 = vpop.permute.xlu1 %1086 }
 0x439   :  { %v1092_v4 = vpop.permute.xlu1 %1091 }
 0x43a   :  { %v1161_v57 = vmul.f32 %v1092_v4, %v35_v35 }
 0x43d   :  { %v1097_v2 = vpop.permute.xlu1 %1096 }
 0x43e   :  { %v1162_v46 = vmul.f32 %v1097_v2, %v36_v60  ;;  %v41_v2 = vld [vmem:[%s13172_s1 + $0x40] sm:$0xff]  ;;  %v1160_v60 = vmul.f32 %v1087_v41, %v34_v5  ;;  %v44_v5 = vld [vmem:[%s13172_s1 + $0x58] sm:$0xff] }
 0x43f   :  { %v1167_v18 = vmul.f32 %v1122_v50, %v41_v2 }
 0x440   :  { %v1182_v40 = vadd.f32 %v1162_v46, %v1161_v57  ;;  %v1175_v10 = vadd.f32 %v1160_v60, %v1159_v31  ;;  %v46_v46 = vld [vmem:[%s13172_s1 + $0x68] sm:$0xff]  ;;  %v48_v60 = vld [vmem:[%s13172_s1 + $0x78] sm:$0xff] }
 0x441   :  { %v1102_v61 = vpop.permute.xlu1 %1101 }
 0x442   :  { %v1163_v53 = vmul.f32 %v1102_v61, %v37_v16 }
 0x445   :  { %v1107_v63 = vpop.permute.xlu1 %1106 }
 0x446   :  { %v1164_v56 = vmul.f32 %v1107_v63, %v38_v0 }
 0x448   :  { %v1189_v63 = vadd.f32 %v1164_v56, %v1163_v53 }
 0x449   :  { %v1112_v34 = vpop.permute.xlu1 %1111 }
 0x44a   :  { %v1165_v29 = vmul.f32 %v1112_v34, %v39_v23  ;;  %v1190_v16 = vrot.slane %v1189_v63, 4 }
 0x44d   :  { %v1117_v36 = vpop.permute.xlu1 %1116 }
 0x44e   :  { %v1166_v7 = vmul.f32 %v1117_v36, %v40_v3  ;;  %v1183_v3 = vrot.slane %v1182_v40, 4 }
 0x450   :  { %v1196_v62 = vadd.f32 %v1166_v7, %v1165_v29  ;;  %v1184_v56 = vadd.f32 %v1183_v3, %v1182_v40  ;;  %v1191_v29 = vadd.f32 %v1190_v16, %v1189_v63  ;;  %v1152_v40 = vpop.permute.xlu0 %1151 }
 0x451   :  { %v1127_v6 = vpop.permute.xlu1 %1126 }
 0x452   :  { %v1168_v28 = vmul.f32 %v1127_v6, %v42_v49  ;;  %v1176_v49 = vrot.slane %v1175_v10, 4  ;;  %v1197_v57 = vrot.slane %v1196_v62, 4  ;;  %v1185_v12 = vrot.slane %v1184_v56, 2 }
 0x453   :  { %v1192_v41 = vrot.slane %v1191_v29, 2 }
 0x454   :  { %v1203_v30 = vadd.f32 %v1168_v28, %v1167_v18  ;;  %v1177_v28 = vadd.f32 %v1176_v49, %v1175_v10  ;;  %v1198_v7 = vadd.f32 %v1197_v57, %v1196_v62  ;;  %v47_v10 = vld [vmem:[%s13172_s1 + $0x70] sm:$0xff]  ;;  %v1186_v63 = vadd.f32 %v1185_v12, %v1184_v56 }
 0x455   :  { %v1132_v0 = vpop.permute.xlu1 %1131  ;;  %v1173_v3 = vmul.f32 %v1152_v40, %v47_v10  ;;  %v1193_v16 = vadd.f32 %v1192_v41, %v1191_v29 }
 0x456   :  { %v1169_v23 = vmul.f32 %v1132_v0, %v43_v59  ;;  %v1204_v53 = vrot.slane %v1203_v30, 4  ;;  %v1178_v62 = vrot.slane %v1177_v28, 2  ;;  %v1199_v61 = vrot.slane %v1198_v7, 2 }
 0x458   :  { %v1205_v35 = vadd.f32 %v1204_v53, %v1203_v30  ;;  %v1179_v49 = vadd.f32 %v1178_v62, %v1177_v28  ;;  %v1200_v57 = vadd.f32 %v1199_v61, %v1198_v7 }
 0x459   :  { %v1137_v6 = vpop.permute.xlu1 %1136 }
 0x45a   :  { %v1170_v50 = vmul.f32 %v1137_v6, %v44_v5  ;;  %v1206_v2 = vrot.slane %v1205_v35, 2  ;;  %v1201_v43 = vrot.slane %v1200_v57, 1 }
 0x45c   :  { %v1210_v31 = vadd.f32 %v1170_v50, %v1169_v23  ;;  %v1207_v53 = vadd.f32 %v1206_v2, %v1205_v35  ;;  %v1202_v7 = vadd.f32 %v1201_v43, %v1200_v57  ;;  %v13524_v57 = vld [vmem:[#allocation13_spill] sm:$0xff] }
 0x45d   :  { %v1142_v18 = vpop.permute.xlu1 %1141 }
 0x45e   :  { %v1211_v34 = vrot.slane %v1210_v31, 4  ;;  %v1171_v30 = vmul.f32 %v1142_v18, %v45_v42  ;;  %v1208_v56 = vrot.slane %v1207_v53, 1 }
 0x460   :  { %v1212_v59 = vadd.f32 %v1211_v34, %v1210_v31  ;;  %v1187_v31 = vrot.slane %v1186_v63, 1  ;;  %v1209_v35 = vadd.f32 %v1208_v56, %v1207_v53  ;;  %v13527_v53 = vld [vmem:[#allocation45_spill] sm:$0xff] }
 0x461   :  { %v1147_v4 = vpop.permute.xlu1 %1146 }
 0x462   :  { %v1172_v36 = vmul.f32 %v1147_v4, %v46_v46  ;;  %v1213_v0 = vrot.slane %v1212_v59, 2  ;;  %v1194_v46 = vrot.slane %v1193_v16, 1  ;;  %v1180_v4 = vrot.slane %v1179_v49, 1 }
 0x463   :  { %v1188_v12 = vadd.f32 %v1187_v31, %v1186_v63 }
 0x464   :  { %v1217_v5 = vadd.f32 %v1172_v36, %v1171_v30  ;;  %v1214_v34 = vadd.f32 %v1213_v0, %v1212_v59  ;;  %v1195_v41 = vadd.f32 %v1194_v46, %v1193_v16  ;;  %v1181_v28 = vadd.f32 %v1180_v4, %v1179_v49  ;;  %v13523_v49 = vld [vmem:[#allocation12_spill] sm:$0xff] }
 0x465   :  { %v1157_v6 = vpop.permute.xlu1 %1156 }
 0x466   :  { %v1218_v23 = vrot.slane %v1217_v5, 4  ;;  %v1174_v50 = vmul.f32 %v1157_v6, %v48_v60  ;;  %v1215_v30 = vrot.slane %v1214_v34, 1  ;;  %v1239_v59 = vsel %vm759_vm1, %v1188_v12, %v1181_v28  ;;  %v13530_v12 = vld [vmem:[#allocation20_spill] sm:$0xff] }
 0x467   :  { %v1240_v2 = vsel %vm761_vm2, %v1195_v41, %v1239_v59 }
 0x468   :  { %v1219_v18 = vadd.f32 %v1218_v23, %v1217_v5  ;;  %v1224_v42 = vadd.f32 %v1174_v50, %v1173_v3  ;;  %v1216_v61 = vadd.f32 %v1215_v30, %v1214_v34  ;;  %v1241_v5 = vsel %vm763_vm3, %v1202_v7, %v1240_v2  ;;  %v13525_v23 = vld [vmem:[#allocation43_spill] sm:$0xff]  ;;  %v13533_v2 = vld [vmem:[#allocation25_spill] sm:$0xff] }
 0x469   :  { %v1242_v63 = vsel %vm765_vm4, %v1209_v35, %v1241_v5  ;;  %v13526_v50 = vmov 0.0|0.0   ;;  %v13535_v5 = vld [vmem:[#allocation24_spill] sm:$0xff] }
 0x46a   :  { %v1220_v11 = vrot.slane %v1219_v18, 2  ;;  %v1225_v55 = vrot.slane %v1224_v42, 4 }
 0x46c   :  { %v1221_v40 = vadd.f32 %v1220_v11, %v1219_v18  ;;  %v1226_v29 = vadd.f32 %v1225_v55, %v1224_v42  ;;  %v1243_v55 = vsel %vm767_vm5, %v1216_v61, %v1242_v63  ;;  %v274_v18 = vld [vmem:[%s13178_s7] sm:$0xf]  ;;  %s277_s7 = sld [smem:[#allocation3]] }
 0x46d   :  { %v13528_v42 = vld [vmem:[#allocation17_spill] sm:$0xff]  ;;  %v10770_v30 = vrot.slane %v274_v18, %v13530_v12  ;;  %v10780_v63 = vrot.slane %v274_v18, %v13535_v5 }
 0x46e   :  { %v1222_v10 = vrot.slane %v1221_v40, 1  ;;  %v1227_v62 = vrot.slane %v1226_v29, 2  ;;  %v10767_v46 = vrot.slane %v274_v18, %v13528_v42 }
 0x46f   :  { %13531 = vst [vmem:[#allocation20_spill] sm:$0xff] %v10770_v30  ;;  %13536 = vst [vmem:[#allocation25_spill] sm:$0xff] %v10780_v63 }
 0x470   :  { %v1228_v36 = vadd.f32 %v1227_v62, %v1226_v29  ;;  %v1223_v60 = vadd.f32 %v1222_v10, %v1221_v40  ;;  %13529 = vst [vmem:[#allocation17_spill] sm:$0xff] %v10767_v46  ;;  %v13532_v40 = vld [vmem:[#allocation16_spill] sm:$0xff] }
 0x472   :  { %v1229_v0 = vrot.slane %v1228_v36, 1  ;;  %v1244_v43 = vsel %vm769_vm6, %v1223_v60, %v1243_v55  ;;  %v10776_v60 = vrot.slane %v274_v18, %v13533_v2 }
 0x474   :  { %v1230_v11 = vadd.f32 %v1229_v0, %v1228_v36  ;;  %13534 = vst [vmem:[#allocation16_spill] sm:$0xff] %v10776_v60 }
 0x476   :  { %v1245_v3 = vsel %vm771_vm7, %v1230_v11, %v1244_v43 }
 0x477   :  { %1312 = vmatmul.mubr.f32.vlgmr.msra.gmra.mrb[2].mxu1 %v1245_v3  ;;  %1383 = vmatmul.mubr.f32.vlgmr.msra.gmra.mrb[4].mxu0 %v1245_v3 }
 0x478   :  { %7664 = vmatpush1.bf16.msra.mxu1 %v9388_v8  ;;  %7696 = vmatpush1.bf16.msra.mxu0 %v9844_v19 }
 0x479   :  { %7666 = vmatprep.subr.bf16.mxu1 %v9390_v9  ;;  %7698 = vmatprep.subr.bf16.mxu0 %v9858_v22 }
 0x47a   :  { %1512 = vmatprep.mubr.f32.mxu1 %v13458_v51  ;;  %1583 = vmatprep.mubr.f32.mxu0 %v13458_v51 }
 0x47c   :  { %7668 = vmatpush1.bf16.msra.mxu1 %v9406_v14  ;;  %7700 = vmatpush1.bf16.msra.mxu0 %v9871_v45 }
 0x47d   :  { %7670 = vmatprep.subr.bf16.mxu1 %v9409_v15  ;;  %7702 = vmatprep.subr.bf16.mxu0 %v9886_v25 }
 0x480   :  { %7672 = vmatpush1.bf16.msra.mxu1 %v9424_v20  ;;  %7704 = vmatpush1.bf16.msra.mxu0 %v9905_v47 }
 0x481   :  { %7674 = vmatprep.subr.bf16.mxu1 %v9427_v21  ;;  %7706 = vmatprep.subr.bf16.mxu0 %v9914_v54 }
 0x484   :  { %7676 = vmatpush1.bf16.msra.mxu1 %v9442_v26  ;;  %7708 = vmatpush1.bf16.msra.mxu0 %v9933_v37 }
 0x485   :  { %7678 = vmatprep.subr.bf16.mxu1 %v9445_v27  ;;  %7710 = vmatprep.subr.bf16.mxu0 %v9942_v1 }
 0x488   :  { %7680 = vmatpush1.bf16.msra.mxu1 %v9460_v32  ;;  %7712 = vmatpush1.bf16.msra.mxu0 %v9961_v17 }
 0x489   :  { %7682 = vmatprep.subr.bf16.mxu1 %v9463_v33  ;;  %7714 = vmatprep.subr.bf16.mxu0 %v9970_v58 }
 0x48a   :  { %v487_v31 = vpop.f32.mrb[2].mxu0 }
 0x48b   :  { %v416_v16 = vpop.f32.mrb[0].mxu1  ;;  %v7269_v34 = vpop.f32.mrb[3].mxu0 }
 0x48c   :  { %7684 = vmatpush1.bf16.msra.mxu1 %v9478_v38  ;;  %7716 = vmatpush1.bf16.msra.mxu0 %v9989_v24  ;;  %v418_v6 = vpop.f32.mrb[1].mxu1 }
 0x48d   :  { %7686 = vmatprep.subr.bf16.mxu1 %v9481_v39  ;;  %7718 = vmatprep.subr.bf16.mxu0 %v9998_v52 }
 0x490   :  { %7688 = vmatpush1.bf16.msra.mxu1 %v9496_v44  ;;  %7720 = vmatpush1.bf16.msra.mxu0 %v10011_v48 }
 0x491   :  { %7690 = vmatprep.subr.bf16.mxu1 %v13523_v49  ;;  %7722 = vmatprep.subr.bf16.mxu0 %v10050_v13 }
 0x494   :  { %7692 = vmatpush1.bf16.msra.mxu1 %v13524_v57  ;;  %7724 = vmatpush1.bf16.msra.mxu0 %v13525_v23 }
 0x495   :  { %7725 = vmatprep.subr.bf16.mxu1 %v13526_v50  ;;  %7750 = vmatprep.subr.bf16.mxu0 %v13527_v53 }
 0x54a   :  { %v1313_v4 = vpop.f32.mrb[2].mxu1  ;;  %v1384_v56 = vpop.f32.mrb[4].mxu0 }
 0x54b   :  { %v1314_v29 = vadd.f32 %v1313_v4, %v13532_v40  ;;  %v1385_v41 = vadd.f32 %v1384_v56, %v418_v6  ;;  %v1315_v28 = vpop.f32.mrb[3].mxu1  ;;  %v1386_v7 = vpop.f32.mrb[5].mxu0  ;;  %v1438_v56 = vstv %s277_s7 }
 0x54c   :  { %v1316_v10 = vadd.f32 %v1315_v28, %v416_v16  ;;  %v1387_v62 = vadd.f32 %v1386_v7, %v487_v31  ;;  %v13537_v7 = vld [vmem:[#allocation14_spill] sm:$0xff] }
 0x54d   :  { %v1410_v35 = vadd.f32 %v10767_v46, %v1314_v29  ;;  %v1412_v55 = vadd.f32 %v10780_v63, %v1385_v41  ;;  %vm10784_vm10 = vcmp.lt.s32.totalorder %v13537_v7, %v1438_v56  ;;  %v13538_v41 = vmov 0  ;;  %v13553_v56 = vld [vmem:[#allocation59_spill] sm:$0xff] }
 0x54e   :  { %v1411_v59 = vadd.f32 %v10770_v30, %v1316_v10  ;;  %v1413_v0 = vadd.f32 %v10776_v60, %v1387_v62  ;;  %v13539_v41 = vsel %vm10784_vm10, 4294967295, %v13538_v41 }
 0x54f   :  { %v7098_v61 = vmul.f32 -1.442695, %v1410_v35  ;;  %13540 = vst [vmem:[#allocation24_spill] sm:$0xff] %v13539_v41 }
 0x550   :  { %v7099_v36 = vmul.f32 -1.442695, %v1411_v59  ;;  %v7100_v11 = vmul.f32 -1.442695, %v1413_v0  ;;  %v13543_v0 = vld [vmem:[#allocation28_spill] sm:$0xff] }
 0x551   :  { %8797 = vpow2.f32 %v7098_v61 }
 0x552   :  { %8799 = vpow2.f32 %v7099_v36  ;;  %v13561_v36 = vld [vmem:[#allocation41_spill] sm:$0xff] }
 0x553   :  { %8801 = vpow2.f32 %v7100_v11  ;;  %v13544_v11 = vld [vmem:[#allocation47_spill] sm:$0xff] }
 0x554   :  { %8803 = vtanh.f32 %v1412_v55  ;;  %v13545_v55 = vld [vmem:[#allocation49_spill] sm:$0xff] }
 0x55b   :  { %v8798_v43 = vpop.eup %8797 }
 0x55c   :  { %v8800_v3 = vpop.eup %8799  ;;  %v1417_v16 = vadd.f32 1.0, %v8798_v43  ;;  %v13546_v43 = vld [vmem:[#allocation29_spill] sm:$0xff] }
 0x55d   :  { %v1423_v6 = vadd.f32 1.0, %v8800_v3  ;;  %v8802_v31 = vpop.eup %8801  ;;  %v13547_v3 = vld [vmem:[#allocation51_spill] sm:$0xff] }
 0x55e   :  { %8805 = vrcp.f32 %v1417_v16  ;;  %v8804_v34 = vpop.eup %8803  ;;  %v1430_v18 = vadd.f32 1.0, %v8802_v31  ;;  %v13548_v16 = vld [vmem:[#allocation53_spill] sm:$0xff]  ;;  %v13550_v31 = vld [vmem:[#allocation55_spill] sm:$0xff] }
 0x55f   :  { %8807 = vrcp.f32 %v1423_v6  ;;  %v13549_v6 = vld [vmem:[#allocation30_spill] sm:$0xff] }
 0x560   :  { %8809 = vrcp.f32 %v1430_v18  ;;  %v13556_v18 = vld [vmem:[#allocation63_spill] sm:$0xff] }
 0x568   :  { %v8806_v4 = vpop.eup %8805 }
 0x569   :  { %v8808_v40 = vpop.eup %8807  ;;  %v1434_v29 = vmul.f32 %v8806_v4, %v8804_v34  ;;  %v13551_v34 = vld [vmem:[#allocation57_spill] sm:$0xff]  ;;  %v13552_v4 = vld [vmem:[#allocation32_spill] sm:$0xff] }
 0x56a   :  { %v1433_v28 = vmul.f32 0.0, %v8808_v40  ;;  %v8810_v35 = vpop.eup %8809  ;;  %v13554_v40 = vld [vmem:[#allocation61_spill] sm:$0xff] }
 0x56c   :  { %v1435_v10 = vadd.f32 %v1434_v29, %v1433_v28  ;;  %v13555_v29 = vld [vmem:[#allocation35_spill] sm:$0xff]  ;;  %v13557_v28 = vld [vmem:[#allocation65_spill] sm:$0xff] }
 0x56e   :  { %8811 = vtanh.f32 %v1435_v10  ;;  %v10790_v62 = vsel %vm10784_vm10, %v1435_v10, 0.0  ;;  %v13558_v10 = vld [vmem:[#allocation38_spill] sm:$0xff] }
 0x56f   :  { %13541 = vst [vmem:[#allocation109_spill] sm:$0xff] %v10790_v62 }
 0x578   :  { %v8812_v59 = vpop.eup %8811 }
 0x579   :  { %v10792_v61 = vmul.f32 %v8812_v59, %v8810_v35  ;;  %v13559_v35 = vld [vmem:[#allocation67_spill] sm:$0xff]  ;;  %v13560_v59 = vld [vmem:[#allocation69_spill] sm:$0xff] }
 0x57b   :  { %13542 = vst [vmem:[#allocation110_spill] sm:$0xff] %v10792_v61  ;;  %1440 = vst [vmem:[%s13179_s8] sm:$0xff] %v10792_v61  ;;  %7103 = vmatmul.mubr.msk.f32.vlgmr.msra.gmra.mrb[4].mxu1 %vm10784_vm10, %v10792_v61  ;;  %7104 = vmatmul.mubr.msk.f32.vlgmr.msra.gmra.mrb[6].mxu0 %vm10784_vm10, %v10792_v61 }
 0x57c   :  { %7727 = vmatpush3.bf16.msra.mxu1 %v13543_v0  ;;  %7302 = vmatprep.mubr.msk.f32.mxu1 %vm9317_vm9, %v13458_v51 }
 0x57d   :  { %7728 = vmatprep.subr.bf16.mxu1 %v13526_v50  ;;  %7752 = vmatpush1.bf16.msra.mxu0 %v13544_v11 }
 0x57e   :  { %7754 = vmatprep.subr.bf16.mxu0 %v13545_v55  ;;  %v9133_v55 = vld [vmem:[%s13173_s2 + $0x8] sm:$0xff] }
 0x580   :  { %7730 = vmatpush3.bf16.msra.mxu1 %v13546_v43 }
 0x581   :  { %7731 = vmatprep.subr.bf16.mxu1 %v13526_v50  ;;  %7756 = vmatpush1.bf16.msra.mxu0 %v13547_v3 }
 0x582   :  { %7758 = vmatprep.subr.bf16.mxu0 %v13548_v16 }
 0x584   :  { %7733 = vmatpush3.bf16.msra.mxu1 %v13549_v6 }
 0x585   :  { %7734 = vmatprep.subr.bf16.mxu1 %v13526_v50  ;;  %7760 = vmatpush1.bf16.msra.mxu0 %v13550_v31  ;;  %v13617_v31 = vld [vmem:[#allocation15_spill] sm:$0xff] }
 0x586   :  { %7762 = vmatprep.subr.bf16.mxu0 %v13551_v34  ;;  %v13578_v34 = vld [vmem:[#allocation87_spill] sm:$0xff] }
 0x588   :  { %7736 = vmatpush3.bf16.msra.mxu1 %v13552_v4  ;;  %v13577_v4 = vld [vmem:[#allocation58_spill] sm:$0xff] }
 0x589   :  { %7737 = vmatprep.subr.bf16.mxu1 %v13526_v50  ;;  %7764 = vmatpush1.bf16.msra.mxu0 %v13553_v56  ;;  %v13564_v56 = vld [vmem:[#allocation44_spill] sm:$0xff] }
 0x58a   :  { %7766 = vmatprep.subr.bf16.mxu0 %v13554_v40  ;;  %v13562_v40 = vld [vmem:[#allocation71_spill] sm:$0xff] }
 0x58c   :  { %7739 = vmatpush3.bf16.msra.mxu1 %v13555_v29  ;;  %v13563_v29 = vld [vmem:[#allocation73_spill] sm:$0xff] }
 0x58d   :  { %7740 = vmatprep.subr.bf16.mxu1 %v13526_v50  ;;  %7768 = vmatpush1.bf16.msra.mxu0 %v13556_v18  ;;  %v13565_v18 = vld [vmem:[#allocation46_spill] sm:$0xff] }
 0x58e   :  { %7770 = vmatprep.subr.bf16.mxu0 %v13557_v28  ;;  %v13566_v28 = vld [vmem:[#allocation75_spill] sm:$0xff] }
 0x590   :  { %7742 = vmatpush3.bf16.msra.mxu1 %v13558_v10  ;;  %v13567_v10 = vld [vmem:[#allocation77_spill] sm:$0xff] }
 0x591   :  { %7743 = vmatprep.subr.bf16.mxu1 %v13526_v50  ;;  %7772 = vmatpush1.bf16.msra.mxu0 %v13559_v35  ;;  %v13570_v35 = vld [vmem:[#allocation79_spill] sm:$0xff] }
 0x592   :  { %7774 = vmatprep.subr.bf16.mxu0 %v13560_v59  ;;  %v13568_v59 = vld [vmem:[#allocation48_spill] sm:$0xff] }
 0x594   :  { %7745 = vmatpush3.bf16.msra.mxu1 %v13561_v36  ;;  %v13569_v36 = vld [vmem:[#allocation50_spill] sm:$0xff] }
 0x595   :  { %7746 = vmatprep.subr.bf16.mxu1 %v13526_v50  ;;  %7776 = vmatpush1.bf16.msra.mxu0 %v13562_v40  ;;  %v13571_v40 = vld [vmem:[#allocation81_spill] sm:$0xff] }
 0x596   :  { %7778 = vmatprep.subr.bf16.mxu0 %v13563_v29  ;;  %v13572_v29 = vld [vmem:[#allocation52_spill] sm:$0xff] }
 0x598   :  { %7748 = vmatpush3.bf16.msra.mxu1 %v13564_v56  ;;  %v13573_v56 = vld [vmem:[#allocation54_spill] sm:$0xff] }
 0x599   :  { %7814 = vmatprep.subr.bf16.mxu1 %v13565_v18  ;;  %7780 = vmatpush1.bf16.msra.mxu0 %v13566_v28  ;;  %v13574_v18 = vld [vmem:[#allocation83_spill] sm:$0xff]  ;;  %v13575_v28 = vld [vmem:[#allocation85_spill] sm:$0xff] }
 0x59a   :  { %7782 = vmatprep.subr.bf16.mxu0 %v13567_v10  ;;  %v13576_v10 = vld [vmem:[#allocation56_spill] sm:$0xff] }
 0x59b   :  { %7303 = vmatmul.mubr.msk.f32.vlgmr.msra.gmra.mrb[6].mxu1 %vm10784_vm10, %v10792_v61 }
 0x59c   :  { %7816 = vmatpush1.bf16.msra.mxu1 %v13568_v59  ;;  %v13579_v59 = vld [vmem:[#allocation89_spill] sm:$0xff] }
 0x59d   :  { %7818 = vmatprep.subr.bf16.mxu1 %v13569_v36  ;;  %7784 = vmatpush1.bf16.msra.mxu0 %v13570_v35  ;;  %v13580_v36 = vld [vmem:[#allocation60_spill] sm:$0xff]  ;;  %v13581_v35 = vld [vmem:[#allocation62_spill] sm:$0xff] }
 0x59e   :  { %7786 = vmatprep.subr.bf16.mxu0 %v13571_v40  ;;  %v13582_v40 = vld [vmem:[#allocation91_spill] sm:$0xff] }
 0x5a0   :  { %7820 = vmatpush1.bf16.msra.mxu1 %v13572_v29  ;;  %v13583_v29 = vld [vmem:[#allocation93_spill] sm:$0xff] }
 0x5a1   :  { %7822 = vmatprep.subr.bf16.mxu1 %v13573_v56  ;;  %7788 = vmatpush1.bf16.msra.mxu0 %v13574_v18  ;;  %v13584_v56 = vld [vmem:[#allocation64_spill] sm:$0xff]  ;;  %v13585_v18 = vld [vmem:[#allocation66_spill] sm:$0xff] }
 0x5a2   :  { %7790 = vmatprep.subr.bf16.mxu0 %v13575_v28  ;;  %v13586_v28 = vld [vmem:[#allocation95_spill] sm:$0xff] }
 0x5a4   :  { %7824 = vmatpush1.bf16.msra.mxu1 %v13576_v10  ;;  %v13587_v10 = vld [vmem:[#allocation97_spill] sm:$0xff] }
 0x5a5   :  { %7826 = vmatprep.subr.bf16.mxu1 %v13577_v4  ;;  %7792 = vmatpush1.bf16.msra.mxu0 %v13578_v34  ;;  %v13588_v4 = vld [vmem:[#allocation68_spill] sm:$0xff]  ;;  %v13589_v34 = vld [vmem:[#allocation70_spill] sm:$0xff] }
 0x5a6   :  { %7794 = vmatprep.subr.bf16.mxu0 %v13579_v59  ;;  %v13590_v59 = vld [vmem:[#allocation99_spill] sm:$0xff] }
 0x5a8   :  { %7828 = vmatpush1.bf16.msra.mxu1 %v13580_v36  ;;  %v13591_v36 = vld [vmem:[#allocation101_spill] sm:$0xff] }
 0x5a9   :  { %7830 = vmatprep.subr.bf16.mxu1 %v13581_v35  ;;  %7796 = vmatpush1.bf16.msra.mxu0 %v13582_v40  ;;  %v13592_v35 = vld [vmem:[#allocation72_spill] sm:$0xff]  ;;  %v13593_v40 = vld [vmem:[#allocation74_spill] sm:$0xff] }
 0x5aa   :  { %7798 = vmatprep.subr.bf16.mxu0 %v13583_v29  ;;  %v13594_v29 = vld [vmem:[#allocation103_spill] sm:$0xff] }
 0x5ac   :  { %7832 = vmatpush1.bf16.msra.mxu1 %v13584_v56  ;;  %v13595_v56 = vld [vmem:[#allocation105_spill] sm:$0xff] }
 0x5ad   :  { %7834 = vmatprep.subr.bf16.mxu1 %v13585_v18  ;;  %7800 = vmatpush1.bf16.msra.mxu0 %v13586_v28  ;;  %v13596_v18 = vld [vmem:[#allocation76_spill] sm:$0xff]  ;;  %v13597_v28 = vld [vmem:[#allocation78_spill] sm:$0xff] }
 0x5ae   :  { %7802 = vmatprep.subr.bf16.mxu0 %v13587_v10  ;;  %v13598_v10 = vld [vmem:[#allocation107_spill] sm:$0xff] }
 0x5b0   :  { %7836 = vmatpush1.bf16.msra.mxu1 %v13588_v4  ;;  %v13599_v4 = vld [vmem:[#allocation5_spill] sm:$0xff] }
 0x5b1   :  { %7838 = vmatprep.subr.bf16.mxu1 %v13589_v34  ;;  %7804 = vmatpush1.bf16.msra.mxu0 %v13590_v59  ;;  %v13600_v34 = vld [vmem:[#allocation80_spill] sm:$0xff]  ;;  %v13601_v59 = vld [vmem:[#allocation82_spill] sm:$0xff] }
 0x5b2   :  { %7806 = vmatprep.subr.bf16.mxu0 %v13591_v36  ;;  %v13602_v36 = vld [vmem:[#allocation84_spill] sm:$0xff] }
 0x5b4   :  { %7840 = vmatpush1.bf16.msra.mxu1 %v13592_v35  ;;  %v13603_v35 = vld [vmem:[#allocation86_spill] sm:$0xff] }
 0x5b5   :  { %7842 = vmatprep.subr.bf16.mxu1 %v13593_v40  ;;  %7808 = vmatpush1.bf16.msra.mxu0 %v13594_v29  ;;  %v13604_v40 = vld [vmem:[#allocation88_spill] sm:$0xff]  ;;  %v13605_v29 = vld [vmem:[#allocation90_spill] sm:$0xff] }
 0x5b6   :  { %7810 = vmatprep.subr.bf16.mxu0 %v13595_v56  ;;  %v13606_v56 = vld [vmem:[#allocation92_spill] sm:$0xff] }
 0x5b8   :  { %7844 = vmatpush1.bf16.msra.mxu1 %v13596_v18  ;;  %v13607_v18 = vld [vmem:[#allocation94_spill] sm:$0xff] }
 0x5b9   :  { %7846 = vmatprep.subr.bf16.mxu1 %v13597_v28  ;;  %7812 = vmatpush1.bf16.msra.mxu0 %v13598_v10  ;;  %v13608_v28 = vld [vmem:[#allocation96_spill] sm:$0xff]  ;;  %v13609_v10 = vld [vmem:[#allocation98_spill] sm:$0xff] }
 0x5ba   :  { %7878 = vmatprep.subr.bf16.mxu0 %v13599_v4  ;;  %v13610_v4 = vld [vmem:[#allocation100_spill] sm:$0xff] }
 0x5bc   :  { %7848 = vmatpush1.bf16.msra.mxu1 %v13600_v34  ;;  %v13611_v34 = vld [vmem:[#allocation102_spill] sm:$0xff] }
 0x5bd   :  { %7850 = vmatprep.subr.bf16.mxu1 %v13601_v59  ;;  %v13612_v59 = vld [vmem:[#allocation104_spill] sm:$0xff] }
 0x5c0   :  { %7852 = vmatpush1.bf16.msra.mxu1 %v13602_v36  ;;  %v13613_v36 = vld [vmem:[#allocation106_spill] sm:$0xff] }
 0x5c1   :  { %7854 = vmatprep.subr.bf16.mxu1 %v13603_v35  ;;  %v13614_v35 = vld [vmem:[#allocation108_spill] sm:$0xff] }
 0x5c4   :  { %7856 = vmatpush1.bf16.msra.mxu1 %v13604_v40  ;;  %v13615_v40 = vld [vmem:[#allocation27_spill] sm:$0xff] }
 0x5c5   :  { %7858 = vmatprep.subr.bf16.mxu1 %v13605_v29 }
 0x5c8   :  { %7860 = vmatpush1.bf16.msra.mxu1 %v13606_v56 }
 0x5c9   :  { %7862 = vmatprep.subr.bf16.mxu1 %v13607_v18 }
 0x5cc   :  { %7864 = vmatpush1.bf16.msra.mxu1 %v13608_v28 }
 0x5cd   :  { %7866 = vmatprep.subr.bf16.mxu1 %v13609_v10 }
 0x5d0   :  { %7868 = vmatpush1.bf16.msra.mxu1 %v13610_v4 }
 0x5d1   :  { %7870 = vmatprep.subr.bf16.mxu1 %v13611_v34 }
 0x5d4   :  { %7872 = vmatpush1.bf16.msra.mxu1 %v13612_v59 }
 0x5d5   :  { %7874 = vmatprep.subr.bf16.mxu1 %v13613_v36 }
 0x5d8   :  { %7876 = vmatpush1.bf16.msra.mxu1 %v13614_v35 }
 0x5d9   :  { %7910 = vmatprep.subr.bf16.mxu1 %v13615_v40 }
 0x64e   :  { %v1514_v29 = vpop.f32.mrb[4].mxu1  ;;  %v10892_v56 = vpop.f32.mrb[6].mxu0 }
 0x64f   :  { %13616 = vst [vmem:[#allocation111_spill] sm:$0xff] %v10892_v56  ;;  %v1661_v18 = vcombine.high %v1514_v29, %v1514_v29  ;;  %v1668_v28 = vrot.slane %v1514_v29, %v13617_v31  ;;  %v10895_v6 = vpop.f32.mrb[5].mxu1  ;;  %v10897_v10 = vpop.f32.mrb[7].mxu0 }
 0x650   :  { %13618 = vst [vmem:[#allocation112_spill] sm:$0xff] %v10895_v6  ;;  %13619 = vst [vmem:[#allocation113_spill] sm:$0xff] %v10897_v10 }
 0x651   :  { %v1675_v34 = vrot.slane %v1661_v18, %v13617_v31  ;;  %v1676_v4 = vcombine.high %v1668_v28, %v1668_v28  ;;  %v1684_v59 = vrot.slane %v1668_v28, %v13617_v31  ;;  %v9134_v18 = vld [vmem:[%s13173_s2] sm:$0xff] }
 0x653   :  { %v1691_v36 = vrot.slane %v1675_v34, %v13617_v31  ;;  %v1698_v35 = vrot.slane %v1676_v4, %v13617_v31  ;;  %v1706_v40 = vcombine.high %v1684_v59, %v1684_v59  ;;  %v1713_v16 = vrot.slane %v1684_v59, %v13528_v42 }
 0x654   :  { %v1677_v3 = vcombine.high %v1675_v34, %v1675_v34  ;;  %v9135_v34 = vld [vmem:[%s13173_s2 + $0x20] sm:$0xff] }
 0x655   :  { %v1708_v43 = vcombine.high %v1698_v35, %v1698_v35  ;;  %v1721_v29 = vrot.slane %v1706_v40, %v13528_v42  ;;  %v1751_v11 = vadd.f32 %v9133_v55, %v1713_v16  ;;  %v1750_v28 = vadd.f32 %v9134_v18, %v1713_v16  ;;  %v9136_v55 = vld [vmem:[%s13173_s2 + $0x10] sm:$0xff]  ;;  %v9137_v16 = vld [vmem:[%s13173_s2 + $0x18] sm:$0xff] }
 0x656   :  { %v1717_v0 = vrot.slane %v1698_v35, %v13528_v42  ;;  %v1729_v4 = vrot.slane %v1691_v36, %v13528_v42  ;;  %v1705_v7 = vrot.slane %v1677_v3, %v13617_v31  ;;  %v9139_v3 = vld [vmem:[%s13173_s2 + $0x40] sm:$0xff] }
 0x657   :  { %v1754_v59 = vadd.f32 %v9135_v34, %v1721_v29  ;;  %v1767_v40 = vmax.f32 %v1751_v11, 0.0  ;;  %v1766_v61 = vmax.f32 %v1750_v28, 0.0  ;;  %v1725_v18 = vrot.slane %v1708_v43, %v13528_v42  ;;  %v10927_v11 = vld [vmem:[%s13176_s5] ss:$0 sm:$0xff]  ;;  %v9140_v43 = vld [vmem:[%s13173_s2 + $0x28] sm:$0xff] }
 0x658   :  { %v1752_v41 = vadd.f32 %v9136_v55, %v1717_v0  ;;  %v1753_v35 = vadd.f32 %v9137_v16, %v1717_v0  ;;  %v1707_v0 = vcombine.high %v1691_v36, %v1691_v36  ;;  %v1755_v31 = vadd.f32 %v9140_v43, %v1721_v29  ;;  %v9142_v29 = vld [vmem:[%s13173_s2 + $0x48] sm:$0xff] }
 0x659   :  { %v1770_v62 = vmax.f32 %v1754_v59, 0.0  ;;  %v1783_v28 = vmul.f32 %v10927_v11, %v1767_v40  ;;  %v1782_v34 = vmul.f32 %v10927_v11, %v1766_v61  ;;  %v1758_v59 = vadd.f32 %v9139_v3, %v1729_v4  ;;  %v9141_v40 = vld [vmem:[%s13173_s2 + $0x30] sm:$0xff] }
 0x65a   :  { %v1768_v55 = vmax.f32 %v1752_v41, 0.0  ;;  %v1769_v16 = vmax.f32 %v1753_v35, 0.0  ;;  %v1756_v61 = vadd.f32 %v9141_v40, %v1725_v18  ;;  %v1771_v35 = vmax.f32 %v1755_v31, 0.0 }
 0x65b   :  { %1800 = vadd.xlane.f32.xlu1 %v1783_v28  ;;  %1798 = vadd.xlane.f32.xlu0 %v1782_v34  ;;  %v1786_v41 = vmul.f32 %v10927_v11, %v1770_v62  ;;  %v1774_v60 = vmax.f32 %v1758_v59, 0.0  ;;  %v1733_v28 = vrot.slane %v1705_v7, %v13528_v42  ;;  %v1759_v3 = vadd.f32 %v9142_v29, %v1729_v4  ;;  %v9143_v62 = vld [vmem:[%s13173_s2 + $0x50] sm:$0xff]  ;;  %v9144_v4 = vld [vmem:[%s13173_s2 + $0x38] sm:$0xff] }
 0x65c   :  { %v1784_v63 = vmul.f32 %v10927_v11, %v1768_v55  ;;  %v1785_v36 = vmul.f32 %v10927_v11, %v1769_v16  ;;  %v1772_v34 = vmax.f32 %v1756_v61, 0.0  ;;  %v1737_v59 = vrot.slane %v1707_v0, %v13528_v42 }
 0x65d   :  { %v1790_v43 = vmul.f32 %v10927_v11, %v1774_v60  ;;  %v1760_v55 = vadd.f32 %v9143_v62, %v1733_v28  ;;  %v1709_v40 = vcombine.high %v1705_v7, %v1705_v7  ;;  %v1757_v16 = vadd.f32 %v9144_v4, %v1725_v18  ;;  %v9148_v4 = vld [vmem:[%s13173_s2 + $0x68] sm:$0xff] }
 0x65e   :  { %v1788_v31 = vmul.f32 %v10927_v11, %v1772_v34  ;;  %v1775_v60 = vmax.f32 %v1759_v3, 0.0 }
 0x65f   :  { %1806 = vadd.xlane.f32.xlu1 %v1786_v41  ;;  %1802 = vadd.xlane.f32.xlu0 %v1784_v63  ;;  %v1787_v63 = vmul.f32 %v10927_v11, %v1771_v35  ;;  %v1776_v61 = vmax.f32 %v1760_v55, 0.0  ;;  %v9145_v41 = vld [vmem:[%s13173_s2 + $0x60] sm:$0xff]  ;;  %v1741_v7 = vrot.slane %v1709_v40, %v13528_v42  ;;  %v1773_v0 = vmax.f32 %v1757_v16, 0.0 }
 0x660   :  { %v1762_v29 = vadd.f32 %v9145_v41, %v1737_v59  ;;  %v1791_v34 = vmul.f32 %v10927_v11, %v1775_v60  ;;  %v1763_v16 = vadd.f32 %v9148_v4, %v1737_v59 }
 0x661   :  { %v1792_v18 = vmul.f32 %v10927_v11, %v1776_v61 }
 0x662   :  { %v1778_v3 = vmax.f32 %v1762_v29, 0.0  ;;  %v1779_v29 = vmax.f32 %v1763_v16, 0.0 }
 0x663   :  { %1804 = vadd.xlane.f32.xlu0 %v1785_v36  ;;  %1814 = vadd.xlane.f32.xlu1 %v1790_v43  ;;  %v9146_v36 = vld [vmem:[%s13173_s2 + $0x58] sm:$0xff]  ;;  %v9147_v43 = vld [vmem:[%s13173_s2 + $0x70] sm:$0xff] }
 0x664   :  { %v1761_v35 = vadd.f32 %v9146_v36, %v1733_v28  ;;  %v1764_v62 = vadd.f32 %v9147_v43, %v1741_v7 }
 0x666   :  { %v1777_v55 = vmax.f32 %v1761_v35, 0.0  ;;  %v1780_v28 = vmax.f32 %v1764_v62, 0.0  ;;  %v1795_v35 = vmul.f32 %v10927_v11, %v1779_v29  ;;  %v13622_v29 = vld [vmem:[#allocation19_spill] sm:$0xff] }
 0x667   :  { %1808 = vadd.xlane.f32.xlu0 %v1787_v63  ;;  %1810 = vadd.xlane.f32.xlu1 %v1788_v31  ;;  %v1789_v63 = vmul.f32 %v10927_v11, %v1773_v0  ;;  %v1794_v31 = vmul.f32 %v10927_v11, %v1778_v3  ;;  %v9149_v0 = vld [vmem:[%s13173_s2 + $0x78] sm:$0xff] }
 0x668   :  { %v1793_v61 = vmul.f32 %v10927_v11, %v1777_v55  ;;  %v1796_v41 = vmul.f32 %v10927_v11, %v1780_v28  ;;  %v1765_v36 = vadd.f32 %v9149_v0, %v1741_v7 }
 0x66b   :  { %1816 = vadd.xlane.f32.xlu0 %v1791_v34  ;;  %1818 = vadd.xlane.f32.xlu1 %v1792_v18  ;;  %v1781_v34 = vmax.f32 %v1765_v36, 0.0 }
 0x66d   :  { %v1797_v59 = vmul.f32 %v10927_v11, %v1781_v34  ;;  %v13621_v11 = vld [vmem:[#allocation18_spill] sm:$0xff] }
 0x66e   :  { %v10969_v40 = vpop.f32.mrb[6].mxu1 }
 0x66f   :  { %13620 = vst [vmem:[#allocation114_spill] sm:$0xff] %v10969_v40  ;;  %v7304_v60 = vpop.f32.mrb[7].mxu1  ;;  %1812 = vadd.xlane.f32.xlu0 %v1789_v63  ;;  %1822 = vadd.xlane.f32.xlu1 %v1794_v31 }
 0x673   :  { %1820 = vadd.xlane.f32.xlu0 %v1793_v61  ;;  %1826 = vadd.xlane.f32.xlu1 %v1796_v41 }
 0x677   :  { %1824 = vadd.xlane.f32.xlu0 %v1795_v35 }
 0x67b   :  { %1828 = vadd.xlane.f32.xlu0 %v1797_v59 }
 0x6e8   :  { %v1801_v18 = vpop.xlane.xlu1 %1800  ;;  %v1799_v3 = vpop.xlane.xlu0 %1798 }
 0x6e9   :  { %v1853_v41 = vrot.slane %v1801_v18, %v13621_v11  ;;  %v1849_v0 = vrot.slane %v1799_v3, %v13622_v29 }
 0x6eb   :  { %v1854_v10 = vsel %vm694_vm0, %v1853_v41, %v1849_v0 }
 0x6ec   :  { %v10983_v43 = vpop.xlane.xlu1 %1806  ;;  %v1803_v62 = vpop.xlane.xlu0 %1802 }
 0x6ed   :  { %v1858_v36 = vrot.slane %v1803_v62, %v13622_v29  ;;  %v1867_v34 = vrot.slane %v10983_v43, %v13622_v29 }
 0x6f0   :  { %v1805_v55 = vpop.xlane.xlu0 %1804  ;;  %v10985_v63 = vpop.xlane.xlu1 %1814 }
 0x6f1   :  { %v1862_v60 = vrot.slane %v1805_v55, %v13621_v11 }
 0x6f3   :  { %v1863_v46 = vsel %vm694_vm0, %v1862_v60, %v1858_v36 }
 0x6f4   :  { %v10987_v31 = vpop.xlane.xlu0 %1808  ;;  %v10989_v7 = vpop.xlane.xlu1 %1810  ;;  %v1918_v50 = vsel %vm759_vm1, %v1863_v46, %v1854_v10 }
 0x6f5   :  { %v1871_v61 = vrot.slane %v10987_v31, %v13621_v11  ;;  %v1876_v40 = vrot.slane %v10989_v7, %v13622_v29 }
 0x6f7   :  { %v1872_v56 = vsel %vm694_vm0, %v1871_v61, %v1867_v34 }
 0x6f8   :  { %v10991_v28 = vpop.xlane.xlu0 %1816  ;;  %v10993_v4 = vpop.xlane.xlu1 %1818  ;;  %v1919_v60 = vsel %vm761_vm2, %v1872_v56, %v1918_v50 }
 0x6f9   :  { %v1889_v23 = vrot.slane %v10991_v28, %v13621_v11  ;;  %v1894_v36 = vrot.slane %v10993_v4, %v13622_v29 }
 0x6fc   :  { %v10995_v16 = vpop.xlane.xlu0 %1812  ;;  %v11007_v59 = vpop.xlane.xlu1 %1822 }
 0x6fd   :  { %v1880_v35 = vrot.slane %v10995_v16, %v13621_v11  ;;  %v1903_v46 = vrot.slane %v11007_v59, %v13622_v29 }
 0x6ff   :  { %v1881_v6 = vsel %vm694_vm0, %v1880_v35, %v1876_v40  ;;  %v1885_v40 = vrot.slane %v10985_v63, %v13622_v29 }
 0x700   :  { %v11009_v30 = vpop.xlane.xlu0 %1820  ;;  %v1920_v41 = vsel %vm763_vm3, %v1881_v6, %v1919_v60  ;;  %v11034_v10 = vpop.xlane.xlu1 %1826 }
 0x701   :  { %v1898_v53 = vrot.slane %v11009_v30, %v13621_v11  ;;  %v1890_v50 = vsel %vm694_vm0, %v1889_v23, %v1885_v40  ;;  %v1912_v34 = vrot.slane %v11034_v10, %v13622_v29 }
 0x702   :  { %v1921_v6 = vsel %vm765_vm4, %v1890_v50, %v1920_v41 }
 0x703   :  { %v1899_v0 = vsel %vm694_vm0, %v1898_v53, %v1894_v36 }
 0x704   :  { %v11022_v57 = vpop.xlane.xlu0 %1824  ;;  %v1922_v60 = vsel %vm767_vm5, %v1899_v0, %v1921_v6 }
 0x705   :  { %v1907_v61 = vrot.slane %v11022_v57, %v13621_v11 }
 0x707   :  { %v1908_v35 = vsel %vm694_vm0, %v1907_v61, %v1903_v46 }
 0x708   :  { %v11038_v56 = vpop.xlane.xlu0 %1828  ;;  %v1923_v53 = vsel %vm769_vm6, %v1908_v35, %v1922_v60 }
 0x709   :  { %v1916_v13 = vrot.slane %v11038_v56, %v13621_v11 }
 0x70b   :  { %v1917_v49 = vsel %vm694_vm0, %v1916_v13, %v1912_v34 }
 0x70c   :  { %v1924_v23 = vsel %vm771_vm7, %v1917_v49, %v1923_v53 }
 0x70d   :  { %v1926_v36 = vsel %vm774_vm8, %v1924_v23, -inf  ;;  %v13623_v23 = vld [vmem:[#allocation26_spill] sm:$0xff] }
 0x70e   :  { %1927 = vmax.xlane.f32.xlu1 %v1926_v36 }
 0x79b   :  { %v1928_v61 = vpop.xlane.xlu1 %1927 }
 0x79c   :  { %v1933_v40 = vrot.slane %v1928_v61, %v13528_v42  ;;  %v1937_v46 = vrot.slane %v1928_v61, %v13530_v12  ;;  %v1941_v48 = vrot.slane %v1928_v61, %v13535_v5  ;;  %v1945_v35 = vrot.slane %v1928_v61, %v13533_v2 }
 0x79d   :  { %v1949_v36 = vrot.slane %v1928_v61, %v13623_v23 }
 0x79e   :  { %v1971_v44 = vsub.f32 %v1801_v18, %v1933_v40  ;;  %v1970_v41 = vsub.f32 %v1799_v3, %v1933_v40  ;;  %v1972_v50 = vsub.f32 %v1803_v62, %v1937_v46  ;;  %v1973_v13 = vsub.f32 %v1805_v55, %v1937_v46  ;;  %v13624_v62 = vld [vmem:[#allocation21_spill] sm:$0xff] }
 0x79f   :  { %v1974_v34 = vsub.f32 %v10983_v43, %v1941_v48  ;;  %v1975_v53 = vsub.f32 %v10987_v31, %v1941_v48  ;;  %v1976_v18 = vsub.f32 %v10989_v7, %v1945_v35  ;;  %v1977_v3 = vsub.f32 %v10995_v16, %v1945_v35  ;;  %v13625_v7 = vld [vmem:[#allocation22_spill] sm:$0xff] }
 0x7a0   :  { %v1988_v0 = vmul.f32 1.442695, %v1971_v44  ;;  %v1986_v6 = vmul.f32 1.442695, %v1970_v41  ;;  %v1990_v49 = vmul.f32 1.442695, %v1972_v50  ;;  %v1953_v55 = vrot.slane %v1928_v61, %v13624_v62 }
 0x7a1   :  { %v1992_v60 = vmul.f32 1.442695, %v1973_v13  ;;  %v1994_v52 = vmul.f32 1.442695, %v1974_v34  ;;  %v1996_v44 = vmul.f32 1.442695, %v1975_v53  ;;  %v1978_v43 = vsub.f32 %v10985_v63, %v1949_v36 }
 0x7a2   :  { %8813 = vpow2.f32 %v1988_v0  ;;  %v1998_v40 = vmul.f32 1.442695, %v1976_v18  ;;  %v2000_v48 = vmul.f32 1.442695, %v1977_v3  ;;  %v1979_v31 = vsub.f32 %v10991_v28, %v1949_v36  ;;  %v13626_v13 = vld [vmem:[#allocation23_spill] sm:$0xff] }
 0x7a3   :  { %8815 = vpow2.f32 %v1986_v6  ;;  %v1957_v50 = vrot.slane %v1928_v61, %v13625_v7  ;;  %v2002_v16 = vmul.f32 1.442695, %v1978_v43  ;;  %v1980_v0 = vsub.f32 %v10993_v4, %v1953_v55 }
 0x7a4   :  { %8817 = vpow2.f32 %v1990_v49  ;;  %v2004_v63 = vmul.f32 1.442695, %v1979_v31  ;;  %v1981_v6 = vsub.f32 %v11009_v30, %v1953_v55  ;;  %v1961_v35 = vrot.slane %v1928_v61, %v13626_v13 }
 0x7a5   :  { %8819 = vpow2.f32 %v1992_v60  ;;  %v2006_v49 = vmul.f32 1.442695, %v1980_v0  ;;  %v1982_v34 = vsub.f32 %v11007_v59, %v1957_v50  ;;  %v1983_v53 = vsub.f32 %v11022_v57, %v1957_v50 }
 0x7a6   :  { %8821 = vpow2.f32 %v1994_v52  ;;  %v2008_v60 = vmul.f32 1.442695, %v1981_v6  ;;  %v1984_v36 = vsub.f32 %v11034_v10, %v1961_v35 }
 0x7a7   :  { %8823 = vpow2.f32 %v1996_v44  ;;  %v2010_v61 = vmul.f32 1.442695, %v1982_v34  ;;  %v2012_v59 = vmul.f32 1.442695, %v1983_v53  ;;  %v1985_v44 = vsub.f32 %v11038_v56, %v1961_v35 }
 0x7a8   :  { %8825 = vpow2.f32 %v1998_v40  ;;  %v2014_v57 = vmul.f32 1.442695, %v1984_v36 }
 0x7a9   :  { %8827 = vpow2.f32 %v2000_v48  ;;  %v2016_v10 = vmul.f32 1.442695, %v1985_v44 }
 0x7aa   :  { %8829 = vpow2.f32 %v2002_v16 }
 0x7ab   :  { %8831 = vpow2.f32 %v2004_v63 }
 0x7ac   :  { %v11062_v46 = vpop.eup %8813  ;;  %8833 = vpow2.f32 %v2006_v49 }
 0x7ad   :  { %2038 = vperm.xlu1 %8747, %v11062_v46   ;;  %v11066_v41 = vpop.eup %8815  ;;  %8835 = vpow2.f32 %v2008_v60 }
 0x7ae   :  { %2035 = vperm.xlu0 %8748, %v11066_v41   ;;  %v11071_v52 = vpop.eup %8817  ;;  %8837 = vpow2.f32 %v2010_v61 }
 0x7af   :  { %v11075_v28 = vpop.eup %8819  ;;  %8839 = vpow2.f32 %v2012_v59 }
 0x7b0   :  { %v11080_v4 = vpop.eup %8821  ;;  %8841 = vpow2.f32 %v2014_v57 }
 0x7b1   :  { %2041 = vperm.xlu1 %8747, %v11071_v52   ;;  %v11084_v30 = vpop.eup %8823  ;;  %8843 = vpow2.f32 %v2016_v10 }
 0x7b2   :  { %2044 = vperm.xlu0 %8748, %v11075_v28   ;;  %v11088_v18 = vpop.eup %8825 }
 0x7b3   :  { %v11092_v3 = vpop.eup %8827 }
 0x7b4   :  { %v11095_v55 = vpop.eup %8829 }
 0x7b5   :  { %2047 = vperm.xlu1 %8747, %v11080_v4   ;;  %v11098_v40 = vpop.eup %8831 }
 0x7b6   :  { %2050 = vperm.xlu0 %8748, %v11084_v30   ;;  %v11101_v56 = vpop.eup %8833 }
 0x7b7   :  { %v11104_v43 = vpop.eup %8835 }
 0x7b8   :  { %v11107_v48 = vpop.eup %8837 }
 0x7b9   :  { %2053 = vperm.xlu1 %8747, %v11088_v18   ;;  %v11110_v31 = vpop.eup %8839 }
 0x7ba   :  { %2056 = vperm.xlu0 %8748, %v11092_v3   ;;  %v11113_v50 = vpop.eup %8841 }
 0x7bb   :  { %v11116_v16 = vpop.eup %8843 }
 0x7bd   :  { %2059 = vperm.xlu1 %8747, %v11095_v55  }
 0x7be   :  { %2062 = vperm.xlu0 %8748, %v11098_v40  }
 0x7c1   :  { %2065 = vperm.xlu1 %8747, %v11101_v56  }
 0x7c2   :  { %2068 = vperm.xlu0 %8748, %v11104_v43  }
 0x7c5   :  { %2071 = vperm.xlu1 %8747, %v11107_v48  }
 0x7c6   :  { %2074 = vperm.xlu0 %8748, %v11110_v31  }
 0x7c9   :  { %2077 = vperm.xlu1 %8747, %v11113_v50  }
 0x7ca   :  { %2080 = vperm.xlu0 %8748, %v11116_v16  }
 0x82c   :  { %v2039_v0 = vpop.permute.xlu1 %2038 }
 0x82d   :  { %v2036_v63 = vpop.permute.xlu0 %2035  ;;  %v2089_v38 = vrot.slane %v2039_v0, %v13621_v11 }
 0x82e   :  { %v2085_v58 = vrot.slane %v2036_v63, %v13622_v29 }
 0x830   :  { %v2042_v6 = vpop.permute.xlu1 %2041 }
 0x831   :  { %v2045_v35 = vpop.permute.xlu0 %2044  ;;  %v2094_v44 = vrot.slane %v2042_v6, %v13622_v29 }
 0x832   :  { %v2098_v57 = vrot.slane %v2045_v35, %v13621_v11 }
 0x834   :  { %v2048_v49 = vpop.permute.xlu1 %2047  ;;  %v2099_v35 = vsel %vm694_vm0, %v2098_v57, %v2094_v44 }
 0x835   :  { %v2051_v34 = vpop.permute.xlu0 %2050  ;;  %v2103_v10 = vrot.slane %v2048_v49, %v13622_v29 }
 0x836   :  { %v2107_v39 = vrot.slane %v2051_v34, %v13621_v11 }
 0x838   :  { %v2054_v60 = vpop.permute.xlu1 %2053  ;;  %v2108_v27 = vsel %vm694_vm0, %v2107_v39, %v2103_v10 }
 0x839   :  { %v2057_v53 = vpop.permute.xlu0 %2056  ;;  %v2112_v33 = vrot.slane %v2054_v60, %v13622_v29  ;;  %v2090_v60 = vsel %vm694_vm0, %v2089_v38, %v2085_v58 }
 0x83a   :  { %v2116_v17 = vrot.slane %v2057_v53, %v13621_v11 }
 0x83c   :  { %v2060_v36 = vpop.permute.xlu1 %2059  ;;  %v2117_v53 = vsel %vm694_vm0, %v2116_v17, %v2112_v33 }
 0x83d   :  { %v2063_v61 = vpop.permute.xlu0 %2062  ;;  %v2121_v32 = vrot.slane %v2060_v36, %v13622_v29 }
 0x83e   :  { %v2125_v1 = vrot.slane %v2063_v61, %v13621_v11  ;;  %v2154_v61 = vsel %vm759_vm1, %v2099_v35, %v2090_v60 }
 0x840   :  { %v2066_v59 = vpop.permute.xlu1 %2065  ;;  %v2126_v37 = vsel %vm694_vm0, %v2125_v1, %v2121_v32 }
 0x841   :  { %v2069_v24 = vpop.permute.xlu0 %2068  ;;  %v2130_v49 = vrot.slane %v2066_v59, %v13622_v29  ;;  %v2155_v59 = vsel %vm761_vm2, %v2108_v27, %v2154_v61 }
 0x842   :  { %v2134_v34 = vrot.slane %v2069_v24, %v13621_v11  ;;  %v2156_v57 = vsel %vm763_vm3, %v2117_v53, %v2155_v59 }
 0x843   :  { %v2157_v33 = vsel %vm765_vm4, %v2126_v37, %v2156_v57 }
 0x844   :  { %v2072_v6 = vpop.permute.xlu1 %2071  ;;  %v2135_v24 = vsel %vm694_vm0, %v2134_v34, %v2130_v49 }
 0x845   :  { %v2139_v0 = vrot.slane %v2072_v6, %v13622_v29  ;;  %v2075_v63 = vpop.permute.xlu0 %2074  ;;  %v2158_v58 = vsel %vm767_vm5, %v2135_v24, %v2157_v33 }
 0x846   :  { %v2143_v36 = vrot.slane %v2075_v63, %v13621_v11 }
 0x848   :  { %v2078_v44 = vpop.permute.xlu1 %2077  ;;  %v2144_v10 = vsel %vm694_vm0, %v2143_v36, %v2139_v0 }
 0x849   :  { %v2148_v39 = vrot.slane %v2078_v44, %v13622_v29  ;;  %v2081_v38 = vpop.permute.xlu0 %2080  ;;  %v2159_v1 = vsel %vm769_vm6, %v2144_v10, %v2158_v58 }
 0x84a   :  { %v2152_v17 = vrot.slane %v2081_v38, %v13621_v11 }
 0x84c   :  { %v2153_v32 = vsel %vm694_vm0, %v2152_v17, %v2148_v39 }
 0x84d   :  { %v2160_v27 = vsel %vm771_vm7, %v2153_v32, %v2159_v1 }
 0x84e   :  { %v2162_v6 = vsel %vm774_vm8, %v2160_v27, 0.0 }
 0x84f   :  { %2163 = vadd.xlane.f32.xlu1 %v2162_v6 }
 0x8dc   :  { %v2164_v35 = vpop.xlane.xlu1 %2163 }
 0x8dd   :  { %v2185_v49 = vrot.slane %v2164_v35, %v13623_v23  ;;  %v2169_v34 = vrot.slane %v2164_v35, %v13528_v42  ;;  %v2197_v37 = vrot.slane %v2164_v35, %v13626_v13  ;;  %v2173_v0 = vrot.slane %v2164_v35, %v13530_v12 }
 0x8de   :  { %v2177_v36 = vrot.slane %v2164_v35, %v13535_v5  ;;  %v2181_v57 = vrot.slane %v2164_v35, %v13533_v2 }
 0x8df   :  { %8845 = vrcp.f32 %v2185_v49 }
 0x8e0   :  { %8847 = vrcp.f32 %v2169_v34 }
 0x8e1   :  { %8849 = vrcp.f32 %v2197_v37 }
 0x8e2   :  { %8851 = vrcp.f32 %v2173_v0  ;;  %v9151_v0 = vld [vmem:[%s13172_s1 + $0x28] sm:$0xff] }
 0x8e3   :  { %8853 = vrcp.f32 %v2177_v36  ;;  %v9152_v36 = vld [vmem:[%s13172_s1 + $0x8] sm:$0xff] }
 0x8e4   :  { %8855 = vrcp.f32 %v2181_v57  ;;  %v9155_v57 = vld [vmem:[%s13172_s1 + $0x20] sm:$0xff] }
 0x8e9   :  { %v8846_v63 = vpop.eup %8845 }
 0x8ea   :  { %v8848_v60 = vpop.eup %8847  ;;  %v2220_v53 = vmul.f32 %v8846_v63, %v11098_v40 }
 0x8eb   :  { %v8850_v61 = vpop.eup %8849  ;;  %v2207_v44 = vmul.f32 %v8848_v60, %v11066_v41  ;;  %v2208_v24 = vmul.f32 %v8848_v60, %v11062_v46 }
 0x8ec   :  { %2277 = vperm.xlu1 %8747, %v2220_v53   ;;  %v2228_v59 = vmul.f32 %v8850_v61, %v11113_v50  ;;  %v8852_v39 = vpop.eup %8851  ;;  %v2189_v50 = vrot.slane %v2164_v35, %v13624_v62 }
 0x8ed   :  { %2232 = vperm.xlu0 %8748, %v2207_v44   ;;  %v2210_v10 = vmul.f32 %v8852_v39, %v11071_v52  ;;  %v2211_v40 = vmul.f32 %v8852_v39, %v11075_v28  ;;  %v8854_v38 = vpop.eup %8853  ;;  %v2193_v52 = vrot.slane %v2164_v35, %v13625_v7  ;;  %v2219_v28 = vmul.f32 %v8846_v63, %v11095_v55  ;;  %v7102_v55 = vld [vmem:[%s13174_s3 + $0x8] sm:$0xff]  ;;  %v9153_v44 = vld [vmem:[%s13172_s1 + $0x10] sm:$0xff] }
 0x8ee   :  { %v2213_v41 = vmul.f32 %v8854_v38, %v11080_v4  ;;  %v2214_v46 = vmul.f32 %v8854_v38, %v11084_v30  ;;  %v8856_v33 = vpop.eup %8855  ;;  %8857 = vrcp.f32 %v2189_v50  ;;  %2462 = vmatprep.mubr.f32.mxu0 %v7102_v55  ;;  %2533 = vmatprep.mubr.f32.mxu1 %v7102_v55 }
 0x8ef   :  { %v2216_v17 = vmul.f32 %v8856_v33, %v11088_v18  ;;  %v2217_v58 = vmul.f32 %v8856_v33, %v11092_v3  ;;  %8859 = vrcp.f32 %v2193_v52  ;;  %v2229_v3 = vmul.f32 %v8850_v61, %v11116_v16  ;;  %v9158_v33 = vld [vmem:[%s13172_s1 + $0x30] sm:$0xff]  ;;  %v9159_v52 = vld [vmem:[%s13172_s1 + $0x48] sm:$0xff] }
 0x8f0   :  { %2302 = vperm.xlu1 %8747, %v2228_v59  }
 0x8f1   :  { %2237 = vperm.xlu0 %8748, %v2208_v24   ;;  %v9154_v24 = vld [vmem:[%s13172_s1 + $0x38] sm:$0xff] }
 0x8f5   :  { %2242 = vperm.xlu0 %8748, %v2210_v10  }
 0x8f8   :  { %v8858_v4 = vpop.eup %8857 }
 0x8f9   :  { %2247 = vperm.xlu0 %8748, %v2211_v40   ;;  %v2222_v32 = vmul.f32 %v8858_v4, %v11101_v56  ;;  %v2223_v30 = vmul.f32 %v8858_v4, %v11104_v43  ;;  %v8860_v1 = vpop.eup %8859  ;;  %v9156_v40 = vld [vmem:[%s13172_s1 + $0x40] sm:$0xff] }
 0x8fa   :  { %v2225_v18 = vmul.f32 %v8860_v1, %v11107_v48  ;;  %v2226_v27 = vmul.f32 %v8860_v1, %v11110_v31  ;;  %v9150_v31 = vld [vmem:[%s13172_s1 + $0x18] sm:$0xff] }
 0x8fd   :  { %2252 = vperm.xlu0 %8748, %v2213_v41   ;;  %v9157_v41 = vld [vmem:[%s13172_s1] sm:$0xff] }
 0x901   :  { %2257 = vperm.xlu0 %8748, %v2214_v46  }
 0x905   :  { %2262 = vperm.xlu0 %8748, %v2216_v17  }
 0x909   :  { %2267 = vperm.xlu0 %8748, %v2217_v58  }
 0x90d   :  { %2272 = vperm.xlu0 %8748, %v2219_v28  }
 0x911   :  { %2282 = vperm.xlu0 %8748, %v2222_v32  }
 0x915   :  { %2287 = vperm.xlu0 %8748, %v2223_v30  }
 0x919   :  { %2292 = vperm.xlu0 %8748, %v2225_v18  }
 0x91d   :  { %2297 = vperm.xlu0 %8748, %v2226_v27  }
 0x921   :  { %2307 = vperm.xlu0 %8748, %v2229_v3  }
 0x96b   :  { %v2278_v53 = vpop.permute.xlu1 %2277 }
 0x96c   :  { %v2233_v56 = vpop.permute.xlu0 %2232  ;;  %v2319_v58 = vmul.f32 %v9159_v52, %v2278_v53  ;;  %v9164_v52 = vld [vmem:[%s13172_s1 + $0x70] sm:$0xff] }
 0x96d   :  { %v2310_v50 = vmul.f32 %v9157_v41, %v2233_v56 }
 0x970   :  { %v2238_v6 = vpop.permute.xlu0 %2237 }
 0x971   :  { %v2311_v61 = vmul.f32 %v9152_v36, %v2238_v6  ;;  %v9160_v6 = vld [vmem:[%s13172_s1 + $0x50] sm:$0xff] }
 0x973   :  { %v2326_v32 = vadd.f32 %v2311_v61, %v2310_v50 }
 0x974   :  { %v2243_v43 = vpop.permute.xlu0 %2242 }
 0x975   :  { %v2312_v59 = vmul.f32 %v9153_v44, %v2243_v43  ;;  %v2327_v55 = vrot.slane %v2326_v32, 4 }
 0x978   :  { %v2248_v35 = vpop.permute.xlu0 %2247 }
 0x979   :  { %v2313_v16 = vmul.f32 %v9150_v31, %v2248_v35  ;;  %v9161_v35 = vld [vmem:[%s13172_s1 + $0x58] sm:$0xff] }
 0x97b   :  { %v2333_v46 = vadd.f32 %v2313_v16, %v2312_v59 }
 0x97c   :  { %v2253_v49 = vpop.permute.xlu0 %2252 }
 0x97d   :  { %v2314_v10 = vmul.f32 %v9155_v57, %v2253_v49  ;;  %v2334_v18 = vrot.slane %v2333_v46, 4 }
 0x980   :  { %v2258_v34 = vpop.permute.xlu0 %2257 }
 0x981   :  { %v2315_v63 = vmul.f32 %v9151_v0, %v2258_v34  ;;  %v2328_v0 = vadd.f32 %v2327_v55, %v2326_v32 }
 0x983   :  { %v2340_v28 = vadd.f32 %v2315_v63, %v2314_v10  ;;  %v9162_v10 = vld [vmem:[%s13172_s1 + $0x60] sm:$0xff] }
 0x984   :  { %v2263_v48 = vpop.permute.xlu0 %2262 }
 0x985   :  { %v2316_v17 = vmul.f32 %v9158_v33, %v2263_v48  ;;  %v2341_v27 = vrot.slane %v2340_v28, 4  ;;  %v2335_v48 = vadd.f32 %v2334_v18, %v2333_v46  ;;  %v9165_v18 = vld [vmem:[%s13172_s1 + $0x78] sm:$0xff] }
 0x987   :  { %v2342_v31 = vadd.f32 %v2341_v27, %v2340_v28  ;;  %v2336_v36 = vrot.slane %v2335_v48, 2 }
 0x988   :  { %v2268_v37 = vpop.permute.xlu0 %2267 }
 0x989   :  { %v2317_v39 = vmul.f32 %v9154_v24, %v2268_v37  ;;  %v2343_v44 = vrot.slane %v2342_v31, 2  ;;  %v2303_v24 = vpop.permute.xlu1 %2302  ;;  %v2337_v46 = vadd.f32 %v2336_v36, %v2335_v48 }
 0x98b   :  { %v2347_v30 = vadd.f32 %v2317_v39, %v2316_v17  ;;  %v2329_v39 = vrot.slane %v2328_v0, 2  ;;  %v2344_v28 = vadd.f32 %v2343_v44, %v2342_v31  ;;  %v2338_v55 = vrot.slane %v2337_v46, 1 }
 0x98c   :  { %v2273_v60 = vpop.permute.xlu0 %2272 }
 0x98d   :  { %v2318_v38 = vmul.f32 %v9156_v40, %v2273_v60  ;;  %v2348_v56 = vrot.slane %v2347_v30, 4  ;;  %v2330_v32 = vadd.f32 %v2329_v39, %v2328_v0 }
 0x98f   :  { %v2354_v1 = vadd.f32 %v2319_v58, %v2318_v38  ;;  %v2349_v63 = vadd.f32 %v2348_v56, %v2347_v30  ;;  %v9163_v38 = vld [vmem:[%s13172_s1 + $0x68] sm:$0xff]  ;;  %v2324_v58 = vmul.f32 %v9164_v52, %v2303_v24 }
 0x990   :  { %v2283_v4 = vpop.permute.xlu0 %2282 }
 0x991   :  { %v2320_v43 = vmul.f32 %v9160_v6, %v2283_v4  ;;  %v2355_v34 = vrot.slane %v2354_v1, 4  ;;  %v2350_v57 = vrot.slane %v2349_v63, 2 }
 0x993   :  { %v2356_v53 = vadd.f32 %v2355_v34, %v2354_v1  ;;  %v2351_v30 = vadd.f32 %v2350_v57, %v2349_v63 }
 0x994   :  { %v2288_v3 = vpop.permute.xlu0 %2287 }
 0x995   :  { %v2321_v49 = vmul.f32 %v9161_v35, %v2288_v3  ;;  %v2357_v50 = vrot.slane %v2356_v53, 2  ;;  %v2345_v35 = vrot.slane %v2344_v28, 1  ;;  %v2352_v34 = vrot.slane %v2351_v30, 1 }
 0x997   :  { %v2361_v37 = vadd.f32 %v2321_v49, %v2320_v43  ;;  %v2358_v3 = vadd.f32 %v2357_v50, %v2356_v53  ;;  %v2331_v49 = vrot.slane %v2330_v32, 1  ;;  %v2346_v36 = vadd.f32 %v2345_v35, %v2344_v28  ;;  %v13627_v28 = vld [vmem:[#allocation31_spill] sm:$0xff]  ;;  %v13639_v35 = vld [vmem:[#allocation40_spill] sm:$0xff] }
 0x998   :  { %v2293_v16 = vpop.permute.xlu0 %2292 }
 0x999   :  { %v2362_v60 = vrot.slane %v2361_v37, 4  ;;  %v2322_v40 = vmul.f32 %v9162_v10, %v2293_v16  ;;  %v2359_v31 = vrot.slane %v2358_v3, 1  ;;  %v2339_v16 = vadd.f32 %v2338_v55, %v2337_v46  ;;  %v13635_v55 = vld [vmem:[#allocation37_spill] sm:$0xff] }
 0x99a   :  { %v2332_v44 = vadd.f32 %v2331_v49, %v2330_v32  ;;  %v13629_v32 = vld [vmem:[#allocation33_spill] sm:$0xff]  ;;  %v13640_v49 = vld [vmem:[#allocation12_spill] sm:$0xff] }
 0x99b   :  { %v2363_v61 = vadd.f32 %v2362_v60, %v2361_v37  ;;  %v2360_v53 = vadd.f32 %v2359_v31, %v2358_v3  ;;  %v13634_v3 = vld [vmem:[#allocation9_spill] sm:$0xff]  ;;  %v13644_v31 = vmov 0.0|0.0  }
 0x99c   :  { %v2298_v59 = vpop.permute.xlu0 %2297 }
 0x99d   :  { %v2323_v41 = vmul.f32 %v9163_v38, %v2298_v59  ;;  %v2364_v33 = vrot.slane %v2363_v61, 2  ;;  %v2353_v59 = vadd.f32 %v2352_v34, %v2351_v30  ;;  %v13630_v30 = vld [vmem:[#allocation7_spill] sm:$0xff]  ;;  %v13641_v34 = vld [vmem:[#allocation42_spill] sm:$0xff] }
 0x99f   :  { %v2368_v17 = vadd.f32 %v2323_v41, %v2322_v40  ;;  %v2365_v56 = vadd.f32 %v2364_v33, %v2363_v61  ;;  %v2390_v61 = vsel %vm759_vm1, %v2339_v16, %v2332_v44  ;;  %v13645_v16 = vld [vmem:[#allocation45_spill] sm:$0xff] }
 0x9a0   :  { %v2308_v4 = vpop.permute.xlu0 %2307  ;;  %v2391_v40 = vsel %vm761_vm2, %v2346_v36, %v2390_v61  ;;  %v13647_v44 = vld [vmem:[#allocation113_spill] sm:$0xff] }
 0x9a1   :  { %v2369_v1 = vrot.slane %v2368_v17, 4  ;;  %v2325_v27 = vmul.f32 %v9165_v18, %v2308_v4  ;;  %v2366_v0 = vrot.slane %v2365_v56, 1  ;;  %v2392_v50 = vsel %vm763_vm3, %v2353_v59, %v2391_v40  ;;  %v13628_v4 = vld [vmem:[#allocation6_spill] sm:$0xff]  ;;  %v13632_v18 = vld [vmem:[#allocation8_spill] sm:$0xff]  ;;  %v13650_v40 = vld [vmem:[#allocation17_spill] sm:$0xff] }
 0x9a2   :  { %v2393_v46 = vsel %vm765_vm4, %v2360_v53, %v2392_v50  ;;  %v13648_v53 = vld [vmem:[#allocation111_spill] sm:$0xff] }
 0x9a3   :  { %v2370_v6 = vadd.f32 %v2369_v1, %v2368_v17  ;;  %v2375_v43 = vadd.f32 %v2325_v27, %v2324_v58  ;;  %v2367_v57 = vadd.f32 %v2366_v0, %v2365_v56  ;;  %v13631_v1 = vld [vmem:[#allocation34_spill] sm:$0xff]  ;;  %v13633_v27 = vld [vmem:[#allocation36_spill] sm:$0xff] }
 0x9a4   :  { %v13636_v56 = vld [vmem:[#allocation10_spill] sm:$0xff] }
 0x9a5   :  { %v2371_v48 = vrot.slane %v2370_v6, 2  ;;  %v2376_v37 = vrot.slane %v2375_v43, 4  ;;  %v2394_v17 = vsel %vm767_vm5, %v2367_v57, %v2393_v46  ;;  %v13649_v57 = vld [vmem:[#allocation114_spill] sm:$0xff] }
 0x9a7   :  { %v2372_v63 = vadd.f32 %v2371_v48, %v2370_v6  ;;  %v2377_v60 = vadd.f32 %v2376_v37, %v2375_v43  ;;  %v13637_v6 = vld [vmem:[#allocation39_spill] sm:$0xff]  ;;  %v13642_v48 = vld [vmem:[#allocation13_spill] sm:$0xff] }
 0x9a8   :  { %v13638_v43 = vld [vmem:[#allocation11_spill] sm:$0xff] }
 0x9a9   :  { %v2373_v24 = vrot.slane %v2372_v63, 1  ;;  %v2378_v39 = vrot.slane %v2377_v60, 2  ;;  %v13643_v37 = vld [vmem:[#allocation43_spill] sm:$0xff] }
 0x9ab   :  { %v2379_v10 = vadd.f32 %v2378_v39, %v2377_v60  ;;  %v2374_v38 = vadd.f32 %v2373_v24, %v2372_v63  ;;  %v13646_v60 = vld [vmem:[#allocation112_spill] sm:$0xff] }
 0x9ad   :  { %v2380_v41 = vrot.slane %v2379_v10, 1  ;;  %v2395_v52 = vsel %vm769_vm6, %v2374_v38, %v2394_v17  ;;  %v13652_v17 = vld [vmem:[#allocation16_spill] sm:$0xff] }
 0x9af   :  { %v2381_v33 = vadd.f32 %v2380_v41, %v2379_v10  ;;  %v13651_v41 = vld [vmem:[#allocation20_spill] sm:$0xff] }
 0x9b1   :  { %v2396_v58 = vsel %vm771_vm7, %v2381_v33, %v2395_v52 }
 0x9b2   :  { %2463 = vmatmul.mubr.f32.vlgmr.msra.gmra.mrb[8].mxu0 %v2396_v58  ;;  %2534 = vmatmul.mubr.f32.vlgmr.msra.gmra.mrb[8].mxu1 %v2396_v58 }
 0x9b3   :  { %7880 = vmatpush1.bf16.msra.mxu0 %v9388_v8  ;;  %7912 = vmatpush1.bf16.msra.mxu1 %v9844_v19 }
 0x9b4   :  { %7882 = vmatprep.subr.bf16.mxu0 %v9390_v9  ;;  %7914 = vmatprep.subr.bf16.mxu1 %v9858_v22 }
 0x9b5   :  { %2643 = vmatprep.mubr.f32.mxu0 %v13458_v51  ;;  %2714 = vmatprep.mubr.f32.mxu1 %v13458_v51 }
 0x9b7   :  { %7884 = vmatpush1.bf16.msra.mxu0 %v9406_v14  ;;  %7916 = vmatpush1.bf16.msra.mxu1 %v9871_v45 }
 0x9b8   :  { %7886 = vmatprep.subr.bf16.mxu0 %v9409_v15  ;;  %7918 = vmatprep.subr.bf16.mxu1 %v9886_v25 }
 0x9bb   :  { %7888 = vmatpush1.bf16.msra.mxu0 %v9424_v20  ;;  %7920 = vmatpush1.bf16.msra.mxu1 %v9905_v47 }
 0x9bc   :  { %7890 = vmatprep.subr.bf16.mxu0 %v9427_v21  ;;  %7922 = vmatprep.subr.bf16.mxu1 %v9914_v54 }
 0x9bf   :  { %7892 = vmatpush1.bf16.msra.mxu0 %v9442_v26  ;;  %7924 = vmatpush1.bf16.msra.mxu1 %v13627_v28 }
 0x9c0   :  { %7894 = vmatprep.subr.bf16.mxu0 %v13628_v4  ;;  %7926 = vmatprep.subr.bf16.mxu1 %v13629_v32 }
 0x9c3   :  { %7896 = vmatpush1.bf16.msra.mxu0 %v13630_v30  ;;  %7928 = vmatpush1.bf16.msra.mxu1 %v13631_v1 }
 0x9c4   :  { %7898 = vmatprep.subr.bf16.mxu0 %v13632_v18  ;;  %7930 = vmatprep.subr.bf16.mxu1 %v13633_v27 }
 0x9c7   :  { %7900 = vmatpush1.bf16.msra.mxu0 %v13634_v3  ;;  %7932 = vmatpush1.bf16.msra.mxu1 %v13635_v55 }
 0x9c8   :  { %7902 = vmatprep.subr.bf16.mxu0 %v13636_v56  ;;  %7934 = vmatprep.subr.bf16.mxu1 %v13637_v6 }
 0x9cb   :  { %7904 = vmatpush1.bf16.msra.mxu0 %v13638_v43  ;;  %7936 = vmatpush1.bf16.msra.mxu1 %v13639_v35 }
 0x9cc   :  { %7906 = vmatprep.subr.bf16.mxu0 %v13640_v49  ;;  %7938 = vmatprep.subr.bf16.mxu1 %v13641_v34 }
 0x9cf   :  { %7908 = vmatpush1.bf16.msra.mxu0 %v13642_v48  ;;  %7940 = vmatpush1.bf16.msra.mxu1 %v13643_v37 }
 0x9d0   :  { %7941 = vmatprep.subr.bf16.mxu0 %v13644_v31  ;;  %7966 = vmatprep.subr.bf16.mxu1 %v13645_v16 }
 0xa85   :  { %v2464_v0 = vpop.f32.mrb[8].mxu0  ;;  %v2535_v63 = vpop.f32.mrb[8].mxu1 }
 0xa86   :  { %v2465_v36 = vadd.f32 %v2464_v0, %v13646_v60  ;;  %v2536_v59 = vadd.f32 %v2535_v63, %v13647_v44  ;;  %v2466_v24 = vpop.f32.mrb[9].mxu0  ;;  %v2537_v39 = vpop.f32.mrb[9].mxu1  ;;  %v13653_v0 = vld [vmem:[#allocation25_spill] sm:$0xff] }
 0xa87   :  { %v2467_v61 = vadd.f32 %v2466_v24, %v13648_v53  ;;  %v2538_v10 = vadd.f32 %v2537_v39, %v13649_v57 }
 0xa88   :  { %v2540_v38 = vadd.f32 %v2465_v36, %v13650_v40  ;;  %v2542_v60 = vadd.f32 %v2536_v59, %v13653_v0 }
 0xa89   :  { %v2541_v50 = vadd.f32 %v2467_v61, %v13651_v41  ;;  %v2543_v52 = vadd.f32 %v2538_v10, %v13652_v17  ;;  %v2568_v61 = vstv %s7101_s14  ;;  %v13654_v10 = vld [vmem:[#allocation109_spill] sm:$0xff] }
 0xa8a   :  { %v7106_v46 = vmul.f32 -1.442695, %v2540_v38 }
 0xa8b   :  { %v7107_v33 = vmul.f32 -1.442695, %v2541_v50  ;;  %v7108_v58 = vmul.f32 -1.442695, %v2543_v52 }
 0xa8c   :  { %8861 = vpow2.f32 %v7106_v46 }
 0xa8d   :  { %8863 = vpow2.f32 %v7107_v33  ;;  %v13655_v33 = vld [vmem:[#allocation14_spill] sm:$0xff] }
 0xa8e   :  { %8865 = vpow2.f32 %v7108_v58  ;;  %vm2569_vm11 = vcmp.lt.s32.totalorder %v13655_v33, %v2568_v61  ;;  %v13663_v61 = vld [vmem:[#allocation49_spill] sm:$0xff] }
 0xa8f   :  { %8867 = vtanh.f32 %v2542_v60 }
 0xa96   :  { %v8862_v63 = vpop.eup %8861 }
 0xa97   :  { %v8864_v44 = vpop.eup %8863  ;;  %v2547_v16 = vadd.f32 1.0, %v8862_v63  ;;  %v13673_v63 = vld [vmem:[#allocation35_spill] sm:$0xff] }
 0xa98   :  { %v2553_v24 = vadd.f32 1.0, %v8864_v44  ;;  %v8866_v36 = vpop.eup %8865  ;;  %v13658_v44 = vld [vmem:[#allocation110_spill] sm:$0xff] }
 0xa99   :  { %8869 = vrcp.f32 %v2547_v16  ;;  %v8868_v39 = vpop.eup %8867  ;;  %v2560_v50 = vadd.f32 1.0, %v8866_v36 }
 0xa9a   :  { %8871 = vrcp.f32 %v2553_v24  ;;  %v13659_v24 = vsel %vm10784_vm10, %v13658_v44, 0.0  ;;  %v13674_v44 = vld [vmem:[#allocation63_spill] sm:$0xff] }
 0xa9b   :  { %8873 = vrcp.f32 %v2560_v50  ;;  %v13666_v50 = vld [vmem:[#allocation53_spill] sm:$0xff] }
 0xaa3   :  { %v8870_v53 = vpop.eup %8869 }
 0xaa4   :  { %v8872_v57 = vpop.eup %8871  ;;  %v2564_v38 = vmul.f32 %v8870_v53, %v8868_v39  ;;  %v13661_v39 = vld [vmem:[#allocation28_spill] sm:$0xff]  ;;  %v13662_v53 = vld [vmem:[#allocation47_spill] sm:$0xff] }
 0xaa5   :  { %v2563_v46 = vmul.f32 %v8872_v57, %v13654_v10  ;;  %v8874_v16 = vpop.eup %8873  ;;  %v13664_v57 = vld [vmem:[#allocation29_spill] sm:$0xff] }
 0xaa7   :  { %v2565_v59 = vadd.f32 %v2564_v38, %v2563_v46  ;;  %v13665_v38 = vld [vmem:[#allocation51_spill] sm:$0xff] }
 0xaa8   :  { %v13668_v46 = vld [vmem:[#allocation55_spill] sm:$0xff] }
 0xaa9   :  { %8875 = vtanh.f32 %v2565_v59  ;;  %v11278_v52 = vsel %vm2569_vm11, %v2565_v59, %v13654_v10  ;;  %v13667_v10 = vld [vmem:[#allocation30_spill] sm:$0xff]  ;;  %v13669_v59 = vld [vmem:[#allocation57_spill] sm:$0xff] }
 0xaaa   :  { %13656 = vst [vmem:[#allocation18_spill] sm:$0xff] %v11278_v52  ;;  %v9169_v52 = vld [vmem:[%s13173_s2 + $0x10] sm:$0xff] }
 0xab3   :  { %v8876_v58 = vpop.eup %8875 }
 0xab4   :  { %v2567_v60 = vmul.f32 %v8876_v58, %v8874_v16  ;;  %v13670_v16 = vld [vmem:[#allocation32_spill] sm:$0xff]  ;;  %v13671_v58 = vld [vmem:[#allocation59_spill] sm:$0xff] }
 0xab6   :  { %7109 = vst [vmem:[%s13179_s8 + $0x8] sm:$0xff] %v2567_v60  ;;  %v11287_v36 = vsel %vm2569_vm11, %v2567_v60, %v13659_v24  ;;  %v13672_v60 = vld [vmem:[#allocation61_spill] sm:$0xff] }
 0xab7   :  { %13660 = vst [vmem:[#allocation19_spill] sm:$0xff] %v11287_v36  ;;  %2644 = vmatmul.mubr.f32.vlgmr.msra.gmra.mrb[10].mxu0 %v11287_v36  ;;  %2715 = vmatmul.mubr.f32.vlgmr.msra.gmra.mrb[10].mxu1 %v11287_v36  ;;  %v13675_v24 = vld [vmem:[#allocation65_spill] sm:$0xff] }
 0xab8   :  { %7943 = vmatpush3.bf16.msra.mxu0 %v13661_v39  ;;  %7337 = vmatprep.mubr.msk.f32.mxu0 %vm9317_vm9, %v13458_v51 }
 0xab9   :  { %7944 = vmatprep.subr.bf16.mxu0 %v13644_v31  ;;  %7968 = vmatpush1.bf16.msra.mxu1 %v13662_v53 }
 0xaba   :  { %7970 = vmatprep.subr.bf16.mxu1 %v13663_v61 }
 0xabc   :  { %7946 = vmatpush3.bf16.msra.mxu0 %v13664_v57  ;;  %v13735_v57 = vld [vmem:[#allocation15_spill] sm:$0xff] }
 0xabd   :  { %7947 = vmatprep.subr.bf16.mxu0 %v13644_v31  ;;  %7972 = vmatpush1.bf16.msra.mxu1 %v13665_v38  ;;  %v13696_v38 = vld [vmem:[#allocation87_spill] sm:$0xff] }
 0xabe   :  { %7974 = vmatprep.subr.bf16.mxu1 %v13666_v50  ;;  %v13689_v50 = vld [vmem:[#allocation81_spill] sm:$0xff] }
 0xac0   :  { %7949 = vmatpush3.bf16.msra.mxu0 %v13667_v10  ;;  %v13676_v10 = vld [vmem:[#allocation38_spill] sm:$0xff] }
 0xac1   :  { %7950 = vmatprep.subr.bf16.mxu0 %v13644_v31  ;;  %7976 = vmatpush1.bf16.msra.mxu1 %v13668_v46  ;;  %v13679_v46 = vld [vmem:[#allocation41_spill] sm:$0xff] }
 0xac2   :  { %7978 = vmatprep.subr.bf16.mxu1 %v13669_v59  ;;  %v13677_v59 = vld [vmem:[#allocation67_spill] sm:$0xff] }
 0xac4   :  { %7952 = vmatpush3.bf16.msra.mxu0 %v13670_v16  ;;  %v13678_v16 = vld [vmem:[#allocation69_spill] sm:$0xff] }
 0xac5   :  { %7953 = vmatprep.subr.bf16.mxu0 %v13644_v31  ;;  %7980 = vmatpush1.bf16.msra.mxu1 %v13671_v58  ;;  %v13682_v58 = vld [vmem:[#allocation44_spill] sm:$0xff] }
 0xac6   :  { %7982 = vmatprep.subr.bf16.mxu1 %v13672_v60  ;;  %v13680_v60 = vld [vmem:[#allocation71_spill] sm:$0xff] }
 0xac8   :  { %7955 = vmatpush3.bf16.msra.mxu0 %v13673_v63  ;;  %v13681_v63 = vld [vmem:[#allocation73_spill] sm:$0xff] }
 0xac9   :  { %7956 = vmatprep.subr.bf16.mxu0 %v13644_v31  ;;  %7984 = vmatpush1.bf16.msra.mxu1 %v13674_v44  ;;  %v13683_v44 = vld [vmem:[#allocation46_spill] sm:$0xff] }
 0xaca   :  { %7986 = vmatprep.subr.bf16.mxu1 %v13675_v24  ;;  %v13684_v24 = vld [vmem:[#allocation75_spill] sm:$0xff] }
 0xacc   :  { %7958 = vmatpush3.bf16.msra.mxu0 %v13676_v10  ;;  %v13685_v10 = vld [vmem:[#allocation77_spill] sm:$0xff] }
 0xacd   :  { %7959 = vmatprep.subr.bf16.mxu0 %v13644_v31  ;;  %7988 = vmatpush1.bf16.msra.mxu1 %v13677_v59  ;;  %v13686_v59 = vld [vmem:[#allocation48_spill] sm:$0xff] }
 0xace   :  { %7990 = vmatprep.subr.bf16.mxu1 %v13678_v16  ;;  %v13687_v16 = vld [vmem:[#allocation50_spill] sm:$0xff] }
 0xad0   :  { %7961 = vmatpush3.bf16.msra.mxu0 %v13679_v46  ;;  %v13688_v46 = vld [vmem:[#allocation79_spill] sm:$0xff] }
 0xad1   :  { %7962 = vmatprep.subr.bf16.mxu0 %v13644_v31  ;;  %7992 = vmatpush1.bf16.msra.mxu1 %v13680_v60  ;;  %v13690_v60 = vld [vmem:[#allocation52_spill] sm:$0xff] }
 0xad2   :  { %7994 = vmatprep.subr.bf16.mxu1 %v13681_v63  ;;  %v13691_v63 = vld [vmem:[#allocation54_spill] sm:$0xff] }
 0xad4   :  { %7964 = vmatpush3.bf16.msra.mxu0 %v13682_v58  ;;  %v13692_v58 = vld [vmem:[#allocation83_spill] sm:$0xff] }
 0xad5   :  { %8030 = vmatprep.subr.bf16.mxu0 %v13683_v44  ;;  %7996 = vmatpush1.bf16.msra.mxu1 %v13684_v24  ;;  %v13693_v44 = vld [vmem:[#allocation85_spill] sm:$0xff]  ;;  %v13694_v24 = vld [vmem:[#allocation56_spill] sm:$0xff] }
 0xad6   :  { %7998 = vmatprep.subr.bf16.mxu1 %v13685_v10  ;;  %v13695_v10 = vld [vmem:[#allocation58_spill] sm:$0xff] }
 0xad7   :  { %7338 = vmatmul.mubr.f32.vlgmr.msra.gmra.mrb[12].mxu0 %v11287_v36  ;;  %v9166_v36 = vld [vmem:[%s13173_s2 + $0x8] sm:$0xff] }
 0xad8   :  { %8032 = vmatpush1.bf16.msra.mxu0 %v13686_v59  ;;  %v13697_v59 = vld [vmem:[#allocation89_spill] sm:$0xff] }
 0xad9   :  { %8034 = vmatprep.subr.bf16.mxu0 %v13687_v16  ;;  %8000 = vmatpush1.bf16.msra.mxu1 %v13688_v46  ;;  %v13698_v16 = vld [vmem:[#allocation60_spill] sm:$0xff]  ;;  %v13699_v46 = vld [vmem:[#allocation62_spill] sm:$0xff] }
 0xada   :  { %8002 = vmatprep.subr.bf16.mxu1 %v13689_v50  ;;  %v13700_v50 = vld [vmem:[#allocation91_spill] sm:$0xff] }
 0xadc   :  { %8036 = vmatpush1.bf16.msra.mxu0 %v13690_v60  ;;  %v13701_v60 = vld [vmem:[#allocation93_spill] sm:$0xff] }
 0xadd   :  { %8038 = vmatprep.subr.bf16.mxu0 %v13691_v63  ;;  %8004 = vmatpush1.bf16.msra.mxu1 %v13692_v58  ;;  %v13702_v63 = vld [vmem:[#allocation64_spill] sm:$0xff]  ;;  %v13703_v58 = vld [vmem:[#allocation66_spill] sm:$0xff] }
 0xade   :  { %8006 = vmatprep.subr.bf16.mxu1 %v13693_v44  ;;  %v13704_v44 = vld [vmem:[#allocation95_spill] sm:$0xff] }
 0xae0   :  { %8040 = vmatpush1.bf16.msra.mxu0 %v13694_v24  ;;  %v13705_v24 = vld [vmem:[#allocation97_spill] sm:$0xff] }
 0xae1   :  { %8042 = vmatprep.subr.bf16.mxu0 %v13695_v10  ;;  %8008 = vmatpush1.bf16.msra.mxu1 %v13696_v38  ;;  %v13706_v10 = vld [vmem:[#allocation68_spill] sm:$0xff]  ;;  %v13707_v38 = vld [vmem:[#allocation70_spill] sm:$0xff] }
 0xae2   :  { %8010 = vmatprep.subr.bf16.mxu1 %v13697_v59  ;;  %v13708_v59 = vld [vmem:[#allocation99_spill] sm:$0xff] }
 0xae4   :  { %8044 = vmatpush1.bf16.msra.mxu0 %v13698_v16  ;;  %v13709_v16 = vld [vmem:[#allocation101_spill] sm:$0xff] }
 0xae5   :  { %8046 = vmatprep.subr.bf16.mxu0 %v13699_v46  ;;  %8012 = vmatpush1.bf16.msra.mxu1 %v13700_v50  ;;  %v13710_v46 = vld [vmem:[#allocation72_spill] sm:$0xff]  ;;  %v13711_v50 = vld [vmem:[#allocation74_spill] sm:$0xff] }
 0xae6   :  { %8014 = vmatprep.subr.bf16.mxu1 %v13701_v60  ;;  %v13712_v60 = vld [vmem:[#allocation103_spill] sm:$0xff] }
 0xae8   :  { %8048 = vmatpush1.bf16.msra.mxu0 %v13702_v63  ;;  %v13713_v63 = vld [vmem:[#allocation105_spill] sm:$0xff] }
 0xae9   :  { %8050 = vmatprep.subr.bf16.mxu0 %v13703_v58  ;;  %8016 = vmatpush1.bf16.msra.mxu1 %v13704_v44  ;;  %v13714_v58 = vld [vmem:[#allocation76_spill] sm:$0xff]  ;;  %v13715_v44 = vld [vmem:[#allocation78_spill] sm:$0xff] }
 0xaea   :  { %8018 = vmatprep.subr.bf16.mxu1 %v13705_v24  ;;  %v13716_v24 = vld [vmem:[#allocation107_spill] sm:$0xff] }
 0xaec   :  { %8052 = vmatpush1.bf16.msra.mxu0 %v13706_v10  ;;  %v13717_v10 = vld [vmem:[#allocation5_spill] sm:$0xff] }
 0xaed   :  { %8054 = vmatprep.subr.bf16.mxu0 %v13707_v38  ;;  %8020 = vmatpush1.bf16.msra.mxu1 %v13708_v59  ;;  %v13718_v38 = vld [vmem:[#allocation80_spill] sm:$0xff]  ;;  %v13719_v59 = vld [vmem:[#allocation82_spill] sm:$0xff] }
 0xaee   :  { %8022 = vmatprep.subr.bf16.mxu1 %v13709_v16  ;;  %v13720_v16 = vld [vmem:[#allocation84_spill] sm:$0xff] }
 0xaf0   :  { %8056 = vmatpush1.bf16.msra.mxu0 %v13710_v46  ;;  %v13721_v46 = vld [vmem:[#allocation86_spill] sm:$0xff] }
 0xaf1   :  { %8058 = vmatprep.subr.bf16.mxu0 %v13711_v50  ;;  %8024 = vmatpush1.bf16.msra.mxu1 %v13712_v60  ;;  %v13722_v50 = vld [vmem:[#allocation88_spill] sm:$0xff]  ;;  %v13723_v60 = vld [vmem:[#allocation90_spill] sm:$0xff] }
 0xaf2   :  { %8026 = vmatprep.subr.bf16.mxu1 %v13713_v63  ;;  %v13724_v63 = vld [vmem:[#allocation92_spill] sm:$0xff] }
 0xaf4   :  { %8060 = vmatpush1.bf16.msra.mxu0 %v13714_v58  ;;  %v13725_v58 = vld [vmem:[#allocation94_spill] sm:$0xff] }
 0xaf5   :  { %8062 = vmatprep.subr.bf16.mxu0 %v13715_v44  ;;  %8028 = vmatpush1.bf16.msra.mxu1 %v13716_v24  ;;  %v13726_v44 = vld [vmem:[#allocation96_spill] sm:$0xff]  ;;  %v13727_v24 = vld [vmem:[#allocation98_spill] sm:$0xff] }
 0xaf6   :  { %8094 = vmatprep.subr.bf16.mxu1 %v13717_v10  ;;  %v13728_v10 = vld [vmem:[#allocation100_spill] sm:$0xff] }
 0xaf8   :  { %8064 = vmatpush1.bf16.msra.mxu0 %v13718_v38  ;;  %v13729_v38 = vld [vmem:[#allocation102_spill] sm:$0xff] }
 0xaf9   :  { %8066 = vmatprep.subr.bf16.mxu0 %v13719_v59  ;;  %v13730_v59 = vld [vmem:[#allocation104_spill] sm:$0xff] }
 0xafc   :  { %8068 = vmatpush1.bf16.msra.mxu0 %v13720_v16  ;;  %v13731_v16 = vld [vmem:[#allocation106_spill] sm:$0xff] }
 0xafd   :  { %8070 = vmatprep.subr.bf16.mxu0 %v13721_v46  ;;  %v13732_v46 = vld [vmem:[#allocation108_spill] sm:$0xff] }
 0xb00   :  { %8072 = vmatpush1.bf16.msra.mxu0 %v13722_v50  ;;  %v13733_v50 = vld [vmem:[#allocation27_spill] sm:$0xff] }
 0xb01   :  { %8074 = vmatprep.subr.bf16.mxu0 %v13723_v60 }
 0xb04   :  { %8076 = vmatpush1.bf16.msra.mxu0 %v13724_v63 }
 0xb05   :  { %8078 = vmatprep.subr.bf16.mxu0 %v13725_v58 }
 0xb08   :  { %8080 = vmatpush1.bf16.msra.mxu0 %v13726_v44 }
 0xb09   :  { %8082 = vmatprep.subr.bf16.mxu0 %v13727_v24 }
 0xb0c   :  { %8084 = vmatpush1.bf16.msra.mxu0 %v13728_v10 }
 0xb0d   :  { %8086 = vmatprep.subr.bf16.mxu0 %v13729_v38 }
 0xb10   :  { %8088 = vmatpush1.bf16.msra.mxu0 %v13730_v59 }
 0xb11   :  { %8090 = vmatprep.subr.bf16.mxu0 %v13731_v16 }
 0xb14   :  { %8092 = vmatpush1.bf16.msra.mxu0 %v13732_v46 }
 0xb15   :  { %8126 = vmatprep.subr.bf16.mxu0 %v13733_v50 }
 0xb8a   :  { %v2645_v60 = vpop.f32.mrb[10].mxu0  ;;  %v11374_v63 = vpop.f32.mrb[10].mxu1 }
 0xb8b   :  { %13734 = vst [vmem:[#allocation26_spill] sm:$0xff] %v11374_v63  ;;  %v2792_v58 = vcombine.high %v2645_v60, %v2645_v60  ;;  %v2799_v44 = vrot.slane %v2645_v60, %v13735_v57  ;;  %v11377_v61 = vpop.f32.mrb[11].mxu0  ;;  %v11379_v24 = vpop.f32.mrb[11].mxu1 }
 0xb8c   :  { %13736 = vst [vmem:[#allocation21_spill] sm:$0xff] %v11377_v61  ;;  %13737 = vst [vmem:[#allocation22_spill] sm:$0xff] %v11379_v24 }
 0xb8d   :  { %v2806_v38 = vrot.slane %v2792_v58, %v13735_v57  ;;  %v2807_v10 = vcombine.high %v2799_v44, %v2799_v44  ;;  %v2815_v59 = vrot.slane %v2799_v44, %v13735_v57  ;;  %v9167_v58 = vld [vmem:[%s13173_s2] sm:$0xff] }
 0xb8f   :  { %v2829_v16 = vrot.slane %v2807_v10, %v13735_v57  ;;  %v2837_v46 = vcombine.high %v2815_v59, %v2815_v59  ;;  %v2844_v50 = vrot.slane %v2815_v59, %v13528_v42  ;;  %v2822_v53 = vrot.slane %v2806_v38, %v13735_v57  ;;  %v9168_v10 = vld [vmem:[%s13173_s2 + $0x18] sm:$0xff] }
 0xb90   :  { %v2808_v0 = vcombine.high %v2806_v38, %v2806_v38 }
 0xb91   :  { %v2848_v39 = vrot.slane %v2829_v16, %v13528_v42  ;;  %v2852_v60 = vrot.slane %v2837_v46, %v13528_v42  ;;  %v2882_v33 = vadd.f32 %v9166_v36, %v2844_v50  ;;  %v2881_v44 = vadd.f32 %v9167_v58, %v2844_v50  ;;  %v9170_v50 = vld [vmem:[%s13173_s2 + $0x28] sm:$0xff] }
 0xb92   :  { %v2839_v40 = vcombine.high %v2829_v16, %v2829_v16  ;;  %v2860_v36 = vrot.slane %v2822_v53, %v13528_v42 }
 0xb93   :  { %v2884_v59 = vadd.f32 %v9168_v10, %v2848_v39  ;;  %v2883_v46 = vadd.f32 %v9169_v52, %v2848_v39  ;;  %v2898_v17 = vmax.f32 %v2882_v33, 0.0  ;;  %v2897_v41 = vmax.f32 %v2881_v44, 0.0  ;;  %v9171_v10 = vld [vmem:[%s13173_s2 + $0x20] sm:$0xff] }
 0xb94   :  { %v2886_v58 = vadd.f32 %v9170_v50, %v2852_v60  ;;  %v2885_v63 = vadd.f32 %v9171_v10, %v2852_v60  ;;  %v11410_v52 = vld [vmem:[%s13176_s5] ss:$0 sm:$0xff]  ;;  %v2836_v44 = vrot.slane %v2808_v0, %v13735_v57  ;;  %v9173_v50 = vld [vmem:[%s13173_s2 + $0x48] sm:$0xff]  ;;  %v2838_v0 = vcombine.high %v2822_v53, %v2822_v53 }
 0xb95   :  { %v2914_v33 = vmul.f32 %v11410_v52, %v2898_v17  ;;  %v2913_v39 = vmul.f32 %v11410_v52, %v2897_v41  ;;  %v2900_v38 = vmax.f32 %v2884_v59, 0.0  ;;  %v2899_v16 = vmax.f32 %v2883_v46, 0.0  ;;  %v9174_v10 = vld [vmem:[%s13173_s2 + $0x40] sm:$0xff] }
 0xb96   :  { %v2890_v60 = vadd.f32 %v9173_v50, %v2860_v36  ;;  %v2889_v24 = vadd.f32 %v9174_v10, %v2860_v36  ;;  %v2856_v17 = vrot.slane %v2839_v40, %v13528_v42  ;;  %v2902_v46 = vmax.f32 %v2886_v58, 0.0  ;;  %v9175_v50 = vld [vmem:[%s13173_s2 + $0x38] sm:$0xff] }
 0xb97   :  { %2931 = vadd.xlane.f32.xlu0 %v2914_v33  ;;  %2929 = vadd.xlane.f32.xlu1 %v2913_v39  ;;  %v2916_v41 = vmul.f32 %v11410_v52, %v2900_v38  ;;  %v2915_v59 = vmul.f32 %v11410_v52, %v2899_v16  ;;  %v2901_v33 = vmax.f32 %v2885_v63, 0.0  ;;  %v9176_v38 = vld [vmem:[%s13173_s2 + $0x30] sm:$0xff]  ;;  %v2864_v63 = vrot.slane %v2836_v44, %v13528_v42 }
 0xb98   :  { %v2906_v39 = vmax.f32 %v2890_v60, 0.0  ;;  %v2905_v57 = vmax.f32 %v2889_v24, 0.0  ;;  %v2888_v61 = vadd.f32 %v9175_v50, %v2856_v17  ;;  %v2918_v36 = vmul.f32 %v11410_v52, %v2902_v46 }
 0xb99   :  { %v2917_v40 = vmul.f32 %v11410_v52, %v2901_v33  ;;  %v2887_v58 = vadd.f32 %v9176_v38, %v2856_v17  ;;  %v2840_v53 = vcombine.high %v2836_v44, %v2836_v44  ;;  %v2868_v60 = vrot.slane %v2838_v0, %v13528_v42  ;;  %v9178_v17 = vld [vmem:[%s13173_s2 + $0x50] sm:$0xff] }
 0xb9a   :  { %v2922_v24 = vmul.f32 %v11410_v52, %v2906_v39  ;;  %v2904_v16 = vmax.f32 %v2888_v61, 0.0  ;;  %v2921_v10 = vmul.f32 %v11410_v52, %v2905_v57  ;;  %v2891_v33 = vadd.f32 %v9178_v17, %v2864_v63  ;;  %v9179_v61 = vld [vmem:[%s13173_s2 + $0x68] sm:$0xff] }
 0xb9b   :  { %2935 = vadd.xlane.f32.xlu1 %v2916_v41  ;;  %2933 = vadd.xlane.f32.xlu0 %v2915_v59  ;;  %v2903_v41 = vmax.f32 %v2887_v58, 0.0  ;;  %v9177_v59 = vld [vmem:[%s13173_s2 + $0x58] sm:$0xff]  ;;  %v2894_v57 = vadd.f32 %v9179_v61, %v2868_v60  ;;  %v2872_v0 = vrot.slane %v2840_v53, %v13528_v42 }
 0xb9c   :  { %v2892_v46 = vadd.f32 %v9177_v59, %v2864_v63  ;;  %v2920_v44 = vmul.f32 %v11410_v52, %v2904_v16  ;;  %v9181_v63 = vld [vmem:[%s13173_s2 + $0x78] sm:$0xff]  ;;  %v9182_v59 = vld [vmem:[%s13173_s2 + $0x70] sm:$0xff] }
 0xb9d   :  { %v2919_v39 = vmul.f32 %v11410_v52, %v2903_v41  ;;  %v2910_v58 = vmax.f32 %v2894_v57, 0.0 }
 0xb9e   :  { %v2908_v50 = vmax.f32 %v2892_v46, 0.0 }
 0xb9f   :  { %2939 = vadd.xlane.f32.xlu1 %v2918_v36  ;;  %2937 = vadd.xlane.f32.xlu0 %v2917_v40  ;;  %v2907_v36 = vmax.f32 %v2891_v33, 0.0  ;;  %v9180_v40 = vld [vmem:[%s13173_s2 + $0x60] sm:$0xff]  ;;  %v2926_v17 = vmul.f32 %v11410_v52, %v2910_v58 }
 0xba0   :  { %v2893_v38 = vadd.f32 %v9180_v40, %v2868_v60  ;;  %v2924_v53 = vmul.f32 %v11410_v52, %v2908_v50  ;;  %v2895_v60 = vadd.f32 %v9182_v59, %v2872_v0 }
 0xba2   :  { %v2909_v41 = vmax.f32 %v2893_v38, 0.0  ;;  %v2911_v61 = vmax.f32 %v2895_v60, 0.0 }
 0xba3   :  { %2947 = vadd.xlane.f32.xlu1 %v2922_v24  ;;  %2945 = vadd.xlane.f32.xlu0 %v2921_v10  ;;  %v2896_v24 = vadd.f32 %v9181_v63, %v2872_v0  ;;  %v2923_v10 = vmul.f32 %v11410_v52, %v2907_v36 }
 0xba4   :  { %v2925_v33 = vmul.f32 %v11410_v52, %v2909_v41 }
 0xba7   :  { %2943 = vadd.xlane.f32.xlu1 %v2920_v44  ;;  %2941 = vadd.xlane.f32.xlu0 %v2919_v39  ;;  %v2912_v44 = vmax.f32 %v2896_v24, 0.0  ;;  %v2927_v39 = vmul.f32 %v11410_v52, %v2911_v61 }
 0xba9   :  { %v2928_v57 = vmul.f32 %v11410_v52, %v2912_v44 }
 0xbaa   :  { %v11454_v16 = vpop.f32.mrb[12].mxu0 }
 0xbab   :  { %13738 = vst [vmem:[#allocation23_spill] sm:$0xff] %v11454_v16  ;;  %v7339_v46 = vpop.f32.mrb[13].mxu0  ;;  %2951 = vadd.xlane.f32.xlu1 %v2924_v53  ;;  %2949 = vadd.xlane.f32.xlu0 %v2923_v10 }
 0xbaf   :  { %2955 = vadd.xlane.f32.xlu1 %v2926_v17  ;;  %2953 = vadd.xlane.f32.xlu0 %v2925_v33 }
 0xbb3   :  { %2959 = vadd.xlane.f32.xlu1 %v2928_v57  ;;  %2957 = vadd.xlane.f32.xlu0 %v2927_v39 }
 0xc24   :  { %v2932_v50 = vpop.xlane.xlu0 %2931  ;;  %v2930_v36 = vpop.xlane.xlu1 %2929 }
 0xc25   :  { %v2984_v46 = vrot.slane %v2932_v50, %v13621_v11  ;;  %v2980_v17 = vrot.slane %v2930_v36, %v13622_v29 }
 0xc27   :  { %v2985_v31 = vsel %vm694_vm0, %v2984_v46, %v2980_v17 }
 0xc28   :  { %v11465_v0 = vpop.xlane.xlu1 %2935  ;;  %v2934_v40 = vpop.xlane.xlu0 %2933 }
 0xc29   :  { %v2993_v52 = vrot.slane %v11465_v0, %v13621_v11  ;;  %v2989_v41 = vrot.slane %v2934_v40, %v13622_v29 }
 0xc2b   :  { %v2994_v39 = vsel %vm694_vm0, %v2993_v52, %v2989_v41 }
 0xc2c   :  { %v11467_v38 = vpop.xlane.xlu1 %2939  ;;  %v2938_v58 = vpop.xlane.xlu0 %2937  ;;  %v3049_v49 = vsel %vm759_vm1, %v2994_v39, %v2985_v31 }
 0xc2d   :  { %v3002_v59 = vrot.slane %v11467_v38, %v13621_v11  ;;  %v2998_v60 = vrot.slane %v2938_v58, %v13622_v29 }
 0xc2f   :  { %v3003_v16 = vsel %vm694_vm0, %v3002_v59, %v2998_v60 }
 0xc30   :  { %v11469_v63 = vpop.xlane.xlu1 %2947  ;;  %v11471_v24 = vpop.xlane.xlu0 %2945  ;;  %v3050_v60 = vsel %vm761_vm2, %v3003_v16, %v3049_v49 }
 0xc31   :  { %v3020_v35 = vrot.slane %v11469_v63, %v13621_v11  ;;  %v3016_v52 = vrot.slane %v11471_v24, %v13622_v29 }
 0xc34   :  { %v11473_v53 = vpop.xlane.xlu1 %2943  ;;  %v11475_v10 = vpop.xlane.xlu0 %2941 }
 0xc35   :  { %v3011_v33 = vrot.slane %v11473_v53, %v13621_v11  ;;  %v3007_v44 = vrot.slane %v11475_v10, %v13622_v29 }
 0xc37   :  { %v3012_v37 = vsel %vm694_vm0, %v3011_v33, %v3007_v44  ;;  %v3021_v44 = vsel %vm694_vm0, %v3020_v35, %v3016_v52 }
 0xc38   :  { %v11489_v61 = vpop.xlane.xlu1 %2951  ;;  %v11491_v57 = vpop.xlane.xlu0 %2949  ;;  %v3051_v31 = vsel %vm763_vm3, %v3012_v37, %v3050_v60 }
 0xc39   :  { %v3029_v48 = vrot.slane %v11489_v61, %v13621_v11  ;;  %v3025_v34 = vrot.slane %v11491_v57, %v13622_v29  ;;  %v3052_v56 = vsel %vm765_vm4, %v3021_v44, %v3051_v31 }
 0xc3b   :  { %v3030_v33 = vsel %vm694_vm0, %v3029_v48, %v3025_v34 }
 0xc3c   :  { %v11506_v41 = vpop.xlane.xlu1 %2955  ;;  %v11508_v59 = vpop.xlane.xlu0 %2953  ;;  %v3053_v37 = vsel %vm767_vm5, %v3030_v33, %v3052_v56 }
 0xc3d   :  { %v3038_v46 = vrot.slane %v11506_v41, %v13621_v11  ;;  %v3034_v17 = vrot.slane %v11508_v59, %v13622_v29 }
 0xc3f   :  { %v3039_v6 = vsel %vm694_vm0, %v3038_v46, %v3034_v17 }
 0xc40   :  { %v11518_v39 = vpop.xlane.xlu1 %2959  ;;  %v11520_v43 = vpop.xlane.xlu0 %2957  ;;  %v3054_v35 = vsel %vm769_vm6, %v3039_v6, %v3053_v37 }
 0xc41   :  { %v3047_v49 = vrot.slane %v11518_v39, %v13621_v11  ;;  %v3043_v16 = vrot.slane %v11520_v43, %v13622_v29 }
 0xc43   :  { %v3048_v34 = vsel %vm694_vm0, %v3047_v49, %v3043_v16 }
 0xc44   :  { %v3055_v48 = vsel %vm771_vm7, %v3048_v34, %v3054_v35 }
 0xc45   :  { %v3057_v52 = vsel %vm774_vm8, %v3055_v48, -inf }
 0xc46   :  { %3058 = vmax.xlane.f32.xlu0 %v3057_v52 }
 0xcd3   :  { %v3059_v60 = vpop.xlane.xlu0 %3058 }
 0xcd4   :  { %v3064_v46 = vrot.slane %v3059_v60, %v13528_v42  ;;  %v3068_v17 = vrot.slane %v3059_v60, %v13530_v12  ;;  %v3072_v55 = vrot.slane %v3059_v60, %v13535_v5  ;;  %v3076_v56 = vrot.slane %v3059_v60, %v13533_v2 }
 0xcd5   :  { %v3080_v34 = vrot.slane %v3059_v60, %v13623_v23 }
 0xcd6   :  { %v3101_v3 = vsub.f32 %v2930_v36, %v3064_v46  ;;  %v3102_v31 = vsub.f32 %v2932_v50, %v3064_v46  ;;  %v3103_v44 = vsub.f32 %v2934_v40, %v3068_v17  ;;  %v3105_v33 = vsub.f32 %v2938_v58, %v3072_v55 }
 0xcd7   :  { %v3104_v16 = vsub.f32 %v11465_v0, %v3068_v17  ;;  %v3107_v35 = vsub.f32 %v11475_v10, %v3076_v56  ;;  %v3106_v52 = vsub.f32 %v11467_v38, %v3072_v55  ;;  %v3084_v36 = vrot.slane %v3059_v60, %v13624_v62 }
 0xcd8   :  { %v3117_v49 = vmul.f32 1.442695, %v3101_v3  ;;  %v3119_v6 = vmul.f32 1.442695, %v3102_v31  ;;  %v3121_v37 = vmul.f32 1.442695, %v3103_v44  ;;  %v3109_v40 = vsub.f32 %v11471_v24, %v3080_v34 }
 0xcd9   :  { %v3125_v48 = vmul.f32 1.442695, %v3105_v33  ;;  %v3123_v50 = vmul.f32 1.442695, %v3104_v16  ;;  %v3129_v3 = vmul.f32 1.442695, %v3107_v35  ;;  %v3108_v0 = vsub.f32 %v11473_v53, %v3076_v56 }
 0xcda   :  { %8877 = vpow2.f32 %v3117_v49  ;;  %v3127_v58 = vmul.f32 1.442695, %v3106_v52  ;;  %v3088_v46 = vrot.slane %v3059_v60, %v13625_v7  ;;  %v3111_v10 = vsub.f32 %v11491_v57, %v3084_v36 }
 0xcdb   :  { %8879 = vpow2.f32 %v3119_v6  ;;  %v3133_v17 = vmul.f32 1.442695, %v3109_v40  ;;  %v3110_v38 = vsub.f32 %v11469_v63, %v3080_v34  ;;  %v3131_v24 = vmul.f32 1.442695, %v3108_v0 }
 0xcdc   :  { %8881 = vpow2.f32 %v3121_v37  ;;  %v3092_v53 = vrot.slane %v3059_v60, %v13626_v13  ;;  %v3113_v44 = vsub.f32 %v11508_v59, %v3088_v46  ;;  %v3137_v57 = vmul.f32 1.442695, %v3111_v10 }
 0xcdd   :  { %8883 = vpow2.f32 %v3125_v48  ;;  %v3112_v49 = vsub.f32 %v11489_v61, %v3084_v36  ;;  %v3135_v63 = vmul.f32 1.442695, %v3110_v38  ;;  %v3114_v37 = vsub.f32 %v11506_v41, %v3088_v46 }
 0xcde   :  { %8885 = vpow2.f32 %v3123_v50  ;;  %v3115_v6 = vsub.f32 %v11520_v43, %v3092_v53  ;;  %v3141_v60 = vmul.f32 1.442695, %v3113_v44  ;;  %v3116_v43 = vsub.f32 %v11518_v39, %v3092_v53 }
 0xcdf   :  { %8887 = vpow2.f32 %v3129_v3  ;;  %v3139_v34 = vmul.f32 1.442695, %v3112_v49  ;;  %v3143_v52 = vmul.f32 1.442695, %v3114_v37 }
 0xce0   :  { %8889 = vpow2.f32 %v3127_v58  ;;  %v3145_v61 = vmul.f32 1.442695, %v3115_v6  ;;  %v3147_v36 = vmul.f32 1.442695, %v3116_v43 }
 0xce1   :  { %8891 = vpow2.f32 %v3133_v17 }
 0xce2   :  { %8893 = vpow2.f32 %v3131_v24 }
 0xce3   :  { %8895 = vpow2.f32 %v3137_v57 }
 0xce4   :  { %v11546_v31 = vpop.eup %8877  ;;  %8897 = vpow2.f32 %v3135_v63 }
 0xce5   :  { %v11548_v55 = vpop.eup %8879  ;;  %3166 = vperm.xlu1 %8747, %v11546_v31   ;;  %8899 = vpow2.f32 %v3141_v60 }
 0xce6   :  { %3169 = vperm.xlu0 %8748, %v11548_v55   ;;  %v11555_v56 = vpop.eup %8881  ;;  %8901 = vpow2.f32 %v3139_v34 }
 0xce7   :  { %v11557_v33 = vpop.eup %8883  ;;  %8903 = vpow2.f32 %v3145_v61 }
 0xce8   :  { %v11563_v16 = vpop.eup %8885  ;;  %8905 = vpow2.f32 %v3143_v52 }
 0xce9   :  { %3172 = vperm.xlu1 %8747, %v11555_v56   ;;  %v11565_v59 = vpop.eup %8887  ;;  %8907 = vpow2.f32 %v3147_v36 }
 0xcea   :  { %3178 = vperm.xlu0 %8748, %v11557_v33   ;;  %v11570_v35 = vpop.eup %8889 }
 0xceb   :  { %v11572_v48 = vpop.eup %8891 }
 0xcec   :  { %v11577_v41 = vpop.eup %8893 }
 0xced   :  { %3175 = vperm.xlu1 %8747, %v11563_v16   ;;  %v11579_v50 = vpop.eup %8895 }
 0xcee   :  { %3184 = vperm.xlu0 %8748, %v11565_v59   ;;  %v11583_v40 = vpop.eup %8897 }
 0xcef   :  { %v11585_v3 = vpop.eup %8899 }
 0xcf0   :  { %v11589_v39 = vpop.eup %8901 }
 0xcf1   :  { %3181 = vperm.xlu1 %8747, %v11570_v35   ;;  %v11591_v0 = vpop.eup %8903 }
 0xcf2   :  { %3190 = vperm.xlu0 %8748, %v11572_v48   ;;  %v11595_v58 = vpop.eup %8905 }
 0xcf3   :  { %v11598_v46 = vpop.eup %8907 }
 0xcf5   :  { %3187 = vperm.xlu1 %8747, %v11577_v41  }
 0xcf6   :  { %3196 = vperm.xlu0 %8748, %v11579_v50  }
 0xcf9   :  { %3193 = vperm.xlu1 %8747, %v11583_v40  }
 0xcfa   :  { %3202 = vperm.xlu0 %8748, %v11585_v3  }
 0xcfd   :  { %3199 = vperm.xlu1 %8747, %v11589_v39  }
 0xcfe   :  { %3208 = vperm.xlu0 %8748, %v11591_v0  }
 0xd01   :  { %3205 = vperm.xlu1 %8747, %v11595_v58  }
 0xd05   :  { %3211 = vperm.xlu1 %8747, %v11598_v46  }
 0xd64   :  { %v3167_v10 = vpop.permute.xlu1 %3166 }
 0xd65   :  { %v3170_v17 = vpop.permute.xlu0 %3169  ;;  %v3216_v36 = vrot.slane %v3167_v10, %v13622_v29 }
 0xd66   :  { %v3220_v52 = vrot.slane %v3170_v17, %v13621_v11 }
 0xd68   :  { %v3173_v38 = vpop.permute.xlu1 %3172  ;;  %v3221_v10 = vsel %vm694_vm0, %v3220_v52, %v3216_v36 }
 0xd69   :  { %v3179_v24 = vpop.permute.xlu0 %3178  ;;  %v3225_v27 = vrot.slane %v3173_v38, %v13622_v29 }
 0xd6a   :  { %v3234_v1 = vrot.slane %v3179_v24, %v13622_v29 }
 0xd6c   :  { %v3176_v53 = vpop.permute.xlu1 %3175 }
 0xd6d   :  { %v3185_v44 = vpop.permute.xlu0 %3184  ;;  %v3229_v37 = vrot.slane %v3176_v53, %v13621_v11 }
 0xd6e   :  { %v3243_v32 = vrot.slane %v3185_v44, %v13622_v29 }
 0xd6f   :  { %v3230_v53 = vsel %vm694_vm0, %v3229_v37, %v3225_v27 }
 0xd70   :  { %v3182_v57 = vpop.permute.xlu1 %3181 }
 0xd71   :  { %v3191_v49 = vpop.permute.xlu0 %3190  ;;  %v3238_v34 = vrot.slane %v3182_v57, %v13621_v11 }
 0xd72   :  { %v3252_v4 = vrot.slane %v3191_v49, %v13622_v29 }
 0xd73   :  { %v3239_v17 = vsel %vm694_vm0, %v3238_v34, %v3234_v1 }
 0xd74   :  { %v3188_v63 = vpop.permute.xlu1 %3187 }
 0xd75   :  { %v3197_v6 = vpop.permute.xlu0 %3196  ;;  %v3247_v18 = vrot.slane %v3188_v63, %v13621_v11 }
 0xd76   :  { %v3261_v38 = vrot.slane %v3197_v6, %v13622_v29 }
 0xd77   :  { %v3248_v63 = vsel %vm694_vm0, %v3247_v18, %v3243_v32 }
 0xd78   :  { %v3194_v60 = vpop.permute.xlu1 %3193 }
 0xd79   :  { %v3203_v61 = vpop.permute.xlu0 %3202  ;;  %v3256_v30 = vrot.slane %v3194_v60, %v13621_v11  ;;  %v3285_v60 = vsel %vm759_vm1, %v3230_v53, %v3221_v10 }
 0xd7a   :  { %v3270_v44 = vrot.slane %v3203_v61, %v13622_v29  ;;  %v3286_v49 = vsel %vm761_vm2, %v3239_v17, %v3285_v60 }
 0xd7b   :  { %v3257_v27 = vsel %vm694_vm0, %v3256_v30, %v3252_v4  ;;  %v3287_v34 = vsel %vm763_vm3, %v3248_v63, %v3286_v49 }
 0xd7c   :  { %v3200_v43 = vpop.permute.xlu1 %3199  ;;  %v3288_v32 = vsel %vm765_vm4, %v3257_v27, %v3287_v34 }
 0xd7d   :  { %v3265_v57 = vrot.slane %v3200_v43, %v13621_v11  ;;  %v3209_v37 = vpop.permute.xlu0 %3208 }
 0xd7f   :  { %v3266_v1 = vsel %vm694_vm0, %v3265_v57, %v3261_v38 }
 0xd80   :  { %v3206_v28 = vpop.permute.xlu1 %3205  ;;  %v3289_v61 = vsel %vm767_vm5, %v3266_v1, %v3288_v32 }
 0xd81   :  { %v3274_v24 = vrot.slane %v3206_v28, %v13621_v11  ;;  %v3279_v28 = vrot.slane %v3209_v37, %v13622_v29 }
 0xd83   :  { %v3275_v43 = vsel %vm694_vm0, %v3274_v24, %v3270_v44 }
 0xd84   :  { %v3212_v6 = vpop.permute.xlu1 %3211  ;;  %v3290_v30 = vsel %vm769_vm6, %v3275_v43, %v3289_v61 }
 0xd85   :  { %v3283_v18 = vrot.slane %v3212_v6, %v13621_v11 }
 0xd87   :  { %v3284_v4 = vsel %vm694_vm0, %v3283_v18, %v3279_v28 }
 0xd88   :  { %v3291_v52 = vsel %vm771_vm7, %v3284_v4, %v3290_v30 }
 0xd89   :  { %v3293_v36 = vsel %vm774_vm8, %v3291_v52, 0.0 }
 0xd8a   :  { %3294 = vadd.xlane.f32.xlu0 %v3293_v36 }
 0xe17   :  { %v3295_v53 = vpop.xlane.xlu0 %3294 }
 0xe18   :  { %v3316_v57 = vrot.slane %v3295_v53, %v13623_v23  ;;  %v3300_v17 = vrot.slane %v3295_v53, %v13528_v42  ;;  %v3328_v10 = vrot.slane %v3295_v53, %v13626_v13  ;;  %v3304_v38 = vrot.slane %v3295_v53, %v13530_v12 }
 0xe19   :  { %v3308_v44 = vrot.slane %v3295_v53, %v13535_v5  ;;  %v3312_v43 = vrot.slane %v3295_v53, %v13533_v2 }
 0xe1a   :  { %8909 = vrcp.f32 %v3316_v57 }
 0xe1b   :  { %8911 = vrcp.f32 %v3300_v17 }
 0xe1c   :  { %8913 = vrcp.f32 %v3328_v10 }
 0xe1d   :  { %8915 = vrcp.f32 %v3304_v38  ;;  %v9184_v38 = vld [vmem:[%s13172_s1 + $0x28] sm:$0xff] }
 0xe1e   :  { %8917 = vrcp.f32 %v3308_v44  ;;  %v9185_v44 = vld [vmem:[%s13172_s1 + $0x8] sm:$0xff] }
 0xe1f   :  { %8919 = vrcp.f32 %v3312_v43  ;;  %v9188_v43 = vld [vmem:[%s13172_s1 + $0x20] sm:$0xff] }
 0xe24   :  { %v8910_v63 = vpop.eup %8909 }
 0xe25   :  { %v8912_v24 = vpop.eup %8911  ;;  %v3350_v60 = vmul.f32 %v8910_v63, %v11572_v48 }
 0xe26   :  { %v8914_v27 = vpop.eup %8913  ;;  %v3338_v37 = vmul.f32 %v8912_v24, %v11546_v31  ;;  %v3339_v1 = vmul.f32 %v8912_v24, %v11548_v55 }
 0xe27   :  { %3403 = vperm.xlu0 %8748, %v3350_v60   ;;  %v3359_v49 = vmul.f32 %v8914_v27, %v11591_v0  ;;  %v8916_v34 = vpop.eup %8915  ;;  %v3320_v0 = vrot.slane %v3295_v53, %v13624_v62 }
 0xe28   :  { %3363 = vperm.xlu1 %8747, %v3338_v37   ;;  %v3341_v6 = vmul.f32 %v8916_v34, %v11555_v56  ;;  %v3342_v48 = vmul.f32 %v8916_v34, %v11563_v16  ;;  %v8918_v32 = vpop.eup %8917  ;;  %v3324_v56 = vrot.slane %v3295_v53, %v13625_v7  ;;  %v3351_v16 = vmul.f32 %v8910_v63, %v11583_v40  ;;  %v7111_v40 = vld [vmem:[%s13174_s3 + $0x10] sm:$0xff] }
 0xe29   :  { %v3344_v31 = vmul.f32 %v8918_v32, %v11557_v33  ;;  %v3345_v55 = vmul.f32 %v8918_v32, %v11570_v35  ;;  %v8920_v28 = vpop.eup %8919  ;;  %8921 = vrcp.f32 %v3320_v0  ;;  %3593 = vmatprep.mubr.f32.mxu1 %v7111_v40  ;;  %3664 = vmatprep.mubr.f32.mxu0 %v7111_v40  ;;  %v9186_v37 = vld [vmem:[%s13172_s1 + $0x10] sm:$0xff] }
 0xe2a   :  { %v3347_v18 = vmul.f32 %v8920_v28, %v11565_v59  ;;  %v3348_v61 = vmul.f32 %v8920_v28, %v11577_v41  ;;  %8923 = vrcp.f32 %v3324_v56  ;;  %v3360_v41 = vmul.f32 %v8914_v27, %v11598_v46  ;;  %v9191_v28 = vld [vmem:[%s13172_s1 + $0x30] sm:$0xff]  ;;  %v9192_v56 = vld [vmem:[%s13172_s1 + $0x40] sm:$0xff] }
 0xe2b   :  { %3433 = vperm.xlu0 %8748, %v3359_v49  }
 0xe2c   :  { %3368 = vperm.xlu1 %8747, %v3339_v1   ;;  %v9187_v1 = vld [vmem:[%s13172_s1 + $0x38] sm:$0xff] }
 0xe30   :  { %3373 = vperm.xlu1 %8747, %v3341_v6  }
 0xe33   :  { %v8922_v33 = vpop.eup %8921 }
 0xe34   :  { %3378 = vperm.xlu1 %8747, %v3342_v48   ;;  %v3353_v4 = vmul.f32 %v8922_v33, %v11579_v50  ;;  %v3354_v35 = vmul.f32 %v8922_v33, %v11589_v39  ;;  %v8924_v30 = vpop.eup %8923  ;;  %v9189_v48 = vld [vmem:[%s13172_s1 + $0x48] sm:$0xff] }
 0xe35   :  { %v3356_v59 = vmul.f32 %v8924_v30, %v11585_v3  ;;  %v3357_v52 = vmul.f32 %v8924_v30, %v11595_v58  ;;  %v9183_v58 = vld [vmem:[%s13172_s1 + $0x18] sm:$0xff] }
 0xe38   :  { %3383 = vperm.xlu1 %8747, %v3344_v31   ;;  %v9190_v31 = vld [vmem:[%s13172_s1] sm:$0xff] }
 0xe3c   :  { %3388 = vperm.xlu1 %8747, %v3345_v55  }
 0xe40   :  { %3393 = vperm.xlu1 %8747, %v3347_v18  }
 0xe44   :  { %3398 = vperm.xlu1 %8747, %v3348_v61  }
 0xe48   :  { %3408 = vperm.xlu1 %8747, %v3351_v16  }
 0xe4c   :  { %3413 = vperm.xlu1 %8747, %v3353_v4  }
 0xe50   :  { %3418 = vperm.xlu1 %8747, %v3354_v35  }
 0xe54   :  { %3423 = vperm.xlu1 %8747, %v3356_v59  }
 0xe58   :  { %3428 = vperm.xlu1 %8747, %v3357_v52  }
 0xe5c   :  { %3438 = vperm.xlu1 %8747, %v3360_v41  }
 0xea6   :  { %v3404_v60 = vpop.permute.xlu0 %3403 }
 0xea7   :  { %v3364_v50 = vpop.permute.xlu1 %3363  ;;  %v3449_v61 = vmul.f32 %v9192_v56, %v3404_v60  ;;  %v9197_v56 = vld [vmem:[%s13172_s1 + $0x70] sm:$0xff] }
 0xea8   :  { %v3441_v0 = vmul.f32 %v9190_v31, %v3364_v50 }
 0xeab   :  { %v3369_v36 = vpop.permute.xlu1 %3368 }
 0xeac   :  { %v3442_v27 = vmul.f32 %v9185_v44, %v3369_v36  ;;  %v9193_v36 = vld [vmem:[%s13172_s1 + $0x50] sm:$0xff] }
 0xeae   :  { %v3457_v4 = vadd.f32 %v3442_v27, %v3441_v0 }
 0xeaf   :  { %v3374_v39 = vpop.permute.xlu1 %3373 }
 0xeb0   :  { %v3443_v49 = vmul.f32 %v9186_v37, %v3374_v39  ;;  %v3458_v40 = vrot.slane %v3457_v4, 4 }
 0xeb3   :  { %v3379_v53 = vpop.permute.xlu1 %3378 }
 0xeb4   :  { %v3444_v46 = vmul.f32 %v9183_v58, %v3379_v53  ;;  %v9194_v53 = vld [vmem:[%s13172_s1 + $0x58] sm:$0xff] }
 0xeb6   :  { %v3464_v55 = vadd.f32 %v3444_v46, %v3443_v49 }
 0xeb7   :  { %v3384_v57 = vpop.permute.xlu1 %3383 }
 0xeb8   :  { %v3445_v6 = vmul.f32 %v9188_v43, %v3384_v57  ;;  %v3465_v59 = vrot.slane %v3464_v55, 4 }
 0xebb   :  { %v3389_v17 = vpop.permute.xlu1 %3388 }
 0xebc   :  { %v3446_v63 = vmul.f32 %v9184_v38, %v3389_v17  ;;  %v3459_v38 = vadd.f32 %v3458_v40, %v3457_v4 }
 0xebe   :  { %v3471_v16 = vadd.f32 %v3446_v63, %v3445_v6  ;;  %v9195_v6 = vld [vmem:[%s13172_s1 + $0x60] sm:$0xff] }
 0xebf   :  { %v3394_v3 = vpop.permute.xlu1 %3393 }
 0xec0   :  { %v3447_v18 = vmul.f32 %v9191_v28, %v3394_v3  ;;  %v3472_v52 = vrot.slane %v3471_v16, 4  ;;  %v3466_v3 = vadd.f32 %v3465_v59, %v3464_v55  ;;  %v9198_v59 = vld [vmem:[%s13172_s1 + $0x78] sm:$0xff] }
 0xec2   :  { %v3473_v58 = vadd.f32 %v3472_v52, %v3471_v16  ;;  %v3467_v44 = vrot.slane %v3466_v3, 2 }
 0xec3   :  { %v3399_v10 = vpop.permute.xlu1 %3398 }
 0xec4   :  { %v3448_v34 = vmul.f32 %v9187_v1, %v3399_v10  ;;  %v3474_v37 = vrot.slane %v3473_v58, 2  ;;  %v3434_v1 = vpop.permute.xlu0 %3433  ;;  %v3468_v55 = vadd.f32 %v3467_v44, %v3466_v3 }
 0xec6   :  { %v3478_v35 = vadd.f32 %v3448_v34, %v3447_v18  ;;  %v3460_v34 = vrot.slane %v3459_v38, 2  ;;  %v3475_v16 = vadd.f32 %v3474_v37, %v3473_v58  ;;  %v3469_v40 = vrot.slane %v3468_v55, 1 }
 0xec7   :  { %v3409_v24 = vpop.permute.xlu1 %3408 }
 0xec8   :  { %v3450_v32 = vmul.f32 %v9189_v48, %v3409_v24  ;;  %v3479_v50 = vrot.slane %v3478_v35, 4  ;;  %v3461_v4 = vadd.f32 %v3460_v34, %v3459_v38 }
 0xeca   :  { %v3485_v30 = vadd.f32 %v3450_v32, %v3449_v61  ;;  %v3480_v63 = vadd.f32 %v3479_v50, %v3478_v35  ;;  %v9196_v32 = vld [vmem:[%s13172_s1 + $0x68] sm:$0xff]  ;;  %v3455_v61 = vmul.f32 %v9197_v56, %v3434_v1 }
 0xecb   :  { %v3414_v33 = vpop.permute.xlu1 %3413 }
 0xecc   :  { %v3451_v39 = vmul.f32 %v9193_v36, %v3414_v33  ;;  %v3486_v17 = vrot.slane %v3485_v30, 4  ;;  %v3481_v43 = vrot.slane %v3480_v63, 2 }
 0xece   :  { %v3487_v60 = vadd.f32 %v3486_v17, %v3485_v30  ;;  %v3482_v35 = vadd.f32 %v3481_v43, %v3480_v63 }
 0xecf   :  { %v3419_v41 = vpop.permute.xlu1 %3418 }
 0xed0   :  { %v3452_v57 = vmul.f32 %v9194_v53, %v3419_v41  ;;  %v3488_v0 = vrot.slane %v3487_v60, 2  ;;  %v3476_v53 = vrot.slane %v3475_v16, 1  ;;  %v3483_v17 = vrot.slane %v3482_v35, 1 }
 0xed2   :  { %v3492_v10 = vadd.f32 %v3452_v57, %v3451_v39  ;;  %v3489_v41 = vadd.f32 %v3488_v0, %v3487_v60  ;;  %v3462_v57 = vrot.slane %v3461_v4, 1  ;;  %v3477_v44 = vadd.f32 %v3476_v53, %v3475_v16  ;;  %v13739_v16 = vld [vmem:[#allocation31_spill] sm:$0xff]  ;;  %v13751_v53 = vld [vmem:[#allocation40_spill] sm:$0xff] }
 0xed3   :  { %v3424_v46 = vpop.permute.xlu1 %3423 }
 0xed4   :  { %v3493_v24 = vrot.slane %v3492_v10, 4  ;;  %v3453_v48 = vmul.f32 %v9195_v6, %v3424_v46  ;;  %v3490_v58 = vrot.slane %v3489_v41, 1  ;;  %v3470_v46 = vadd.f32 %v3469_v40, %v3468_v55  ;;  %v13747_v40 = vld [vmem:[#allocation37_spill] sm:$0xff] }
 0xed5   :  { %v3463_v37 = vadd.f32 %v3462_v57, %v3461_v4  ;;  %v13741_v4 = vld [vmem:[#allocation33_spill] sm:$0xff]  ;;  %v13752_v57 = vld [vmem:[#allocation12_spill] sm:$0xff] }
 0xed6   :  { %v3494_v27 = vadd.f32 %v3493_v24, %v3492_v10  ;;  %v3491_v60 = vadd.f32 %v3490_v58, %v3489_v41  ;;  %v13746_v41 = vld [vmem:[#allocation9_spill] sm:$0xff]  ;;  %v13756_v58 = vmov 0.0|0.0  }
 0xed7   :  { %v3429_v49 = vpop.permute.xlu1 %3428 }
 0xed8   :  { %v3454_v31 = vmul.f32 %v9196_v32, %v3429_v49  ;;  %v3495_v28 = vrot.slane %v3494_v27, 2  ;;  %v3484_v49 = vadd.f32 %v3483_v17, %v3482_v35  ;;  %v13742_v35 = vld [vmem:[#allocation7_spill] sm:$0xff]  ;;  %v13753_v17 = vld [vmem:[#allocation42_spill] sm:$0xff] }
 0xeda   :  { %v3499_v18 = vadd.f32 %v3454_v31, %v3453_v48  ;;  %v3496_v50 = vadd.f32 %v3495_v28, %v3494_v27  ;;  %v3521_v27 = vsel %vm759_vm1, %v3470_v46, %v3463_v37  ;;  %v13757_v46 = vld [vmem:[#allocation45_spill] sm:$0xff]  ;;  %v13759_v37 = vld [vmem:[#allocation22_spill] sm:$0xff] }
 0xedb   :  { %v3439_v33 = vpop.permute.xlu1 %3438  ;;  %v3522_v48 = vsel %vm761_vm2, %v3477_v44, %v3521_v27 }
 0xedc   :  { %v3500_v30 = vrot.slane %v3499_v18, 4  ;;  %v3456_v52 = vmul.f32 %v9198_v59, %v3439_v33  ;;  %v3497_v38 = vrot.slane %v3496_v50, 1  ;;  %v3523_v0 = vsel %vm763_vm3, %v3484_v49, %v3522_v48  ;;  %v13740_v33 = vld [vmem:[#allocation6_spill] sm:$0xff]  ;;  %v13744_v59 = vld [vmem:[#allocation8_spill] sm:$0xff]  ;;  %v13762_v48 = vld [vmem:[#allocation17_spill] sm:$0xff] }
 0xedd   :  { %v3524_v55 = vsel %vm765_vm4, %v3491_v60, %v3523_v0  ;;  %v13760_v60 = vld [vmem:[#allocation26_spill] sm:$0xff] }
 0xede   :  { %v3501_v36 = vadd.f32 %v3500_v30, %v3499_v18  ;;  %v3506_v39 = vadd.f32 %v3456_v52, %v3455_v61  ;;  %v3498_v43 = vadd.f32 %v3497_v38, %v3496_v50  ;;  %v13743_v30 = vld [vmem:[#allocation34_spill] sm:$0xff]  ;;  %v13745_v52 = vld [vmem:[#allocation36_spill] sm:$0xff] }
 0xedf   :  { %v13748_v50 = vld [vmem:[#allocation10_spill] sm:$0xff] }
 0xee0   :  { %v3502_v3 = vrot.slane %v3501_v36, 2  ;;  %v3507_v10 = vrot.slane %v3506_v39, 4  ;;  %v3525_v18 = vsel %vm767_vm5, %v3498_v43, %v3524_v55  ;;  %v13761_v43 = vld [vmem:[#allocation23_spill] sm:$0xff] }
 0xee2   :  { %v3503_v63 = vadd.f32 %v3502_v3, %v3501_v36  ;;  %v3508_v24 = vadd.f32 %v3507_v10, %v3506_v39  ;;  %v13749_v36 = vld [vmem:[#allocation39_spill] sm:$0xff]  ;;  %v13754_v3 = vld [vmem:[#allocation13_spill] sm:$0xff] }
 0xee3   :  { %v13750_v39 = vld [vmem:[#allocation11_spill] sm:$0xff] }
 0xee4   :  { %v3504_v1 = vrot.slane %v3503_v63, 1  ;;  %v3509_v34 = vrot.slane %v3508_v24, 2  ;;  %v13755_v10 = vld [vmem:[#allocation43_spill] sm:$0xff] }
 0xee6   :  { %v3510_v6 = vadd.f32 %v3509_v34, %v3508_v24  ;;  %v3505_v32 = vadd.f32 %v3504_v1, %v3503_v63  ;;  %v13758_v24 = vld [vmem:[#allocation21_spill] sm:$0xff] }
 0xee8   :  { %v3511_v31 = vrot.slane %v3510_v6, 1  ;;  %v3526_v56 = vsel %vm769_vm6, %v3505_v32, %v3525_v18  ;;  %v13764_v18 = vld [vmem:[#allocation16_spill] sm:$0xff] }
 0xeea   :  { %v3512_v28 = vadd.f32 %v3511_v31, %v3510_v6  ;;  %v13763_v31 = vld [vmem:[#allocation20_spill] sm:$0xff] }
 0xeec   :  { %v3527_v61 = vsel %vm771_vm7, %v3512_v28, %v3526_v56 }
 0xeed   :  { %3594 = vmatmul.mubr.f32.vlgmr.msra.gmra.mrb[12].mxu1 %v3527_v61  ;;  %3665 = vmatmul.mubr.f32.vlgmr.msra.gmra.mrb[14].mxu0 %v3527_v61 }
 0xeee   :  { %8096 = vmatpush1.bf16.msra.mxu1 %v9388_v8  ;;  %8128 = vmatpush1.bf16.msra.mxu0 %v9844_v19 }
 0xeef   :  { %8098 = vmatprep.subr.bf16.mxu1 %v9390_v9  ;;  %8130 = vmatprep.subr.bf16.mxu0 %v9858_v22 }
 0xef0   :  { %3774 = vmatprep.mubr.f32.mxu1 %v13458_v51  ;;  %3845 = vmatprep.mubr.f32.mxu0 %v13458_v51 }
 0xef2   :  { %8100 = vmatpush1.bf16.msra.mxu1 %v9406_v14  ;;  %8132 = vmatpush1.bf16.msra.mxu0 %v9871_v45 }
 0xef3   :  { %8102 = vmatprep.subr.bf16.mxu1 %v9409_v15  ;;  %8134 = vmatprep.subr.bf16.mxu0 %v9886_v25 }
 0xef6   :  { %8104 = vmatpush1.bf16.msra.mxu1 %v9424_v20  ;;  %8136 = vmatpush1.bf16.msra.mxu0 %v9905_v47 }
 0xef7   :  { %8106 = vmatprep.subr.bf16.mxu1 %v9427_v21  ;;  %8138 = vmatprep.subr.bf16.mxu0 %v9914_v54 }
 0xefa   :  { %8108 = vmatpush1.bf16.msra.mxu1 %v9442_v26  ;;  %8140 = vmatpush1.bf16.msra.mxu0 %v13739_v16 }
 0xefb   :  { %8110 = vmatprep.subr.bf16.mxu1 %v13740_v33  ;;  %8142 = vmatprep.subr.bf16.mxu0 %v13741_v4 }
 0xefe   :  { %8112 = vmatpush1.bf16.msra.mxu1 %v13742_v35  ;;  %8144 = vmatpush1.bf16.msra.mxu0 %v13743_v30 }
 0xeff   :  { %8114 = vmatprep.subr.bf16.mxu1 %v13744_v59  ;;  %8146 = vmatprep.subr.bf16.mxu0 %v13745_v52 }
 0xf02   :  { %8116 = vmatpush1.bf16.msra.mxu1 %v13746_v41  ;;  %8148 = vmatpush1.bf16.msra.mxu0 %v13747_v40 }
 0xf03   :  { %8118 = vmatprep.subr.bf16.mxu1 %v13748_v50  ;;  %8150 = vmatprep.subr.bf16.mxu0 %v13749_v36 }
 0xf06   :  { %8120 = vmatpush1.bf16.msra.mxu1 %v13750_v39  ;;  %8152 = vmatpush1.bf16.msra.mxu0 %v13751_v53 }
 0xf07   :  { %8122 = vmatprep.subr.bf16.mxu1 %v13752_v57  ;;  %8154 = vmatprep.subr.bf16.mxu0 %v13753_v17 }
 0xf0a   :  { %8124 = vmatpush1.bf16.msra.mxu1 %v13754_v3  ;;  %8156 = vmatpush1.bf16.msra.mxu0 %v13755_v10 }
 0xf0b   :  { %8157 = vmatprep.subr.bf16.mxu1 %v13756_v58  ;;  %8182 = vmatprep.subr.bf16.mxu0 %v13757_v46 }
 0xfc0   :  { %v3595_v38 = vpop.f32.mrb[12].mxu1  ;;  %v3666_v63 = vpop.f32.mrb[14].mxu0 }
 0xfc1   :  { %v3596_v44 = vadd.f32 %v3595_v38, %v13758_v24  ;;  %v3667_v49 = vadd.f32 %v3666_v63, %v13759_v37  ;;  %v3597_v1 = vpop.f32.mrb[13].mxu1  ;;  %v3668_v34 = vpop.f32.mrb[15].mxu0  ;;  %v13765_v38 = vld [vmem:[#allocation25_spill] sm:$0xff] }
 0xfc2   :  { %v3598_v27 = vadd.f32 %v3597_v1, %v13760_v60  ;;  %v3669_v6 = vadd.f32 %v3668_v34, %v13761_v43 }
 0xfc3   :  { %v3671_v32 = vadd.f32 %v3596_v44, %v13762_v48  ;;  %v3673_v24 = vadd.f32 %v3667_v49, %v13765_v38 }
 0xfc4   :  { %v3672_v0 = vadd.f32 %v3598_v27, %v13763_v31  ;;  %v3674_v56 = vadd.f32 %v3669_v6, %v13764_v18  ;;  %v3699_v27 = vstv %s7110_s9  ;;  %v13766_v6 = vld [vmem:[#allocation18_spill] sm:$0xff] }
 0xfc5   :  { %v7112_v55 = vmul.f32 -1.442695, %v3671_v32 }
 0xfc6   :  { %v7113_v28 = vmul.f32 -1.442695, %v3672_v0  ;;  %v7114_v61 = vmul.f32 -1.442695, %v3674_v56 }
 0xfc7   :  { %8925 = vpow2.f32 %v7112_v55 }
 0xfc8   :  { %8927 = vpow2.f32 %v7113_v28  ;;  %v13767_v28 = vld [vmem:[#allocation14_spill] sm:$0xff] }
 0xfc9   :  { %8929 = vpow2.f32 %v7114_v61  ;;  %vm3700_vm12 = vcmp.lt.s32.totalorder %v13767_v28, %v3699_v27  ;;  %v13775_v27 = vld [vmem:[#allocation51_spill] sm:$0xff] }
 0xfca   :  { %8931 = vtanh.f32 %v3673_v24 }
 0xfd1   :  { %v8926_v63 = vpop.eup %8925 }
 0xfd2   :  { %v8928_v37 = vpop.eup %8927  ;;  %v3678_v46 = vadd.f32 1.0, %v8926_v63  ;;  %v13769_v63 = vld [vmem:[#allocation19_spill] sm:$0xff] }
 0xfd3   :  { %v3684_v1 = vadd.f32 1.0, %v8928_v37  ;;  %v8930_v44 = vpop.eup %8929 }
 0xfd4   :  { %8933 = vrcp.f32 %v3678_v46  ;;  %v8932_v34 = vpop.eup %8931  ;;  %v3691_v0 = vadd.f32 1.0, %v8930_v44  ;;  %v13772_v44 = vld [vmem:[#allocation47_spill] sm:$0xff] }
 0xfd5   :  { %8935 = vrcp.f32 %v3684_v1  ;;  %v13771_v1 = vld [vmem:[#allocation28_spill] sm:$0xff] }
 0xfd6   :  { %8937 = vrcp.f32 %v3691_v0  ;;  %v13778_v0 = vld [vmem:[#allocation55_spill] sm:$0xff] }
 0xfde   :  { %v8934_v60 = vpop.eup %8933 }
 0xfdf   :  { %v8936_v43 = vpop.eup %8935  ;;  %v3695_v32 = vmul.f32 %v8934_v60, %v8932_v34  ;;  %v13773_v34 = vld [vmem:[#allocation49_spill] sm:$0xff] }
 0xfe0   :  { %v3694_v55 = vmul.f32 %v8936_v43, %v13766_v6  ;;  %v8938_v46 = vpop.eup %8937  ;;  %v13774_v60 = vld [vmem:[#allocation29_spill] sm:$0xff] }
 0xfe1   :  { %v13776_v43 = vld [vmem:[#allocation53_spill] sm:$0xff] }
 0xfe2   :  { %v3696_v49 = vadd.f32 %v3695_v32, %v3694_v55  ;;  %v13777_v32 = vld [vmem:[#allocation30_spill] sm:$0xff]  ;;  %v13780_v55 = vld [vmem:[#allocation32_spill] sm:$0xff] }
 0xfe4   :  { %8939 = vtanh.f32 %v3696_v49  ;;  %v11760_v56 = vsel %vm3700_vm12, %v3696_v49, %v13766_v6  ;;  %v13779_v6 = vld [vmem:[#allocation57_spill] sm:$0xff]  ;;  %v13781_v49 = vld [vmem:[#allocation59_spill] sm:$0xff] }
 0xfe5   :  { %13768 = vst [vmem:[#allocation112_spill] sm:$0xff] %v11760_v56 }
 0xfee   :  { %v8940_v61 = vpop.eup %8939 }
 0xfef   :  { %v3698_v24 = vmul.f32 %v8940_v61, %v8938_v46  ;;  %v13782_v46 = vld [vmem:[#allocation61_spill] sm:$0xff]  ;;  %v13783_v61 = vld [vmem:[#allocation35_spill] sm:$0xff] }
 0xff1   :  { %7115 = vst [vmem:[%s13179_s8 + $0x10] sm:$0xff] %v3698_v24  ;;  %v11766_v37 = vsel %vm3700_vm12, %v3698_v24, %v13769_v63  ;;  %v13784_v24 = vld [vmem:[#allocation63_spill] sm:$0xff]  ;;  %v13785_v63 = vld [vmem:[#allocation65_spill] sm:$0xff] }
 0xff2   :  { %13770 = vst [vmem:[#allocation113_spill] sm:$0xff] %v11766_v37  ;;  %3775 = vmatmul.mubr.f32.vlgmr.msra.gmra.mrb[14].mxu1 %v11766_v37  ;;  %3846 = vmatmul.mubr.f32.vlgmr.msra.gmra.mrb[16].mxu0 %v11766_v37 }
 0xff3   :  { %8159 = vmatpush3.bf16.msra.mxu1 %v13771_v1  ;;  %7372 = vmatprep.mubr.msk.f32.mxu1 %vm9317_vm9, %v13458_v51 }
 0xff4   :  { %8160 = vmatprep.subr.bf16.mxu1 %v13756_v58  ;;  %8184 = vmatpush1.bf16.msra.mxu0 %v13772_v44 }
 0xff5   :  { %8186 = vmatprep.subr.bf16.mxu0 %v13773_v34 }
 0xff7   :  { %8162 = vmatpush3.bf16.msra.mxu1 %v13774_v60  ;;  %v13845_v60 = vld [vmem:[#allocation15_spill] sm:$0xff] }
 0xff8   :  { %8163 = vmatprep.subr.bf16.mxu1 %v13756_v58  ;;  %8188 = vmatpush1.bf16.msra.mxu0 %v13775_v27  ;;  %v13806_v27 = vld [vmem:[#allocation87_spill] sm:$0xff] }
 0xff9   :  { %8190 = vmatprep.subr.bf16.mxu0 %v13776_v43  ;;  %v13799_v43 = vld [vmem:[#allocation81_spill] sm:$0xff] }
 0xffb   :  { %8165 = vmatpush3.bf16.msra.mxu1 %v13777_v32  ;;  %v13786_v32 = vld [vmem:[#allocation38_spill] sm:$0xff] }
 0xffc   :  { %8166 = vmatprep.subr.bf16.mxu1 %v13756_v58  ;;  %8192 = vmatpush1.bf16.msra.mxu0 %v13778_v0  ;;  %v13789_v0 = vld [vmem:[#allocation41_spill] sm:$0xff] }
 0xffd   :  { %8194 = vmatprep.subr.bf16.mxu0 %v13779_v6  ;;  %v13787_v6 = vld [vmem:[#allocation67_spill] sm:$0xff] }
 0xfff   :  { %8168 = vmatpush3.bf16.msra.mxu1 %v13780_v55  ;;  %v13788_v55 = vld [vmem:[#allocation69_spill] sm:$0xff] }
0x1000   :  { %8169 = vmatprep.subr.bf16.mxu1 %v13756_v58  ;;  %8196 = vmatpush1.bf16.msra.mxu0 %v13781_v49  ;;  %v13792_v49 = vld [vmem:[#allocation44_spill] sm:$0xff] }
0x1001   :  { %8198 = vmatprep.subr.bf16.mxu0 %v13782_v46  ;;  %v13790_v46 = vld [vmem:[#allocation71_spill] sm:$0xff] }
0x1003   :  { %8171 = vmatpush3.bf16.msra.mxu1 %v13783_v61  ;;  %v13791_v61 = vld [vmem:[#allocation73_spill] sm:$0xff] }
0x1004   :  { %8172 = vmatprep.subr.bf16.mxu1 %v13756_v58  ;;  %8200 = vmatpush1.bf16.msra.mxu0 %v13784_v24  ;;  %v13793_v24 = vld [vmem:[#allocation46_spill] sm:$0xff] }
0x1005   :  { %8202 = vmatprep.subr.bf16.mxu0 %v13785_v63  ;;  %v13794_v63 = vld [vmem:[#allocation75_spill] sm:$0xff] }
0x1007   :  { %8174 = vmatpush3.bf16.msra.mxu1 %v13786_v32  ;;  %v13795_v32 = vld [vmem:[#allocation77_spill] sm:$0xff] }
0x1008   :  { %8175 = vmatprep.subr.bf16.mxu1 %v13756_v58  ;;  %8204 = vmatpush1.bf16.msra.mxu0 %v13787_v6  ;;  %v13796_v6 = vld [vmem:[#allocation48_spill] sm:$0xff] }
0x1009   :  { %8206 = vmatprep.subr.bf16.mxu0 %v13788_v55  ;;  %v13797_v55 = vld [vmem:[#allocation50_spill] sm:$0xff] }
0x100b   :  { %8177 = vmatpush3.bf16.msra.mxu1 %v13789_v0  ;;  %v13798_v0 = vld [vmem:[#allocation79_spill] sm:$0xff] }
0x100c   :  { %8178 = vmatprep.subr.bf16.mxu1 %v13756_v58  ;;  %8208 = vmatpush1.bf16.msra.mxu0 %v13790_v46  ;;  %v13800_v46 = vld [vmem:[#allocation52_spill] sm:$0xff] }
0x100d   :  { %8210 = vmatprep.subr.bf16.mxu0 %v13791_v61  ;;  %v13801_v61 = vld [vmem:[#allocation54_spill] sm:$0xff] }
0x100f   :  { %8180 = vmatpush3.bf16.msra.mxu1 %v13792_v49  ;;  %v13802_v49 = vld [vmem:[#allocation83_spill] sm:$0xff] }
0x1010   :  { %8246 = vmatprep.subr.bf16.mxu1 %v13793_v24  ;;  %8212 = vmatpush1.bf16.msra.mxu0 %v13794_v63  ;;  %v13803_v24 = vld [vmem:[#allocation85_spill] sm:$0xff]  ;;  %v13804_v63 = vld [vmem:[#allocation56_spill] sm:$0xff] }
0x1011   :  { %8214 = vmatprep.subr.bf16.mxu0 %v13795_v32  ;;  %v13805_v32 = vld [vmem:[#allocation58_spill] sm:$0xff] }
0x1012   :  { %7373 = vmatmul.mubr.f32.vlgmr.msra.gmra.mrb[16].mxu1 %v11766_v37 }
0x1013   :  { %8248 = vmatpush1.bf16.msra.mxu1 %v13796_v6  ;;  %v13807_v6 = vld [vmem:[#allocation89_spill] sm:$0xff] }
0x1014   :  { %8250 = vmatprep.subr.bf16.mxu1 %v13797_v55  ;;  %8216 = vmatpush1.bf16.msra.mxu0 %v13798_v0  ;;  %v13808_v55 = vld [vmem:[#allocation60_spill] sm:$0xff]  ;;  %v13809_v0 = vld [vmem:[#allocation62_spill] sm:$0xff] }
0x1015   :  { %8218 = vmatprep.subr.bf16.mxu0 %v13799_v43  ;;  %v13810_v43 = vld [vmem:[#allocation91_spill] sm:$0xff] }
0x1017   :  { %8252 = vmatpush1.bf16.msra.mxu1 %v13800_v46  ;;  %v13811_v46 = vld [vmem:[#allocation93_spill] sm:$0xff] }
0x1018   :  { %8254 = vmatprep.subr.bf16.mxu1 %v13801_v61  ;;  %8220 = vmatpush1.bf16.msra.mxu0 %v13802_v49  ;;  %v13812_v61 = vld [vmem:[#allocation64_spill] sm:$0xff]  ;;  %v13813_v49 = vld [vmem:[#allocation66_spill] sm:$0xff] }
0x1019   :  { %8222 = vmatprep.subr.bf16.mxu0 %v13803_v24  ;;  %v13814_v24 = vld [vmem:[#allocation95_spill] sm:$0xff] }
0x101b   :  { %8256 = vmatpush1.bf16.msra.mxu1 %v13804_v63  ;;  %v13815_v63 = vld [vmem:[#allocation97_spill] sm:$0xff] }
0x101c   :  { %8258 = vmatprep.subr.bf16.mxu1 %v13805_v32  ;;  %8224 = vmatpush1.bf16.msra.mxu0 %v13806_v27  ;;  %v13816_v32 = vld [vmem:[#allocation68_spill] sm:$0xff]  ;;  %v13817_v27 = vld [vmem:[#allocation70_spill] sm:$0xff] }
0x101d   :  { %8226 = vmatprep.subr.bf16.mxu0 %v13807_v6  ;;  %v13818_v6 = vld [vmem:[#allocation99_spill] sm:$0xff] }
0x101f   :  { %8260 = vmatpush1.bf16.msra.mxu1 %v13808_v55  ;;  %v13819_v55 = vld [vmem:[#allocation101_spill] sm:$0xff] }
0x1020   :  { %8262 = vmatprep.subr.bf16.mxu1 %v13809_v0  ;;  %8228 = vmatpush1.bf16.msra.mxu0 %v13810_v43  ;;  %v13820_v0 = vld [vmem:[#allocation72_spill] sm:$0xff]  ;;  %v13821_v43 = vld [vmem:[#allocation74_spill] sm:$0xff] }
0x1021   :  { %8230 = vmatprep.subr.bf16.mxu0 %v13811_v46  ;;  %v13822_v46 = vld [vmem:[#allocation103_spill] sm:$0xff] }
0x1023   :  { %8264 = vmatpush1.bf16.msra.mxu1 %v13812_v61  ;;  %v13823_v61 = vld [vmem:[#allocation105_spill] sm:$0xff] }
0x1024   :  { %8266 = vmatprep.subr.bf16.mxu1 %v13813_v49  ;;  %8232 = vmatpush1.bf16.msra.mxu0 %v13814_v24  ;;  %v13824_v49 = vld [vmem:[#allocation76_spill] sm:$0xff]  ;;  %v13825_v24 = vld [vmem:[#allocation78_spill] sm:$0xff] }
0x1025   :  { %8234 = vmatprep.subr.bf16.mxu0 %v13815_v63  ;;  %v13826_v63 = vld [vmem:[#allocation107_spill] sm:$0xff] }
0x1027   :  { %8268 = vmatpush1.bf16.msra.mxu1 %v13816_v32  ;;  %v13827_v32 = vld [vmem:[#allocation5_spill] sm:$0xff] }
0x1028   :  { %8270 = vmatprep.subr.bf16.mxu1 %v13817_v27  ;;  %8236 = vmatpush1.bf16.msra.mxu0 %v13818_v6  ;;  %v13828_v27 = vld [vmem:[#allocation80_spill] sm:$0xff]  ;;  %v13829_v6 = vld [vmem:[#allocation82_spill] sm:$0xff] }
0x1029   :  { %8238 = vmatprep.subr.bf16.mxu0 %v13819_v55  ;;  %v13830_v55 = vld [vmem:[#allocation84_spill] sm:$0xff] }
0x102b   :  { %8272 = vmatpush1.bf16.msra.mxu1 %v13820_v0  ;;  %v13831_v0 = vld [vmem:[#allocation86_spill] sm:$0xff] }
0x102c   :  { %8274 = vmatprep.subr.bf16.mxu1 %v13821_v43  ;;  %8240 = vmatpush1.bf16.msra.mxu0 %v13822_v46  ;;  %v13832_v43 = vld [vmem:[#allocation88_spill] sm:$0xff]  ;;  %v13833_v46 = vld [vmem:[#allocation90_spill] sm:$0xff] }
0x102d   :  { %8242 = vmatprep.subr.bf16.mxu0 %v13823_v61  ;;  %v13834_v61 = vld [vmem:[#allocation92_spill] sm:$0xff] }
0x102f   :  { %8276 = vmatpush1.bf16.msra.mxu1 %v13824_v49  ;;  %v13835_v49 = vld [vmem:[#allocation94_spill] sm:$0xff] }
0x1030   :  { %8278 = vmatprep.subr.bf16.mxu1 %v13825_v24  ;;  %8244 = vmatpush1.bf16.msra.mxu0 %v13826_v63  ;;  %v13836_v24 = vld [vmem:[#allocation96_spill] sm:$0xff]  ;;  %v13837_v63 = vld [vmem:[#allocation98_spill] sm:$0xff] }
0x1031   :  { %8310 = vmatprep.subr.bf16.mxu0 %v13827_v32  ;;  %v13838_v32 = vld [vmem:[#allocation100_spill] sm:$0xff] }
0x1033   :  { %8280 = vmatpush1.bf16.msra.mxu1 %v13828_v27  ;;  %v13839_v27 = vld [vmem:[#allocation102_spill] sm:$0xff] }
0x1034   :  { %8282 = vmatprep.subr.bf16.mxu1 %v13829_v6  ;;  %v13840_v6 = vld [vmem:[#allocation104_spill] sm:$0xff] }
0x1037   :  { %8284 = vmatpush1.bf16.msra.mxu1 %v13830_v55  ;;  %v13841_v55 = vld [vmem:[#allocation106_spill] sm:$0xff] }
0x1038   :  { %8286 = vmatprep.subr.bf16.mxu1 %v13831_v0  ;;  %v13842_v0 = vld [vmem:[#allocation108_spill] sm:$0xff] }
0x103b   :  { %8288 = vmatpush1.bf16.msra.mxu1 %v13832_v43  ;;  %v13843_v43 = vld [vmem:[#allocation27_spill] sm:$0xff] }
0x103c   :  { %8290 = vmatprep.subr.bf16.mxu1 %v13833_v46 }
0x103f   :  { %8292 = vmatpush1.bf16.msra.mxu1 %v13834_v61 }
0x1040   :  { %8294 = vmatprep.subr.bf16.mxu1 %v13835_v49 }
0x1043   :  { %8296 = vmatpush1.bf16.msra.mxu1 %v13836_v24 }
0x1044   :  { %8298 = vmatprep.subr.bf16.mxu1 %v13837_v63 }
0x1047   :  { %8300 = vmatpush1.bf16.msra.mxu1 %v13838_v32 }
0x1048   :  { %8302 = vmatprep.subr.bf16.mxu1 %v13839_v27 }
0x104b   :  { %8304 = vmatpush1.bf16.msra.mxu1 %v13840_v6 }
0x104c   :  { %8306 = vmatprep.subr.bf16.mxu1 %v13841_v55 }
0x104f   :  { %8308 = vmatpush1.bf16.msra.mxu1 %v13842_v0 }
0x1050   :  { %8342 = vmatprep.subr.bf16.mxu1 %v13843_v43 }
0x10c5   :  { %v3776_v46 = vpop.f32.mrb[14].mxu1  ;;  %v11853_v61 = vpop.f32.mrb[16].mxu0 }
0x10c6   :  { %13844 = vst [vmem:[#allocation111_spill] sm:$0xff] %v11853_v61  ;;  %v3923_v49 = vcombine.high %v3776_v46, %v3776_v46  ;;  %v3930_v24 = vrot.slane %v3776_v46, %v13845_v60  ;;  %v11856_v34 = vpop.f32.mrb[15].mxu1  ;;  %v11858_v63 = vpop.f32.mrb[17].mxu0 }
0x10c7   :  { %13846 = vst [vmem:[#allocation114_spill] sm:$0xff] %v11856_v34  ;;  %13847 = vst [vmem:[#allocation109_spill] sm:$0xff] %v11858_v63  ;;  %v9207_v63 = vld [vmem:[%s13173_s2 + $0x30] sm:$0xff] }
0x10c8   :  { %v3937_v27 = vrot.slane %v3923_v49, %v13845_v60  ;;  %v3938_v32 = vcombine.high %v3930_v24, %v3930_v24  ;;  %v3946_v6 = vrot.slane %v3930_v24, %v13845_v60  ;;  %v9199_v49 = vld [vmem:[%s13173_s2 + $0x8] sm:$0xff] }
0x10ca   :  { %v3953_v55 = vrot.slane %v3937_v27, %v13845_v60  ;;  %v3960_v0 = vrot.slane %v3938_v32, %v13845_v60  ;;  %v3968_v43 = vcombine.high %v3946_v6, %v3946_v6  ;;  %v3975_v44 = vrot.slane %v3946_v6, %v13528_v42  ;;  %v9200_v32 = vld [vmem:[%s13173_s2] sm:$0xff] }
0x10cb   :  { %v3939_v1 = vcombine.high %v3937_v27, %v3937_v27  ;;  %v9201_v27 = vld [vmem:[%s13173_s2 + $0x10] sm:$0xff] }
0x10cc   :  { %v3970_v37 = vcombine.high %v3960_v0, %v3960_v0  ;;  %v3979_v46 = vrot.slane %v3960_v0, %v13528_v42  ;;  %v3983_v28 = vrot.slane %v3968_v43, %v13528_v42  ;;  %v3991_v56 = vrot.slane %v3953_v55, %v13528_v42  ;;  %v9202_v43 = vld [vmem:[%s13173_s2 + $0x20] sm:$0xff] }
0x10cd   :  { %v4013_v24 = vadd.f32 %v9199_v49, %v3975_v44  ;;  %v4012_v38 = vadd.f32 %v9200_v32, %v3975_v44  ;;  %v3967_v48 = vrot.slane %v3939_v1, %v13845_v60  ;;  %v9203_v49 = vld [vmem:[%s13173_s2 + $0x18] sm:$0xff]  ;;  %v9204_v44 = vld [vmem:[%s13173_s2 + $0x40] sm:$0xff] }
0x10ce   :  { %v4014_v6 = vadd.f32 %v9201_v27, %v3979_v46  ;;  %v4016_v31 = vadd.f32 %v9202_v43, %v3983_v28  ;;  %v4015_v61 = vadd.f32 %v9203_v49, %v3979_v46  ;;  %v4020_v32 = vadd.f32 %v9204_v44, %v3991_v56  ;;  %v9206_v44 = vld [vmem:[%s13173_s2 + $0x28] sm:$0xff] }
0x10cf   :  { %v4029_v0 = vmax.f32 %v4013_v24, 0.0  ;;  %v4028_v18 = vmax.f32 %v4012_v38, 0.0  ;;  %v3987_v24 = vrot.slane %v3970_v37, %v13528_v42  ;;  %v11891_v38 = vld [vmem:[%s13176_s5] ss:$0 sm:$0xff]  ;;  %v3969_v46 = vcombine.high %v3953_v55, %v3953_v55 }
0x10d0   :  { %v4032_v43 = vmax.f32 %v4016_v31, 0.0  ;;  %v4030_v60 = vmax.f32 %v4014_v6, 0.0  ;;  %v4031_v49 = vmax.f32 %v4015_v61, 0.0  ;;  %v4017_v37 = vadd.f32 %v9206_v44, %v3983_v28 }
0x10d1   :  { %v4045_v27 = vmul.f32 %v11891_v38, %v4029_v0  ;;  %v4044_v1 = vmul.f32 %v11891_v38, %v4028_v18  ;;  %v4018_v34 = vadd.f32 %v9207_v63, %v3987_v24  ;;  %v4036_v31 = vmax.f32 %v4020_v32, 0.0  ;;  %v9208_v63 = vld [vmem:[%s13173_s2 + $0x48] sm:$0xff] }
0x10d2   :  { %v4048_v0 = vmul.f32 %v11891_v38, %v4032_v43  ;;  %v4046_v18 = vmul.f32 %v11891_v38, %v4030_v60  ;;  %v3995_v6 = vrot.slane %v3967_v48, %v13528_v42  ;;  %v3971_v55 = vcombine.high %v3967_v48, %v3967_v48  ;;  %v9209_v60 = vld [vmem:[%s13173_s2 + $0x50] sm:$0xff] }
0x10d3   :  { %4062 = vadd.xlane.f32.xlu1 %v4045_v27  ;;  %4060 = vadd.xlane.f32.xlu0 %v4044_v1  ;;  %v4047_v61 = vmul.f32 %v11891_v38, %v4031_v49  ;;  %v4033_v27 = vmax.f32 %v4017_v37, 0.0  ;;  %v4034_v1 = vmax.f32 %v4018_v34, 0.0  ;;  %v4052_v28 = vmul.f32 %v11891_v38, %v4036_v31  ;;  %v9210_v49 = vld [vmem:[%s13173_s2 + $0x38] sm:$0xff] }
0x10d4   :  { %v4021_v44 = vadd.f32 %v9208_v63, %v3991_v56  ;;  %v4022_v32 = vadd.f32 %v9209_v60, %v3995_v6  ;;  %v3999_v43 = vrot.slane %v3969_v46, %v13528_v42  ;;  %v4019_v37 = vadd.f32 %v9210_v49, %v3987_v24  ;;  %v9214_v49 = vld [vmem:[%s13173_s2 + $0x68] sm:$0xff] }
0x10d5   :  { %v4049_v48 = vmul.f32 %v11891_v38, %v4033_v27  ;;  %v4050_v34 = vmul.f32 %v11891_v38, %v4034_v1  ;;  %v4003_v46 = vrot.slane %v3971_v55, %v13528_v42  ;;  %v9212_v27 = vld [vmem:[%s13173_s2 + $0x58] sm:$0xff] }
0x10d6   :  { %v4038_v56 = vmax.f32 %v4022_v32, 0.0  ;;  %v4023_v1 = vadd.f32 %v9212_v27, %v3995_v6 }
0x10d7   :  { %4068 = vadd.xlane.f32.xlu1 %v4048_v0  ;;  %4064 = vadd.xlane.f32.xlu0 %v4046_v18  ;;  %v4037_v0 = vmax.f32 %v4021_v44, 0.0  ;;  %v9211_v18 = vld [vmem:[%s13173_s2 + $0x60] sm:$0xff]  ;;  %v9213_v44 = vld [vmem:[%s13173_s2 + $0x70] sm:$0xff] }
0x10d8   :  { %v4024_v31 = vadd.f32 %v9211_v18, %v3999_v43  ;;  %v4054_v24 = vmul.f32 %v11891_v38, %v4038_v56  ;;  %v4026_v60 = vadd.f32 %v9213_v44, %v4003_v46 }
0x10da   :  { %v4040_v63 = vmax.f32 %v4024_v31, 0.0  ;;  %v4042_v6 = vmax.f32 %v4026_v60, 0.0 }
0x10db   :  { %4066 = vadd.xlane.f32.xlu0 %v4047_v61  ;;  %4076 = vadd.xlane.f32.xlu1 %v4052_v28  ;;  %v4035_v61 = vmax.f32 %v4019_v37, 0.0  ;;  %v4053_v28 = vmul.f32 %v11891_v38, %v4037_v0  ;;  %v4025_v37 = vadd.f32 %v9214_v49, %v3999_v43 }
0x10dc   :  { %v4058_v18 = vmul.f32 %v11891_v38, %v4042_v6 }
0x10dd   :  { %v4051_v55 = vmul.f32 %v11891_v38, %v4035_v61  ;;  %v4041_v31 = vmax.f32 %v4025_v37, 0.0  ;;  %v9215_v61 = vld [vmem:[%s13173_s2 + $0x78] sm:$0xff] }
0x10de   :  { %v4027_v27 = vadd.f32 %v9215_v61, %v4003_v46 }
0x10df   :  { %4070 = vadd.xlane.f32.xlu0 %v4049_v48  ;;  %4072 = vadd.xlane.f32.xlu1 %v4050_v34  ;;  %v4056_v48 = vmul.f32 %v11891_v38, %v4040_v63  ;;  %v4039_v34 = vmax.f32 %v4023_v1, 0.0  ;;  %v4057_v1 = vmul.f32 %v11891_v38, %v4041_v31 }
0x10e1   :  { %v4055_v56 = vmul.f32 %v11891_v38, %v4039_v34 }
0x10e3   :  { %4078 = vadd.xlane.f32.xlu0 %v4053_v28  ;;  %4080 = vadd.xlane.f32.xlu1 %v4054_v24  ;;  %v4043_v28 = vmax.f32 %v4027_v27, 0.0 }
0x10e5   :  { %v11931_v32 = vpop.f32.mrb[16].mxu1  ;;  %v4059_v43 = vmul.f32 %v11891_v38, %v4043_v28 }
0x10e6   :  { %13848 = vst [vmem:[#allocation24_spill] sm:$0xff] %v11931_v32  ;;  %v7374_v0 = vpop.f32.mrb[17].mxu1 }
0x10e7   :  { %4074 = vadd.xlane.f32.xlu0 %v4051_v55  ;;  %4084 = vadd.xlane.f32.xlu1 %v4056_v48 }
0x10eb   :  { %4082 = vadd.xlane.f32.xlu0 %v4055_v56  ;;  %4088 = vadd.xlane.f32.xlu1 %v4058_v18 }
0x10ef   :  { %4086 = vadd.xlane.f32.xlu0 %v4057_v1 }
0x10f3   :  { %4090 = vadd.xlane.f32.xlu0 %v4059_v43 }
0x1160   :  { %v4063_v24 = vpop.xlane.xlu1 %4062  ;;  %v4061_v63 = vpop.xlane.xlu0 %4060 }
0x1161   :  { %v4115_v56 = vrot.slane %v4063_v24, %v13621_v11  ;;  %v4111_v18 = vrot.slane %v4061_v63, %v13622_v29 }
0x1163   :  { %v4116_v10 = vsel %vm694_vm0, %v4115_v56, %v4111_v18 }
0x1164   :  { %v11944_v44 = vpop.xlane.xlu1 %4068  ;;  %v4065_v60 = vpop.xlane.xlu0 %4064 }
0x1165   :  { %v4120_v31 = vrot.slane %v4065_v60, %v13622_v29  ;;  %v4129_v27 = vrot.slane %v11944_v44, %v13622_v29 }
0x1168   :  { %v4067_v55 = vpop.xlane.xlu0 %4066  ;;  %v11946_v48 = vpop.xlane.xlu1 %4076 }
0x1169   :  { %v4124_v38 = vrot.slane %v4067_v55, %v13621_v11 }
0x116b   :  { %v4125_v43 = vsel %vm694_vm0, %v4124_v38, %v4120_v31 }
0x116c   :  { %v11948_v34 = vpop.xlane.xlu0 %4070  ;;  %v11950_v46 = vpop.xlane.xlu1 %4072  ;;  %v4180_v57 = vsel %vm759_vm1, %v4125_v43, %v4116_v10 }
0x116d   :  { %v4133_v0 = vrot.slane %v11948_v34, %v13621_v11  ;;  %v4138_v32 = vrot.slane %v11950_v46, %v13622_v29 }
0x116f   :  { %v4134_v58 = vsel %vm694_vm0, %v4133_v0, %v4129_v27 }
0x1170   :  { %v11952_v6 = vpop.xlane.xlu0 %4078  ;;  %v11954_v49 = vpop.xlane.xlu1 %4080  ;;  %v4181_v38 = vsel %vm761_vm2, %v4134_v58, %v4180_v57 }
0x1171   :  { %v4151_v53 = vrot.slane %v11952_v6, %v13621_v11  ;;  %v4156_v31 = vrot.slane %v11954_v49, %v13622_v29 }
0x1174   :  { %v11956_v37 = vpop.xlane.xlu0 %4074  ;;  %v11968_v1 = vpop.xlane.xlu1 %4084 }
0x1175   :  { %v4142_v61 = vrot.slane %v11956_v37, %v13621_v11  ;;  %v4165_v10 = vrot.slane %v11968_v1, %v13622_v29 }
0x1177   :  { %v4143_v3 = vsel %vm694_vm0, %v4142_v61, %v4138_v32  ;;  %v4147_v32 = vrot.slane %v11946_v48, %v13622_v29 }
0x1178   :  { %v11970_v28 = vpop.xlane.xlu0 %4082  ;;  %v4182_v56 = vsel %vm763_vm3, %v4143_v3, %v4181_v38  ;;  %v11995_v18 = vpop.xlane.xlu1 %4088 }
0x1179   :  { %v4160_v17 = vrot.slane %v11970_v28, %v13621_v11  ;;  %v4152_v57 = vsel %vm694_vm0, %v4151_v53, %v4147_v32  ;;  %v4174_v43 = vrot.slane %v11995_v18, %v13622_v29 }
0x117a   :  { %v4183_v3 = vsel %vm765_vm4, %v4152_v57, %v4182_v56 }
0x117b   :  { %v4161_v61 = vsel %vm694_vm0, %v4160_v17, %v4156_v31 }
0x117c   :  { %v11983_v39 = vpop.xlane.xlu0 %4086  ;;  %v4184_v38 = vsel %vm767_vm5, %v4161_v61, %v4183_v3 }
0x117d   :  { %v4169_v0 = vrot.slane %v11983_v39, %v13621_v11 }
0x117f   :  { %v4170_v27 = vsel %vm694_vm0, %v4169_v0, %v4165_v10 }
0x1180   :  { %v11999_v58 = vpop.xlane.xlu0 %4090  ;;  %v4185_v17 = vsel %vm769_vm6, %v4170_v27, %v4184_v38 }
0x1181   :  { %v4178_v36 = vrot.slane %v11999_v58, %v13621_v11 }
0x1183   :  { %v4179_v50 = vsel %vm694_vm0, %v4178_v36, %v4174_v43 }
0x1184   :  { %v4186_v53 = vsel %vm771_vm7, %v4179_v50, %v4185_v17 }
0x1185   :  { %v4188_v31 = vsel %vm774_vm8, %v4186_v53, -inf }
0x1186   :  { %4189 = vmax.xlane.f32.xlu1 %v4188_v31 }
0x1213   :  { %v4190_v0 = vpop.xlane.xlu1 %4189 }
0x1214   :  { %v4195_v32 = vrot.slane %v4190_v0, %v13528_v42  ;;  %v4199_v10 = vrot.slane %v4190_v0, %v13530_v12  ;;  %v4203_v56 = vrot.slane %v4190_v0, %v13535_v5  ;;  %v4207_v27 = vrot.slane %v4190_v0, %v13533_v2 }
0x1215   :  { %v4211_v53 = vrot.slane %v4190_v0, %v13623_v23 }
0x1216   :  { %v4232_v40 = vsub.f32 %v4061_v63, %v4195_v32  ;;  %v4233_v41 = vsub.f32 %v4063_v24, %v4195_v32  ;;  %v4235_v57 = vsub.f32 %v4067_v55, %v4199_v10  ;;  %v4234_v61 = vsub.f32 %v4065_v60, %v4199_v10 }
0x1217   :  { %v4237_v50 = vsub.f32 %v11948_v34, %v4203_v56  ;;  %v4236_v38 = vsub.f32 %v11944_v44, %v4203_v56  ;;  %v4239_v24 = vsub.f32 %v11956_v37, %v4207_v27  ;;  %v4238_v60 = vsub.f32 %v11950_v46, %v4207_v27 }
0x1218   :  { %v4248_v3 = vmul.f32 1.442695, %v4232_v40  ;;  %v4250_v36 = vmul.f32 1.442695, %v4233_v41  ;;  %v4254_v43 = vmul.f32 1.442695, %v4235_v57  ;;  %v4215_v40 = vrot.slane %v4190_v0, %v13624_v62 }
0x1219   :  { %v4252_v17 = vmul.f32 1.442695, %v4234_v61  ;;  %v4258_v63 = vmul.f32 1.442695, %v4237_v50  ;;  %v4256_v41 = vmul.f32 1.442695, %v4236_v38  ;;  %v4241_v55 = vsub.f32 %v11952_v6, %v4211_v53 }
0x121a   :  { %8941 = vpow2.f32 %v4248_v3  ;;  %v4262_v34 = vmul.f32 1.442695, %v4239_v24  ;;  %v4240_v44 = vsub.f32 %v11946_v48, %v4211_v53  ;;  %v4260_v31 = vmul.f32 1.442695, %v4238_v60 }
0x121b   :  { %8943 = vpow2.f32 %v4250_v36  ;;  %v4219_v46 = vrot.slane %v4190_v0, %v13625_v7  ;;  %v4243_v37 = vsub.f32 %v11970_v28, %v4215_v40  ;;  %v4266_v56 = vmul.f32 1.442695, %v4241_v55 }
0x121c   :  { %8945 = vpow2.f32 %v4254_v43  ;;  %v4242_v6 = vsub.f32 %v11954_v49, %v4215_v40  ;;  %v4264_v48 = vmul.f32 1.442695, %v4240_v44  ;;  %v4223_v3 = vrot.slane %v4190_v0, %v13626_v13 }
0x121d   :  { %8947 = vpow2.f32 %v4252_v17  ;;  %v4245_v36 = vsub.f32 %v11983_v39, %v4219_v46  ;;  %v4270_v28 = vmul.f32 1.442695, %v4243_v37  ;;  %v4244_v27 = vsub.f32 %v11968_v1, %v4219_v46 }
0x121e   :  { %8949 = vpow2.f32 %v4258_v63  ;;  %v4268_v49 = vmul.f32 1.442695, %v4242_v6  ;;  %v4247_v38 = vsub.f32 %v11999_v58, %v4223_v3  ;;  %v4246_v39 = vsub.f32 %v11995_v18, %v4223_v3 }
0x121f   :  { %8951 = vpow2.f32 %v4256_v41  ;;  %v4274_v0 = vmul.f32 1.442695, %v4245_v36  ;;  %v4272_v17 = vmul.f32 1.442695, %v4244_v27 }
0x1220   :  { %8953 = vpow2.f32 %v4262_v34  ;;  %v4278_v24 = vmul.f32 1.442695, %v4247_v38  ;;  %v4276_v58 = vmul.f32 1.442695, %v4246_v39 }
0x1221   :  { %8955 = vpow2.f32 %v4260_v31 }
0x1222   :  { %8957 = vpow2.f32 %v4266_v56 }
0x1223   :  { %8959 = vpow2.f32 %v4264_v48 }
0x1224   :  { %v12024_v32 = vpop.eup %8941  ;;  %8961 = vpow2.f32 %v4270_v28 }
0x1225   :  { %v12026_v10 = vpop.eup %8943  ;;  %4297 = vperm.xlu0 %8748, %v12024_v32   ;;  %8963 = vpow2.f32 %v4268_v49 }
0x1226   :  { %4300 = vperm.xlu1 %8747, %v12026_v10   ;;  %v12033_v57 = vpop.eup %8945  ;;  %8965 = vpow2.f32 %v4274_v0 }
0x1227   :  { %v12035_v61 = vpop.eup %8947  ;;  %8967 = vpow2.f32 %v4272_v17 }
0x1228   :  { %v12042_v50 = vpop.eup %8949  ;;  %8969 = vpow2.f32 %v4278_v24 }
0x1229   :  { %4306 = vperm.xlu0 %8748, %v12033_v57   ;;  %v12044_v43 = vpop.eup %8951  ;;  %8971 = vpow2.f32 %v4276_v58 }
0x122a   :  { %4303 = vperm.xlu1 %8747, %v12035_v61   ;;  %v12050_v53 = vpop.eup %8953 }
0x122b   :  { %v12052_v1 = vpop.eup %8955 }
0x122c   :  { %v12056_v63 = vpop.eup %8957 }
0x122d   :  { %4312 = vperm.xlu0 %8748, %v12042_v50   ;;  %v12058_v60 = vpop.eup %8959 }
0x122e   :  { %4309 = vperm.xlu1 %8747, %v12044_v43   ;;  %v12062_v18 = vpop.eup %8961 }
0x122f   :  { %v12064_v41 = vpop.eup %8963 }
0x1230   :  { %v12068_v40 = vpop.eup %8965 }
0x1231   :  { %4318 = vperm.xlu0 %8748, %v12050_v53   ;;  %v12070_v55 = vpop.eup %8967 }
0x1232   :  { %4315 = vperm.xlu1 %8747, %v12052_v1   ;;  %v12074_v34 = vpop.eup %8969 }
0x1233   :  { %v12076_v44 = vpop.eup %8971 }
0x1235   :  { %4324 = vperm.xlu0 %8748, %v12056_v63  }
0x1236   :  { %4321 = vperm.xlu1 %8747, %v12058_v60  }
0x1239   :  { %4330 = vperm.xlu0 %8748, %v12062_v18  }
0x123a   :  { %4327 = vperm.xlu1 %8747, %v12064_v41  }
0x123d   :  { %4336 = vperm.xlu0 %8748, %v12068_v40  }
0x123e   :  { %4333 = vperm.xlu1 %8747, %v12070_v55  }
0x1241   :  { %4342 = vperm.xlu0 %8748, %v12074_v34  }
0x1242   :  { %4339 = vperm.xlu1 %8747, %v12076_v44  }
0x12a4   :  { %v4298_v31 = vpop.permute.xlu0 %4297 }
0x12a5   :  { %v4301_v46 = vpop.permute.xlu1 %4300  ;;  %v4347_v52 = vrot.slane %v4298_v31, %v13622_v29 }
0x12a6   :  { %v4351_v58 = vrot.slane %v4301_v46, %v13621_v11 }
0x12a8   :  { %v4307_v37 = vpop.permute.xlu0 %4306 }
0x12a9   :  { %v4304_v56 = vpop.permute.xlu1 %4303  ;;  %v4360_v38 = vrot.slane %v4307_v37, %v13621_v11 }
0x12aa   :  { %v4356_v49 = vrot.slane %v4304_v56, %v13622_v29 }
0x12ac   :  { %v4313_v6 = vpop.permute.xlu0 %4312  ;;  %v4361_v37 = vsel %vm694_vm0, %v4360_v38, %v4356_v49 }
0x12ad   :  { %v4310_v48 = vpop.permute.xlu1 %4309  ;;  %v4369_v17 = vrot.slane %v4313_v6, %v13621_v11 }
0x12ae   :  { %v4365_v39 = vrot.slane %v4310_v48, %v13622_v29 }
0x12b0   :  { %v4319_v3 = vpop.permute.xlu0 %4318  ;;  %v4370_v33 = vsel %vm694_vm0, %v4369_v17, %v4365_v39 }
0x12b1   :  { %v4316_v36 = vpop.permute.xlu1 %4315  ;;  %v4378_v30 = vrot.slane %v4319_v3, %v13621_v11 }
0x12b2   :  { %v4374_v59 = vrot.slane %v4316_v36, %v13622_v29  ;;  %v4352_v36 = vsel %vm694_vm0, %v4351_v58, %v4347_v52 }
0x12b4   :  { %v4325_v28 = vpop.permute.xlu0 %4324  ;;  %v4379_v3 = vsel %vm694_vm0, %v4378_v30, %v4374_v59 }
0x12b5   :  { %v4322_v27 = vpop.permute.xlu1 %4321  ;;  %v4387_v56 = vrot.slane %v4325_v28, %v13621_v11  ;;  %v4416_v28 = vsel %vm759_vm1, %v4361_v37, %v4352_v36 }
0x12b6   :  { %v4383_v35 = vrot.slane %v4322_v27, %v13622_v29  ;;  %v4417_v38 = vsel %vm761_vm2, %v4370_v33, %v4416_v28 }
0x12b7   :  { %v4418_v39 = vsel %vm763_vm3, %v4379_v3, %v4417_v38 }
0x12b8   :  { %v4331_v0 = vpop.permute.xlu0 %4330  ;;  %v4388_v49 = vsel %vm694_vm0, %v4387_v56, %v4383_v35 }
0x12b9   :  { %v4328_v24 = vpop.permute.xlu1 %4327  ;;  %v4396_v48 = vrot.slane %v4331_v0, %v13621_v11  ;;  %v4419_v30 = vsel %vm765_vm4, %v4388_v49, %v4418_v39 }
0x12ba   :  { %v4392_v4 = vrot.slane %v4328_v24, %v13622_v29 }
0x12bc   :  { %v4337_v6 = vpop.permute.xlu0 %4336  ;;  %v4397_v0 = vsel %vm694_vm0, %v4396_v48, %v4392_v4 }
0x12bd   :  { %v4334_v46 = vpop.permute.xlu1 %4333  ;;  %v4405_v31 = vrot.slane %v4337_v6, %v13621_v11  ;;  %v4420_v58 = vsel %vm767_vm5, %v4397_v0, %v4419_v30 }
0x12be   :  { %v4401_v27 = vrot.slane %v4334_v46, %v13622_v29 }
0x12c0   :  { %v4343_v24 = vpop.permute.xlu0 %4342  ;;  %v4406_v17 = vsel %vm694_vm0, %v4405_v31, %v4401_v27 }
0x12c1   :  { %v4340_v6 = vpop.permute.xlu1 %4339  ;;  %v4414_v52 = vrot.slane %v4343_v24, %v13621_v11  ;;  %v4421_v33 = vsel %vm769_vm6, %v4406_v17, %v4420_v58 }
0x12c2   :  { %v4410_v59 = vrot.slane %v4340_v6, %v13622_v29 }
0x12c4   :  { %v4415_v35 = vsel %vm694_vm0, %v4414_v52, %v4410_v59 }
0x12c5   :  { %v4422_v4 = vsel %vm771_vm7, %v4415_v35, %v4421_v33 }
0x12c6   :  { %v4424_v56 = vsel %vm774_vm8, %v4422_v4, 0.0 }
0x12c7   :  { %4425 = vadd.xlane.f32.xlu1 %v4424_v56 }
0x1354   :  { %v4426_v37 = vpop.xlane.xlu1 %4425 }
0x1355   :  { %v4447_v48 = vrot.slane %v4426_v37, %v13623_v23  ;;  %v4431_v46 = vrot.slane %v4426_v37, %v13528_v42  ;;  %v4459_v31 = vrot.slane %v4426_v37, %v13626_v13  ;;  %v4435_v36 = vrot.slane %v4426_v37, %v13530_v12 }
0x1356   :  { %v4439_v49 = vrot.slane %v4426_v37, %v13535_v5  ;;  %v4443_v6 = vrot.slane %v4426_v37, %v13533_v2 }
0x1357   :  { %8973 = vrcp.f32 %v4447_v48 }
0x1358   :  { %8975 = vrcp.f32 %v4431_v46 }
0x1359   :  { %8977 = vrcp.f32 %v4459_v31 }
0x135a   :  { %8979 = vrcp.f32 %v4435_v36 }
0x135b   :  { %8981 = vrcp.f32 %v4439_v49 }
0x135c   :  { %8983 = vrcp.f32 %v4443_v6 }
0x1361   :  { %v8974_v3 = vpop.eup %8973 }
0x1362   :  { %v8976_v27 = vpop.eup %8975  ;;  %v4482_v28 = vmul.f32 %v8974_v3, %v12056_v63 }
0x1363   :  { %v8978_v38 = vpop.eup %8977  ;;  %v4469_v0 = vmul.f32 %v8976_v27, %v12024_v32  ;;  %v4470_v39 = vmul.f32 %v8976_v27, %v12026_v10 }
0x1364   :  { %4539 = vperm.xlu1 %8747, %v4482_v28   ;;  %v4490_v24 = vmul.f32 %v8978_v38, %v12076_v44  ;;  %v8980_v17 = vpop.eup %8979  ;;  %v4451_v44 = vrot.slane %v4426_v37, %v13624_v62 }
0x1365   :  { %4494 = vperm.xlu0 %8748, %v4469_v0   ;;  %v4472_v52 = vmul.f32 %v8980_v17, %v12035_v61  ;;  %v4473_v63 = vmul.f32 %v8980_v17, %v12033_v57  ;;  %v8982_v30 = vpop.eup %8981  ;;  %v4455_v61 = vrot.slane %v4426_v37, %v13625_v7  ;;  %v4481_v57 = vmul.f32 %v8974_v3, %v12058_v60  ;;  %v7117_v60 = vld [vmem:[%s13174_s3 + $0x18] sm:$0xff]  ;;  %v9217_v3 = vld [vmem:[%s13172_s1 + $0x28] sm:$0xff] }
0x1366   :  { %v4475_v32 = vmul.f32 %v8982_v30, %v12044_v43  ;;  %v4476_v10 = vmul.f32 %v8982_v30, %v12042_v50  ;;  %v8984_v59 = vpop.eup %8983  ;;  %8985 = vrcp.f32 %v4451_v44  ;;  %4724 = vmatprep.mubr.f32.mxu0 %v7117_v60  ;;  %4795 = vmatprep.mubr.f32.mxu1 %v7117_v60  ;;  %v9220_v17 = vld [vmem:[%s13172_s1 + $0x38] sm:$0xff]  ;;  %v9222_v30 = vld [vmem:[%s13172_s1 + $0x40] sm:$0xff] }
0x1367   :  { %v4478_v58 = vmul.f32 %v8984_v59, %v12052_v1  ;;  %v4479_v35 = vmul.f32 %v8984_v59, %v12050_v53  ;;  %8987 = vrcp.f32 %v4455_v61  ;;  %v4491_v53 = vmul.f32 %v8978_v38, %v12074_v34  ;;  %v9218_v38 = vld [vmem:[%s13172_s1 + $0x8] sm:$0xff]  ;;  %v9223_v44 = vld [vmem:[%s13172_s1] sm:$0xff] }
0x1368   :  { %4564 = vperm.xlu1 %8747, %v4490_v24   ;;  %v9219_v24 = vld [vmem:[%s13172_s1 + $0x10] sm:$0xff] }
0x1369   :  { %4499 = vperm.xlu0 %8748, %v4470_v39  }
0x136d   :  { %4504 = vperm.xlu0 %8748, %v4472_v52   ;;  %v9221_v52 = vld [vmem:[%s13172_s1 + $0x20] sm:$0xff] }
0x1370   :  { %v8986_v43 = vpop.eup %8985 }
0x1371   :  { %4509 = vperm.xlu0 %8748, %v4473_v63   ;;  %v4484_v33 = vmul.f32 %v8986_v43, %v12064_v41  ;;  %v4485_v50 = vmul.f32 %v8986_v43, %v12062_v18  ;;  %v8988_v4 = vpop.eup %8987 }
0x1372   :  { %v4487_v1 = vmul.f32 %v8988_v4, %v12070_v55  ;;  %v4488_v56 = vmul.f32 %v8988_v4, %v12068_v40  ;;  %v9216_v40 = vld [vmem:[%s13172_s1 + $0x18] sm:$0xff] }
0x1375   :  { %4514 = vperm.xlu0 %8748, %v4475_v32  }
0x1379   :  { %4519 = vperm.xlu0 %8748, %v4476_v10  }
0x137d   :  { %4524 = vperm.xlu0 %8748, %v4478_v58   ;;  %v9224_v58 = vld [vmem:[%s13172_s1 + $0x30] sm:$0xff] }
0x1381   :  { %4529 = vperm.xlu0 %8748, %v4479_v35   ;;  %v9225_v35 = vld [vmem:[%s13172_s1 + $0x48] sm:$0xff] }
0x1385   :  { %4534 = vperm.xlu0 %8748, %v4481_v57  }
0x1389   :  { %4544 = vperm.xlu0 %8748, %v4484_v33  }
0x138d   :  { %4549 = vperm.xlu0 %8748, %v4485_v50  }
0x1391   :  { %4554 = vperm.xlu0 %8748, %v4487_v1  }
0x1395   :  { %4559 = vperm.xlu0 %8748, %v4488_v56  }
0x1399   :  { %4569 = vperm.xlu0 %8748, %v4491_v53  }
0x13e3   :  { %v4540_v49 = vpop.permute.xlu1 %4539 }
0x13e4   :  { %v4495_v41 = vpop.permute.xlu0 %4494  ;;  %v4581_v57 = vmul.f32 %v9225_v35, %v4540_v49 }
0x13e5   :  { %v4572_v10 = vmul.f32 %v9223_v44, %v4495_v41  ;;  %v9229_v44 = vld [vmem:[%s13172_s1 + $0x68] sm:$0xff] }
0x13e8   :  { %v4500_v37 = vpop.permute.xlu0 %4499 }
0x13e9   :  { %v4573_v0 = vmul.f32 %v9218_v38, %v4500_v37 }
0x13eb   :  { %v4588_v50 = vadd.f32 %v4573_v0, %v4572_v10 }
0x13ec   :  { %v4505_v18 = vpop.permute.xlu0 %4504 }
0x13ed   :  { %v4574_v39 = vmul.f32 %v9219_v24, %v4505_v18  ;;  %v4589_v41 = vrot.slane %v4588_v50, 4  ;;  %v9226_v18 = vld [vmem:[%s13172_s1 + $0x50] sm:$0xff] }
0x13f0   :  { %v4510_v48 = vpop.permute.xlu0 %4509 }
0x13f1   :  { %v4575_v34 = vmul.f32 %v9216_v40, %v4510_v48 }
0x13f3   :  { %v4595_v59 = vadd.f32 %v4575_v34, %v4574_v39 }
0x13f4   :  { %v4515_v46 = vpop.permute.xlu0 %4514 }
0x13f5   :  { %v4576_v63 = vmul.f32 %v9221_v52, %v4515_v46  ;;  %v4596_v56 = vrot.slane %v4595_v59, 4  ;;  %v9227_v46 = vld [vmem:[%s13172_s1 + $0x58] sm:$0xff] }
0x13f8   :  { %v4520_v31 = vpop.permute.xlu0 %4519 }
0x13f9   :  { %v4577_v27 = vmul.f32 %v9217_v3, %v4520_v31 }
0x13fb   :  { %v4602_v43 = vadd.f32 %v4577_v27, %v4576_v63  ;;  %v4590_v27 = vadd.f32 %v4589_v41, %v4588_v50 }
0x13fc   :  { %v4525_v55 = vpop.permute.xlu0 %4524 }
0x13fd   :  { %v4578_v61 = vmul.f32 %v9224_v58, %v4525_v55  ;;  %v4603_v53 = vrot.slane %v4602_v43, 4  ;;  %v4591_v52 = vrot.slane %v4590_v27, 2 }
0x13ff   :  { %v4604_v34 = vadd.f32 %v4603_v53, %v4602_v43  ;;  %v9231_v53 = vld [vmem:[%s13172_s1 + $0x78] sm:$0xff] }
0x1400   :  { %v4530_v36 = vpop.permute.xlu0 %4529 }
0x1401   :  { %v4579_v6 = vmul.f32 %v9220_v17, %v4530_v36  ;;  %v4597_v36 = vadd.f32 %v4596_v56, %v4595_v59  ;;  %v4605_v39 = vrot.slane %v4604_v34, 2 }
0x1403   :  { %v4609_v4 = vadd.f32 %v4579_v6, %v4578_v61  ;;  %v4598_v0 = vrot.slane %v4597_v36, 2  ;;  %v4565_v6 = vpop.permute.xlu1 %4564 }
0x1404   :  { %v4535_v28 = vpop.permute.xlu0 %4534 }
0x1405   :  { %v4580_v32 = vmul.f32 %v9222_v30, %v4535_v28  ;;  %v4610_v37 = vrot.slane %v4609_v4, 4  ;;  %v9228_v30 = vld [vmem:[%s13172_s1 + $0x60] sm:$0xff]  ;;  %v4599_v58 = vadd.f32 %v4598_v0, %v4597_v36 }
0x1407   :  { %v4616_v1 = vadd.f32 %v4581_v57, %v4580_v32  ;;  %v4611_v28 = vadd.f32 %v4610_v37, %v4609_v4  ;;  %v9230_v57 = vld [vmem:[%s13172_s1 + $0x70] sm:$0xff]  ;;  %v4592_v4 = vadd.f32 %v4591_v52, %v4590_v27  ;;  %v4600_v37 = vrot.slane %v4599_v58, 1 }
0x1408   :  { %v4545_v33 = vpop.permute.xlu0 %4544  ;;  %v4586_v43 = vmul.f32 %v9230_v57, %v4565_v6 }
0x1409   :  { %v4582_v48 = vmul.f32 %v9226_v18, %v4545_v33  ;;  %v4617_v55 = vrot.slane %v4616_v1, 4  ;;  %v4612_v63 = vrot.slane %v4611_v28, 2  ;;  %v4606_v33 = vadd.f32 %v4605_v39, %v4604_v34 }
0x140b   :  { %v4618_v38 = vadd.f32 %v4617_v55, %v4616_v1  ;;  %v4613_v1 = vadd.f32 %v4612_v63, %v4611_v28  ;;  %v4593_v55 = vrot.slane %v4592_v4, 1 }
0x140c   :  { %v4550_v60 = vpop.permute.xlu0 %4549 }
0x140d   :  { %v4583_v31 = vmul.f32 %v9227_v46, %v4550_v60  ;;  %v4619_v59 = vrot.slane %v4618_v38, 2  ;;  %v4614_v36 = vrot.slane %v4613_v1, 1 }
0x140f   :  { %v4623_v40 = vadd.f32 %v4583_v31, %v4582_v48  ;;  %v4620_v41 = vadd.f32 %v4619_v59, %v4618_v38  ;;  %v4607_v31 = vrot.slane %v4606_v33, 1  ;;  %v4615_v6 = vadd.f32 %v4614_v36, %v4613_v1  ;;  %v13851_v1 = vld [vmem:[#allocation7_spill] sm:$0xff]  ;;  %v13862_v36 = vld [vmem:[#allocation42_spill] sm:$0xff] }
0x1410   :  { %v4555_v3 = vpop.permute.xlu0 %4554 }
0x1411   :  { %v4624_v49 = vrot.slane %v4623_v40, 4  ;;  %v4584_v32 = vmul.f32 %v9228_v30, %v4555_v3  ;;  %v4621_v34 = vrot.slane %v4620_v41, 1  ;;  %v4608_v39 = vadd.f32 %v4607_v31, %v4606_v33  ;;  %v13860_v31 = vld [vmem:[#allocation40_spill] sm:$0xff] }
0x1413   :  { %v4625_v24 = vadd.f32 %v4624_v49, %v4623_v40  ;;  %v4601_v49 = vadd.f32 %v4600_v37, %v4599_v58  ;;  %v4622_v38 = vadd.f32 %v4621_v34, %v4620_v41  ;;  %v13855_v41 = vld [vmem:[#allocation9_spill] sm:$0xff]  ;;  %v13865_v34 = vmov 0.0|0.0  }
0x1414   :  { %v4560_v17 = vpop.permute.xlu0 %4559  ;;  %v13856_v37 = vld [vmem:[#allocation37_spill] sm:$0xff] }
0x1415   :  { %v4585_v10 = vmul.f32 %v9229_v44, %v4560_v17  ;;  %v4626_v61 = vrot.slane %v4625_v24, 2  ;;  %v4594_v17 = vadd.f32 %v4593_v55, %v4592_v4  ;;  %v13850_v4 = vld [vmem:[#allocation33_spill] sm:$0xff]  ;;  %v13861_v55 = vld [vmem:[#allocation12_spill] sm:$0xff] }
0x1417   :  { %v4630_v35 = vadd.f32 %v4585_v10, %v4584_v32  ;;  %v4627_v18 = vadd.f32 %v4626_v61, %v4625_v24  ;;  %v4652_v24 = vsel %vm759_vm1, %v4601_v49, %v4594_v17  ;;  %v13866_v49 = vld [vmem:[#allocation45_spill] sm:$0xff] }
0x1418   :  { %v4570_v50 = vpop.permute.xlu0 %4569  ;;  %v4653_v44 = vsel %vm761_vm2, %v4608_v39, %v4652_v24  ;;  %v13868_v17 = vld [vmem:[#allocation109_spill] sm:$0xff] }
0x1419   :  { %v4631_v56 = vrot.slane %v4630_v35, 4  ;;  %v4587_v60 = vmul.f32 %v9231_v53, %v4570_v50  ;;  %v4628_v27 = vrot.slane %v4627_v18, 1  ;;  %v4654_v61 = vsel %vm763_vm3, %v4615_v6, %v4653_v44  ;;  %v13849_v50 = vld [vmem:[#allocation6_spill] sm:$0xff]  ;;  %v13853_v53 = vld [vmem:[#allocation8_spill] sm:$0xff]  ;;  %v13871_v44 = vld [vmem:[#allocation17_spill] sm:$0xff] }
0x141a   :  { %v4655_v58 = vsel %vm765_vm4, %v4622_v38, %v4654_v61  ;;  %v13869_v38 = vld [vmem:[#allocation111_spill] sm:$0xff] }
0x141b   :  { %v4632_v48 = vadd.f32 %v4631_v56, %v4630_v35  ;;  %v4637_v46 = vadd.f32 %v4587_v60, %v4586_v43  ;;  %v4629_v30 = vadd.f32 %v4628_v27, %v4627_v18  ;;  %v13852_v56 = vld [vmem:[#allocation34_spill] sm:$0xff]  ;;  %v13854_v60 = vld [vmem:[#allocation36_spill] sm:$0xff] }
0x141c   :  { %v13857_v18 = vld [vmem:[#allocation10_spill] sm:$0xff] }
0x141d   :  { %v4633_v40 = vrot.slane %v4632_v48, 2  ;;  %v4638_v3 = vrot.slane %v4637_v46, 4  ;;  %v4656_v57 = vsel %vm767_vm5, %v4629_v30, %v4655_v58  ;;  %v13870_v30 = vld [vmem:[#allocation24_spill] sm:$0xff] }
0x141f   :  { %v4634_v28 = vadd.f32 %v4633_v40, %v4632_v48  ;;  %v4639_v0 = vadd.f32 %v4638_v3, %v4637_v46  ;;  %v13858_v48 = vld [vmem:[#allocation39_spill] sm:$0xff]  ;;  %v13863_v40 = vld [vmem:[#allocation13_spill] sm:$0xff] }
0x1420   :  { %v13859_v46 = vld [vmem:[#allocation11_spill] sm:$0xff] }
0x1421   :  { %v4635_v52 = vrot.slane %v4634_v28, 1  ;;  %v4640_v63 = vrot.slane %v4639_v0, 2  ;;  %v13864_v3 = vld [vmem:[#allocation43_spill] sm:$0xff] }
0x1423   :  { %v4641_v32 = vadd.f32 %v4640_v63, %v4639_v0  ;;  %v4636_v10 = vadd.f32 %v4635_v52, %v4634_v28  ;;  %v13867_v0 = vld [vmem:[#allocation114_spill] sm:$0xff] }
0x1425   :  { %v4642_v59 = vrot.slane %v4641_v32, 1  ;;  %v4657_v43 = vsel %vm769_vm6, %v4636_v10, %v4656_v57  ;;  %v13873_v57 = vld [vmem:[#allocation16_spill] sm:$0xff] }
0x1427   :  { %v4643_v35 = vadd.f32 %v4642_v59, %v4641_v32  ;;  %v13872_v59 = vld [vmem:[#allocation20_spill] sm:$0xff] }
0x1429   :  { %v4658_v33 = vsel %vm771_vm7, %v4643_v35, %v4657_v43 }
0x142a   :  { %4725 = vmatmul.mubr.f32.vlgmr.msra.gmra.mrb[18].mxu0 %v4658_v33  ;;  %4796 = vmatmul.mubr.f32.vlgmr.msra.gmra.mrb[18].mxu1 %v4658_v33 }
0x142b   :  { %8312 = vmatpush1.bf16.msra.mxu0 %v9388_v8  ;;  %8344 = vmatpush1.bf16.msra.mxu1 %v9844_v19 }
0x142c   :  { %8314 = vmatprep.subr.bf16.mxu0 %v9390_v9  ;;  %8346 = vmatprep.subr.bf16.mxu1 %v9858_v22 }
0x142d   :  { %4905 = vmatprep.mubr.f32.mxu0 %v13458_v51  ;;  %4976 = vmatprep.mubr.f32.mxu1 %v13458_v51 }
0x142f   :  { %8316 = vmatpush1.bf16.msra.mxu0 %v9406_v14  ;;  %8348 = vmatpush1.bf16.msra.mxu1 %v9871_v45 }
0x1430   :  { %8318 = vmatprep.subr.bf16.mxu0 %v9409_v15  ;;  %8350 = vmatprep.subr.bf16.mxu1 %v9886_v25 }
0x1433   :  { %8320 = vmatpush1.bf16.msra.mxu0 %v9424_v20  ;;  %8352 = vmatpush1.bf16.msra.mxu1 %v9905_v47 }
0x1434   :  { %8322 = vmatprep.subr.bf16.mxu0 %v9427_v21  ;;  %8354 = vmatprep.subr.bf16.mxu1 %v9914_v54 }
0x1437   :  { %8324 = vmatpush1.bf16.msra.mxu0 %v9442_v26  ;;  %8356 = vmatpush1.bf16.msra.mxu1 %v13739_v16 }
0x1438   :  { %8326 = vmatprep.subr.bf16.mxu0 %v13849_v50  ;;  %8358 = vmatprep.subr.bf16.mxu1 %v13850_v4 }
0x143b   :  { %8328 = vmatpush1.bf16.msra.mxu0 %v13851_v1  ;;  %8360 = vmatpush1.bf16.msra.mxu1 %v13852_v56 }
0x143c   :  { %8330 = vmatprep.subr.bf16.mxu0 %v13853_v53  ;;  %8362 = vmatprep.subr.bf16.mxu1 %v13854_v60 }
0x143f   :  { %8332 = vmatpush1.bf16.msra.mxu0 %v13855_v41  ;;  %8364 = vmatpush1.bf16.msra.mxu1 %v13856_v37 }
0x1440   :  { %8334 = vmatprep.subr.bf16.mxu0 %v13857_v18  ;;  %8366 = vmatprep.subr.bf16.mxu1 %v13858_v48 }
0x1443   :  { %8336 = vmatpush1.bf16.msra.mxu0 %v13859_v46  ;;  %8368 = vmatpush1.bf16.msra.mxu1 %v13860_v31 }
0x1444   :  { %8338 = vmatprep.subr.bf16.mxu0 %v13861_v55  ;;  %8370 = vmatprep.subr.bf16.mxu1 %v13862_v36 }
0x1447   :  { %8340 = vmatpush1.bf16.msra.mxu0 %v13863_v40  ;;  %8372 = vmatpush1.bf16.msra.mxu1 %v13864_v3 }
0x1448   :  { %8373 = vmatprep.subr.bf16.mxu0 %v13865_v34  ;;  %8398 = vmatprep.subr.bf16.mxu1 %v13866_v49 }
0x14fd   :  { %v4726_v27 = vpop.f32.mrb[18].mxu0  ;;  %v4797_v28 = vpop.f32.mrb[18].mxu1 }
0x14fe   :  { %v4727_v39 = vadd.f32 %v4726_v27, %v13867_v0  ;;  %v4798_v6 = vadd.f32 %v4797_v28, %v13868_v17  ;;  %v4728_v52 = vpop.f32.mrb[19].mxu0  ;;  %v4799_v63 = vpop.f32.mrb[19].mxu1  ;;  %v13874_v27 = vld [vmem:[#allocation25_spill] sm:$0xff] }
0x14ff   :  { %v4729_v24 = vadd.f32 %v4728_v52, %v13869_v38  ;;  %v4800_v32 = vadd.f32 %v4799_v63, %v13870_v30 }
0x1500   :  { %v4802_v10 = vadd.f32 %v4727_v39, %v13871_v44  ;;  %v4804_v0 = vadd.f32 %v4798_v6, %v13874_v27 }
0x1501   :  { %v4803_v61 = vadd.f32 %v4729_v24, %v13872_v59  ;;  %v4805_v43 = vadd.f32 %v4800_v32, %v13873_v57  ;;  %v4830_v24 = vstv %s7116_s24  ;;  %v13875_v32 = vld [vmem:[#allocation112_spill] sm:$0xff] }
0x1502   :  { %v7118_v58 = vmul.f32 -1.442695, %v4802_v10 }
0x1503   :  { %v7119_v35 = vmul.f32 -1.442695, %v4803_v61  ;;  %v7120_v33 = vmul.f32 -1.442695, %v4805_v43 }
0x1504   :  { %8989 = vpow2.f32 %v7118_v58 }
0x1505   :  { %8991 = vpow2.f32 %v7119_v35  ;;  %v13876_v35 = vld [vmem:[#allocation14_spill] sm:$0xff] }
0x1506   :  { %8993 = vpow2.f32 %v7120_v33  ;;  %vm4831_vm13 = vcmp.lt.s32.totalorder %v13876_v35, %v4830_v24  ;;  %v13884_v24 = vld [vmem:[#allocation51_spill] sm:$0xff] }
0x1507   :  { %8995 = vtanh.f32 %v4804_v0 }
0x150e   :  { %v8990_v28 = vpop.eup %8989 }
0x150f   :  { %v8992_v17 = vpop.eup %8991  ;;  %v4809_v49 = vadd.f32 1.0, %v8990_v28  ;;  %v13878_v28 = vld [vmem:[#allocation113_spill] sm:$0xff] }
0x1510   :  { %v4815_v52 = vadd.f32 1.0, %v8992_v17  ;;  %v8994_v39 = vpop.eup %8993 }
0x1511   :  { %8997 = vrcp.f32 %v4809_v49  ;;  %v8996_v63 = vpop.eup %8995  ;;  %v4822_v61 = vadd.f32 1.0, %v8994_v39  ;;  %v13881_v39 = vld [vmem:[#allocation47_spill] sm:$0xff] }
0x1512   :  { %8999 = vrcp.f32 %v4815_v52  ;;  %v13880_v52 = vld [vmem:[#allocation28_spill] sm:$0xff] }
0x1513   :  { %9001 = vrcp.f32 %v4822_v61  ;;  %v13887_v61 = vld [vmem:[#allocation55_spill] sm:$0xff] }
0x151b   :  { %v8998_v38 = vpop.eup %8997 }
0x151c   :  { %v9000_v30 = vpop.eup %8999  ;;  %v4826_v10 = vmul.f32 %v8998_v38, %v8996_v63  ;;  %v13882_v63 = vld [vmem:[#allocation49_spill] sm:$0xff] }
0x151d   :  { %v4825_v58 = vmul.f32 %v9000_v30, %v13875_v32  ;;  %v9002_v49 = vpop.eup %9001  ;;  %v13883_v38 = vld [vmem:[#allocation29_spill] sm:$0xff] }
0x151e   :  { %v13885_v30 = vld [vmem:[#allocation53_spill] sm:$0xff] }
0x151f   :  { %v4827_v6 = vadd.f32 %v4826_v10, %v4825_v58  ;;  %v13886_v10 = vld [vmem:[#allocation30_spill] sm:$0xff]  ;;  %v13889_v58 = vld [vmem:[#allocation32_spill] sm:$0xff] }
0x1521   :  { %9003 = vtanh.f32 %v4827_v6  ;;  %v12239_v43 = vsel %vm4831_vm13, %v4827_v6, %v13875_v32  ;;  %v13888_v32 = vld [vmem:[#allocation57_spill] sm:$0xff]  ;;  %v13890_v6 = vld [vmem:[#allocation59_spill] sm:$0xff] }
0x1522   :  { %13877 = vst [vmem:[#allocation110_spill] sm:$0xff] %v12239_v43  ;;  %v9235_v43 = vld [vmem:[%s13173_s2 + $0x10] sm:$0xff] }
0x152b   :  { %v9004_v33 = vpop.eup %9003 }
0x152c   :  { %v4829_v0 = vmul.f32 %v9004_v33, %v9002_v49  ;;  %v13891_v49 = vld [vmem:[#allocation61_spill] sm:$0xff]  ;;  %v13892_v33 = vld [vmem:[#allocation35_spill] sm:$0xff] }
0x152e   :  { %7121 = vst [vmem:[%s13179_s8 + $0x18] sm:$0xff] %v4829_v0  ;;  %v12245_v17 = vsel %vm4831_vm13, %v4829_v0, %v13878_v28  ;;  %v13893_v0 = vld [vmem:[#allocation63_spill] sm:$0xff]  ;;  %v13894_v28 = vld [vmem:[#allocation65_spill] sm:$0xff] }
0x152f   :  { %13879 = vst [vmem:[#allocation21_spill] sm:$0xff] %v12245_v17  ;;  %4906 = vmatmul.mubr.f32.vlgmr.msra.gmra.mrb[20].mxu0 %v12245_v17  ;;  %4977 = vmatmul.mubr.f32.vlgmr.msra.gmra.mrb[20].mxu1 %v12245_v17 }
0x1530   :  { %8375 = vmatpush3.bf16.msra.mxu0 %v13880_v52  ;;  %7407 = vmatprep.mubr.msk.f32.mxu0 %vm9317_vm9, %v13458_v51 }
0x1531   :  { %8376 = vmatprep.subr.bf16.mxu0 %v13865_v34  ;;  %8400 = vmatpush1.bf16.msra.mxu1 %v13881_v39 }
0x1532   :  { %8402 = vmatprep.subr.bf16.mxu1 %v13882_v63 }
0x1534   :  { %8378 = vmatpush3.bf16.msra.mxu0 %v13883_v38  ;;  %v13954_v38 = vld [vmem:[#allocation15_spill] sm:$0xff] }
0x1535   :  { %8379 = vmatprep.subr.bf16.mxu0 %v13865_v34  ;;  %8404 = vmatpush1.bf16.msra.mxu1 %v13884_v24  ;;  %v13915_v24 = vld [vmem:[#allocation87_spill] sm:$0xff] }
0x1536   :  { %8406 = vmatprep.subr.bf16.mxu1 %v13885_v30  ;;  %v13908_v30 = vld [vmem:[#allocation81_spill] sm:$0xff] }
0x1538   :  { %8381 = vmatpush3.bf16.msra.mxu0 %v13886_v10  ;;  %v13895_v10 = vld [vmem:[#allocation38_spill] sm:$0xff] }
0x1539   :  { %8382 = vmatprep.subr.bf16.mxu0 %v13865_v34  ;;  %8408 = vmatpush1.bf16.msra.mxu1 %v13887_v61  ;;  %v13898_v61 = vld [vmem:[#allocation41_spill] sm:$0xff] }
0x153a   :  { %8410 = vmatprep.subr.bf16.mxu1 %v13888_v32  ;;  %v13896_v32 = vld [vmem:[#allocation67_spill] sm:$0xff] }
0x153c   :  { %8384 = vmatpush3.bf16.msra.mxu0 %v13889_v58  ;;  %v13897_v58 = vld [vmem:[#allocation69_spill] sm:$0xff] }
0x153d   :  { %8385 = vmatprep.subr.bf16.mxu0 %v13865_v34  ;;  %8412 = vmatpush1.bf16.msra.mxu1 %v13890_v6  ;;  %v13901_v6 = vld [vmem:[#allocation44_spill] sm:$0xff] }
0x153e   :  { %8414 = vmatprep.subr.bf16.mxu1 %v13891_v49  ;;  %v13899_v49 = vld [vmem:[#allocation71_spill] sm:$0xff] }
0x1540   :  { %8387 = vmatpush3.bf16.msra.mxu0 %v13892_v33  ;;  %v13900_v33 = vld [vmem:[#allocation73_spill] sm:$0xff] }
0x1541   :  { %8388 = vmatprep.subr.bf16.mxu0 %v13865_v34  ;;  %8416 = vmatpush1.bf16.msra.mxu1 %v13893_v0  ;;  %v13902_v0 = vld [vmem:[#allocation46_spill] sm:$0xff] }
0x1542   :  { %8418 = vmatprep.subr.bf16.mxu1 %v13894_v28  ;;  %v13903_v28 = vld [vmem:[#allocation75_spill] sm:$0xff] }
0x1544   :  { %8390 = vmatpush3.bf16.msra.mxu0 %v13895_v10  ;;  %v13904_v10 = vld [vmem:[#allocation77_spill] sm:$0xff] }
0x1545   :  { %8391 = vmatprep.subr.bf16.mxu0 %v13865_v34  ;;  %8420 = vmatpush1.bf16.msra.mxu1 %v13896_v32  ;;  %v13905_v32 = vld [vmem:[#allocation48_spill] sm:$0xff] }
0x1546   :  { %8422 = vmatprep.subr.bf16.mxu1 %v13897_v58  ;;  %v13906_v58 = vld [vmem:[#allocation50_spill] sm:$0xff] }
0x1548   :  { %8393 = vmatpush3.bf16.msra.mxu0 %v13898_v61  ;;  %v13907_v61 = vld [vmem:[#allocation79_spill] sm:$0xff] }
0x1549   :  { %8394 = vmatprep.subr.bf16.mxu0 %v13865_v34  ;;  %8424 = vmatpush1.bf16.msra.mxu1 %v13899_v49  ;;  %v13909_v49 = vld [vmem:[#allocation52_spill] sm:$0xff] }
0x154a   :  { %8426 = vmatprep.subr.bf16.mxu1 %v13900_v33  ;;  %v13910_v33 = vld [vmem:[#allocation54_spill] sm:$0xff] }
0x154c   :  { %8396 = vmatpush3.bf16.msra.mxu0 %v13901_v6  ;;  %v13911_v6 = vld [vmem:[#allocation83_spill] sm:$0xff] }
0x154d   :  { %8462 = vmatprep.subr.bf16.mxu0 %v13902_v0  ;;  %8428 = vmatpush1.bf16.msra.mxu1 %v13903_v28  ;;  %v13912_v0 = vld [vmem:[#allocation85_spill] sm:$0xff]  ;;  %v13913_v28 = vld [vmem:[#allocation56_spill] sm:$0xff] }
0x154e   :  { %8430 = vmatprep.subr.bf16.mxu1 %v13904_v10  ;;  %v13914_v10 = vld [vmem:[#allocation58_spill] sm:$0xff] }
0x154f   :  { %7408 = vmatmul.mubr.f32.vlgmr.msra.gmra.mrb[22].mxu0 %v12245_v17  ;;  %v9232_v17 = vld [vmem:[%s13173_s2 + $0x8] sm:$0xff] }
0x1550   :  { %8464 = vmatpush1.bf16.msra.mxu0 %v13905_v32  ;;  %v13916_v32 = vld [vmem:[#allocation89_spill] sm:$0xff] }
0x1551   :  { %8466 = vmatprep.subr.bf16.mxu0 %v13906_v58  ;;  %8432 = vmatpush1.bf16.msra.mxu1 %v13907_v61  ;;  %v13917_v58 = vld [vmem:[#allocation60_spill] sm:$0xff]  ;;  %v13918_v61 = vld [vmem:[#allocation62_spill] sm:$0xff] }
0x1552   :  { %8434 = vmatprep.subr.bf16.mxu1 %v13908_v30  ;;  %v13919_v30 = vld [vmem:[#allocation91_spill] sm:$0xff] }
0x1554   :  { %8468 = vmatpush1.bf16.msra.mxu0 %v13909_v49  ;;  %v13920_v49 = vld [vmem:[#allocation93_spill] sm:$0xff] }
0x1555   :  { %8470 = vmatprep.subr.bf16.mxu0 %v13910_v33  ;;  %8436 = vmatpush1.bf16.msra.mxu1 %v13911_v6  ;;  %v13921_v33 = vld [vmem:[#allocation64_spill] sm:$0xff]  ;;  %v13922_v6 = vld [vmem:[#allocation66_spill] sm:$0xff] }
0x1556   :  { %8438 = vmatprep.subr.bf16.mxu1 %v13912_v0  ;;  %v13923_v0 = vld [vmem:[#allocation95_spill] sm:$0xff] }
0x1558   :  { %8472 = vmatpush1.bf16.msra.mxu0 %v13913_v28  ;;  %v13924_v28 = vld [vmem:[#allocation97_spill] sm:$0xff] }
0x1559   :  { %8474 = vmatprep.subr.bf16.mxu0 %v13914_v10  ;;  %8440 = vmatpush1.bf16.msra.mxu1 %v13915_v24  ;;  %v13925_v10 = vld [vmem:[#allocation68_spill] sm:$0xff]  ;;  %v13926_v24 = vld [vmem:[#allocation70_spill] sm:$0xff] }
0x155a   :  { %8442 = vmatprep.subr.bf16.mxu1 %v13916_v32  ;;  %v13927_v32 = vld [vmem:[#allocation99_spill] sm:$0xff] }
0x155c   :  { %8476 = vmatpush1.bf16.msra.mxu0 %v13917_v58  ;;  %v13928_v58 = vld [vmem:[#allocation101_spill] sm:$0xff] }
0x155d   :  { %8478 = vmatprep.subr.bf16.mxu0 %v13918_v61  ;;  %8444 = vmatpush1.bf16.msra.mxu1 %v13919_v30  ;;  %v13929_v61 = vld [vmem:[#allocation72_spill] sm:$0xff]  ;;  %v13930_v30 = vld [vmem:[#allocation74_spill] sm:$0xff] }
0x155e   :  { %8446 = vmatprep.subr.bf16.mxu1 %v13920_v49  ;;  %v13931_v49 = vld [vmem:[#allocation103_spill] sm:$0xff] }
0x1560   :  { %8480 = vmatpush1.bf16.msra.mxu0 %v13921_v33  ;;  %v13932_v33 = vld [vmem:[#allocation105_spill] sm:$0xff] }
0x1561   :  { %8482 = vmatprep.subr.bf16.mxu0 %v13922_v6  ;;  %8448 = vmatpush1.bf16.msra.mxu1 %v13923_v0  ;;  %v13933_v6 = vld [vmem:[#allocation76_spill] sm:$0xff]  ;;  %v13934_v0 = vld [vmem:[#allocation78_spill] sm:$0xff] }
0x1562   :  { %8450 = vmatprep.subr.bf16.mxu1 %v13924_v28  ;;  %v13935_v28 = vld [vmem:[#allocation107_spill] sm:$0xff] }
0x1564   :  { %8484 = vmatpush1.bf16.msra.mxu0 %v13925_v10  ;;  %v13936_v10 = vld [vmem:[#allocation5_spill] sm:$0xff] }
0x1565   :  { %8486 = vmatprep.subr.bf16.mxu0 %v13926_v24  ;;  %8452 = vmatpush1.bf16.msra.mxu1 %v13927_v32  ;;  %v13937_v24 = vld [vmem:[#allocation80_spill] sm:$0xff]  ;;  %v13938_v32 = vld [vmem:[#allocation82_spill] sm:$0xff] }
0x1566   :  { %8454 = vmatprep.subr.bf16.mxu1 %v13928_v58  ;;  %v13939_v58 = vld [vmem:[#allocation84_spill] sm:$0xff] }
0x1568   :  { %8488 = vmatpush1.bf16.msra.mxu0 %v13929_v61  ;;  %v13940_v61 = vld [vmem:[#allocation86_spill] sm:$0xff] }
0x1569   :  { %8490 = vmatprep.subr.bf16.mxu0 %v13930_v30  ;;  %8456 = vmatpush1.bf16.msra.mxu1 %v13931_v49  ;;  %v13941_v30 = vld [vmem:[#allocation88_spill] sm:$0xff]  ;;  %v13942_v49 = vld [vmem:[#allocation90_spill] sm:$0xff] }
0x156a   :  { %8458 = vmatprep.subr.bf16.mxu1 %v13932_v33  ;;  %v13943_v33 = vld [vmem:[#allocation92_spill] sm:$0xff] }
0x156c   :  { %8492 = vmatpush1.bf16.msra.mxu0 %v13933_v6  ;;  %v13944_v6 = vld [vmem:[#allocation94_spill] sm:$0xff] }
0x156d   :  { %8494 = vmatprep.subr.bf16.mxu0 %v13934_v0  ;;  %8460 = vmatpush1.bf16.msra.mxu1 %v13935_v28  ;;  %v13945_v0 = vld [vmem:[#allocation96_spill] sm:$0xff]  ;;  %v13946_v28 = vld [vmem:[#allocation98_spill] sm:$0xff] }
0x156e   :  { %8526 = vmatprep.subr.bf16.mxu1 %v13936_v10  ;;  %v13947_v10 = vld [vmem:[#allocation100_spill] sm:$0xff] }
0x1570   :  { %8496 = vmatpush1.bf16.msra.mxu0 %v13937_v24  ;;  %v13948_v24 = vld [vmem:[#allocation102_spill] sm:$0xff] }
0x1571   :  { %8498 = vmatprep.subr.bf16.mxu0 %v13938_v32  ;;  %v13949_v32 = vld [vmem:[#allocation104_spill] sm:$0xff] }
0x1574   :  { %8500 = vmatpush1.bf16.msra.mxu0 %v13939_v58  ;;  %v13950_v58 = vld [vmem:[#allocation106_spill] sm:$0xff] }
0x1575   :  { %8502 = vmatprep.subr.bf16.mxu0 %v13940_v61  ;;  %v13951_v61 = vld [vmem:[#allocation108_spill] sm:$0xff] }
0x1578   :  { %8504 = vmatpush1.bf16.msra.mxu0 %v13941_v30  ;;  %v13952_v30 = vld [vmem:[#allocation27_spill] sm:$0xff] }
0x1579   :  { %8506 = vmatprep.subr.bf16.mxu0 %v13942_v49 }
0x157c   :  { %8508 = vmatpush1.bf16.msra.mxu0 %v13943_v33 }
0x157d   :  { %8510 = vmatprep.subr.bf16.mxu0 %v13944_v6 }
0x1580   :  { %8512 = vmatpush1.bf16.msra.mxu0 %v13945_v0 }
0x1581   :  { %8514 = vmatprep.subr.bf16.mxu0 %v13946_v28 }
0x1584   :  { %8516 = vmatpush1.bf16.msra.mxu0 %v13947_v10 }
0x1585   :  { %8518 = vmatprep.subr.bf16.mxu0 %v13948_v24 }
0x1588   :  { %8520 = vmatpush1.bf16.msra.mxu0 %v13949_v32 }
0x1589   :  { %8522 = vmatprep.subr.bf16.mxu0 %v13950_v58 }
0x158c   :  { %8524 = vmatpush1.bf16.msra.mxu0 %v13951_v61 }
0x158d   :  { %8558 = vmatprep.subr.bf16.mxu0 %v13952_v30 }
0x1602   :  { %v4907_v49 = vpop.f32.mrb[20].mxu0  ;;  %v12332_v33 = vpop.f32.mrb[20].mxu1 }
0x1603   :  { %13953 = vst [vmem:[#allocation22_spill] sm:$0xff] %v12332_v33  ;;  %v5054_v6 = vcombine.high %v4907_v49, %v4907_v49  ;;  %v5061_v0 = vrot.slane %v4907_v49, %v13954_v38  ;;  %v12335_v63 = vpop.f32.mrb[21].mxu0  ;;  %v12337_v28 = vpop.f32.mrb[21].mxu1 }
0x1604   :  { %13955 = vst [vmem:[#allocation26_spill] sm:$0xff] %v12335_v63  ;;  %13956 = vst [vmem:[#allocation23_spill] sm:$0xff] %v12337_v28 }
0x1605   :  { %v5068_v24 = vrot.slane %v5054_v6, %v13954_v38  ;;  %v5069_v10 = vcombine.high %v5061_v0, %v5061_v0  ;;  %v5077_v32 = vrot.slane %v5061_v0, %v13954_v38  ;;  %v9233_v6 = vld [vmem:[%s13173_s2] sm:$0xff] }
0x1607   :  { %v5091_v58 = vrot.slane %v5069_v10, %v13954_v38  ;;  %v5099_v61 = vcombine.high %v5077_v32, %v5077_v32  ;;  %v5106_v30 = vrot.slane %v5077_v32, %v13528_v42  ;;  %v5084_v39 = vrot.slane %v5068_v24, %v13954_v38  ;;  %v9234_v32 = vld [vmem:[%s13173_s2 + $0x18] sm:$0xff] }
0x1608   :  { %v5070_v27 = vcombine.high %v5068_v24, %v5068_v24 }
0x1609   :  { %v5110_v52 = vrot.slane %v5091_v58, %v13528_v42  ;;  %v5114_v49 = vrot.slane %v5099_v61, %v13528_v42  ;;  %v5144_v35 = vadd.f32 %v9232_v17, %v5106_v30  ;;  %v5143_v0 = vadd.f32 %v9233_v6, %v5106_v30  ;;  %v9236_v30 = vld [vmem:[%s13173_s2 + $0x28] sm:$0xff] }
0x160a   :  { %v5101_v44 = vcombine.high %v5091_v58, %v5091_v58  ;;  %v5122_v17 = vrot.slane %v5084_v39, %v13528_v42 }
0x160b   :  { %v5146_v10 = vadd.f32 %v9234_v32, %v5110_v52  ;;  %v5145_v61 = vadd.f32 %v9235_v43, %v5110_v52  ;;  %v5160_v57 = vmax.f32 %v5144_v35, 0.0  ;;  %v5159_v59 = vmax.f32 %v5143_v0, 0.0  ;;  %v9237_v32 = vld [vmem:[%s13173_s2 + $0x20] sm:$0xff] }
0x160c   :  { %v5148_v6 = vadd.f32 %v9236_v30, %v5114_v49  ;;  %v5147_v33 = vadd.f32 %v9237_v32, %v5114_v49  ;;  %v12368_v43 = vld [vmem:[%s13176_s5] ss:$0 sm:$0xff]  ;;  %v5098_v0 = vrot.slane %v5070_v27, %v13954_v38  ;;  %v9239_v30 = vld [vmem:[%s13173_s2 + $0x48] sm:$0xff]  ;;  %v5100_v27 = vcombine.high %v5084_v39, %v5084_v39 }
0x160d   :  { %v5176_v35 = vmul.f32 %v12368_v43, %v5160_v57  ;;  %v5175_v52 = vmul.f32 %v12368_v43, %v5159_v59  ;;  %v5162_v24 = vmax.f32 %v5146_v10, 0.0  ;;  %v5161_v58 = vmax.f32 %v5145_v61, 0.0  ;;  %v9240_v32 = vld [vmem:[%s13173_s2 + $0x40] sm:$0xff] }
0x160e   :  { %v5152_v49 = vadd.f32 %v9239_v30, %v5122_v17  ;;  %v5151_v28 = vadd.f32 %v9240_v32, %v5122_v17  ;;  %v5118_v57 = vrot.slane %v5101_v44, %v13528_v42  ;;  %v5164_v61 = vmax.f32 %v5148_v6, 0.0  ;;  %v9241_v30 = vld [vmem:[%s13173_s2 + $0x38] sm:$0xff] }
0x160f   :  { %5193 = vadd.xlane.f32.xlu0 %v5176_v35  ;;  %5191 = vadd.xlane.f32.xlu1 %v5175_v52  ;;  %v5178_v59 = vmul.f32 %v12368_v43, %v5162_v24  ;;  %v5177_v10 = vmul.f32 %v12368_v43, %v5161_v58  ;;  %v5163_v35 = vmax.f32 %v5147_v33, 0.0  ;;  %v9242_v24 = vld [vmem:[%s13173_s2 + $0x30] sm:$0xff]  ;;  %v5126_v33 = vrot.slane %v5098_v0, %v13528_v42 }
0x1610   :  { %v5168_v52 = vmax.f32 %v5152_v49, 0.0  ;;  %v5167_v38 = vmax.f32 %v5151_v28, 0.0  ;;  %v5150_v63 = vadd.f32 %v9241_v30, %v5118_v57  ;;  %v5180_v17 = vmul.f32 %v12368_v43, %v5164_v61 }
0x1611   :  { %v5179_v44 = vmul.f32 %v12368_v43, %v5163_v35  ;;  %v5149_v6 = vadd.f32 %v9242_v24, %v5118_v57  ;;  %v5102_v39 = vcombine.high %v5098_v0, %v5098_v0  ;;  %v5130_v49 = vrot.slane %v5100_v27, %v13528_v42  ;;  %v9244_v57 = vld [vmem:[%s13173_s2 + $0x50] sm:$0xff] }
0x1612   :  { %v5184_v28 = vmul.f32 %v12368_v43, %v5168_v52  ;;  %v5166_v58 = vmax.f32 %v5150_v63, 0.0  ;;  %v5183_v32 = vmul.f32 %v12368_v43, %v5167_v38  ;;  %v5153_v35 = vadd.f32 %v9244_v57, %v5126_v33  ;;  %v9245_v63 = vld [vmem:[%s13173_s2 + $0x68] sm:$0xff] }
0x1613   :  { %5197 = vadd.xlane.f32.xlu1 %v5178_v59  ;;  %5195 = vadd.xlane.f32.xlu0 %v5177_v10  ;;  %v5165_v59 = vmax.f32 %v5149_v6, 0.0  ;;  %v9243_v10 = vld [vmem:[%s13173_s2 + $0x58] sm:$0xff]  ;;  %v5156_v38 = vadd.f32 %v9245_v63, %v5130_v49  ;;  %v5134_v27 = vrot.slane %v5102_v39, %v13528_v42 }
0x1614   :  { %v5154_v61 = vadd.f32 %v9243_v10, %v5126_v33  ;;  %v5182_v0 = vmul.f32 %v12368_v43, %v5166_v58  ;;  %v9247_v33 = vld [vmem:[%s13173_s2 + $0x78] sm:$0xff]  ;;  %v9248_v10 = vld [vmem:[%s13173_s2 + $0x70] sm:$0xff] }
0x1615   :  { %v5181_v52 = vmul.f32 %v12368_v43, %v5165_v59  ;;  %v5172_v6 = vmax.f32 %v5156_v38, 0.0 }
0x1616   :  { %v5170_v30 = vmax.f32 %v5154_v61, 0.0 }
0x1617   :  { %5201 = vadd.xlane.f32.xlu1 %v5180_v17  ;;  %5199 = vadd.xlane.f32.xlu0 %v5179_v44  ;;  %v5169_v17 = vmax.f32 %v5153_v35, 0.0  ;;  %v9246_v44 = vld [vmem:[%s13173_s2 + $0x60] sm:$0xff]  ;;  %v5188_v57 = vmul.f32 %v12368_v43, %v5172_v6 }
0x1618   :  { %v5155_v24 = vadd.f32 %v9246_v44, %v5130_v49  ;;  %v5186_v39 = vmul.f32 %v12368_v43, %v5170_v30  ;;  %v5157_v49 = vadd.f32 %v9248_v10, %v5134_v27 }
0x161a   :  { %v5171_v59 = vmax.f32 %v5155_v24, 0.0  ;;  %v5173_v63 = vmax.f32 %v5157_v49, 0.0 }
0x161b   :  { %5209 = vadd.xlane.f32.xlu1 %v5184_v28  ;;  %5207 = vadd.xlane.f32.xlu0 %v5183_v32  ;;  %v5158_v28 = vadd.f32 %v9247_v33, %v5134_v27  ;;  %v5185_v32 = vmul.f32 %v12368_v43, %v5169_v17 }
0x161c   :  { %v5187_v35 = vmul.f32 %v12368_v43, %v5171_v59 }
0x161f   :  { %5205 = vadd.xlane.f32.xlu1 %v5182_v0  ;;  %5203 = vadd.xlane.f32.xlu0 %v5181_v52  ;;  %v5174_v0 = vmax.f32 %v5158_v28, 0.0  ;;  %v5189_v52 = vmul.f32 %v12368_v43, %v5173_v63 }
0x1621   :  { %v5190_v38 = vmul.f32 %v12368_v43, %v5174_v0 }
0x1622   :  { %v12412_v58 = vpop.f32.mrb[22].mxu0 }
0x1623   :  { %13957 = vst [vmem:[#allocation18_spill] sm:$0xff] %v12412_v58  ;;  %v7409_v61 = vpop.f32.mrb[23].mxu0  ;;  %5213 = vadd.xlane.f32.xlu1 %v5186_v39  ;;  %5211 = vadd.xlane.f32.xlu0 %v5185_v32 }
0x1627   :  { %5217 = vadd.xlane.f32.xlu1 %v5188_v57  ;;  %5215 = vadd.xlane.f32.xlu0 %v5187_v35 }
0x162b   :  { %5221 = vadd.xlane.f32.xlu1 %v5190_v38  ;;  %5219 = vadd.xlane.f32.xlu0 %v5189_v52 }
0x169c   :  { %v5194_v30 = vpop.xlane.xlu0 %5193  ;;  %v5192_v17 = vpop.xlane.xlu1 %5191 }
0x169d   :  { %v5246_v61 = vrot.slane %v5194_v30, %v13621_v11  ;;  %v5242_v57 = vrot.slane %v5192_v17, %v13622_v29 }
0x169f   :  { %v5247_v34 = vsel %vm694_vm0, %v5246_v61, %v5242_v57 }
0x16a0   :  { %v12423_v27 = vpop.xlane.xlu1 %5197  ;;  %v5196_v44 = vpop.xlane.xlu0 %5195 }
0x16a1   :  { %v5255_v43 = vrot.slane %v12423_v27, %v13621_v11  ;;  %v5251_v59 = vrot.slane %v5196_v44, %v13622_v29 }
0x16a3   :  { %v5256_v52 = vsel %vm694_vm0, %v5255_v43, %v5251_v59 }
0x16a4   :  { %v12425_v24 = vpop.xlane.xlu1 %5201  ;;  %v5200_v6 = vpop.xlane.xlu0 %5199  ;;  %v5311_v55 = vsel %vm759_vm1, %v5256_v52, %v5247_v34 }
0x16a5   :  { %v5264_v10 = vrot.slane %v12425_v24, %v13621_v11  ;;  %v5260_v49 = vrot.slane %v5200_v6, %v13622_v29 }
0x16a7   :  { %v5265_v58 = vsel %vm694_vm0, %v5264_v10, %v5260_v49 }
0x16a8   :  { %v12427_v33 = vpop.xlane.xlu1 %5209  ;;  %v12429_v28 = vpop.xlane.xlu0 %5207  ;;  %v5312_v49 = vsel %vm761_vm2, %v5265_v58, %v5311_v55 }
0x16a9   :  { %v5282_v31 = vrot.slane %v12427_v33, %v13621_v11  ;;  %v5278_v43 = vrot.slane %v12429_v28, %v13622_v29 }
0x16ac   :  { %v12431_v39 = vpop.xlane.xlu1 %5205  ;;  %v12433_v32 = vpop.xlane.xlu0 %5203 }
0x16ad   :  { %v5273_v35 = vrot.slane %v12431_v39, %v13621_v11  ;;  %v5269_v0 = vrot.slane %v12433_v32, %v13622_v29 }
0x16af   :  { %v5274_v3 = vsel %vm694_vm0, %v5273_v35, %v5269_v0  ;;  %v5283_v0 = vsel %vm694_vm0, %v5282_v31, %v5278_v43 }
0x16b0   :  { %v12447_v63 = vpop.xlane.xlu1 %5213  ;;  %v12449_v38 = vpop.xlane.xlu0 %5211  ;;  %v5313_v34 = vsel %vm763_vm3, %v5274_v3, %v5312_v49 }
0x16b1   :  { %v5291_v40 = vrot.slane %v12447_v63, %v13621_v11  ;;  %v5287_v36 = vrot.slane %v12449_v38, %v13622_v29  ;;  %v5314_v18 = vsel %vm765_vm4, %v5283_v0, %v5313_v34 }
0x16b3   :  { %v5292_v35 = vsel %vm694_vm0, %v5291_v40, %v5287_v36 }
0x16b4   :  { %v12464_v59 = vpop.xlane.xlu1 %5217  ;;  %v12466_v10 = vpop.xlane.xlu0 %5215  ;;  %v5315_v3 = vsel %vm767_vm5, %v5292_v35, %v5314_v18 }
0x16b5   :  { %v5300_v61 = vrot.slane %v12464_v59, %v13621_v11  ;;  %v5296_v57 = vrot.slane %v12466_v10, %v13622_v29 }
0x16b7   :  { %v5301_v52 = vsel %vm694_vm0, %v5300_v61, %v5296_v57 }
0x16b8   :  { %v12477_v46 = vpop.xlane.xlu1 %5221  ;;  %v12479_v48 = vpop.xlane.xlu0 %5219  ;;  %v5316_v31 = vsel %vm769_vm6, %v5301_v52, %v5315_v3 }
0x16b9   :  { %v5309_v55 = vrot.slane %v12477_v46, %v13621_v11  ;;  %v5305_v58 = vrot.slane %v12479_v48, %v13622_v29 }
0x16bb   :  { %v5310_v36 = vsel %vm694_vm0, %v5309_v55, %v5305_v58 }
0x16bc   :  { %v5317_v40 = vsel %vm771_vm7, %v5310_v36, %v5316_v31 }
0x16bd   :  { %v5319_v43 = vsel %vm774_vm8, %v5317_v40, -inf }
0x16be   :  { %5320 = vmax.xlane.f32.xlu0 %v5319_v43 }
0x174b   :  { %v5321_v49 = vpop.xlane.xlu0 %5320 }
0x174c   :  { %v5326_v61 = vrot.slane %v5321_v49, %v13528_v42  ;;  %v5330_v57 = vrot.slane %v5321_v49, %v13530_v12  ;;  %v5334_v37 = vrot.slane %v5321_v49, %v13535_v5  ;;  %v5338_v18 = vrot.slane %v5321_v49, %v13533_v2 }
0x174d   :  { %v5342_v36 = vrot.slane %v5321_v49, %v13623_v23 }
0x174e   :  { %v5363_v41 = vsub.f32 %v5192_v17, %v5326_v61  ;;  %v5364_v34 = vsub.f32 %v5194_v30, %v5326_v61  ;;  %v5365_v0 = vsub.f32 %v5196_v44, %v5330_v57  ;;  %v5367_v35 = vsub.f32 %v5200_v6, %v5334_v37 }
0x174f   :  { %v5366_v58 = vsub.f32 %v12423_v27, %v5330_v57  ;;  %v5369_v31 = vsub.f32 %v12433_v32, %v5338_v18  ;;  %v5368_v43 = vsub.f32 %v12425_v24, %v5334_v37  ;;  %v5346_v17 = vrot.slane %v5321_v49, %v13624_v62 }
0x1750   :  { %v5379_v55 = vmul.f32 1.442695, %v5363_v41  ;;  %v5381_v52 = vmul.f32 1.442695, %v5364_v34  ;;  %v5383_v3 = vmul.f32 1.442695, %v5365_v0  ;;  %v5371_v44 = vsub.f32 %v12429_v28, %v5342_v36 }
0x1751   :  { %v5387_v40 = vmul.f32 1.442695, %v5367_v35  ;;  %v5385_v30 = vmul.f32 1.442695, %v5366_v58  ;;  %v5391_v41 = vmul.f32 1.442695, %v5369_v31  ;;  %v5370_v27 = vsub.f32 %v12431_v39, %v5338_v18 }
0x1752   :  { %9005 = vpow2.f32 %v5379_v55  ;;  %v5389_v6 = vmul.f32 1.442695, %v5368_v43  ;;  %v5350_v61 = vrot.slane %v5321_v49, %v13625_v7  ;;  %v5373_v32 = vsub.f32 %v12449_v38, %v5346_v17 }
0x1753   :  { %9007 = vpow2.f32 %v5381_v52  ;;  %v5395_v57 = vmul.f32 1.442695, %v5371_v44  ;;  %v5372_v24 = vsub.f32 %v12427_v33, %v5342_v36  ;;  %v5393_v28 = vmul.f32 1.442695, %v5370_v27 }
0x1754   :  { %9009 = vpow2.f32 %v5383_v3  ;;  %v5354_v39 = vrot.slane %v5321_v49, %v13626_v13  ;;  %v5375_v0 = vsub.f32 %v12466_v10, %v5350_v61  ;;  %v5399_v38 = vmul.f32 1.442695, %v5373_v32 }
0x1755   :  { %9011 = vpow2.f32 %v5387_v40  ;;  %v5374_v55 = vsub.f32 %v12447_v63, %v5346_v17  ;;  %v5397_v33 = vmul.f32 1.442695, %v5372_v24  ;;  %v5376_v3 = vsub.f32 %v12464_v59, %v5350_v61 }
0x1756   :  { %9013 = vpow2.f32 %v5385_v30  ;;  %v5377_v52 = vsub.f32 %v12479_v48, %v5354_v39  ;;  %v5403_v49 = vmul.f32 1.442695, %v5375_v0  ;;  %v5378_v48 = vsub.f32 %v12477_v46, %v5354_v39 }
0x1757   :  { %9015 = vpow2.f32 %v5391_v41  ;;  %v5401_v36 = vmul.f32 1.442695, %v5374_v55  ;;  %v5405_v43 = vmul.f32 1.442695, %v5376_v3 }
0x1758   :  { %9017 = vpow2.f32 %v5389_v6  ;;  %v5407_v63 = vmul.f32 1.442695, %v5377_v52  ;;  %v5409_v17 = vmul.f32 1.442695, %v5378_v48 }
0x1759   :  { %9019 = vpow2.f32 %v5395_v57 }
0x175a   :  { %9021 = vpow2.f32 %v5393_v28 }
0x175b   :  { %9023 = vpow2.f32 %v5399_v38 }
0x175c   :  { %v12504_v34 = vpop.eup %9005  ;;  %9025 = vpow2.f32 %v5397_v33 }
0x175d   :  { %v12506_v37 = vpop.eup %9007  ;;  %5428 = vperm.xlu1 %8747, %v12504_v34   ;;  %9027 = vpow2.f32 %v5403_v49 }
0x175e   :  { %5431 = vperm.xlu0 %8748, %v12506_v37   ;;  %v12513_v18 = vpop.eup %9009  ;;  %9029 = vpow2.f32 %v5401_v36 }
0x175f   :  { %v12515_v35 = vpop.eup %9011  ;;  %9031 = vpow2.f32 %v5407_v63 }
0x1760   :  { %v12521_v58 = vpop.eup %9013  ;;  %9033 = vpow2.f32 %v5405_v43 }
0x1761   :  { %5434 = vperm.xlu1 %8747, %v12513_v18   ;;  %v12523_v10 = vpop.eup %9015  ;;  %9035 = vpow2.f32 %v5409_v17 }
0x1762   :  { %5440 = vperm.xlu0 %8748, %v12515_v35   ;;  %v12528_v31 = vpop.eup %9017 }
0x1763   :  { %v12530_v40 = vpop.eup %9019 }
0x1764   :  { %v12535_v59 = vpop.eup %9021 }
0x1765   :  { %5437 = vperm.xlu1 %8747, %v12521_v58   ;;  %v12537_v30 = vpop.eup %9023 }
0x1766   :  { %5446 = vperm.xlu0 %8748, %v12523_v10   ;;  %v12541_v44 = vpop.eup %9025 }
0x1767   :  { %v12543_v41 = vpop.eup %9027 }
0x1768   :  { %v12547_v46 = vpop.eup %9029 }
0x1769   :  { %5443 = vperm.xlu1 %8747, %v12528_v31   ;;  %v12549_v27 = vpop.eup %9031 }
0x176a   :  { %5452 = vperm.xlu0 %8748, %v12530_v40   ;;  %v12553_v6 = vpop.eup %9033 }
0x176b   :  { %v12556_v61 = vpop.eup %9035 }
0x176d   :  { %5449 = vperm.xlu1 %8747, %v12535_v59  }
0x176e   :  { %5458 = vperm.xlu0 %8748, %v12537_v30  }
0x1771   :  { %5455 = vperm.xlu1 %8747, %v12541_v44  }
0x1772   :  { %5464 = vperm.xlu0 %8748, %v12543_v41  }
0x1775   :  { %5461 = vperm.xlu1 %8747, %v12547_v46  }
0x1776   :  { %5470 = vperm.xlu0 %8748, %v12549_v27  }
0x1779   :  { %5467 = vperm.xlu1 %8747, %v12553_v6  }
0x177d   :  { %5473 = vperm.xlu1 %8747, %v12556_v61  }
0x17dc   :  { %v5429_v32 = vpop.permute.xlu1 %5428 }
0x17dd   :  { %v5432_v57 = vpop.permute.xlu0 %5431  ;;  %v5478_v17 = vrot.slane %v5429_v32, %v13622_v29 }
0x17de   :  { %v5482_v43 = vrot.slane %v5432_v57, %v13621_v11 }
0x17e0   :  { %v5435_v24 = vpop.permute.xlu1 %5434  ;;  %v5483_v32 = vsel %vm694_vm0, %v5482_v43, %v5478_v17 }
0x17e1   :  { %v5441_v28 = vpop.permute.xlu0 %5440  ;;  %v5487_v60 = vrot.slane %v5435_v24, %v13622_v29 }
0x17e2   :  { %v5496_v56 = vrot.slane %v5441_v28, %v13622_v29 }
0x17e4   :  { %v5438_v39 = vpop.permute.xlu1 %5437 }
0x17e5   :  { %v5447_v0 = vpop.permute.xlu0 %5446  ;;  %v5491_v3 = vrot.slane %v5438_v39, %v13621_v11 }
0x17e6   :  { %v5505_v4 = vrot.slane %v5447_v0, %v13622_v29 }
0x17e7   :  { %v5492_v39 = vsel %vm694_vm0, %v5491_v3, %v5487_v60 }
0x17e8   :  { %v5444_v38 = vpop.permute.xlu1 %5443 }
0x17e9   :  { %v5453_v55 = vpop.permute.xlu0 %5452  ;;  %v5500_v36 = vrot.slane %v5444_v38, %v13621_v11 }
0x17ea   :  { %v5514_v50 = vrot.slane %v5453_v55, %v13622_v29 }
0x17eb   :  { %v5501_v57 = vsel %vm694_vm0, %v5500_v36, %v5496_v56 }
0x17ec   :  { %v5450_v33 = vpop.permute.xlu1 %5449 }
0x17ed   :  { %v5459_v52 = vpop.permute.xlu0 %5458  ;;  %v5509_v53 = vrot.slane %v5450_v33, %v13621_v11 }
0x17ee   :  { %v5523_v24 = vrot.slane %v5459_v52, %v13622_v29 }
0x17ef   :  { %v5510_v33 = vsel %vm694_vm0, %v5509_v53, %v5505_v4 }
0x17f0   :  { %v5456_v49 = vpop.permute.xlu1 %5455 }
0x17f1   :  { %v5465_v63 = vpop.permute.xlu0 %5464  ;;  %v5518_v1 = vrot.slane %v5456_v49, %v13621_v11  ;;  %v5547_v49 = vsel %vm759_vm1, %v5492_v39, %v5483_v32 }
0x17f2   :  { %v5532_v0 = vrot.slane %v5465_v63, %v13622_v29  ;;  %v5548_v55 = vsel %vm761_vm2, %v5501_v57, %v5547_v49 }
0x17f3   :  { %v5519_v60 = vsel %vm694_vm0, %v5518_v1, %v5514_v50  ;;  %v5549_v36 = vsel %vm763_vm3, %v5510_v33, %v5548_v55 }
0x17f4   :  { %v5462_v48 = vpop.permute.xlu1 %5461  ;;  %v5550_v4 = vsel %vm765_vm4, %v5519_v60, %v5549_v36 }
0x17f5   :  { %v5527_v38 = vrot.slane %v5462_v48, %v13621_v11  ;;  %v5471_v3 = vpop.permute.xlu0 %5470 }
0x17f7   :  { %v5528_v56 = vsel %vm694_vm0, %v5527_v38, %v5523_v24 }
0x17f8   :  { %v5468_v16 = vpop.permute.xlu1 %5467  ;;  %v5551_v63 = vsel %vm767_vm5, %v5528_v56, %v5550_v4 }
0x17f9   :  { %v5536_v28 = vrot.slane %v5468_v16, %v13621_v11  ;;  %v5541_v16 = vrot.slane %v5471_v3, %v13622_v29 }
0x17fb   :  { %v5537_v48 = vsel %vm694_vm0, %v5536_v28, %v5532_v0 }
0x17fc   :  { %v5474_v52 = vpop.permute.xlu1 %5473  ;;  %v5552_v1 = vsel %vm769_vm6, %v5537_v48, %v5551_v63 }
0x17fd   :  { %v5545_v53 = vrot.slane %v5474_v52, %v13621_v11 }
0x17ff   :  { %v5546_v50 = vsel %vm694_vm0, %v5545_v53, %v5541_v16 }
0x1800   :  { %v5553_v43 = vsel %vm771_vm7, %v5546_v50, %v5552_v1 }
0x1801   :  { %v5555_v17 = vsel %vm774_vm8, %v5553_v43, 0.0 }
0x1802   :  { %5556 = vadd.xlane.f32.xlu0 %v5555_v17 }
0x188f   :  { %v5557_v39 = vpop.xlane.xlu0 %5556 }
0x1890   :  { %v5578_v38 = vrot.slane %v5557_v39, %v13623_v23  ;;  %v5562_v57 = vrot.slane %v5557_v39, %v13528_v42  ;;  %v5590_v32 = vrot.slane %v5557_v39, %v13626_v13  ;;  %v5566_v24 = vrot.slane %v5557_v39, %v13530_v12 }
0x1891   :  { %v5570_v0 = vrot.slane %v5557_v39, %v13535_v5  ;;  %v5574_v48 = vrot.slane %v5557_v39, %v13533_v2 }
0x1892   :  { %9037 = vrcp.f32 %v5578_v38 }
0x1893   :  { %9039 = vrcp.f32 %v5562_v57 }
0x1894   :  { %9041 = vrcp.f32 %v5590_v32 }
0x1895   :  { %9043 = vrcp.f32 %v5566_v24  ;;  %v9250_v24 = vld [vmem:[%s13172_s1 + $0x28] sm:$0xff] }
0x1896   :  { %9045 = vrcp.f32 %v5570_v0  ;;  %v9251_v0 = vld [vmem:[%s13172_s1 + $0x8] sm:$0xff] }
0x1897   :  { %9047 = vrcp.f32 %v5574_v48  ;;  %v9254_v48 = vld [vmem:[%s13172_s1 + $0x20] sm:$0xff] }
0x189c   :  { %v9038_v33 = vpop.eup %9037 }
0x189d   :  { %v9040_v28 = vpop.eup %9039  ;;  %v5612_v49 = vmul.f32 %v9038_v33, %v12530_v40 }
0x189e   :  { %v9042_v60 = vpop.eup %9041  ;;  %v5600_v3 = vmul.f32 %v9040_v28, %v12504_v34  ;;  %v5601_v56 = vmul.f32 %v9040_v28, %v12506_v37 }
0x189f   :  { %5665 = vperm.xlu0 %8748, %v5612_v49   ;;  %v5621_v55 = vmul.f32 %v9042_v60, %v12549_v27  ;;  %v9044_v36 = vpop.eup %9043  ;;  %v5582_v27 = vrot.slane %v5557_v39, %v13624_v62 }
0x18a0   :  { %5625 = vperm.xlu1 %8747, %v5600_v3   ;;  %v5603_v52 = vmul.f32 %v9044_v36, %v12513_v18  ;;  %v5604_v40 = vmul.f32 %v9044_v36, %v12521_v58  ;;  %v9046_v4 = vpop.eup %9045  ;;  %v5586_v18 = vrot.slane %v5557_v39, %v13625_v7  ;;  %v5613_v58 = vmul.f32 %v9038_v33, %v12541_v44  ;;  %v7123_v44 = vld [vmem:[%s13174_s3 + $0x20] sm:$0xff]  ;;  %v9252_v3 = vld [vmem:[%s13172_s1 + $0x10] sm:$0xff] }
0x18a1   :  { %v5606_v34 = vmul.f32 %v9046_v4, %v12515_v35  ;;  %v5607_v37 = vmul.f32 %v9046_v4, %v12528_v31  ;;  %v9048_v16 = vpop.eup %9047  ;;  %9049 = vrcp.f32 %v5582_v27  ;;  %5855 = vmatprep.mubr.f32.mxu1 %v7123_v44  ;;  %5926 = vmatprep.mubr.f32.mxu0 %v7123_v44 }
0x18a2   :  { %v5609_v53 = vmul.f32 %v9048_v16, %v12523_v10  ;;  %v5610_v63 = vmul.f32 %v9048_v16, %v12535_v59  ;;  %9051 = vrcp.f32 %v5586_v18  ;;  %v5622_v59 = vmul.f32 %v9042_v60, %v12556_v61  ;;  %v9257_v16 = vld [vmem:[%s13172_s1 + $0x30] sm:$0xff]  ;;  %v9258_v18 = vld [vmem:[%s13172_s1 + $0x40] sm:$0xff] }
0x18a3   :  { %5695 = vperm.xlu0 %8748, %v5621_v55  }
0x18a4   :  { %5630 = vperm.xlu1 %8747, %v5601_v56   ;;  %v9253_v56 = vld [vmem:[%s13172_s1 + $0x38] sm:$0xff] }
0x18a8   :  { %5635 = vperm.xlu1 %8747, %v5603_v52  }
0x18ab   :  { %v9050_v35 = vpop.eup %9049 }
0x18ac   :  { %5640 = vperm.xlu1 %8747, %v5604_v40   ;;  %v5615_v50 = vmul.f32 %v9050_v35, %v12537_v30  ;;  %v5616_v31 = vmul.f32 %v9050_v35, %v12547_v46  ;;  %v9052_v1 = vpop.eup %9051  ;;  %v9255_v40 = vld [vmem:[%s13172_s1 + $0x48] sm:$0xff] }
0x18ad   :  { %v5618_v10 = vmul.f32 %v9052_v1, %v12543_v41  ;;  %v5619_v43 = vmul.f32 %v9052_v1, %v12553_v6  ;;  %v9249_v6 = vld [vmem:[%s13172_s1 + $0x18] sm:$0xff] }
0x18b0   :  { %5645 = vperm.xlu1 %8747, %v5606_v34   ;;  %v9256_v34 = vld [vmem:[%s13172_s1] sm:$0xff] }
0x18b4   :  { %5650 = vperm.xlu1 %8747, %v5607_v37  }
0x18b8   :  { %5655 = vperm.xlu1 %8747, %v5609_v53  }
0x18bc   :  { %5660 = vperm.xlu1 %8747, %v5610_v63  }
0x18c0   :  { %5670 = vperm.xlu1 %8747, %v5613_v58  }
0x18c4   :  { %5675 = vperm.xlu1 %8747, %v5615_v50  }
0x18c8   :  { %5680 = vperm.xlu1 %8747, %v5616_v31  }
0x18cc   :  { %5685 = vperm.xlu1 %8747, %v5618_v10  }
0x18d0   :  { %5690 = vperm.xlu1 %8747, %v5619_v43  }
0x18d4   :  { %5700 = vperm.xlu1 %8747, %v5622_v59  }
0x191e   :  { %v5666_v49 = vpop.permute.xlu0 %5665 }
0x191f   :  { %v5626_v30 = vpop.permute.xlu1 %5625  ;;  %v5711_v63 = vmul.f32 %v9258_v18, %v5666_v49  ;;  %v9263_v18 = vld [vmem:[%s13172_s1 + $0x70] sm:$0xff] }
0x1920   :  { %v5703_v27 = vmul.f32 %v9256_v34, %v5626_v30 }
0x1923   :  { %v5631_v17 = vpop.permute.xlu1 %5630 }
0x1924   :  { %v5704_v60 = vmul.f32 %v9251_v0, %v5631_v17  ;;  %v9259_v17 = vld [vmem:[%s13172_s1 + $0x50] sm:$0xff] }
0x1926   :  { %v5719_v50 = vadd.f32 %v5704_v60, %v5703_v27 }
0x1927   :  { %v5636_v46 = vpop.permute.xlu1 %5635 }
0x1928   :  { %v5705_v55 = vmul.f32 %v9252_v3, %v5636_v46  ;;  %v5720_v44 = vrot.slane %v5719_v50, 4 }
0x192b   :  { %v5641_v39 = vpop.permute.xlu1 %5640 }
0x192c   :  { %v5706_v61 = vmul.f32 %v9249_v6, %v5641_v39  ;;  %v9260_v39 = vld [vmem:[%s13172_s1 + $0x58] sm:$0xff] }
0x192e   :  { %v5726_v37 = vadd.f32 %v5706_v61, %v5705_v55 }
0x192f   :  { %v5646_v38 = vpop.permute.xlu1 %5645 }
0x1930   :  { %v5707_v52 = vmul.f32 %v9254_v48, %v5646_v38  ;;  %v5727_v10 = vrot.slane %v5726_v37, 4 }
0x1933   :  { %v5651_v57 = vpop.permute.xlu1 %5650 }
0x1934   :  { %v5708_v33 = vmul.f32 %v9250_v24, %v5651_v57  ;;  %v5721_v24 = vadd.f32 %v5720_v44, %v5719_v50 }
0x1936   :  { %v5733_v58 = vadd.f32 %v5708_v33, %v5707_v52  ;;  %v9261_v52 = vld [vmem:[%s13172_s1 + $0x60] sm:$0xff] }
0x1937   :  { %v5656_v41 = vpop.permute.xlu1 %5655 }
0x1938   :  { %v5709_v53 = vmul.f32 %v9257_v16, %v5656_v41  ;;  %v5734_v43 = vrot.slane %v5733_v58, 4  ;;  %v5728_v41 = vadd.f32 %v5727_v10, %v5726_v37  ;;  %v9264_v10 = vld [vmem:[%s13172_s1 + $0x78] sm:$0xff] }
0x193a   :  { %v5735_v6 = vadd.f32 %v5734_v43, %v5733_v58  ;;  %v5729_v0 = vrot.slane %v5728_v41, 2 }
0x193b   :  { %v5661_v32 = vpop.permute.xlu1 %5660 }
0x193c   :  { %v5710_v36 = vmul.f32 %v9253_v56, %v5661_v32  ;;  %v5736_v3 = vrot.slane %v5735_v6, 2  ;;  %v5696_v56 = vpop.permute.xlu0 %5695  ;;  %v5730_v37 = vadd.f32 %v5729_v0, %v5728_v41 }
0x193e   :  { %v5740_v31 = vadd.f32 %v5710_v36, %v5709_v53  ;;  %v5722_v36 = vrot.slane %v5721_v24, 2  ;;  %v5737_v58 = vadd.f32 %v5736_v3, %v5735_v6  ;;  %v5731_v44 = vrot.slane %v5730_v37, 1 }
0x193f   :  { %v5671_v28 = vpop.permute.xlu1 %5670 }
0x1940   :  { %v5712_v4 = vmul.f32 %v9255_v40, %v5671_v28  ;;  %v5741_v30 = vrot.slane %v5740_v31, 4  ;;  %v5723_v50 = vadd.f32 %v5722_v36, %v5721_v24 }
0x1942   :  { %v5747_v1 = vadd.f32 %v5712_v4, %v5711_v63  ;;  %v5742_v33 = vadd.f32 %v5741_v30, %v5740_v31  ;;  %v9262_v4 = vld [vmem:[%s13172_s1 + $0x68] sm:$0xff]  ;;  %v5717_v63 = vmul.f32 %v9263_v18, %v5696_v56 }
0x1943   :  { %v5676_v35 = vpop.permute.xlu1 %5675 }
0x1944   :  { %v5713_v46 = vmul.f32 %v9259_v17, %v5676_v35  ;;  %v5748_v57 = vrot.slane %v5747_v1, 4  ;;  %v5743_v48 = vrot.slane %v5742_v33, 2 }
0x1946   :  { %v5749_v49 = vadd.f32 %v5748_v57, %v5747_v1  ;;  %v5744_v31 = vadd.f32 %v5743_v48, %v5742_v33 }
0x1947   :  { %v5681_v59 = vpop.permute.xlu1 %5680 }
0x1948   :  { %v5714_v38 = vmul.f32 %v9260_v39, %v5681_v59  ;;  %v5750_v27 = vrot.slane %v5749_v49, 2  ;;  %v5738_v39 = vrot.slane %v5737_v58, 1  ;;  %v5745_v57 = vrot.slane %v5744_v31, 1 }
0x194a   :  { %v5754_v32 = vadd.f32 %v5714_v38, %v5713_v46  ;;  %v5751_v59 = vadd.f32 %v5750_v27, %v5749_v49  ;;  %v5724_v38 = vrot.slane %v5723_v50, 1  ;;  %v5739_v0 = vadd.f32 %v5738_v39, %v5737_v58  ;;  %v13971_v58 = vld [vmem:[#allocation12_spill] sm:$0xff] }
0x194b   :  { %v5686_v61 = vpop.permute.xlu1 %5685 }
0x194c   :  { %v5755_v28 = vrot.slane %v5754_v32, 4  ;;  %v5715_v40 = vmul.f32 %v9261_v52, %v5686_v61  ;;  %v5752_v6 = vrot.slane %v5751_v59, 1  ;;  %v5732_v61 = vadd.f32 %v5731_v44, %v5730_v37  ;;  %v13977_v44 = vld [vmem:[#allocation26_spill] sm:$0xff] }
0x194d   :  { %v5725_v3 = vadd.f32 %v5724_v38, %v5723_v50  ;;  %v13973_v50 = vld [vmem:[#allocation13_spill] sm:$0xff] }
0x194e   :  { %v5756_v60 = vadd.f32 %v5755_v28, %v5754_v32  ;;  %v5753_v49 = vadd.f32 %v5752_v6, %v5751_v59 }
0x194f   :  { %v5691_v55 = vpop.permute.xlu1 %5690 }
0x1950   :  { %v5716_v34 = vmul.f32 %v9262_v4, %v5691_v55  ;;  %v5757_v16 = vrot.slane %v5756_v60, 2  ;;  %v5746_v55 = vadd.f32 %v5745_v57, %v5744_v31  ;;  %v13974_v31 = vld [vmem:[#allocation43_spill] sm:$0xff]  ;;  %v13979_v57 = vld [vmem:[#allocation22_spill] sm:$0xff] }
0x1952   :  { %v5761_v53 = vadd.f32 %v5716_v34, %v5715_v40  ;;  %v5758_v30 = vadd.f32 %v5757_v16, %v5756_v60  ;;  %v5783_v60 = vsel %vm759_vm1, %v5732_v61, %v5725_v3  ;;  %v13981_v61 = vld [vmem:[#allocation17_spill] sm:$0xff] }
0x1953   :  { %v5701_v35 = vpop.permute.xlu1 %5700  ;;  %v5784_v40 = vsel %vm761_vm2, %v5739_v0, %v5783_v60 }
0x1954   :  { %v5762_v1 = vrot.slane %v5761_v53, 4  ;;  %v5718_v43 = vmul.f32 %v9264_v10, %v5701_v35  ;;  %v5759_v24 = vrot.slane %v5758_v30, 1  ;;  %v5785_v27 = vsel %vm763_vm3, %v5746_v55, %v5784_v40  ;;  %v13972_v35 = vld [vmem:[#allocation42_spill] sm:$0xff]  ;;  %v13976_v10 = vld [vmem:[#allocation45_spill] sm:$0xff]  ;;  %v13983_v55 = vld [vmem:[#allocation16_spill] sm:$0xff] }
0x1955   :  { %v5786_v37 = vsel %vm765_vm4, %v5753_v49, %v5785_v27  ;;  %v13984_v49 = vld [vmem:[#allocation25_spill] sm:$0xff] }
0x1956   :  { %v5763_v17 = vadd.f32 %v5762_v1, %v5761_v53  ;;  %v5768_v46 = vadd.f32 %v5718_v43, %v5717_v63  ;;  %v5760_v48 = vadd.f32 %v5759_v24, %v5758_v30  ;;  %v13975_v1 = vmov 0.0|0.0  }
0x1958   :  { %v5764_v41 = vrot.slane %v5763_v17, 2  ;;  %v5769_v32 = vrot.slane %v5768_v46, 4  ;;  %v5787_v53 = vsel %vm767_vm5, %v5760_v48, %v5786_v37 }
0x195a   :  { %v5765_v33 = vadd.f32 %v5764_v41, %v5763_v17  ;;  %v5770_v28 = vadd.f32 %v5769_v32, %v5768_v46  ;;  %v13978_v17 = vld [vmem:[#allocation23_spill] sm:$0xff]  ;;  %v13980_v32 = vld [vmem:[#allocation18_spill] sm:$0xff] }
0x195c   :  { %v5766_v56 = vrot.slane %v5765_v33, 1  ;;  %v5771_v36 = vrot.slane %v5770_v28, 2 }
0x195e   :  { %v5772_v52 = vadd.f32 %v5771_v36, %v5770_v28  ;;  %v5767_v4 = vadd.f32 %v5766_v56, %v5765_v33  ;;  %v13982_v33 = vld [vmem:[#allocation20_spill] sm:$0xff] }
0x1960   :  { %v5773_v34 = vrot.slane %v5772_v52, 1  ;;  %v5788_v18 = vsel %vm769_vm6, %v5767_v4, %v5787_v53 }
0x1962   :  { %v5774_v16 = vadd.f32 %v5773_v34, %v5772_v52 }
0x1964   :  { %v5789_v63 = vsel %vm771_vm7, %v5774_v16, %v5788_v18  ;;  %v5961_v16 = vstv %s7122_s4 }
0x1965   :  { %5856 = vmatmul.mubr.f32.vlgmr.msra.gmra.mrb[22].mxu1 %v5789_v63  ;;  %5927 = vmatmul.mubr.f32.vlgmr.msra.gmra.mrb[24].mxu0 %v5789_v63 }
0x1966   :  { %8528 = vmatpush1.bf16.msra.mxu1 %v9388_v8  ;;  %8560 = vmatpush1.bf16.msra.mxu0 %v9844_v19  ;;  %v13958_v8 = vld [vmem:[#allocation31_spill] sm:$0xff] }
0x1967   :  { %8530 = vmatprep.subr.bf16.mxu1 %v9390_v9  ;;  %8562 = vmatprep.subr.bf16.mxu0 %v9858_v22  ;;  %v13959_v9 = vld [vmem:[#allocation6_spill] sm:$0xff]  ;;  %v13961_v19 = vld [vmem:[#allocation7_spill] sm:$0xff]  ;;  %v13963_v22 = vld [vmem:[#allocation8_spill] sm:$0xff] }
0x1968   :  { %6035 = vmatprep.mubr.f32.mxu1 %v13458_v51  ;;  %6106 = vmatprep.mubr.f32.mxu0 %v13458_v51 }
0x196a   :  { %8532 = vmatpush1.bf16.msra.mxu1 %v9406_v14  ;;  %8564 = vmatpush1.bf16.msra.mxu0 %v9871_v45  ;;  %v13960_v14 = vld [vmem:[#allocation33_spill] sm:$0xff] }
0x196b   :  { %8534 = vmatprep.subr.bf16.mxu1 %v9409_v15  ;;  %8566 = vmatprep.subr.bf16.mxu0 %v9886_v25  ;;  %v13962_v15 = vld [vmem:[#allocation34_spill] sm:$0xff]  ;;  %v13965_v45 = vld [vmem:[#allocation9_spill] sm:$0xff] }
0x196c   :  { %v13967_v25 = vld [vmem:[#allocation10_spill] sm:$0xff] }
0x196e   :  { %8536 = vmatpush1.bf16.msra.mxu1 %v9424_v20  ;;  %8568 = vmatpush1.bf16.msra.mxu0 %v9905_v47  ;;  %v13964_v20 = vld [vmem:[#allocation36_spill] sm:$0xff]  ;;  %v13969_v47 = vld [vmem:[#allocation11_spill] sm:$0xff] }
0x196f   :  { %8538 = vmatprep.subr.bf16.mxu1 %v9427_v21  ;;  %8570 = vmatprep.subr.bf16.mxu0 %v9914_v54  ;;  %v13966_v21 = vld [vmem:[#allocation37_spill] sm:$0xff]  ;;  %v13970_v54 = vld [vmem:[#allocation40_spill] sm:$0xff] }
0x1972   :  { %8540 = vmatpush1.bf16.msra.mxu1 %v9442_v26  ;;  %8572 = vmatpush1.bf16.msra.mxu0 %v13958_v8  ;;  %v13968_v26 = vld [vmem:[#allocation39_spill] sm:$0xff]  ;;  %v13985_v8 = vld [vmem:[#allocation110_spill] sm:$0xff] }
0x1973   :  { %8542 = vmatprep.subr.bf16.mxu1 %v13959_v9  ;;  %8574 = vmatprep.subr.bf16.mxu0 %v13960_v14  ;;  %v13986_v14 = vld [vmem:[#allocation14_spill] sm:$0xff] }
0x1974   :  { %vm12717_vm14 = vcmp.lt.s32.totalorder %v13986_v14, %v5961_v16  ;;  %v14025_v16 = vld [vmem:[#allocation87_spill] sm:$0xff]  ;;  %v14030_v14 = vld [vmem:[#allocation93_spill] sm:$0xff] }
0x1976   :  { %8544 = vmatpush1.bf16.msra.mxu1 %v13961_v19  ;;  %8576 = vmatpush1.bf16.msra.mxu0 %v13962_v15 }
0x1977   :  { %8546 = vmatprep.subr.bf16.mxu1 %v13963_v22  ;;  %8578 = vmatprep.subr.bf16.mxu0 %v13964_v20 }
0x197a   :  { %8548 = vmatpush1.bf16.msra.mxu1 %v13965_v45  ;;  %8580 = vmatpush1.bf16.msra.mxu0 %v13966_v21 }
0x197b   :  { %8550 = vmatprep.subr.bf16.mxu1 %v13967_v25  ;;  %8582 = vmatprep.subr.bf16.mxu0 %v13968_v26  ;;  %v13989_v25 = vld [vmem:[#allocation21_spill] sm:$0xff] }
0x197e   :  { %8552 = vmatpush1.bf16.msra.mxu1 %v13969_v47  ;;  %8584 = vmatpush1.bf16.msra.mxu0 %v13970_v54  ;;  %v13990_v47 = vld [vmem:[#allocation28_spill] sm:$0xff]  ;;  %v13991_v54 = vld [vmem:[#allocation47_spill] sm:$0xff] }
0x197f   :  { %8554 = vmatprep.subr.bf16.mxu1 %v13971_v58  ;;  %8586 = vmatprep.subr.bf16.mxu0 %v13972_v35  ;;  %v13992_v58 = vld [vmem:[#allocation49_spill] sm:$0xff] }
0x1980   :  { %v13993_v35 = vld [vmem:[#allocation29_spill] sm:$0xff] }
0x1982   :  { %8556 = vmatpush1.bf16.msra.mxu1 %v13973_v50  ;;  %8588 = vmatpush1.bf16.msra.mxu0 %v13974_v31  ;;  %v13994_v50 = vld [vmem:[#allocation51_spill] sm:$0xff]  ;;  %v13995_v31 = vld [vmem:[#allocation53_spill] sm:$0xff] }
0x1983   :  { %8589 = vmatprep.subr.bf16.mxu1 %v13975_v1  ;;  %8614 = vmatprep.subr.bf16.mxu0 %v13976_v10  ;;  %v13996_v10 = vld [vmem:[#allocation30_spill] sm:$0xff] }
0x1a38   :  { %v5857_v43 = vpop.f32.mrb[22].mxu1  ;;  %v5928_v59 = vpop.f32.mrb[24].mxu0 }
0x1a39   :  { %v5858_v30 = vadd.f32 %v5857_v43, %v13977_v44  ;;  %v5929_v46 = vadd.f32 %v5928_v59, %v13978_v17  ;;  %v5859_v39 = vpop.f32.mrb[23].mxu1  ;;  %v5930_v38 = vpop.f32.mrb[25].mxu0  ;;  %v13997_v43 = vld [vmem:[#allocation55_spill] sm:$0xff]  ;;  %v13999_v59 = vld [vmem:[#allocation32_spill] sm:$0xff] }
0x1a3a   :  { %v5860_v41 = vadd.f32 %v5859_v39, %v13979_v57  ;;  %v5931_v6 = vadd.f32 %v5930_v38, %v13980_v32  ;;  %v14000_v44 = vld [vmem:[#allocation59_spill] sm:$0xff]  ;;  %v14004_v39 = vld [vmem:[#allocation65_spill] sm:$0xff]  ;;  %v14005_v38 = vld [vmem:[#allocation38_spill] sm:$0xff] }
0x1a3b   :  { %v5933_v24 = vadd.f32 %v5858_v30, %v13981_v61  ;;  %v5935_v60 = vadd.f32 %v5929_v46, %v13984_v49  ;;  %v14001_v30 = vld [vmem:[#allocation61_spill] sm:$0xff]  ;;  %v14002_v17 = vld [vmem:[#allocation35_spill] sm:$0xff] }
0x1a3c   :  { %v5934_v28 = vadd.f32 %v5860_v41, %v13982_v33  ;;  %v5936_v56 = vadd.f32 %v5931_v6, %v13983_v55  ;;  %v14003_v46 = vld [vmem:[#allocation63_spill] sm:$0xff]  ;;  %v14007_v41 = vld [vmem:[#allocation69_spill] sm:$0xff] }
0x1a3d   :  { %v7124_v0 = vmul.f32 -1.442695, %v5933_v24  ;;  %v14006_v57 = vld [vmem:[#allocation67_spill] sm:$0xff]  ;;  %v14008_v32 = vld [vmem:[#allocation41_spill] sm:$0xff] }
0x1a3e   :  { %v7125_v3 = vmul.f32 -1.442695, %v5934_v28  ;;  %v7126_v36 = vmul.f32 -1.442695, %v5936_v56  ;;  %v14009_v6 = vld [vmem:[#allocation71_spill] sm:$0xff]  ;;  %v14010_v24 = vld [vmem:[#allocation73_spill] sm:$0xff] }
0x1a3f   :  { %9053 = vpow2.f32 %v7124_v0  ;;  %v14011_v28 = vld [vmem:[#allocation44_spill] sm:$0xff]  ;;  %v14012_v0 = vld [vmem:[#allocation46_spill] sm:$0xff]  ;;  %v14014_v56 = vld [vmem:[#allocation77_spill] sm:$0xff] }
0x1a40   :  { %9055 = vpow2.f32 %v7125_v3  ;;  %v14013_v3 = vld [vmem:[#allocation75_spill] sm:$0xff] }
0x1a41   :  { %9057 = vpow2.f32 %v7126_v36  ;;  %v14015_v36 = vld [vmem:[#allocation48_spill] sm:$0xff] }
0x1a42   :  { %9059 = vtanh.f32 %v5935_v60  ;;  %v14016_v60 = vld [vmem:[#allocation50_spill] sm:$0xff] }
0x1a49   :  { %v9054_v48 = vpop.eup %9053 }
0x1a4a   :  { %v9056_v52 = vpop.eup %9055  ;;  %v5940_v40 = vadd.f32 1.0, %v9054_v48  ;;  %v14017_v48 = vld [vmem:[#allocation79_spill] sm:$0xff] }
0x1a4b   :  { %v5946_v4 = vadd.f32 1.0, %v9056_v52  ;;  %v9058_v34 = vpop.eup %9057  ;;  %v14019_v52 = vld [vmem:[#allocation52_spill] sm:$0xff] }
0x1a4c   :  { %9061 = vrcp.f32 %v5940_v40  ;;  %v9060_v27 = vpop.eup %9059  ;;  %v5953_v63 = vadd.f32 1.0, %v9058_v34  ;;  %v14020_v40 = vld [vmem:[#allocation54_spill] sm:$0xff]  ;;  %v14022_v34 = vld [vmem:[#allocation85_spill] sm:$0xff] }
0x1a4d   :  { %9063 = vrcp.f32 %v5946_v4  ;;  %v14021_v4 = vld [vmem:[#allocation83_spill] sm:$0xff] }
0x1a4e   :  { %9065 = vrcp.f32 %v5953_v63  ;;  %v14028_v63 = vld [vmem:[#allocation62_spill] sm:$0xff] }
0x1a56   :  { %v9062_v37 = vpop.eup %9061 }
0x1a57   :  { %v9064_v53 = vpop.eup %9063  ;;  %v5957_v18 = vmul.f32 %v9062_v37, %v9060_v27  ;;  %v14023_v27 = vld [vmem:[#allocation56_spill] sm:$0xff]  ;;  %v14024_v37 = vld [vmem:[#allocation58_spill] sm:$0xff] }
0x1a58   :  { %v5956_v9 = vmul.f32 %v9064_v53, %v13985_v8  ;;  %v9066_v20 = vpop.eup %9065  ;;  %v14026_v53 = vld [vmem:[#allocation89_spill] sm:$0xff] }
0x1a5a   :  { %v12721_v15 = vadd.f32 %v5957_v18, %v5956_v9  ;;  %v14027_v18 = vld [vmem:[#allocation60_spill] sm:$0xff]  ;;  %v14029_v9 = vld [vmem:[#allocation91_spill] sm:$0xff] }
0x1a5c   :  { %9067 = vtanh.f32 %v12721_v15  ;;  %v5968_v22 = vsel %vm12717_vm14, %v12721_v15, %v13985_v8 }
0x1a66   :  { %v9068_v45 = vpop.eup %9067 }
0x1a67   :  { %v5960_v21 = vmul.f32 %v9068_v45, %v9066_v20  ;;  %v14031_v20 = vld [vmem:[#allocation64_spill] sm:$0xff]  ;;  %v14032_v45 = vld [vmem:[#allocation66_spill] sm:$0xff] }
0x1a69   :  { %7127 = vst [vmem:[%s13179_s8 + $0x20] sm:$0xff] %v5960_v21  ;;  %v5967_v26 = vsel %vm12717_vm14, %v5960_v21, %v13989_v25  ;;  %v14033_v21 = vld [vmem:[#allocation95_spill] sm:$0xff]  ;;  %v14034_v25 = vld [vmem:[#allocation97_spill] sm:$0xff] }
0x1a6a   :  { %6036 = vmatmul.mubr.f32.vlgmr.msra.gmra.mrb[24].mxu1 %v5967_v26  ;;  %6107 = vmatmul.mubr.f32.vlgmr.msra.gmra.mrb[26].mxu0 %v5967_v26 }
0x1a6b   :  { %8591 = vmatpush3.bf16.msra.mxu1 %v13990_v47  ;;  %7442 = vmatprep.mubr.msk.f32.mxu1 %vm9317_vm9, %v13458_v51  ;;  %v13998_v51 = vld [vmem:[#allocation57_spill] sm:$0xff]  ;;  %v14036_v47 = vld [vmem:[#allocation70_spill] sm:$0xff] }
0x1a6c   :  { %8592 = vmatprep.subr.bf16.mxu1 %v13975_v1  ;;  %8616 = vmatpush1.bf16.msra.mxu0 %v13991_v54  ;;  %v14037_v54 = vld [vmem:[#allocation99_spill] sm:$0xff] }
0x1a6d   :  { %8618 = vmatprep.subr.bf16.mxu0 %v13992_v58  ;;  %v14038_v58 = vld [vmem:[#allocation101_spill] sm:$0xff] }
0x1a6f   :  { %8594 = vmatpush3.bf16.msra.mxu1 %v13993_v35  ;;  %v14039_v35 = vld [vmem:[#allocation72_spill] sm:$0xff] }
0x1a70   :  { %8595 = vmatprep.subr.bf16.mxu1 %v13975_v1  ;;  %8620 = vmatpush1.bf16.msra.mxu0 %v13994_v50  ;;  %v14040_v50 = vld [vmem:[#allocation74_spill] sm:$0xff] }
0x1a71   :  { %8622 = vmatprep.subr.bf16.mxu0 %v13995_v31  ;;  %v14041_v31 = vld [vmem:[#allocation103_spill] sm:$0xff] }
0x1a73   :  { %8597 = vmatpush3.bf16.msra.mxu1 %v13996_v10  ;;  %v14042_v10 = vld [vmem:[#allocation105_spill] sm:$0xff] }
0x1a74   :  { %8598 = vmatprep.subr.bf16.mxu1 %v13975_v1  ;;  %8624 = vmatpush1.bf16.msra.mxu0 %v13997_v43  ;;  %v14043_v43 = vld [vmem:[#allocation76_spill] sm:$0xff] }
0x1a75   :  { %8626 = vmatprep.subr.bf16.mxu0 %v13998_v51  ;;  %v14044_v51 = vld [vmem:[#allocation78_spill] sm:$0xff] }
0x1a77   :  { %8600 = vmatpush3.bf16.msra.mxu1 %v13999_v59  ;;  %v14045_v59 = vld [vmem:[#allocation107_spill] sm:$0xff] }
0x1a78   :  { %8601 = vmatprep.subr.bf16.mxu1 %v13975_v1  ;;  %8628 = vmatpush1.bf16.msra.mxu0 %v14000_v44  ;;  %v14046_v44 = vld [vmem:[#allocation80_spill] sm:$0xff] }
0x1a79   :  { %8630 = vmatprep.subr.bf16.mxu0 %v14001_v30  ;;  %v14047_v30 = vld [vmem:[#allocation82_spill] sm:$0xff] }
0x1a7b   :  { %8603 = vmatpush3.bf16.msra.mxu1 %v14002_v17  ;;  %v14048_v17 = vld [vmem:[#allocation84_spill] sm:$0xff] }
0x1a7c   :  { %8604 = vmatprep.subr.bf16.mxu1 %v13975_v1  ;;  %8632 = vmatpush1.bf16.msra.mxu0 %v14003_v46  ;;  %v14049_v46 = vld [vmem:[#allocation86_spill] sm:$0xff] }
0x1a7d   :  { %8634 = vmatprep.subr.bf16.mxu0 %v14004_v39  ;;  %v14050_v39 = vld [vmem:[#allocation88_spill] sm:$0xff] }
0x1a7f   :  { %8606 = vmatpush3.bf16.msra.mxu1 %v14005_v38  ;;  %v14051_v38 = vld [vmem:[#allocation90_spill] sm:$0xff] }
0x1a80   :  { %8607 = vmatprep.subr.bf16.mxu1 %v13975_v1  ;;  %8636 = vmatpush1.bf16.msra.mxu0 %v14006_v57  ;;  %v14052_v57 = vld [vmem:[#allocation92_spill] sm:$0xff] }
0x1a81   :  { %8638 = vmatprep.subr.bf16.mxu0 %v14007_v41  ;;  %v14053_v41 = vld [vmem:[#allocation94_spill] sm:$0xff] }
0x1a83   :  { %8609 = vmatpush3.bf16.msra.mxu1 %v14008_v32  ;;  %v14054_v32 = vld [vmem:[#allocation96_spill] sm:$0xff] }
0x1a84   :  { %8610 = vmatprep.subr.bf16.mxu1 %v13975_v1  ;;  %8640 = vmatpush1.bf16.msra.mxu0 %v14009_v6  ;;  %v14018_v1 = vld [vmem:[#allocation81_spill] sm:$0xff]  ;;  %v14055_v6 = vld [vmem:[#allocation98_spill] sm:$0xff] }
0x1a85   :  { %8642 = vmatprep.subr.bf16.mxu0 %v14010_v24  ;;  %v14056_v24 = vld [vmem:[#allocation100_spill] sm:$0xff] }
0x1a87   :  { %8612 = vmatpush3.bf16.msra.mxu1 %v14011_v28  ;;  %v14057_v28 = vld [vmem:[#allocation102_spill] sm:$0xff] }
0x1a88   :  { %8678 = vmatprep.subr.bf16.mxu1 %v14012_v0  ;;  %8644 = vmatpush1.bf16.msra.mxu0 %v14013_v3  ;;  %v14058_v0 = vld [vmem:[#allocation104_spill] sm:$0xff]  ;;  %v14059_v3 = vld [vmem:[#allocation106_spill] sm:$0xff] }
0x1a89   :  { %8646 = vmatprep.subr.bf16.mxu0 %v14014_v56  ;;  %v14060_v56 = vld [vmem:[#allocation108_spill] sm:$0xff] }
0x1a8a   :  { %7443 = vmatmul.mubr.f32.vlgmr.msra.gmra.mrb[26].mxu1 %v5967_v26  ;;  %v14035_v26 = vld [vmem:[#allocation68_spill] sm:$0xff] }
0x1a8b   :  { %8680 = vmatpush1.bf16.msra.mxu1 %v14015_v36 }
0x1a8c   :  { %8682 = vmatprep.subr.bf16.mxu1 %v14016_v60  ;;  %8648 = vmatpush1.bf16.msra.mxu0 %v14017_v48 }
0x1a8d   :  { %8650 = vmatprep.subr.bf16.mxu0 %v14018_v1  ;;  %v14061_v1 = vld [vmem:[#allocation15_spill] sm:$0xff] }
0x1a8f   :  { %8684 = vmatpush1.bf16.msra.mxu1 %v14019_v52 }
0x1a90   :  { %8686 = vmatprep.subr.bf16.mxu1 %v14020_v40  ;;  %8652 = vmatpush1.bf16.msra.mxu0 %v14021_v4 }
0x1a91   :  { %8654 = vmatprep.subr.bf16.mxu0 %v14022_v34 }
0x1a93   :  { %8688 = vmatpush1.bf16.msra.mxu1 %v14023_v27 }
0x1a94   :  { %8690 = vmatprep.subr.bf16.mxu1 %v14024_v37  ;;  %8656 = vmatpush1.bf16.msra.mxu0 %v14025_v16 }
0x1a95   :  { %8658 = vmatprep.subr.bf16.mxu0 %v14026_v53 }
0x1a97   :  { %8692 = vmatpush1.bf16.msra.mxu1 %v14027_v18 }
0x1a98   :  { %8694 = vmatprep.subr.bf16.mxu1 %v14028_v63  ;;  %8660 = vmatpush1.bf16.msra.mxu0 %v14029_v9 }
0x1a99   :  { %8662 = vmatprep.subr.bf16.mxu0 %v14030_v14 }
0x1a9b   :  { %8696 = vmatpush1.bf16.msra.mxu1 %v14031_v20 }
0x1a9c   :  { %8698 = vmatprep.subr.bf16.mxu1 %v14032_v45  ;;  %8664 = vmatpush1.bf16.msra.mxu0 %v14033_v21 }
0x1a9d   :  { %8666 = vmatprep.subr.bf16.mxu0 %v14034_v25  ;;  %v9265_v25 = vld [vmem:[%s13173_s2 + $0x8] sm:$0xff] }
0x1a9f   :  { %8700 = vmatpush1.bf16.msra.mxu1 %v14035_v26 }
0x1aa0   :  { %8702 = vmatprep.subr.bf16.mxu1 %v14036_v47  ;;  %8668 = vmatpush1.bf16.msra.mxu0 %v14037_v54  ;;  %v9266_v47 = vld [vmem:[%s13173_s2] sm:$0xff] }
0x1aa1   :  { %8670 = vmatprep.subr.bf16.mxu0 %v14038_v58  ;;  %v9267_v58 = vld [vmem:[%s13173_s2 + $0x10] sm:$0xff] }
0x1aa3   :  { %8704 = vmatpush1.bf16.msra.mxu1 %v14039_v35 }
0x1aa4   :  { %8706 = vmatprep.subr.bf16.mxu1 %v14040_v50  ;;  %8672 = vmatpush1.bf16.msra.mxu0 %v14041_v31 }
0x1aa5   :  { %8674 = vmatprep.subr.bf16.mxu0 %v14042_v10  ;;  %v9268_v10 = vld [vmem:[%s13173_s2 + $0x20] sm:$0xff] }
0x1aa7   :  { %8708 = vmatpush1.bf16.msra.mxu1 %v14043_v43 }
0x1aa8   :  { %8710 = vmatprep.subr.bf16.mxu1 %v14044_v51  ;;  %8676 = vmatpush1.bf16.msra.mxu0 %v14045_v59  ;;  %v9269_v59 = vld [vmem:[%s13173_s2 + $0x18] sm:$0xff] }
0x1aab   :  { %8712 = vmatpush1.bf16.msra.mxu1 %v14046_v44 }
0x1aac   :  { %8714 = vmatprep.subr.bf16.mxu1 %v14047_v30  ;;  %v9270_v30 = vld [vmem:[%s13173_s2 + $0x40] sm:$0xff] }
0x1aaf   :  { %8716 = vmatpush1.bf16.msra.mxu1 %v14048_v17 }
0x1ab0   :  { %8718 = vmatprep.subr.bf16.mxu1 %v14049_v46 }
0x1ab3   :  { %8720 = vmatpush1.bf16.msra.mxu1 %v14050_v39  ;;  %v12852_v39 = vld [vmem:[%s13176_s5] ss:$0 sm:$0xff] }
0x1ab4   :  { %8722 = vmatprep.subr.bf16.mxu1 %v14051_v38 }
0x1ab7   :  { %8724 = vmatpush1.bf16.msra.mxu1 %v14052_v57 }
0x1ab8   :  { %8726 = vmatprep.subr.bf16.mxu1 %v14053_v41 }
0x1abb   :  { %8728 = vmatpush1.bf16.msra.mxu1 %v14054_v32 }
0x1abc   :  { %8730 = vmatprep.subr.bf16.mxu1 %v14055_v6 }
0x1abf   :  { %8732 = vmatpush1.bf16.msra.mxu1 %v14056_v24 }
0x1ac0   :  { %8734 = vmatprep.subr.bf16.mxu1 %v14057_v28  ;;  %v9272_v28 = vld [vmem:[%s13173_s2 + $0x28] sm:$0xff] }
0x1ac3   :  { %8736 = vmatpush1.bf16.msra.mxu1 %v14058_v0 }
0x1ac4   :  { %8738 = vmatprep.subr.bf16.mxu1 %v14059_v3  ;;  %v9273_v3 = vld [vmem:[%s13173_s2 + $0x30] sm:$0xff] }
0x1ac7   :  { %8740 = vmatpush1.bf16.msra.mxu1 %v14060_v56 }
0x1b3d   :  { %v6037_v36 = vpop.f32.mrb[24].mxu1  ;;  %v12814_v60 = vpop.f32.mrb[26].mxu0 }
0x1b3e   :  { %v6184_v48 = vcombine.high %v6037_v36, %v6037_v36  ;;  %v6191_v52 = vrot.slane %v6037_v36, %v14061_v1  ;;  %v12817_v40 = vpop.f32.mrb[25].mxu1  ;;  %v12819_v4 = vpop.f32.mrb[27].mxu0 }
0x1b40   :  { %v6198_v34 = vrot.slane %v6184_v48, %v14061_v1  ;;  %v6199_v27 = vcombine.high %v6191_v52, %v6191_v52  ;;  %v6207_v37 = vrot.slane %v6191_v52, %v14061_v1 }
0x1b42   :  { %v6214_v16 = vrot.slane %v6198_v34, %v14061_v1  ;;  %v6221_v53 = vrot.slane %v6199_v27, %v14061_v1  ;;  %v6229_v18 = vcombine.high %v6207_v37, %v6207_v37  ;;  %v6236_v63 = vrot.slane %v6207_v37, %v13528_v42 }
0x1b43   :  { %v6200_v9 = vcombine.high %v6198_v34, %v6198_v34 }
0x1b44   :  { %v6231_v14 = vcombine.high %v6221_v53, %v6221_v53  ;;  %v6240_v20 = vrot.slane %v6221_v53, %v13528_v42  ;;  %v6244_v45 = vrot.slane %v6229_v18, %v13528_v42  ;;  %v6252_v21 = vrot.slane %v6214_v16, %v13528_v42  ;;  %v9274_v18 = vld [vmem:[%s13173_s2 + $0x48] sm:$0xff] }
0x1b45   :  { %v6274_v26 = vadd.f32 %v9265_v25, %v6236_v63  ;;  %v6273_v54 = vadd.f32 %v9266_v47, %v6236_v63  ;;  %v6228_v51 = vrot.slane %v6200_v9, %v14061_v1  ;;  %v6230_v6 = vcombine.high %v6214_v16, %v6214_v16  ;;  %v9275_v9 = vld [vmem:[%s13173_s2 + $0x50] sm:$0xff] }
0x1b46   :  { %v6275_v35 = vadd.f32 %v9267_v58, %v6240_v20  ;;  %v6277_v43 = vadd.f32 %v9268_v10, %v6244_v45  ;;  %v6276_v44 = vadd.f32 %v9269_v59, %v6240_v20  ;;  %v6281_v17 = vadd.f32 %v9270_v30, %v6252_v21  ;;  %v9277_v58 = vld [vmem:[%s13173_s2 + $0x60] sm:$0xff]  ;;  %v9278_v10 = vld [vmem:[%s13173_s2 + $0x58] sm:$0xff]  ;;  %v9279_v30 = vld [vmem:[%s13173_s2 + $0x70] sm:$0xff] }
0x1b47   :  { %v6290_v50 = vmax.f32 %v6274_v26, 0.0  ;;  %v6289_v31 = vmax.f32 %v6273_v54, 0.0  ;;  %v6248_v46 = vrot.slane %v6231_v14, %v13528_v42  ;;  %v6278_v0 = vadd.f32 %v9272_v28, %v6244_v45  ;;  %v9276_v26 = vld [vmem:[%s13173_s2 + $0x38] sm:$0xff] }
0x1b48   :  { %v6293_v41 = vmax.f32 %v6277_v43, 0.0  ;;  %v6291_v32 = vmax.f32 %v6275_v35, 0.0  ;;  %v6292_v24 = vmax.f32 %v6276_v44, 0.0  ;;  %v6297_v1 = vmax.f32 %v6281_v17, 0.0 }
0x1b49   :  { %v6306_v38 = vmul.f32 %v12852_v39, %v6290_v50  ;;  %v6305_v57 = vmul.f32 %v12852_v39, %v6289_v31  ;;  %v6279_v56 = vadd.f32 %v9273_v3, %v6248_v46  ;;  %v6256_v52 = vrot.slane %v6228_v51, %v13528_v42 }
0x1b4a   :  { %v6309_v36 = vmul.f32 %v12852_v39, %v6293_v41  ;;  %v6307_v48 = vmul.f32 %v12852_v39, %v6291_v32  ;;  %v6232_v34 = vcombine.high %v6228_v51, %v6228_v51  ;;  %v6308_v27 = vmul.f32 %v12852_v39, %v6292_v24 }
0x1b4b   :  { %6323 = vadd.xlane.f32.xlu1 %v6306_v38  ;;  %6321 = vadd.xlane.f32.xlu0 %v6305_v57  ;;  %v6294_v37 = vmax.f32 %v6278_v0, 0.0  ;;  %v6295_v16 = vmax.f32 %v6279_v56, 0.0  ;;  %v6313_v53 = vmul.f32 %v12852_v39, %v6297_v1  ;;  %v6282_v63 = vadd.f32 %v9274_v18, %v6252_v21 }
0x1b4c   :  { %v6283_v14 = vadd.f32 %v9275_v9, %v6256_v52  ;;  %v6260_v20 = vrot.slane %v6230_v6, %v13528_v42  ;;  %v6280_v47 = vadd.f32 %v9276_v26, %v6248_v46  ;;  %v6264_v50 = vrot.slane %v6232_v34, %v13528_v42  ;;  %v9280_v6 = vld [vmem:[%s13173_s2 + $0x68] sm:$0xff] }
0x1b4d   :  { %v6310_v45 = vmul.f32 %v12852_v39, %v6294_v37  ;;  %v6311_v25 = vmul.f32 %v12852_v39, %v6295_v16  ;;  %v6298_v54 = vmax.f32 %v6282_v63, 0.0  ;;  %v6284_v43 = vadd.f32 %v9278_v10, %v6256_v52 }
0x1b4e   :  { %v6299_v21 = vmax.f32 %v6283_v14, 0.0  ;;  %v6285_v35 = vadd.f32 %v9277_v58, %v6260_v20  ;;  %v6296_v31 = vmax.f32 %v6280_v47, 0.0  ;;  %v6287_v17 = vadd.f32 %v9279_v30, %v6264_v50 }
0x1b4f   :  { %6329 = vadd.xlane.f32.xlu1 %v6309_v36  ;;  %6325 = vadd.xlane.f32.xlu0 %v6307_v48  ;;  %v6314_v51 = vmul.f32 %v12852_v39, %v6298_v54  ;;  %v6300_v41 = vmax.f32 %v6284_v43, 0.0  ;;  %v6286_v24 = vadd.f32 %v9280_v6, %v6260_v20  ;;  %v9281_v36 = vld [vmem:[%s13173_s2 + $0x78] sm:$0xff] }
0x1b50   :  { %v6315_v59 = vmul.f32 %v12852_v39, %v6299_v21  ;;  %v6301_v44 = vmax.f32 %v6285_v35, 0.0  ;;  %v6312_v46 = vmul.f32 %v12852_v39, %v6296_v31  ;;  %v6303_v32 = vmax.f32 %v6287_v17, 0.0 }
0x1b51   :  { %v6316_v0 = vmul.f32 %v12852_v39, %v6300_v41  ;;  %v6302_v56 = vmax.f32 %v6286_v24, 0.0  ;;  %v6288_v48 = vadd.f32 %v9281_v36, %v6264_v50 }
0x1b52   :  { %v6317_v57 = vmul.f32 %v12852_v39, %v6301_v44  ;;  %v6319_v3 = vmul.f32 %v12852_v39, %v6303_v32 }
0x1b53   :  { %6327 = vadd.xlane.f32.xlu0 %v6308_v27  ;;  %6337 = vadd.xlane.f32.xlu1 %v6313_v53  ;;  %v6318_v1 = vmul.f32 %v12852_v39, %v6302_v56  ;;  %v6304_v52 = vmax.f32 %v6288_v48, 0.0 }
0x1b55   :  { %v6320_v34 = vmul.f32 %v12852_v39, %v6304_v52 }
0x1b57   :  { %6331 = vadd.xlane.f32.xlu0 %v6310_v45  ;;  %6333 = vadd.xlane.f32.xlu1 %v6311_v25 }
0x1b5b   :  { %6339 = vadd.xlane.f32.xlu0 %v6314_v51  ;;  %6341 = vadd.xlane.f32.xlu1 %v6315_v59 }
0x1b5d   :  { %v12892_v38 = vpop.f32.mrb[26].mxu1 }
0x1b5e   :  { %v7444_v28 = vpop.f32.mrb[27].mxu1 }
0x1b5f   :  { %6335 = vadd.xlane.f32.xlu0 %v6312_v46  ;;  %6345 = vadd.xlane.f32.xlu1 %v6317_v57 }
0x1b63   :  { %6343 = vadd.xlane.f32.xlu0 %v6316_v0  ;;  %6349 = vadd.xlane.f32.xlu1 %v6319_v3 }
0x1b67   :  { %6347 = vadd.xlane.f32.xlu0 %v6318_v1 }
0x1b6b   :  { %6351 = vadd.xlane.f32.xlu0 %v6320_v34 }
0x1bd8   :  { %v6324_v27 = vpop.xlane.xlu1 %6323  ;;  %v6322_v37 = vpop.xlane.xlu0 %6321 }
0x1bd9   :  { %v6376_v47 = vrot.slane %v6324_v27, %v13621_v11  ;;  %v6372_v54 = vrot.slane %v6322_v37, %v13622_v29 }
0x1bdb   :  { %v6377_v59 = vsel %vm694_vm0, %v6376_v47, %v6372_v54 }
0x1bdc   :  { %v12905_v16 = vpop.xlane.xlu1 %6329  ;;  %v6326_v53 = vpop.xlane.xlu0 %6325 }
0x1bdd   :  { %v6381_v21 = vrot.slane %v6326_v53, %v13622_v29  ;;  %v6390_v35 = vrot.slane %v12905_v16, %v13622_v29 }
0x1be0   :  { %v6328_v18 = vpop.xlane.xlu0 %6327  ;;  %v12907_v63 = vpop.xlane.xlu1 %6337 }
0x1be1   :  { %v6385_v39 = vrot.slane %v6328_v18, %v13621_v11  ;;  %v6408_v24 = vrot.slane %v12907_v63, %v13622_v29 }
0x1be3   :  { %v6386_v10 = vsel %vm694_vm0, %v6385_v39, %v6381_v21 }
0x1be4   :  { %v12909_v9 = vpop.xlane.xlu0 %6331  ;;  %v12911_v14 = vpop.xlane.xlu1 %6333  ;;  %v6441_v17 = vsel %vm759_vm1, %v6386_v10, %v6377_v59 }
0x1be5   :  { %v6394_v26 = vrot.slane %v12909_v9, %v13621_v11  ;;  %v6399_v43 = vrot.slane %v12911_v14, %v13622_v29 }
0x1be7   :  { %v6395_v51 = vsel %vm694_vm0, %v6394_v26, %v6390_v35 }
0x1be8   :  { %v12913_v20 = vpop.xlane.xlu0 %6339  ;;  %v12915_v45 = vpop.xlane.xlu1 %6341  ;;  %v6442_v41 = vsel %vm761_vm2, %v6395_v51, %v6441_v17 }
0x1be9   :  { %v6412_v46 = vrot.slane %v12913_v20, %v13621_v11  ;;  %v6417_v32 = vrot.slane %v12915_v45, %v13622_v29 }
0x1beb   :  { %v6413_v36 = vsel %vm694_vm0, %v6412_v46, %v6408_v24 }
0x1bec   :  { %v12917_v25 = vpop.xlane.xlu0 %6335  ;;  %v12929_v50 = vpop.xlane.xlu1 %6345 }
0x1bed   :  { %v6403_v58 = vrot.slane %v12917_v25, %v13621_v11  ;;  %v6426_v0 = vrot.slane %v12929_v50, %v13622_v29 }
0x1bef   :  { %v6404_v44 = vsel %vm694_vm0, %v6403_v58, %v6399_v43 }
0x1bf0   :  { %v12931_v31 = vpop.xlane.xlu0 %6343  ;;  %v6443_v28 = vsel %vm763_vm3, %v6404_v44, %v6442_v41  ;;  %v12956_v3 = vpop.xlane.xlu1 %6349 }
0x1bf1   :  { %v6421_v30 = vrot.slane %v12931_v31, %v13621_v11  ;;  %v6435_v52 = vrot.slane %v12956_v3, %v13622_v29  ;;  %v6444_v39 = vsel %vm765_vm4, %v6413_v36, %v6443_v28 }
0x1bf3   :  { %v6422_v56 = vsel %vm694_vm0, %v6421_v30, %v6417_v32 }
0x1bf4   :  { %v12944_v57 = vpop.xlane.xlu0 %6347  ;;  %v6445_v26 = vsel %vm767_vm5, %v6422_v56, %v6444_v39 }
0x1bf5   :  { %v6430_v6 = vrot.slane %v12944_v57, %v13621_v11 }
0x1bf7   :  { %v6431_v48 = vsel %vm694_vm0, %v6430_v6, %v6426_v0 }
0x1bf8   :  { %v12961_v1 = vpop.xlane.xlu0 %6351  ;;  %v6446_v54 = vsel %vm769_vm6, %v6431_v48, %v6445_v26 }
0x1bf9   :  { %v6439_v34 = vrot.slane %v12961_v1, %v13621_v11 }
0x1bfb   :  { %v6440_v47 = vsel %vm694_vm0, %v6439_v34, %v6435_v52 }
0x1bfc   :  { %v6447_v21 = vsel %vm771_vm7, %v6440_v47, %v6446_v54 }
0x1bfd   :  { %v6449_v58 = vsel %vm774_vm8, %v6447_v21, -inf }
0x1bfe   :  { %6450 = vmax.xlane.f32.xlu1 %v6449_v58 }
0x1c8b   :  { %v6451_v35 = vpop.xlane.xlu1 %6450 }
0x1c8c   :  { %v6456_v10 = vrot.slane %v6451_v35, %v13528_v42  ;;  %v6460_v43 = vrot.slane %v6451_v35, %v13530_v12  ;;  %v6464_v44 = vrot.slane %v6451_v35, %v13535_v5  ;;  %v6468_v32 = vrot.slane %v6451_v35, %v13533_v2 }
0x1c8d   :  { %v6472_v56 = vrot.slane %v6451_v35, %v13623_v23  ;;  %v6476_v36 = vrot.slane %v6451_v35, %v13624_v62  ;;  %v6484_v21 = vrot.slane %v6451_v35, %v13626_v13 }
0x1c8e   :  { %v6493_v51 = vsub.f32 %v6322_v37, %v6456_v10  ;;  %v6494_v59 = vsub.f32 %v6324_v27, %v6456_v10  ;;  %v6496_v30 = vsub.f32 %v6328_v18, %v6460_v43  ;;  %v6495_v17 = vsub.f32 %v6326_v53, %v6460_v43 }
0x1c8f   :  { %v6498_v6 = vsub.f32 %v12909_v9, %v6464_v44  ;;  %v6497_v28 = vsub.f32 %v12905_v16, %v6464_v44  ;;  %v6500_v27 = vsub.f32 %v12917_v25, %v6468_v32  ;;  %v6499_v53 = vsub.f32 %v12911_v14, %v6468_v32 }
0x1c90   :  { %v6509_v46 = vmul.f32 1.442695, %v6493_v51  ;;  %v6511_v41 = vmul.f32 1.442695, %v6494_v59  ;;  %v6515_v24 = vmul.f32 1.442695, %v6496_v30  ;;  %v6502_v9 = vsub.f32 %v12913_v20, %v6472_v56 }
0x1c91   :  { %v6513_v0 = vmul.f32 1.442695, %v6495_v17  ;;  %v6519_v37 = vmul.f32 1.442695, %v6498_v6  ;;  %v6517_v18 = vmul.f32 1.442695, %v6497_v28  ;;  %v6501_v16 = vsub.f32 %v12907_v63, %v6472_v56 }
0x1c92   :  { %9069 = vpow2.f32 %v6509_v46  ;;  %v6523_v48 = vmul.f32 1.442695, %v6500_v27  ;;  %v6521_v52 = vmul.f32 1.442695, %v6499_v53  ;;  %v6480_v14 = vrot.slane %v6451_v35, %v13625_v7 }
0x1c93   :  { %9071 = vpow2.f32 %v6511_v41  ;;  %v6504_v25 = vsub.f32 %v12931_v31, %v6476_v36  ;;  %v6527_v26 = vmul.f32 1.442695, %v6502_v9  ;;  %v6503_v20 = vsub.f32 %v12915_v45, %v6476_v36 }
0x1c94   :  { %9073 = vpow2.f32 %v6515_v24  ;;  %v6525_v63 = vmul.f32 1.442695, %v6501_v16  ;;  %v6506_v58 = vsub.f32 %v12944_v57, %v6480_v14  ;;  %v6505_v10 = vsub.f32 %v12929_v50, %v6480_v14 }
0x1c95   :  { %9075 = vpow2.f32 %v6513_v0  ;;  %v6531_v31 = vmul.f32 1.442695, %v6504_v25  ;;  %v6529_v45 = vmul.f32 1.442695, %v6503_v20  ;;  %v6508_v59 = vsub.f32 %v12961_v1, %v6484_v21 }
0x1c96   :  { %9077 = vpow2.f32 %v6519_v37  ;;  %v6535_v35 = vmul.f32 1.442695, %v6506_v58  ;;  %v6507_v57 = vsub.f32 %v12956_v3, %v6484_v21  ;;  %v6533_v44 = vmul.f32 1.442695, %v6505_v10 }
0x1c97   :  { %9079 = vpow2.f32 %v6517_v18  ;;  %v6539_v17 = vmul.f32 1.442695, %v6508_v59 }
0x1c98   :  { %9081 = vpow2.f32 %v6523_v48  ;;  %v6537_v1 = vmul.f32 1.442695, %v6507_v57 }
0x1c99   :  { %9083 = vpow2.f32 %v6521_v52 }
0x1c9a   :  { %9085 = vpow2.f32 %v6527_v26 }
0x1c9b   :  { %9087 = vpow2.f32 %v6525_v63 }
0x1c9c   :  { %v12985_v34 = vpop.eup %9069  ;;  %9089 = vpow2.f32 %v6531_v31 }
0x1c9d   :  { %v12987_v39 = vpop.eup %9071  ;;  %6558 = vperm.xlu0 %8748, %v12985_v34   ;;  %9091 = vpow2.f32 %v6529_v45 }
0x1c9e   :  { %6561 = vperm.xlu1 %8747, %v12987_v39   ;;  %v12994_v47 = vpop.eup %9073  ;;  %9093 = vpow2.f32 %v6535_v35 }
0x1c9f   :  { %v12996_v54 = vpop.eup %9075  ;;  %9095 = vpow2.f32 %v6533_v44 }
0x1ca0   :  { %v13003_v43 = vpop.eup %9077  ;;  %9097 = vpow2.f32 %v6539_v17 }
0x1ca1   :  { %6567 = vperm.xlu0 %8748, %v12994_v47   ;;  %v13005_v51 = vpop.eup %9079  ;;  %9099 = vpow2.f32 %v6537_v1 }
0x1ca2   :  { %6564 = vperm.xlu1 %8747, %v12996_v54   ;;  %v13011_v30 = vpop.eup %9081 }
0x1ca3   :  { %v13013_v50 = vpop.eup %9083 }
0x1ca4   :  { %v13017_v46 = vpop.eup %9085 }
0x1ca5   :  { %6573 = vperm.xlu0 %8748, %v13003_v43   ;;  %v13019_v41 = vpop.eup %9087 }
0x1ca6   :  { %6570 = vperm.xlu1 %8747, %v13005_v51   ;;  %v13023_v3 = vpop.eup %9089 }
0x1ca7   :  { %v13025_v32 = vpop.eup %9091 }
0x1ca8   :  { %v13029_v6 = vpop.eup %9093 }
0x1ca9   :  { %6579 = vperm.xlu0 %8748, %v13011_v30   ;;  %v13031_v24 = vpop.eup %9095 }
0x1caa   :  { %6576 = vperm.xlu1 %8747, %v13013_v50   ;;  %v13035_v28 = vpop.eup %9097 }
0x1cab   :  { %v13037_v0 = vpop.eup %9099 }
0x1cad   :  { %6585 = vperm.xlu0 %8748, %v13017_v46  }
0x1cae   :  { %6582 = vperm.xlu1 %8747, %v13019_v41  }
0x1cb1   :  { %6591 = vperm.xlu0 %8748, %v13023_v3  }
0x1cb2   :  { %6588 = vperm.xlu1 %8747, %v13025_v32  }
0x1cb5   :  { %6597 = vperm.xlu0 %8748, %v13029_v6  }
0x1cb6   :  { %6594 = vperm.xlu1 %8747, %v13031_v24  }
0x1cb9   :  { %6603 = vperm.xlu0 %8748, %v13035_v28  }
0x1cba   :  { %6600 = vperm.xlu1 %8747, %v13037_v0  }
0x1d1c   :  { %v6559_v56 = vpop.permute.xlu0 %6558 }
0x1d1d   :  { %v6562_v27 = vpop.permute.xlu1 %6561  ;;  %v6608_v31 = vrot.slane %v6559_v56, %v13622_v29 }
0x1d1e   :  { %v6612_v58 = vrot.slane %v6562_v27, %v13621_v11 }
0x1d20   :  { %v6568_v37 = vpop.permute.xlu0 %6567 }
0x1d21   :  { %v6565_v53 = vpop.permute.xlu1 %6564  ;;  %v6621_v25 = vrot.slane %v6568_v37, %v13621_v11 }
0x1d22   :  { %v6617_v14 = vrot.slane %v6565_v53, %v13622_v29  ;;  %v6613_v53 = vsel %vm694_vm0, %v6612_v58, %v6608_v31 }
0x1d24   :  { %v6574_v18 = vpop.permute.xlu0 %6573  ;;  %v6622_v57 = vsel %vm694_vm0, %v6621_v25, %v6617_v14 }
0x1d25   :  { %v6571_v36 = vpop.permute.xlu1 %6570  ;;  %v6630_v63 = vrot.slane %v6574_v18, %v13621_v11 }
0x1d26   :  { %v6626_v20 = vrot.slane %v6571_v36, %v13622_v29 }
0x1d28   :  { %v6580_v9 = vpop.permute.xlu0 %6579  ;;  %v6631_v37 = vsel %vm694_vm0, %v6630_v63, %v6626_v20 }
0x1d29   :  { %v6577_v48 = vpop.permute.xlu1 %6576  ;;  %v6639_v45 = vrot.slane %v6580_v9, %v13621_v11  ;;  %v6677_v9 = vsel %vm759_vm1, %v6622_v57, %v6613_v53 }
0x1d2a   :  { %v6635_v10 = vrot.slane %v6577_v48, %v13622_v29 }
0x1d2c   :  { %v6586_v16 = vpop.permute.xlu0 %6585  ;;  %v6640_v18 = vsel %vm694_vm0, %v6639_v45, %v6635_v10 }
0x1d2d   :  { %v6583_v52 = vpop.permute.xlu1 %6582  ;;  %v6648_v35 = vrot.slane %v6586_v16, %v13621_v11  ;;  %v6678_v16 = vsel %vm761_vm2, %v6631_v37, %v6677_v9 }
0x1d2e   :  { %v6644_v59 = vrot.slane %v6583_v52, %v13622_v29  ;;  %v6679_v25 = vsel %vm763_vm3, %v6640_v18, %v6678_v16 }
0x1d30   :  { %v6592_v26 = vpop.permute.xlu0 %6591  ;;  %v6649_v48 = vsel %vm694_vm0, %v6648_v35, %v6644_v59 }
0x1d31   :  { %v6589_v21 = vpop.permute.xlu1 %6588  ;;  %v6657_v17 = vrot.slane %v6592_v26, %v13621_v11 }
0x1d32   :  { %v6653_v44 = vrot.slane %v6589_v21, %v13622_v29  ;;  %v6680_v21 = vsel %vm765_vm4, %v6649_v48, %v6679_v25 }
0x1d34   :  { %v6598_v1 = vpop.permute.xlu0 %6597  ;;  %v6658_v52 = vsel %vm694_vm0, %v6657_v17, %v6653_v44 }
0x1d35   :  { %v6595_v27 = vpop.permute.xlu1 %6594  ;;  %v6666_v56 = vrot.slane %v6598_v1, %v13621_v11  ;;  %v6681_v31 = vsel %vm767_vm5, %v6658_v52, %v6680_v21 }
0x1d36   :  { %v6662_v36 = vrot.slane %v6595_v27, %v13622_v29 }
0x1d38   :  { %v6604_v14 = vpop.permute.xlu0 %6603  ;;  %v6667_v26 = vsel %vm694_vm0, %v6666_v56, %v6662_v36 }
0x1d39   :  { %v6601_v20 = vpop.permute.xlu1 %6600  ;;  %v6675_v63 = vrot.slane %v6604_v14, %v13621_v11  ;;  %v6682_v45 = vsel %vm769_vm6, %v6667_v26, %v6681_v31 }
0x1d3a   :  { %v6671_v58 = vrot.slane %v6601_v20, %v13622_v29 }
0x1d3c   :  { %v6676_v10 = vsel %vm694_vm0, %v6675_v63, %v6671_v58  ;;  %v9283_v63 = vld [vmem:[%s13172_s1 + $0x28] sm:$0xff] }
0x1d3d   :  { %v6683_v59 = vsel %vm771_vm7, %v6676_v10, %v6682_v45  ;;  %v9284_v10 = vld [vmem:[%s13172_s1 + $0x8] sm:$0xff] }
0x1d3e   :  { %v6685_v35 = vsel %vm774_vm8, %v6683_v59, 0.0  ;;  %v9285_v59 = vld [vmem:[%s13172_s1 + $0x10] sm:$0xff] }
0x1d3f   :  { %6686 = vadd.xlane.f32.xlu1 %v6685_v35 }
0x1dcc   :  { %v6687_v57 = vpop.xlane.xlu1 %6686 }
0x1dcd   :  { %v6708_v44 = vrot.slane %v6687_v57, %v13623_v23  ;;  %v6692_v11 = vrot.slane %v6687_v57, %v13528_v42  ;;  %v6720_v17 = vrot.slane %v6687_v57, %v13626_v13  ;;  %v6696_v29 = vrot.slane %v6687_v57, %v13530_v12 }
0x1dce   :  { %v6700_v56 = vrot.slane %v6687_v57, %v13535_v5  ;;  %v6704_v12 = vrot.slane %v6687_v57, %v13533_v2 }
0x1dcf   :  { %9101 = vrcp.f32 %v6708_v44 }
0x1dd0   :  { %9103 = vrcp.f32 %v6692_v11  ;;  %v9287_v11 = vld [vmem:[%s13172_s1 + $0x20] sm:$0xff] }
0x1dd1   :  { %9105 = vrcp.f32 %v6720_v17 }
0x1dd2   :  { %9107 = vrcp.f32 %v6696_v29  ;;  %v9288_v29 = vld [vmem:[%s13172_s1 + $0x40] sm:$0xff] }
0x1dd3   :  { %9109 = vrcp.f32 %v6700_v56 }
0x1dd4   :  { %9111 = vrcp.f32 %v6704_v12 }
0x1dd9   :  { %v9102_v1 = vpop.eup %9101 }
0x1dda   :  { %v9104_v37 = vpop.eup %9103  ;;  %v6743_v27 = vmul.f32 %v9102_v1, %v13017_v46 }
0x1ddb   :  { %v9106_v53 = vpop.eup %9105  ;;  %v6730_v18 = vmul.f32 %v9104_v37, %v12985_v34  ;;  %v6731_v23 = vmul.f32 %v9104_v37, %v12987_v39  ;;  %v9289_v37 = vld [vmem:[%s13172_s1] sm:$0xff] }
0x1ddc   :  { %6800 = vperm.xlu1 %8747, %v6743_v27   ;;  %v6751_v42 = vmul.f32 %v9106_v53, %v13037_v0  ;;  %v9108_v13 = vpop.eup %9107  ;;  %v6712_v0 = vrot.slane %v6687_v57, %v13624_v62 }
0x1ddd   :  { %6755 = vperm.xlu0 %8748, %v6730_v18   ;;  %v6733_v36 = vmul.f32 %v9108_v13, %v12996_v54  ;;  %v6734_v5 = vmul.f32 %v9108_v13, %v12994_v47  ;;  %v9110_v46 = vpop.eup %9109  ;;  %v6716_v54 = vrot.slane %v6687_v57, %v13625_v7  ;;  %v6742_v47 = vmul.f32 %v9102_v1, %v13019_v41  ;;  %v7128_v41 = vld [vmem:[%s13174_s3 + $0x28] sm:$0xff]  ;;  %v9286_v57 = vld [vmem:[%s13172_s1 + $0x38] sm:$0xff] }
0x1dde   :  { %v6736_v34 = vmul.f32 %v9110_v46, %v13005_v51  ;;  %v6737_v39 = vmul.f32 %v9110_v46, %v13003_v43  ;;  %v9112_v9 = vpop.eup %9111  ;;  %9113 = vrcp.f32 %v6712_v0  ;;  %6985 = vmatprep.mubr.f32.mxu0 %v7128_v41  ;;  %7056 = vmatprep.mubr.f32.mxu1 %v7128_v41 }
0x1ddf   :  { %v6739_v2 = vmul.f32 %v9112_v9, %v13013_v50  ;;  %v6740_v48 = vmul.f32 %v9112_v9, %v13011_v30  ;;  %9115 = vrcp.f32 %v6716_v54  ;;  %v6752_v30 = vmul.f32 %v9106_v53, %v13035_v28  ;;  %v9290_v53 = vld [vmem:[%s13172_s1 + $0x30] sm:$0xff] }
0x1de0   :  { %6825 = vperm.xlu1 %8747, %v6751_v42   ;;  %v9291_v42 = vld [vmem:[%s13172_s1 + $0x48] sm:$0xff]  ;;  %v9292_v54 = vld [vmem:[%s13172_s1 + $0x50] sm:$0xff] }
0x1de1   :  { %6760 = vperm.xlu0 %8748, %v6731_v23  }
0x1de5   :  { %6765 = vperm.xlu0 %8748, %v6733_v36  }
0x1de8   :  { %v9114_v51 = vpop.eup %9113 }
0x1de9   :  { %6770 = vperm.xlu0 %8748, %v6734_v5   ;;  %v6745_v62 = vmul.f32 %v9114_v51, %v13025_v32  ;;  %v6746_v43 = vmul.f32 %v9114_v51, %v13023_v3  ;;  %v9116_v16 = vpop.eup %9115 }
0x1dea   :  { %v6748_v50 = vmul.f32 %v9116_v16, %v13031_v24  ;;  %v6749_v7 = vmul.f32 %v9116_v16, %v13029_v6  ;;  %v9282_v6 = vld [vmem:[%s13172_s1 + $0x18] sm:$0xff] }
0x1ded   :  { %6775 = vperm.xlu0 %8748, %v6736_v34  }
0x1df1   :  { %6780 = vperm.xlu0 %8748, %v6737_v39  }
0x1df5   :  { %6785 = vperm.xlu0 %8748, %v6739_v2  }
0x1df9   :  { %6790 = vperm.xlu0 %8748, %v6740_v48  }
0x1dfd   :  { %6795 = vperm.xlu0 %8748, %v6742_v47   ;;  %v9293_v47 = vld [vmem:[%s13172_s1 + $0x58] sm:$0xff] }
0x1e01   :  { %6805 = vperm.xlu0 %8748, %v6745_v62  }
0x1e05   :  { %6810 = vperm.xlu0 %8748, %v6746_v43  }
0x1e09   :  { %6815 = vperm.xlu0 %8748, %v6748_v50  }
0x1e0d   :  { %6820 = vperm.xlu0 %8748, %v6749_v7  }
0x1e11   :  { %6830 = vperm.xlu0 %8748, %v6752_v30  }
0x1e5b   :  { %v6801_v31 = vpop.permute.xlu1 %6800 }
0x1e5c   :  { %v6756_v32 = vpop.permute.xlu0 %6755  ;;  %v6842_v23 = vmul.f32 %v9291_v42, %v6801_v31 }
0x1e5d   :  { %v6833_v27 = vmul.f32 %v9289_v37, %v6756_v32  ;;  %v9297_v37 = vld [vmem:[%s13172_s1 + $0x78] sm:$0xff] }
0x1e60   :  { %v6761_v52 = vpop.permute.xlu0 %6760 }
0x1e61   :  { %v6834_v45 = vmul.f32 %v9284_v10, %v6761_v52 }
0x1e63   :  { %v6849_v36 = vadd.f32 %v6834_v45, %v6833_v27 }
0x1e64   :  { %v6766_v3 = vpop.permute.xlu0 %6765 }
0x1e65   :  { %v6835_v35 = vmul.f32 %v9285_v59, %v6766_v3  ;;  %v6850_v9 = vrot.slane %v6849_v36, 4 }
0x1e67   :  { %v6851_v30 = vadd.f32 %v6850_v9, %v6849_v36 }
0x1e68   :  { %v6771_v14 = vpop.permute.xlu0 %6770 }
0x1e69   :  { %v6836_v28 = vmul.f32 %v9282_v6, %v6771_v14 }
0x1e6b   :  { %v6856_v56 = vadd.f32 %v6836_v28, %v6835_v35  ;;  %v9294_v28 = vld [vmem:[%s13172_s1 + $0x60] sm:$0xff]  ;;  %v9296_v35 = vld [vmem:[%s13172_s1 + $0x70] sm:$0xff] }
0x1e6c   :  { %v6776_v25 = vpop.permute.xlu0 %6775 }
0x1e6d   :  { %v6837_v17 = vmul.f32 %v9287_v11, %v6776_v25  ;;  %v6857_v34 = vrot.slane %v6856_v56, 4 }
0x1e6f   :  { %v6858_v43 = vadd.f32 %v6857_v34, %v6856_v56 }
0x1e70   :  { %v6781_v26 = vpop.permute.xlu0 %6780 }
0x1e71   :  { %v6838_v21 = vmul.f32 %v9283_v63, %v6781_v26  ;;  %v6859_v3 = vrot.slane %v6858_v43, 2 }
0x1e73   :  { %v6863_v13 = vadd.f32 %v6838_v21, %v6837_v17  ;;  %v9295_v21 = vld [vmem:[%s13172_s1 + $0x68] sm:$0xff]  ;;  %v6860_v10 = vadd.f32 %v6859_v3, %v6858_v43 }
0x1e74   :  { %v6786_v24 = vpop.permute.xlu0 %6785 }
0x1e75   :  { %v6839_v18 = vmul.f32 %v9290_v53, %v6786_v24  ;;  %v6864_v0 = vrot.slane %v6863_v13, 4  ;;  %v6826_v24 = vpop.permute.xlu1 %6825  ;;  %v6861_v53 = vrot.slane %v6860_v10, 1 }
0x1e77   :  { %v6865_v50 = vadd.f32 %v6864_v0, %v6863_v13  ;;  %v6862_v0 = vadd.f32 %v6861_v53, %v6860_v10 }
0x1e78   :  { %v6791_v20 = vpop.permute.xlu0 %6790 }
0x1e79   :  { %v6840_v44 = vmul.f32 %v9286_v57, %v6791_v20  ;;  %v6866_v25 = vrot.slane %v6865_v50, 2  ;;  %v6852_v20 = vrot.slane %v6851_v30, 2  ;;  %v6847_v57 = vmul.f32 %v9296_v35, %v6826_v24 }
0x1e7b   :  { %v6870_v5 = vadd.f32 %v6840_v44, %v6839_v18  ;;  %v6867_v44 = vadd.f32 %v6866_v25, %v6865_v50  ;;  %v6853_v17 = vadd.f32 %v6852_v20, %v6851_v30 }
0x1e7c   :  { %v6796_v58 = vpop.permute.xlu0 %6795 }
0x1e7d   :  { %v6841_v1 = vmul.f32 %v9288_v29, %v6796_v58  ;;  %v6871_v2 = vrot.slane %v6870_v5, 4  ;;  %v6868_v13 = vrot.slane %v6867_v44, 1 }
0x1e7f   :  { %v6877_v46 = vadd.f32 %v6842_v23, %v6841_v1  ;;  %v6872_v41 = vadd.f32 %v6871_v2, %v6870_v5 }
0x1e80   :  { %v6806_v12 = vpop.permute.xlu0 %6805 }
0x1e81   :  { %v6843_v48 = vmul.f32 %v9292_v54, %v6806_v12  ;;  %v6878_v62 = vrot.slane %v6877_v46, 4  ;;  %v6873_v6 = vrot.slane %v6872_v41, 2  ;;  %v6854_v12 = vrot.slane %v6853_v17, 1 }
0x1e82   :  { %v6869_v54 = vadd.f32 %v6868_v13, %v6867_v44 }
0x1e83   :  { %v6879_v52 = vadd.f32 %v6878_v62, %v6877_v46  ;;  %v6874_v29 = vadd.f32 %v6873_v6, %v6872_v41 }
0x1e84   :  { %v6811_v39 = vpop.permute.xlu0 %6810 }
0x1e85   :  { %v6844_v51 = vmul.f32 %v9293_v47, %v6811_v39  ;;  %v6880_v31 = vrot.slane %v6879_v52, 2  ;;  %v6875_v36 = vrot.slane %v6874_v29, 1 }
0x1e87   :  { %v6884_v16 = vadd.f32 %v6844_v51, %v6843_v48  ;;  %v6881_v56 = vadd.f32 %v6880_v31, %v6879_v52  ;;  %v6855_v48 = vadd.f32 %v6854_v12, %v6853_v17  ;;  %v6876_v47 = vadd.f32 %v6875_v36, %v6874_v29 }
0x1e88   :  { %v6816_v7 = vpop.permute.xlu0 %6815 }
0x1e89   :  { %v6885_v32 = vrot.slane %v6884_v16, 4  ;;  %v6845_v63 = vmul.f32 %v9294_v28, %v6816_v7  ;;  %v6882_v34 = vrot.slane %v6881_v56, 1 }
0x1e8b   :  { %v6886_v14 = vadd.f32 %v6885_v32, %v6884_v16  ;;  %v6883_v43 = vadd.f32 %v6882_v34, %v6881_v56  ;;  %v6913_v16 = vsel %vm759_vm1, %v6862_v0, %v6855_v48 }
0x1e8c   :  { %v6821_v26 = vpop.permute.xlu0 %6820  ;;  %v6914_v30 = vsel %vm761_vm2, %v6869_v54, %v6913_v16 }
0x1e8d   :  { %v6846_v58 = vmul.f32 %v9295_v21, %v6821_v26  ;;  %v6887_v45 = vrot.slane %v6886_v14, 2  ;;  %v6915_v52 = vsel %vm763_vm3, %v6876_v47, %v6914_v30 }
0x1e8e   :  { %v6916_v3 = vsel %vm765_vm4, %v6883_v43, %v6915_v52 }
0x1e8f   :  { %v6891_v59 = vadd.f32 %v6846_v58, %v6845_v63  ;;  %v6888_v18 = vadd.f32 %v6887_v45, %v6886_v14 }
0x1e90   :  { %v6831_v11 = vpop.permute.xlu0 %6830 }
0x1e91   :  { %v6892_v1 = vrot.slane %v6891_v59, 4  ;;  %v6848_v27 = vmul.f32 %v9297_v37, %v6831_v11  ;;  %v6889_v39 = vrot.slane %v6888_v18, 1 }
0x1e93   :  { %v6893_v42 = vadd.f32 %v6892_v1, %v6891_v59  ;;  %v6898_v23 = vadd.f32 %v6848_v27, %v6847_v57  ;;  %v6890_v50 = vadd.f32 %v6889_v39, %v6888_v18 }
0x1e95   :  { %v6894_v5 = vrot.slane %v6893_v42, 2  ;;  %v6899_v46 = vrot.slane %v6898_v23, 4  ;;  %v6917_v25 = vsel %vm767_vm5, %v6890_v50, %v6916_v3 }
0x1e97   :  { %v6895_v9 = vadd.f32 %v6894_v5, %v6893_v42  ;;  %v6900_v2 = vadd.f32 %v6899_v46, %v6898_v23 }
0x1e99   :  { %v6896_v51 = vrot.slane %v6895_v9, 1  ;;  %v6901_v62 = vrot.slane %v6900_v2, 2 }
0x1e9b   :  { %v6902_v7 = vadd.f32 %v6901_v62, %v6900_v2  ;;  %v6897_v41 = vadd.f32 %v6896_v51, %v6895_v9 }
0x1e9d   :  { %v6903_v32 = vrot.slane %v6902_v7, 1  ;;  %v6918_v26 = vsel %vm769_vm6, %v6897_v41, %v6917_v25 }
0x1e9f   :  { %v6904_v14 = vadd.f32 %v6903_v32, %v6902_v7 }
0x1ea1   :  { %v6919_v24 = vsel %vm771_vm7, %v6904_v14, %v6918_v26 }
0x1ea2   :  { %6986 = vmatmul.mubr.f32.vlgmr.msra.gmra.mrb[28].mxu0 %v6919_v24  ;;  %7057 = vmatmul.mubr.f32.vlgmr.msra.gmra.mrb[28].mxu1 %v6919_v24 }
0x1f75   :  { %v6987_v20 = vpop.f32.mrb[28].mxu0  ;;  %v7058_v6 = vpop.f32.mrb[28].mxu1 }
0x1f76   :  { %v6988_v28 = vadd.f32 %v6987_v20, %v12817_v40  ;;  %v7059_v63 = vadd.f32 %v7058_v6, %v12819_v4  ;;  %v6989_v21 = vpop.f32.mrb[29].mxu0  ;;  %v7060_v58 = vpop.f32.mrb[29].mxu1 }
0x1f77   :  { %v6990_v31 = vadd.f32 %v6989_v21, %v12814_v60  ;;  %v7061_v10 = vadd.f32 %v7060_v58, %v12892_v38 }
0x1f78   :  { %v7063_v45 = vadd.f32 %v6988_v28, %v13981_v61  ;;  %v7065_v40 = vadd.f32 %v7059_v63, %v13984_v49 }
0x1f79   :  { %v7064_v59 = vadd.f32 %v6990_v31, %v13982_v33  ;;  %v7066_v44 = vadd.f32 %v7061_v10, %v13983_v55 }
0x1f7a   :  { %v7129_v35 = vmul.f32 -1.442695, %v7063_v45 }
0x1f7b   :  { %v7130_v57 = vmul.f32 -1.442695, %v7064_v59  ;;  %v7131_v11 = vmul.f32 -1.442695, %v7066_v44 }
0x1f7c   :  { %9117 = vpow2.f32 %v7129_v35 }
0x1f7d   :  { %9119 = vpow2.f32 %v7130_v57 }
0x1f7e   :  { %9121 = vpow2.f32 %v7131_v11 }
0x1f7f   :  { %9123 = vtanh.f32 %v7065_v40 }
0x1f86   :  { %v9118_v4 = vpop.eup %9117 }
0x1f87   :  { %v9120_v17 = vpop.eup %9119  ;;  %v7070_v29 = vadd.f32 1.0, %v9118_v4 }
0x1f88   :  { %v7076_v60 = vadd.f32 1.0, %v9120_v17  ;;  %v9122_v61 = vpop.eup %9121 }
0x1f89   :  { %9125 = vrcp.f32 %v7070_v29  ;;  %v9124_v38 = vpop.eup %9123  ;;  %v7083_v27 = vadd.f32 1.0, %v9122_v61 }
0x1f8a   :  { %9127 = vrcp.f32 %v7076_v60 }
0x1f8b   :  { %9129 = vrcp.f32 %v7083_v27 }
0x1f93   :  { %v9126_v33 = vpop.eup %9125 }
0x1f94   :  { %v9128_v1 = vpop.eup %9127  ;;  %v7087_v37 = vmul.f32 %v9126_v33, %v9124_v38 }
0x1f95   :  { %v7086_v55 = vmul.f32 %v9128_v1, %v5968_v22  ;;  %v9130_v56 = vpop.eup %9129 }
0x1f97   :  { %v7088_v49 = vadd.f32 %v7087_v37, %v7086_v55 }
0x1f99   :  { %9131 = vtanh.f32 %v7088_v49 }
0x1fa3   :  { %v9132_v53 = vpop.eup %9131 }
0x1fa4   :  { %v7090_v18 = vmul.f32 %v9132_v53, %v9130_v56 }
0x1fa6   :  { %7132 = vst [vmem:[%s13179_s8 + $0x28] sm:$0xff] %v7090_v18 }

</bundles_post_ra>
